<compile_context>
chip_gen: v5e
topology: v5e:2x2
jax: 0.10.0
libtpu: 0.0.40
codegen_flags: <defaults>
</compile_context>

<pallas_src>
import functools
import numpy as np
import jax
import jax.numpy as jnp
from jax.experimental import pallas as pl
from jax.experimental.pallas import tpu as pltpu

LN_EPS = 1e-5
BN_EPS = 1e-5
_VMEM_LIMIT = 48 * 1024 * 1024        # < 64 MiB physical VMEM on v7x


def _cparams():
    return pltpu.CompilerParams(dimension_semantics=("parallel",),
                                vmem_limit_bytes=_VMEM_LIMIT)


def _gelu(x):
    return jax.nn.gelu(x, approximate=False)      # matches torch nn.GELU()


# ----------------------------------------------------------------- kernels ---
def _embed_kernel(x_ref, wc1_ref, bc1_ref, gpre_ref, bpre_ref, g1_ref, b1_ref,
                  wn_ref, bnb_ref, w2_ref, b2_ref, o_ref, pad_ref, *, H, W):
    """Whole Embedding stage for one image:
       pre-LN -> 3x3 conv (in-VMEM zero pad, 9 shifted matmuls) -> LN + ReLU
       -> neigh_embed matmul (eval BatchNorm folded in) + ReLU -> 1x1 conv."""
    C = x_ref.shape[-1]
    Dn = wc1_ref.shape[-1]
    x = x_ref[0].astype(jnp.float32)                           # (H, W, C)
    mu = jnp.mean(x, axis=-1, keepdims=True)
    var = jnp.mean(jnp.square(x - mu), axis=-1, keepdims=True)
    xn = (x - mu) * jax.lax.rsqrt(var + LN_EPS) * gpre_ref[0] + bpre_ref[0]
    # zero pad in VMEM scratch -> no HBM round trip for the padded copy
    pad_ref[...] = jnp.zeros(pad_ref.shape, pad_ref.dtype)
    pad_ref[1:1 + H, 1:1 + W, :] = xn.astype(pad_ref.dtype)
    acc = jnp.zeros((H * W, Dn), jnp.float32)
    for idx in range(9):                                       # static unroll
        ky, kx = idx // 3, idx % 3
        patch = pad_ref[ky:ky + H, kx:kx + W, :]
        acc = acc + jnp.dot(patch.reshape(H * W, C), wc1_ref[idx],
                            preferred_element_type=jnp.float32)
    acc = acc + bc1_ref[0]
    # LayerNorm over embed_dim + ReLU
    mu1 = jnp.mean(acc, axis=-1, keepdims=True)
    v1 = jnp.mean(jnp.square(acc - mu1), axis=-1, keepdims=True)
    y = (acc - mu1) * jax.lax.rsqrt(v1 + LN_EPS) * g1_ref[0] + b1_ref[0]
    y = jnp.maximum(y, 0.0)
    # neigh_embed (banded channel mix + identity; eval BN folded in) + ReLU
    y = jnp.dot(y.astype(jnp.bfloat16), wn_ref[...],
                preferred_element_type=jnp.float32) + bnb_ref[0]
    y = jnp.maximum(y, 0.0)
    # conv2 (1x1)
    y = jnp.dot(y.astype(jnp.bfloat16), w2_ref[...],
                preferred_element_type=jnp.float32) + b2_ref[0]
    o_ref[0] = y.astype(o_ref.dtype)


def _attn_front_kernel(x_ref, w_ref, b_ref, sig_ref, o_ref):
    """proj_1 (BN1 folded in) + feat_decompose (global avg-pool) + SiLU."""
    xp = jnp.dot(x_ref[0], w_ref[...],
                 preferred_element_type=jnp.float32) + b_ref[0]     # (HW, D)
    xd = jnp.mean(xp, axis=0, keepdims=True)                        # (1, D)
    y = xp + sig_ref[0] * (xp - xd)
    o_ref[0] = jax.nn.silu(y).astype(o_ref.dtype)


def _multi_dw_kernel(x_ref, w0_ref, b0_ref, w1_ref, b1_ref, w2_ref, b2_ref,
                     o_ref, p0_ref, p1_ref, p2_ref, *, H, W, d0, d1, d2):
    """MultiOrderDWConv: three dilated depthwise convs with fused channel
       split/concat; zero padding kept in VMEM scratch (no HBM padded copies)."""
    def dw(pad_ref, src, w_ref, k, dil, pad, ch):
        pad_ref[...] = jnp.zeros(pad_ref.shape, pad_ref.dtype)
        pad_ref[pad:pad + H, pad:pad + W, :] = src.astype(pad_ref.dtype)
        acc = jnp.zeros((H, W, ch), jnp.float32)
        # TODO(synk): the W-axis tap shifts could use pltpu.roll (XLU) instead
        # of unaligned sublane slices to avoid per-tap relayout copies.
        for idx in range(k * k):                               # static unroll
            ky, kx = idx // k, idx % k
            acc = acc + pad_ref[ky * dil:ky * dil + H,
                                kx * dil:kx * dil + W, :] * w_ref[idx]
        return acc

    x = x_ref[0].astype(jnp.float32)                           # (H, W, D)
    v0 = dw(p0_ref, x, w0_ref, 5, 1, 2, d0 + d1 + d2) + b0_ref[0]
    o_ref[0, :, :, :d0] = v0[:, :, :d0].astype(o_ref.dtype)
    v1 = dw(p1_ref, v0[:, :, d0:d0 + d1], w1_ref, 5, 2, 4, d1) + b1_ref[0]
    o_ref[0, :, :, d0:d0 + d1] = v1.astype(o_ref.dtype)
    v2 = dw(p2_ref, v0[:, :, d0 + d1:], w2_ref, 7, 3, 9, d2) + b2_ref[0]
    o_ref[0, :, :, d0 + d1:] = v2.astype(o_ref.dtype)


def _attn_tail_kernel(xv_ref, vc_ref, xe_ref, wg_ref, bg_ref, wpw_ref, bpw_ref,
                      wp2_ref, bp2_ref, s1_ref, t1_ref, ls1_ref, o_ref):
    """gate + PW_conv + SiLU-gating + proj_2, fused with '+shortcut'
       (shortcut = BN1(xe)) and the 'identity + ls1 * attn' residual."""
    g = jnp.dot(xv_ref[...], wg_ref[...],
                preferred_element_type=jnp.float32) + bg_ref[0]
    v = jnp.dot(vc_ref[...], wpw_ref[...],
                preferred_element_type=jnp.float32) + bpw_ref[0]
    gv = (jax.nn.silu(g) * jax.nn.silu(v)).astype(jnp.bfloat16)
    a = jnp.dot(gv, wp2_ref[...],
                preferred_element_type=jnp.float32) + bp2_ref[0]
    xe = xe_ref[...].astype(jnp.float32)
    attn = a + s1_ref[0] * xe + t1_ref[0]            # + shortcut (= BN1(xe))
    o_ref[...] = (xe + ls1_ref[0] * attn).astype(o_ref.dtype)


def _ffn_front_kernel(x_ref, w1_ref, b1_ref, wdw_ref, bdw_ref, o_ref, pad_ref,
                      *, H, W):
    """fc1 (BN2 folded in) + 3x3 depthwise conv (in-VMEM padding) + GELU."""
    Fh = w1_ref.shape[-1]
    x = x_ref[0]                                               # (H, W, D) bf16
    h = jnp.dot(x.reshape(H * W, x.shape[-1]), w1_ref[...],
                preferred_element_type=jnp.float32) + b1_ref[0]
    pad_ref[...] = jnp.zeros(pad_ref.shape, pad_ref.dtype)
    pad_ref[1:1 + H, 1:1 + W, :] = h.reshape(H, W, Fh).astype(pad_ref.dtype)
    acc = jnp.zeros((H, W, Fh), jnp.float32)
    for idx in range(9):                                       # static unroll
        ky, kx = idx // 3, idx % 3
        acc = acc + pad_ref[ky:ky + H, kx:kx + W, :] * wdw_ref[idx]
    o_ref[0] = _gelu(acc + bdw_ref[0]).astype(o_ref.dtype)


def _ffn_tail_kernel(h_ref, x_ref, wd_ref, bd_ref, sig_ref, w2_ref, b2_ref,
                     ls2_ref, o_ref):
    """FFN feat_decompose + fc2, fused with the 'identity + ls2*mlp' residual."""
    h = h_ref[...].astype(jnp.float32)
    d = jnp.sum(h * wd_ref[0], axis=-1, keepdims=True) + bd_ref[0, 0]
    d = _gelu(d)
    hp = h + sig_ref[0] * (h - d)
    y = jnp.dot(hp.astype(jnp.bfloat16), w2_ref[...],
                preferred_element_type=jnp.float32) + b2_ref[0]
    xid = x_ref[...].astype(jnp.float32)
    o_ref[...] = (xid + ls2_ref[0] * y).astype(o_ref.dtype)


# ------------------------------------------------------ pallas_call wrappers --
def _pick_tm(M):
    # Per-grid-step overhead is ~0.35us, so take the biggest row tile that is a
    # clean divisor; blocks stay tiny relative to VMEM at these channel counts.
    for tm in (2048, 1024, 512, 256, 128, 64, 32, 16, 8):
        if M % tm == 0:
            return tm
    return M   # TODO(synk): remainder-tile handling for ragged M at prod sizes


def _rowwise_call(kernel, row_inputs, const_inputs, M, N, out_dtype):
    tm = _pick_tm(M)
    in_specs = []
    for t in row_inputs:
        in_specs.append(pl.BlockSpec((tm, t.shape[1]), lambda i: (i, 0)))
    for c in const_inputs:
        in_specs.append(pl.BlockSpec(c.shape, lambda i, n=c.ndim: (0,) * n))
    return pl.pallas_call(
        kernel,
        out_shape=jax.ShapeDtypeStruct((M, N), out_dtype),
        grid=(M // tm,),
        in_specs=in_specs,
        out_specs=pl.BlockSpec((tm, N), lambda i: (i, 0)),
        compiler_params=_cparams(),
    )(*row_inputs, *const_inputs)


def _batch_call(kernel, batch_inputs, const_inputs, out_shape, out_dtype,
                scratch_shapes=()):
    # TODO(synk): at production resolutions split H into halo'd strips so the
    # per-step blocks fit v7x's 64 MiB VMEM; whole-image blocks are fine here.
    B = batch_inputs[0].shape[0]
    in_specs = []
    for t in batch_inputs:
        in_specs.append(pl.BlockSpec((1,) + tuple(t.shape[1:]),
                                     lambda b, n=t.ndim - 1: (b,) + (0,) * n))
    for c in const_inputs:
        in_specs.append(pl.BlockSpec(c.shape, lambda b, n=c.ndim: (0,) * n))
    return pl.pallas_call(
        kernel,
        out_shape=jax.ShapeDtypeStruct(out_shape, out_dtype),
        grid=(B,),
        in_specs=in_specs,
        out_specs=pl.BlockSpec((1,) + tuple(out_shape[1:]),
                               lambda b, n=len(out_shape) - 1: (b,) + (0,) * n),
        scratch_shapes=list(scratch_shapes),
        compiler_params=_cparams(),
    )(*batch_inputs, *const_inputs)


# ----------------------------------------------------------------- parameters --
def build_neigh_matrix(w_ne, c, neigh=3):
    # neigh_embed == banded channel-mixing matrix plus the identity self term.
    start = (neigh - 1) // 2
    end = c - 1 - start
    w = np.asarray(w_ne)
    m = np.zeros((c, c), np.float32)
    for i in range(c):
        if i == 0 or i < start:
            base = 0
        elif i <= end:
            base = i - start
        else:
            base = c - neigh
        for k in range(neigh):
            m[base + k, i] += w[i, k]
        m[i, i] += 1.0
    return jnp.asarray(m)


def init_params(key, dims, neigh_dims, embed_dims, spe_ratio,
                attn_channel_split=(1, 3, 4), init_value=1e-5):
    ks = iter(jax.random.split(key, 64))

    def nrm(shape, s=0.1):
        return jax.random.normal(next(ks), shape, jnp.float32) * s

    C, Dn, D = dims, neigh_dims, embed_dims
    Fh = int(D * spe_ratio)
    bf = jnp.bfloat16
    p = {}
    # ---- Embedding ----
    p['ln_pre_g'] = 1.0 + nrm((1, C), 0.05); p['ln_pre_b'] = nrm((1, C), 0.05)
    p['w_conv1'] = nrm((9, C, Dn)).astype(bf); p['b_conv1'] = nrm((1, Dn), 0.05)
    p['ln1_g'] = 1.0 + nrm((1, Dn), 0.05);     p['ln1_b'] = nrm((1, Dn), 0.05)
    w_neigh = build_neigh_matrix(nrm((Dn, 3)), Dn, 3)
    b_neigh = nrm((Dn,), 0.05)

    # eval-mode BatchNorm -> per-channel scale/shift, folded into matmuls.
    # TODO(synk): train-mode BatchNorm (batch statistics) not implemented.
    def bn_fold(ch):
        g = 1.0 + nrm((ch,), 0.05); b = nrm((ch,), 0.05)
        rm = nrm((ch,), 0.05);      rv = 1.0 + jnp.abs(nrm((ch,), 0.05))
        s = g / jnp.sqrt(rv + BN_EPS)
        return s, b - rm * s

    s_e, t_e = bn_fold(Dn)                                   # Embedding BN
    p['w_neigh'] = (w_neigh * s_e[None, :]).astype(bf)
    p['b_neigh'] = (b_neigh * s_e + t_e).reshape(1, Dn)
    p['w_conv2'] = nrm((Dn, D)).astype(bf); p['b_conv2'] = nrm((1, D), 0.05)
    # ---- block norms ----
    s1, t1 = bn_fold(D)            # norm1: folded into proj_1; raw copy kept
    p['bn1_s'] = s1.reshape(1, D); p['bn1_t'] = t1.reshape(1, D)   # shortcut
    s2, t2 = bn_fold(D)            # norm2: folded into fc1
    # ---- MultiOrderGatedAggregation ----
    w_p1 = nrm((D, D)); b_p1 = nrm((D,), 0.05)
    p['w_proj1'] = (w_p1 * s1[:, None]).astype(bf)
    p['b_proj1'] = (t1 @ w_p1 + b_p1).reshape(1, D)
    p['sigma_attn'] = jnp.full((1, D), init_value, jnp.float32)
    p['w_gate'] = nrm((D, D)).astype(bf); p['b_gate'] = nrm((1, D), 0.05)
    cs = list(attn_channel_split); tot = sum(cs)
    d1 = int(cs[1] / tot * D); d2 = int(cs[2] / tot * D); d0 = D - d1 - d2
    p['dims_split'] = (d0, d1, d2)
    p['w_dw0'] = nrm((25, D));  p['b_dw0'] = nrm((1, D), 0.05)
    p['w_dw1'] = nrm((25, d1)); p['b_dw1'] = nrm((1, d1), 0.05)
    p['w_dw2'] = nrm((49, d2)); p['b_dw2'] = nrm((1, d2), 0.05)
    p['w_pw'] = nrm((D, D)).astype(bf);    p['b_pw'] = nrm((1, D), 0.05)
    p['w_proj2'] = nrm((D, D)).astype(bf); p['b_proj2'] = nrm((1, D), 0.05)
    # ---- ChannelAggregationFFN ----
    w_fc1 = nrm((D, Fh)); b_fc1 = nrm((Fh,), 0.05)
    p['w_fc1'] = (w_fc1 * s2[:, None]).astype(bf)
    p['b_fc1'] = (t2 @ w_fc1 + b_fc1).reshape(1, Fh)
    p['w_dwffn'] = nrm((9, Fh)); p['b_dwffn'] = nrm((1, Fh), 0.05)
    p['w_dec'] = nrm((1, Fh));   p['b_dec'] = nrm((1, 1), 0.05)
    p['sigma_ffn'] = jnp.full((1, Fh), init_value, jnp.float32)
    p['w_fc2'] = nrm((Fh, D)).astype(bf); p['b_fc2'] = nrm((1, D), 0.05)
    # ---- layer scales ----
    p['ls1'] = jnp.full((1, D), init_value, jnp.float32)
    p['ls2'] = jnp.full((1, D), init_value, jnp.float32)
    return p


# ---------------------------------------------------------------- forward -----
def moga_block_pre_forward(x_nchw, p, neigh_dims, embed_dims):
    B, C, H, W = x_nchw.shape
    D = embed_dims
    HW = H * W
    M = B * HW
    d0, d1, d2 = p['dims_split']
    Fh = p['w_fc1'].shape[1]

    xh = jnp.transpose(x_nchw, (0, 2, 3, 1))                 # NHWC, f32

    # ---- Embedding: pre-LN + 3x3 conv + LN/ReLU + neigh(+BN)/ReLU + 1x1 ----
    xe = _batch_call(
        functools.partial(_embed_kernel, H=H, W=W),
        [xh],
        [p['w_conv1'], p['b_conv1'], p['ln_pre_g'], p['ln_pre_b'],
         p['ln1_g'], p['ln1_b'], p['w_neigh'], p['b_neigh'],
         p['w_conv2'], p['b_conv2']],
        out_shape=(B, HW, D), out_dtype=jnp.bfloat16,
        scratch_shapes=[pltpu.VMEM((H + 2, W + 2, C), jnp.bfloat16)])

    # ---- Attention front: proj_1(+BN1) + feat_decompose + SiLU ----
    xv = _batch_call(
        _attn_front_kernel, [xe],
        [p['w_proj1'], p['b_proj1'], p['sigma_attn']],
        out_shape=(B, HW, D), out_dtype=jnp.bfloat16)

    # ---- Multi-order dilated depthwise convs (fused split/concat) ----
    vcat = _batch_call(
        functools.partial(_multi_dw_kernel, H=H, W=W, d0=d0, d1=d1, d2=d2),
        [xv.reshape(B, H, W, D)],
        [p['w_dw0'], p['b_dw0'], p['w_dw1'], p['b_dw1'], p['w_dw2'], p['b_dw2']],
        out_shape=(B, H, W, D), out_dtype=jnp.bfloat16,
        scratch_shapes=[pltpu.VMEM((H + 4, W + 4, D), jnp.float32),
                        pltpu.VMEM((H + 8, W + 8, d1), jnp.float32),
                        pltpu.VMEM((H + 18, W + 18, d2), jnp.float32)])

    # ---- Attention tail: gate + PW + gating + proj_2 + shortcut + ls1 ----
    xe2 = xe.reshape(M, D)
    x1 = _rowwise_call(
        _attn_tail_kernel,
        [xv.reshape(M, D), vcat.reshape(M, D), xe2],
        [p['w_gate'], p['b_gate'], p['w_pw'], p['b_pw'],
         p['w_proj2'], p['b_proj2'], p['bn1_s'], p['bn1_t'], p['ls1']],
        M, D, jnp.bfloat16)

    # ---- FFN front: fc1(+BN2) + 3x3 depthwise conv + GELU ----
    h = _batch_call(
        functools.partial(_ffn_front_kernel, H=H, W=W),
        [x1.reshape(B, H, W, D)],
        [p['w_fc1'], p['b_fc1'], p['w_dwffn'], p['b_dwffn']],
        out_shape=(B, H, W, Fh), out_dtype=jnp.bfloat16,
        scratch_shapes=[pltpu.VMEM((H + 2, W + 2, Fh), jnp.float32)])

    # ---- FFN tail: feat_decompose + fc2 + ls2 residual ----
    out = _rowwise_call(
        _ffn_tail_kernel,
        [h.reshape(M, Fh), x1],
        [p['w_dec'], p['b_dec'], p['sigma_ffn'],
         p['w_fc2'], p['b_fc2'], p['ls2']],
        M, D, jnp.float32)

    return jnp.transpose(out.reshape(B, H, W, D), (0, 3, 1, 2))   # NCHW


# -------------------------------------------------------------------- main ----
if __name__ == "__main__":
    B, C, H, W = 2, 4, 16, 16          # dims = 4
    neigh_dims = 8                     # neigbor_dims
    embed_dims = 16                    # divisible by sum(attn_channel_split)=8
    spe_ratio = 2.0

    key = jax.random.PRNGKey(0)
    kx, kp = jax.random.split(key)
    x = jax.random.normal(kx, (B, C, H, W), jnp.float32)
    params = init_params(kp, C, neigh_dims, embed_dims, spe_ratio)

    out = moga_block_pre_forward(x, params, neigh_dims, embed_dims)
    out = jax.block_until_ready(out)
    assert out.shape == (B, embed_dims, H, W)
    assert bool(jnp.all(jnp.isfinite(out)))
    print("KERNEL_OK")
</pallas_src>

<mosaic_0001>
module attributes {stable_mosaic.version = 11 : i64} {
  func.func @_embed_kernel(%arg0: i32, %arg1: memref<1x16x16x4xf32, #tpu.memory_space<vmem>>, %arg2: memref<9x4x8xbf16, #tpu.memory_space<vmem>>, %arg3: memref<1x8xf32, #tpu.memory_space<vmem>>, %arg4: memref<1x4xf32, #tpu.memory_space<vmem>>, %arg5: memref<1x4xf32, #tpu.memory_space<vmem>>, %arg6: memref<1x8xf32, #tpu.memory_space<vmem>>, %arg7: memref<1x8xf32, #tpu.memory_space<vmem>>, %arg8: memref<8x8xbf16, #tpu.memory_space<vmem>>, %arg9: memref<1x8xf32, #tpu.memory_space<vmem>>, %arg10: memref<8x16xbf16, #tpu.memory_space<vmem>>, %arg11: memref<1x16xf32, #tpu.memory_space<vmem>>, %arg12: memref<1x256x16xbf16, #tpu.memory_space<vmem>>, %arg13: memref<18x18x4xbf16, #tpu.memory_space<vmem>>) attributes {dimension_semantics = [#tpu.dimension_semantics<parallel>], iteration_bounds = array<i64: 2>, scalar_prefetch = 0 : i64, scratch_operands = 1 : i64, tpu.core_type = #tpu.core_type<tc>, window_params = [{transform_indices = @transform_0, window_bounds = array<i64: 1, 16, 16, 4>}, {pipeline_mode = #tpu.pipeline_mode<synchronous>, transform_indices = @transform_1, window_bounds = array<i64: 9, 4, 8>}, {pipeline_mode = #tpu.pipeline_mode<synchronous>, transform_indices = @transform_2, window_bounds = array<i64: 1, 8>}, {pipeline_mode = #tpu.pipeline_mode<synchronous>, transform_indices = @transform_3, window_bounds = array<i64: 1, 4>}, {pipeline_mode = #tpu.pipeline_mode<synchronous>, transform_indices = @transform_4, window_bounds = array<i64: 1, 4>}, {pipeline_mode = #tpu.pipeline_mode<synchronous>, transform_indices = @transform_5, window_bounds = array<i64: 1, 8>}, {pipeline_mode = #tpu.pipeline_mode<synchronous>, transform_indices = @transform_6, window_bounds = array<i64: 1, 8>}, {pipeline_mode = #tpu.pipeline_mode<synchronous>, transform_indices = @transform_7, window_bounds = array<i64: 8, 8>}, {pipeline_mode = #tpu.pipeline_mode<synchronous>, transform_indices = @transform_8, window_bounds = array<i64: 1, 8>}, {pipeline_mode = #tpu.pipeline_mode<synchronous>, transform_indices = @transform_9, window_bounds = array<i64: 8, 16>}, {pipeline_mode = #tpu.pipeline_mode<synchronous>, transform_indices = @transform_10, window_bounds = array<i64: 1, 16>}, {transform_indices = @transform_11, window_bounds = array<i64: 1, 256, 16>}]} {
    %c0 = arith.constant 0 : index
    %c0_0 = arith.constant 0 : index
    %c0_1 = arith.constant 0 : index
    %c0_2 = arith.constant 0 : index
    %0 = vector.load %arg1[%c0, %c0_0, %c0_1, %c0_2] : memref<1x16x16x4xf32, #tpu.memory_space<vmem>>, vector<1x16x16x4xf32>
    %1 = vector.shape_cast %0 : vector<1x16x16x4xf32> to vector<16x16x4xf32>
    %cst = arith.constant dense<0.000000e+00> : vector<16x16xf32>
    %2 = vector.multi_reduction <add>, %1, %cst [2] : vector<16x16x4xf32> to vector<16x16xf32>
    %3 = vector.shape_cast %2 : vector<16x16xf32> to vector<16x16x1xf32>
    %cst_3 = arith.constant 4.000000e+00 : f32
    %4 = vector.broadcast %cst_3 : f32 to vector<16x16x1xf32>
    %5 = arith.divf %3, %4 : vector<16x16x1xf32>
    %6 = vector.broadcast %5 : vector<16x16x1xf32> to vector<16x16x4xf32>
    %7 = arith.subf %1, %6 : vector<16x16x4xf32>
    %8 = arith.mulf %7, %7 : vector<16x16x4xf32>
    %cst_4 = arith.constant dense<0.000000e+00> : vector<16x16xf32>
    %9 = vector.multi_reduction <add>, %8, %cst_4 [2] : vector<16x16x4xf32> to vector<16x16xf32>
    %10 = vector.shape_cast %9 : vector<16x16xf32> to vector<16x16x1xf32>
    %cst_5 = arith.constant 4.000000e+00 : f32
    %11 = vector.broadcast %cst_5 : f32 to vector<16x16x1xf32>
    %12 = arith.divf %10, %11 : vector<16x16x1xf32>
    %13 = vector.broadcast %5 : vector<16x16x1xf32> to vector<16x16x4xf32>
    %14 = arith.subf %1, %13 : vector<16x16x4xf32>
    %cst_6 = arith.constant 9.99999974E-6 : f32
    %15 = vector.broadcast %cst_6 : f32 to vector<16x16x1xf32>
    %16 = arith.addf %12, %15 : vector<16x16x1xf32>
    %17 = math.rsqrt %16 : vector<16x16x1xf32>
    %18 = vector.broadcast %17 : vector<16x16x1xf32> to vector<16x16x4xf32>
    %19 = arith.mulf %14, %18 : vector<16x16x4xf32>
    %c0_7 = arith.constant 0 : index
    %c0_8 = arith.constant 0 : index
    %20 = vector.load %arg4[%c0_7, %c0_8] : memref<1x4xf32, #tpu.memory_space<vmem>>, vector<1x4xf32>
    %21 = vector.shape_cast %20 : vector<1x4xf32> to vector<4xf32>
    %22 = vector.shape_cast %21 : vector<4xf32> to vector<1x1x4xf32>
    %23 = vector.broadcast %22 : vector<1x1x4xf32> to vector<16x16x4xf32>
    %24 = arith.mulf %19, %23 : vector<16x16x4xf32>
    %c0_9 = arith.constant 0 : index
    %c0_10 = arith.constant 0 : index
    %25 = vector.load %arg5[%c0_9, %c0_10] : memref<1x4xf32, #tpu.memory_space<vmem>>, vector<1x4xf32>
    %26 = vector.shape_cast %25 : vector<1x4xf32> to vector<4xf32>
    %27 = vector.shape_cast %26 : vector<4xf32> to vector<1x1x4xf32>
    %28 = vector.broadcast %27 : vector<1x1x4xf32> to vector<16x16x4xf32>
    %29 = arith.addf %24, %28 : vector<16x16x4xf32>
    %cst_11 = arith.constant 0.000000e+00 : bf16
    %30 = vector.broadcast %cst_11 : bf16 to vector<18x18x4xbf16>
    %c0_12 = arith.constant 0 : index
    %c0_13 = arith.constant 0 : index
    %c0_14 = arith.constant 0 : index
    %31 = vector.load %arg13[%c0_12, %c0_13, %c0_14] : memref<18x18x4xbf16, #tpu.memory_space<vmem>>, vector<18x18x4xbf16>
    tpu.vector_store %arg13[%c0_12, %c0_13, %c0_14], %30 {strides = array<i32>} : memref<18x18x4xbf16, #tpu.memory_space<vmem>>, vector<18x18x4xbf16>,
    %32 = arith.truncf %29 : vector<16x16x4xf32> to vector<16x16x4xbf16>
    %c1 = arith.constant 1 : index
    %c1_15 = arith.constant 1 : index
    %c0_16 = arith.constant 0 : index
    %33 = vector.load %arg13[%c1, %c1_15, %c0_16] : memref<18x18x4xbf16, #tpu.memory_space<vmem>>, vector<16x16x4xbf16>
    tpu.vector_store %arg13[%c1, %c1_15, %c0_16], %32 {strides = array<i32>} : memref<18x18x4xbf16, #tpu.memory_space<vmem>>, vector<16x16x4xbf16>,
    %cst_17 = arith.constant 0.000000e+00 : f32
    %34 = vector.broadcast %cst_17 : f32 to vector<256x8xf32>
    %c0_18 = arith.constant 0 : index
    %c0_19 = arith.constant 0 : index
    %c0_20 = arith.constant 0 : index
    %35 = vector.load %arg13[%c0_18, %c0_19, %c0_20] : memref<18x18x4xbf16, #tpu.memory_space<vmem>>, vector<16x16x4xbf16>
    %36 = vector.shape_cast %35 : vector<16x16x4xbf16> to vector<256x4xbf16>
    %c0_21 = arith.constant 0 : index
    %c0_22 = arith.constant 0 : index
    %c0_23 = arith.constant 0 : index
    %37 = vector.load %arg2[%c0_21, %c0_22, %c0_23] : memref<9x4x8xbf16, #tpu.memory_space<vmem>>, vector<1x4x8xbf16>
    %38 = vector.shape_cast %37 : vector<1x4x8xbf16> to vector<4x8xbf16>
    %cst_24 = arith.constant dense<0.000000e+00> : vector<256x8xf32>
    %39 = tpu.matmul %36, %38, %cst_24 {dimension_numbers = #tpu.dot_dimension_numbers<[1], [0], [0], [1], [0, 0, 1, 1], [], []>} : vector<256x4xbf16>, vector<4x8xbf16>, vector<256x8xf32> -> vector<256x8xf32>
    %40 = arith.addf %34, %39 : vector<256x8xf32>
    %c0_25 = arith.constant 0 : index
    %c1_26 = arith.constant 1 : index
    %c0_27 = arith.constant 0 : index
    %41 = vector.load %arg13[%c0_25, %c1_26, %c0_27] : memref<18x18x4xbf16, #tpu.memory_space<vmem>>, vector<16x16x4xbf16>
    %42 = vector.shape_cast %41 : vector<16x16x4xbf16> to vector<256x4xbf16>
    %c1_28 = arith.constant 1 : index
    %c0_29 = arith.constant 0 : index
    %c0_30 = arith.constant 0 : index
    %43 = vector.load %arg2[%c1_28, %c0_29, %c0_30] : memref<9x4x8xbf16, #tpu.memory_space<vmem>>, vector<1x4x8xbf16>
    %44 = vector.shape_cast %43 : vector<1x4x8xbf16> to vector<4x8xbf16>
    %cst_31 = arith.constant dense<0.000000e+00> : vector<256x8xf32>
    %45 = tpu.matmul %42, %44, %cst_31 {dimension_numbers = #tpu.dot_dimension_numbers<[1], [0], [0], [1], [0, 0, 1, 1], [], []>} : vector<256x4xbf16>, vector<4x8xbf16>, vector<256x8xf32> -> vector<256x8xf32>
    %46 = arith.addf %40, %45 : vector<256x8xf32>
    %c0_32 = arith.constant 0 : index
    %c2 = arith.constant 2 : index
    %c0_33 = arith.constant 0 : index
    %47 = vector.load %arg13[%c0_32, %c2, %c0_33] : memref<18x18x4xbf16, #tpu.memory_space<vmem>>, vector<16x16x4xbf16>
    %48 = vector.shape_cast %47 : vector<16x16x4xbf16> to vector<256x4xbf16>
    %c2_34 = arith.constant 2 : index
    %c0_35 = arith.constant 0 : index
    %c0_36 = arith.constant 0 : index
    %49 = vector.load %arg2[%c2_34, %c0_35, %c0_36] : memref<9x4x8xbf16, #tpu.memory_space<vmem>>, vector<1x4x8xbf16>
    %50 = vector.shape_cast %49 : vector<1x4x8xbf16> to vector<4x8xbf16>
    %cst_37 = arith.constant dense<0.000000e+00> : vector<256x8xf32>
    %51 = tpu.matmul %48, %50, %cst_37 {dimension_numbers = #tpu.dot_dimension_numbers<[1], [0], [0], [1], [0, 0, 1, 1], [], []>} : vector<256x4xbf16>, vector<4x8xbf16>, vector<256x8xf32> -> vector<256x8xf32>
    %52 = arith.addf %46, %51 : vector<256x8xf32>
    %c1_38 = arith.constant 1 : index
    %c0_39 = arith.constant 0 : index
    %c0_40 = arith.constant 0 : index
    %53 = vector.load %arg13[%c1_38, %c0_39, %c0_40] : memref<18x18x4xbf16, #tpu.memory_space<vmem>>, vector<16x16x4xbf16>
    %54 = vector.shape_cast %53 : vector<16x16x4xbf16> to vector<256x4xbf16>
    %c3 = arith.constant 3 : index
    %c0_41 = arith.constant 0 : index
    %c0_42 = arith.constant 0 : index
    %55 = vector.load %arg2[%c3, %c0_41, %c0_42] : memref<9x4x8xbf16, #tpu.memory_space<vmem>>, vector<1x4x8xbf16>
    %56 = vector.shape_cast %55 : vector<1x4x8xbf16> to vector<4x8xbf16>
    %cst_43 = arith.constant dense<0.000000e+00> : vector<256x8xf32>
    %57 = tpu.matmul %54, %56, %cst_43 {dimension_numbers = #tpu.dot_dimension_numbers<[1], [0], [0], [1], [0, 0, 1, 1], [], []>} : vector<256x4xbf16>, vector<4x8xbf16>, vector<256x8xf32> -> vector<256x8xf32>
    %58 = arith.addf %52, %57 : vector<256x8xf32>
    %c1_44 = arith.constant 1 : index
    %c1_45 = arith.constant 1 : index
    %c0_46 = arith.constant 0 : index
    %59 = vector.load %arg13[%c1_44, %c1_45, %c0_46] : memref<18x18x4xbf16, #tpu.memory_space<vmem>>, vector<16x16x4xbf16>
    %60 = vector.shape_cast %59 : vector<16x16x4xbf16> to vector<256x4xbf16>
    %c4 = arith.constant 4 : index
    %c0_47 = arith.constant 0 : index
    %c0_48 = arith.constant 0 : index
    %61 = vector.load %arg2[%c4, %c0_47, %c0_48] : memref<9x4x8xbf16, #tpu.memory_space<vmem>>, vector<1x4x8xbf16>
    %62 = vector.shape_cast %61 : vector<1x4x8xbf16> to vector<4x8xbf16>
    %cst_49 = arith.constant dense<0.000000e+00> : vector<256x8xf32>
    %63 = tpu.matmul %60, %62, %cst_49 {dimension_numbers = #tpu.dot_dimension_numbers<[1], [0], [0], [1], [0, 0, 1, 1], [], []>} : vector<256x4xbf16>, vector<4x8xbf16>, vector<256x8xf32> -> vector<256x8xf32>
    %64 = arith.addf %58, %63 : vector<256x8xf32>
    %c1_50 = arith.constant 1 : index
    %c2_51 = arith.constant 2 : index
    %c0_52 = arith.constant 0 : index
    %65 = vector.load %arg13[%c1_50, %c2_51, %c0_52] : memref<18x18x4xbf16, #tpu.memory_space<vmem>>, vector<16x16x4xbf16>
    %66 = vector.shape_cast %65 : vector<16x16x4xbf16> to vector<256x4xbf16>
    %c5 = arith.constant 5 : index
    %c0_53 = arith.constant 0 : index
    %c0_54 = arith.constant 0 : index
    %67 = vector.load %arg2[%c5, %c0_53, %c0_54] : memref<9x4x8xbf16, #tpu.memory_space<vmem>>, vector<1x4x8xbf16>
    %68 = vector.shape_cast %67 : vector<1x4x8xbf16> to vector<4x8xbf16>
    %cst_55 = arith.constant dense<0.000000e+00> : vector<256x8xf32>
    %69 = tpu.matmul %66, %68, %cst_55 {dimension_numbers = #tpu.dot_dimension_numbers<[1], [0], [0], [1], [0, 0, 1, 1], [], []>} : vector<256x4xbf16>, vector<4x8xbf16>, vector<256x8xf32> -> vector<256x8xf32>
    %70 = arith.addf %64, %69 : vector<256x8xf32>
    %c2_56 = arith.constant 2 : index
    %c0_57 = arith.constant 0 : index
    %c0_58 = arith.constant 0 : index
    %71 = vector.load %arg13[%c2_56, %c0_57, %c0_58] : memref<18x18x4xbf16, #tpu.memory_space<vmem>>, vector<16x16x4xbf16>
    %72 = vector.shape_cast %71 : vector<16x16x4xbf16> to vector<256x4xbf16>
    %c6 = arith.constant 6 : index
    %c0_59 = arith.constant 0 : index
    %c0_60 = arith.constant 0 : index
    %73 = vector.load %arg2[%c6, %c0_59, %c0_60] : memref<9x4x8xbf16, #tpu.memory_space<vmem>>, vector<1x4x8xbf16>
    %74 = vector.shape_cast %73 : vector<1x4x8xbf16> to vector<4x8xbf16>
    %cst_61 = arith.constant dense<0.000000e+00> : vector<256x8xf32>
    %75 = tpu.matmul %72, %74, %cst_61 {dimension_numbers = #tpu.dot_dimension_numbers<[1], [0], [0], [1], [0, 0, 1, 1], [], []>} : vector<256x4xbf16>, vector<4x8xbf16>, vector<256x8xf32> -> vector<256x8xf32>
    %76 = arith.addf %70, %75 : vector<256x8xf32>
    %c2_62 = arith.constant 2 : index
    %c1_63 = arith.constant 1 : index
    %c0_64 = arith.constant 0 : index
    %77 = vector.load %arg13[%c2_62, %c1_63, %c0_64] : memref<18x18x4xbf16, #tpu.memory_space<vmem>>, vector<16x16x4xbf16>
    %78 = vector.shape_cast %77 : vector<16x16x4xbf16> to vector<256x4xbf16>
    %c7 = arith.constant 7 : index
    %c0_65 = arith.constant 0 : index
    %c0_66 = arith.constant 0 : index
    %79 = vector.load %arg2[%c7, %c0_65, %c0_66] : memref<9x4x8xbf16, #tpu.memory_space<vmem>>, vector<1x4x8xbf16>
    %80 = vector.shape_cast %79 : vector<1x4x8xbf16> to vector<4x8xbf16>
    %cst_67 = arith.constant dense<0.000000e+00> : vector<256x8xf32>
    %81 = tpu.matmul %78, %80, %cst_67 {dimension_numbers = #tpu.dot_dimension_numbers<[1], [0], [0], [1], [0, 0, 1, 1], [], []>} : vector<256x4xbf16>, vector<4x8xbf16>, vector<256x8xf32> -> vector<256x8xf32>
    %82 = arith.addf %76, %81 : vector<256x8xf32>
    %c2_68 = arith.constant 2 : index
    %c2_69 = arith.constant 2 : index
    %c0_70 = arith.constant 0 : index
    %83 = vector.load %arg13[%c2_68, %c2_69, %c0_70] : memref<18x18x4xbf16, #tpu.memory_space<vmem>>, vector<16x16x4xbf16>
    %84 = vector.shape_cast %83 : vector<16x16x4xbf16> to vector<256x4xbf16>
    %c8 = arith.constant 8 : index
    %c0_71 = arith.constant 0 : index
    %c0_72 = arith.constant 0 : index
    %85 = vector.load %arg2[%c8, %c0_71, %c0_72] : memref<9x4x8xbf16, #tpu.memory_space<vmem>>, vector<1x4x8xbf16>
    %86 = vector.shape_cast %85 : vector<1x4x8xbf16> to vector<4x8xbf16>
    %cst_73 = arith.constant dense<0.000000e+00> : vector<256x8xf32>
    %87 = tpu.matmul %84, %86, %cst_73 {dimension_numbers = #tpu.dot_dimension_numbers<[1], [0], [0], [1], [0, 0, 1, 1], [], []>} : vector<256x4xbf16>, vector<4x8xbf16>, vector<256x8xf32> -> vector<256x8xf32>
    %88 = arith.addf %82, %87 : vector<256x8xf32>
    %c0_74 = arith.constant 0 : index
    %c0_75 = arith.constant 0 : index
    %89 = vector.load %arg3[%c0_74, %c0_75] : memref<1x8xf32, #tpu.memory_space<vmem>>, vector<1x8xf32>
    %90 = vector.shape_cast %89 : vector<1x8xf32> to vector<8xf32>
    %91 = vector.shape_cast %90 : vector<8xf32> to vector<1x8xf32>
    %92 = vector.broadcast %91 : vector<1x8xf32> to vector<256x8xf32>
    %93 = arith.addf %88, %92 : vector<256x8xf32>
    %cst_76 = arith.constant dense<0.000000e+00> : vector<256xf32>
    %94 = vector.multi_reduction <add>, %93, %cst_76 [1] : vector<256x8xf32> to vector<256xf32>
    %95 = vector.shape_cast %94 : vector<256xf32> to vector<256x1xf32>
    %cst_77 = arith.constant 8.000000e+00 : f32
    %96 = vector.broadcast %cst_77 : f32 to vector<256x1xf32>
    %97 = arith.divf %95, %96 : vector<256x1xf32>
    %98 = vector.broadcast %97 : vector<256x1xf32> to vector<256x8xf32>
    %99 = arith.subf %93, %98 : vector<256x8xf32>
    %100 = arith.mulf %99, %99 : vector<256x8xf32>
    %cst_78 = arith.constant dense<0.000000e+00> : vector<256xf32>
    %101 = vector.multi_reduction <add>, %100, %cst_78 [1] : vector<256x8xf32> to vector<256xf32>
    %102 = vector.shape_cast %101 : vector<256xf32> to vector<256x1xf32>
    %cst_79 = arith.constant 8.000000e+00 : f32
    %103 = vector.broadcast %cst_79 : f32 to vector<256x1xf32>
    %104 = arith.divf %102, %103 : vector<256x1xf32>
    %105 = vector.broadcast %97 : vector<256x1xf32> to vector<256x8xf32>
    %106 = arith.subf %93, %105 : vector<256x8xf32>
    %cst_80 = arith.constant 9.99999974E-6 : f32
    %107 = vector.broadcast %cst_80 : f32 to vector<256x1xf32>
    %108 = arith.addf %104, %107 : vector<256x1xf32>
    %109 = math.rsqrt %108 : vector<256x1xf32>
    %110 = vector.broadcast %109 : vector<256x1xf32> to vector<256x8xf32>
    %111 = arith.mulf %106, %110 : vector<256x8xf32>
    %c0_81 = arith.constant 0 : index
    %c0_82 = arith.constant 0 : index
    %112 = vector.load %arg6[%c0_81, %c0_82] : memref<1x8xf32, #tpu.memory_space<vmem>>, vector<1x8xf32>
    %113 = vector.shape_cast %112 : vector<1x8xf32> to vector<8xf32>
    %114 = vector.shape_cast %113 : vector<8xf32> to vector<1x8xf32>
    %115 = vector.broadcast %114 : vector<1x8xf32> to vector<256x8xf32>
    %116 = arith.mulf %111, %115 : vector<256x8xf32>
    %c0_83 = arith.constant 0 : index
    %c0_84 = arith.constant 0 : index
    %117 = vector.load %arg7[%c0_83, %c0_84] : memref<1x8xf32, #tpu.memory_space<vmem>>, vector<1x8xf32>
    %118 = vector.shape_cast %117 : vector<1x8xf32> to vector<8xf32>
    %119 = vector.shape_cast %118 : vector<8xf32> to vector<1x8xf32>
    %120 = vector.broadcast %119 : vector<1x8xf32> to vector<256x8xf32>
    %121 = arith.addf %116, %120 : vector<256x8xf32>
    %cst_85 = arith.constant 0.000000e+00 : f32
    %122 = vector.broadcast %cst_85 : f32 to vector<256x8xf32>
    %123 = arith.maximumf %121, %122 : vector<256x8xf32>
    %124 = arith.truncf %123 : vector<256x8xf32> to vector<256x8xbf16>
    %c0_86 = arith.constant 0 : index
    %c0_87 = arith.constant 0 : index
    %125 = vector.load %arg8[%c0_86, %c0_87] : memref<8x8xbf16, #tpu.memory_space<vmem>>, vector<8x8xbf16>
    %cst_88 = arith.constant dense<0.000000e+00> : vector<256x8xf32>
    %126 = tpu.matmul %124, %125, %cst_88 {dimension_numbers = #tpu.dot_dimension_numbers<[1], [0], [0], [1], [0, 0, 1, 1], [], []>} : vector<256x8xbf16>, vector<8x8xbf16>, vector<256x8xf32> -> vector<256x8xf32>
    %c0_89 = arith.constant 0 : index
    %c0_90 = arith.constant 0 : index
    %127 = vector.load %arg9[%c0_89, %c0_90] : memref<1x8xf32, #tpu.memory_space<vmem>>, vector<1x8xf32>
    %128 = vector.shape_cast %127 : vector<1x8xf32> to vector<8xf32>
    %129 = vector.shape_cast %128 : vector<8xf32> to vector<1x8xf32>
    %130 = vector.broadcast %129 : vector<1x8xf32> to vector<256x8xf32>
    %131 = arith.addf %126, %130 : vector<256x8xf32>
    %cst_91 = arith.constant 0.000000e+00 : f32
    %132 = vector.broadcast %cst_91 : f32 to vector<256x8xf32>
    %133 = arith.maximumf %131, %132 : vector<256x8xf32>
    %134 = arith.truncf %133 : vector<256x8xf32> to vector<256x8xbf16>
    %c0_92 = arith.constant 0 : index
    %c0_93 = arith.constant 0 : index
    %135 = vector.load %arg10[%c0_92, %c0_93] : memref<8x16xbf16, #tpu.memory_space<vmem>>, vector<8x16xbf16>
    %cst_94 = arith.constant dense<0.000000e+00> : vector<256x16xf32>
    %136 = tpu.matmul %134, %135, %cst_94 {dimension_numbers = #tpu.dot_dimension_numbers<[1], [0], [0], [1], [0, 0, 1, 1], [], []>} : vector<256x8xbf16>, vector<8x16xbf16>, vector<256x16xf32> -> vector<256x16xf32>
    %c0_95 = arith.constant 0 : index
    %c0_96 = arith.constant 0 : index
    %137 = vector.load %arg11[%c0_95, %c0_96] : memref<1x16xf32, #tpu.memory_space<vmem>>, vector<1x16xf32>
    %138 = vector.shape_cast %137 : vector<1x16xf32> to vector<16xf32>
    %139 = vector.shape_cast %138 : vector<16xf32> to vector<1x16xf32>
    %140 = vector.broadcast %139 : vector<1x16xf32> to vector<256x16xf32>
    %141 = arith.addf %136, %140 : vector<256x16xf32>
    %142 = arith.truncf %141 : vector<256x16xf32> to vector<256x16xbf16>
    %c0_97 = arith.constant 0 : index
    %c0_98 = arith.constant 0 : index
    %c0_99 = arith.constant 0 : index
    %143 = vector.load %arg12[%c0_97, %c0_98, %c0_99] : memref<1x256x16xbf16, #tpu.memory_space<vmem>>, vector<1x256x16xbf16>
    %144 = vector.shape_cast %143 : vector<1x256x16xbf16> to vector<256x16xbf16>
    %145 = vector.shape_cast %142 : vector<256x16xbf16> to vector<1x256x16xbf16>
    tpu.vector_store %arg12[%c0_97, %c0_98, %c0_99], %145 {strides = array<i32>} : memref<1x256x16xbf16, #tpu.memory_space<vmem>>, vector<1x256x16xbf16>,
    return
  }
  func.func @transform_0(%arg0: i32) -> (i32, i32, i32, i32) {
    %c0_i32 = arith.constant 0 : i32
    %c0_i32_0 = arith.constant 0 : i32
    %c0_i32_1 = arith.constant 0 : i32
    %c0_i32_2 = arith.constant 0 : i32
    return %arg0, %c0_i32, %c0_i32_0, %c0_i32_1 : i32, i32, i32, i32
  }
  func.func @transform_1(%arg0: i32) -> (i32, i32, i32) {
    %c0_i32 = arith.constant 0 : i32
    %c0_i32_0 = arith.constant 0 : i32
    %c0_i32_1 = arith.constant 0 : i32
    %c0_i32_2 = arith.constant 0 : i32
    return %c0_i32, %c0_i32_0, %c0_i32_1 : i32, i32, i32
  }
  func.func @transform_2(%arg0: i32) -> (i32, i32) {
    %c0_i32 = arith.constant 0 : i32
    %c0_i32_0 = arith.constant 0 : i32
    %c0_i32_1 = arith.constant 0 : i32
    return %c0_i32, %c0_i32_0 : i32, i32
  }
  func.func @transform_3(%arg0: i32) -> (i32, i32) {
    %c0_i32 = arith.constant 0 : i32
    %c0_i32_0 = arith.constant 0 : i32
    %c0_i32_1 = arith.constant 0 : i32
    return %c0_i32, %c0_i32_0 : i32, i32
  }
  func.func @transform_4(%arg0: i32) -> (i32, i32) {
    %c0_i32 = arith.constant 0 : i32
    %c0_i32_0 = arith.constant 0 : i32
    %c0_i32_1 = arith.constant 0 : i32
    return %c0_i32, %c0_i32_0 : i32, i32
  }
  func.func @transform_5(%arg0: i32) -> (i32, i32) {
    %c0_i32 = arith.constant 0 : i32
    %c0_i32_0 = arith.constant 0 : i32
    %c0_i32_1 = arith.constant 0 : i32
    return %c0_i32, %c0_i32_0 : i32, i32
  }
  func.func @transform_6(%arg0: i32) -> (i32, i32) {
    %c0_i32 = arith.constant 0 : i32
    %c0_i32_0 = arith.constant 0 : i32
    %c0_i32_1 = arith.constant 0 : i32
    return %c0_i32, %c0_i32_0 : i32, i32
  }
  func.func @transform_7(%arg0: i32) -> (i32, i32) {
    %c0_i32 = arith.constant 0 : i32
    %c0_i32_0 = arith.constant 0 : i32
    %c0_i32_1 = arith.constant 0 : i32
    return %c0_i32, %c0_i32_0 : i32, i32
  }
  func.func @transform_8(%arg0: i32) -> (i32, i32) {
    %c0_i32 = arith.constant 0 : i32
    %c0_i32_0 = arith.constant 0 : i32
    %c0_i32_1 = arith.constant 0 : i32
    return %c0_i32, %c0_i32_0 : i32, i32
  }
  func.func @transform_9(%arg0: i32) -> (i32, i32) {
    %c0_i32 = arith.constant 0 : i32
    %c0_i32_0 = arith.constant 0 : i32
    %c0_i32_1 = arith.constant 0 : i32
    return %c0_i32, %c0_i32_0 : i32, i32
  }
  func.func @transform_10(%arg0: i32) -> (i32, i32) {
    %c0_i32 = arith.constant 0 : i32
    %c0_i32_0 = arith.constant 0 : i32
    %c0_i32_1 = arith.constant 0 : i32
    return %c0_i32, %c0_i32_0 : i32, i32
  }
  func.func @transform_11(%arg0: i32) -> (i32, i32, i32) {
    %c0_i32 = arith.constant 0 : i32
    %c0_i32_0 = arith.constant 0 : i32
    %c0_i32_1 = arith.constant 0 : i32
    return %arg0, %c0_i32, %c0_i32_0 : i32, i32, i32
  }
}

</mosaic_0001>

<bundles_post_ra>
// kernel: tpu_custom_call.1
= control target key start
LH: loop header
LB: loop body
LE: loop exit
PB: predicated region body
PF: predicated region fallthrough
CT: control target
= control target key end

     0   :  { %s7708_s17 = smov 0   ;;  %s11171_s0 = inlined_call_operand.vmem [shape: f32[2,16,16,4], index: 0, kind: input, shape index: {}]   ;;  %s11172_s1 = inlined_call_operand.vmem [shape: bf16[9,4,8], index: 1, kind: input, shape index: {}]   ;;  %s11173_s2 = inlined_call_operand.vmem [shape: f32[1,8], index: 2, kind: input, shape index: {}]   ;;  %s11174_s3 = inlined_call_operand.vmem [shape: f32[1,4], index: 3, kind: input, shape index: {}]   ;;  %s11175_s4 = inlined_call_operand.vmem [shape: f32[1,4], index: 4, kind: input, shape index: {}]   ;;  %s11176_s5 = inlined_call_operand.vmem [shape: f32[1,8], index: 5, kind: input, shape index: {}]   ;;  %s11177_s6 = inlined_call_operand.vmem [shape: f32[1,8], index: 6, kind: input, shape index: {}]   ;;  %s11178_s7 = inlined_call_operand.vmem [shape: bf16[8,8], index: 7, kind: input, shape index: {}]   ;;  %s11179_s8 = inlined_call_operand.vmem [shape: f32[1,8], index: 8, kind: input, shape index: {}]   ;;  %s11180_s9 = inlined_call_operand.vmem [shape: bf16[8,16], index: 9, kind: input, shape index: {}]   ;;  %s11181_s10 = inlined_call_operand.vmem [shape: f32[1,16], index: 10, kind: input, shape index: {}]   ;;  %s11182_s11 = inlined_call_operand.vmem [shape: bf16[2,256,16], index: 11, kind: output, shape index: {}]  }
   0x1 LB: > { %s6969_s18 = sadd.s32 4294967295, %s7643_s17   ;;  %p6973_p0 = scmp.ge.s32.totalorder %s7643_s17, 1  ;;  %s7643_s17 = sphi %s7708_s17, %s21_s17  }
   0x2   : > { %p337_p1 = scmp.lt.s32.totalorder %s7643_s17, 3 }
   0x4   : > { %p338_p2 = pnand %p6973_p0, %p337_p1 }
   0x6   : > { %341 = sbr.rel (%p338_p2) target bundleno = 2272 (0x8e0), region = 64 }
   0xb   : > { %p377_p3 = scmp.lt.s32.totalorder %s6969_s18, 1  ;;  %vm420_vm0 = vcmask 31744   ;;  %v7645_v24 = vmov 4.0   ;;  %vm1204_vm2 = vcmask 27648   ;;  %vm1207_vm3 = vcmask 24576  }
   0xc   : > { %7475 = vrcp.f32 %v7645_v24  ;;  %vm1617_vm10 = vsmask.f32 7938 }
   0xd   : > { %s11362_s18 = smov (!%p377_p3, %s6969_s18), 1 }
   0xe   : > { %s7404_s19 = sshll.u32 %s11362_s18, 8  ;;  %s7405_s26 = sshll.u32 %s11362_s18, 7 }
   0xf   : > { %s7722_s22 = scalar_lea.vmem %s11171_s0, %s7404_s19  ;;  %s10913_s28 = scalar_lea.vmem %s11182_s11, %s7405_s26 }
  0x10   : > { %v410_v0 = vld [vmem:[%s7722_s22 + $0xb0] sm:$0xff]  ;;  %v388_v1 = vld [vmem:[%s7722_s22] sm:$0xff]  ;;  %v411_v6 = vld [vmem:[%s7722_s22 + $0xb8] sm:$0xff] }
  0x11   : > { %v487_v2 = vsel %vm420_vm0, %v410_v0, 0.0  ;;  %v421_v3 = vsel %vm420_vm0, %v388_v1, 0.0  ;;  %v412_v4 = vld [vmem:[%s7722_s22 + $0xc0] sm:$0xff]  ;;  %v7732_v7 = vld [vmem:[%s7722_s22 + $0x8] sm:$0xff]  ;;  %v490_v9 = vsel %vm420_vm0, %v411_v6, 0.0  ;;  %v7743_v12 = vld [vmem:[%s7722_s22 + $0x10] sm:$0xff] }
  0x12   : > { %488 = vadd.xlane.f32.xlu0 %v487_v2  ;;  %422 = vadd.xlane.f32.xlu2 %v421_v3  ;;  %v493_v5 = vsel %vm420_vm0, %v412_v4, 0.0  ;;  %v7735_v8 = vld [vmem:[%s7722_s22 + $0xc8] sm:$0xff]  ;;  %v424_v10 = vsel %vm420_vm0, %v7732_v7, 0.0  ;;  %v7746_v13 = vld [vmem:[%s7722_s22 + $0xd0] sm:$0xff]  ;;  %v7749_v14 = vld [vmem:[%s7722_s22 + $0xd8] sm:$0xff]  ;;  %v427_v15 = vsel %vm420_vm0, %v7743_v12, 0.0  ;;  %v7476_v25 = vpop.eup %7475 }
  0x13   : > { %494 = vadd.xlane.f32.xlu1 %v493_v5  ;;  %v496_v11 = vsel %vm420_vm0, %v7735_v8, 0.0  ;;  %v499_v16 = vsel %vm420_vm0, %v7746_v13, 0.0  ;;  %v502_v17 = vsel %vm420_vm0, %v7749_v14, 0.0  ;;  %v7758_v18 = vld [vmem:[%s7722_s22 + $0x18] sm:$0xff]  ;;  %v7763_v20 = vld [vmem:[%s7722_s22 + $0xe0] sm:$0xff]  ;;  %v7768_v22 = vld [vmem:[%s7722_s22 + $0x28] sm:$0xff]  ;;  %vm522_vm1 = vweird.f32 %v7476_v25 }
  0x14   : > { %v430_v19 = vsel %vm420_vm0, %v7758_v18, 0.0  ;;  %v505_v21 = vsel %vm420_vm0, %v7763_v20, 0.0  ;;  %v436_v23 = vsel %vm420_vm0, %v7768_v22, 0.0  ;;  %v518_v26 = vmul.f32 4.0, %v7476_v25  ;;  %v7789_v46 = vld [vmem:[%s7722_s22 + $0xe8] sm:$0xff]  ;;  %v7794_v48 = vld [vmem:[%s7722_s22 + $0x38] sm:$0xff] }
  0x15   : > { %v508_v50 = vsel %vm420_vm0, %v7789_v46, 0.0  ;;  %v442_v52 = vsel %vm420_vm0, %v7794_v48, 0.0  ;;  %v7811_v61 = vld [vmem:[%s7722_s22 + $0x20] sm:$0xff] }
  0x16   : > { %v519_v27 = vsub.f32 1.0, %v518_v26  ;;  %v433_v63 = vsel %vm420_vm0, %v7811_v61, 0.0 }
  0x18   : > { %v520_v28 = vmul.f32 %v7476_v25, %v519_v27 }
  0x1a   : > { %491 = vadd.xlane.f32.xlu0 %v490_v9  ;;  %425 = vadd.xlane.f32.xlu2 %v424_v10  ;;  %v521_v29 = vadd.f32 %v7476_v25, %v520_v28  ;;  %v7834_v9 = vld [vmem:[%s7722_s22 + $0x48] sm:$0xff] }
  0x1b   : > { %497 = vadd.xlane.f32.xlu1 %v496_v11 }
  0x1c   : > { %v7772_v30 = vsel %vm522_vm1, %v7476_v25, %v521_v29  ;;  %vm1292_vm1 = vsmask.f32 256 }
  0x22   : > { %428 = vadd.xlane.f32.xlu2 %v427_v15  ;;  %500 = vadd.xlane.f32.xlu0 %v499_v16  ;;  %v448_v16 = vsel %vm420_vm0, %v7834_v9, 0.0 }
  0x23   : > { %503 = vadd.xlane.f32.xlu1 %v502_v17 }
  0x2a   : > { %431 = vadd.xlane.f32.xlu0 %v430_v19 }
  0x32   : > { %506 = vadd.xlane.f32.xlu0 %v505_v21 }
  0x3a   : > { %437 = vadd.xlane.f32.xlu0 %v436_v23  ;;  %v7850_v23 = vld [vmem:[%s7722_s22 + $0x30] sm:$0xff] }
  0x3b   : > { %v439_v27 = vsel %vm420_vm0, %v7850_v23, 0.0 }
  0x85   : > { %v489_v31 = vpop.xlane.xlu0 %488  ;;  %v423_v32 = vpop.xlane.xlu2 %422 }
  0x86   : > { %v546_v33 = vmul.f32 %v7772_v30, %v489_v31  ;;  %v524_v34 = vmul.f32 %v7772_v30, %v423_v32  ;;  %v495_v37 = vpop.xlane.xlu1 %494 }
  0x87   : > { %v548_v45 = vmul.f32 %v7772_v30, %v495_v37 }
  0x88   : > { %v7776_v35 = vsub.f32 %v410_v0, %v546_v33  ;;  %v7778_v36 = vsub.f32 %v388_v1, %v524_v34 }
  0x89   : > { %v7796_v49 = vsub.f32 %v412_v4, %v548_v45 }
  0x8a   : > { %v610_v38 = vmul.f32 %v7776_v35, %v7776_v35  ;;  %v588_v39 = vmul.f32 %v7778_v36, %v7778_v36 }
  0x8b   : > { %v612_v60 = vmul.f32 %v7796_v49, %v7796_v49 }
  0x8c   : > { %v686_v40 = vsel %vm420_vm0, %v610_v38, 0.0  ;;  %v620_v41 = vsel %vm420_vm0, %v588_v39, 0.0  ;;  %v7907_v38 = vld [vmem:[%s7722_s22 + $0x40] sm:$0xff] }
  0x8d   : > { %687 = vadd.xlane.f32.xlu1 %v686_v40  ;;  %v492_v42 = vpop.xlane.xlu0 %491  ;;  %621 = vadd.xlane.f32.xlu0 %v620_v41  ;;  %v426_v43 = vpop.xlane.xlu2 %425  ;;  %v692_v2 = vsel %vm420_vm0, %v612_v60, 0.0  ;;  %v445_v40 = vsel %vm420_vm0, %v7907_v38, 0.0 }
  0x8e   : > { %v547_v44 = vmul.f32 %v7772_v30, %v492_v42  ;;  %v498_v53 = vpop.xlane.xlu1 %497  ;;  %v525_v57 = vmul.f32 %v7772_v30, %v426_v43 }
  0x8f   : > { %v549_v59 = vmul.f32 %v7772_v30, %v498_v53 }
  0x90   : > { %v7791_v47 = vsub.f32 %v411_v6, %v547_v44  ;;  %v7819_v0 = vsub.f32 %v7732_v7, %v525_v57 }
  0x91   : > { %v7822_v1 = vsub.f32 %v7735_v8, %v549_v59 }
  0x92   : > { %v611_v51 = vmul.f32 %v7791_v47, %v7791_v47  ;;  %v589_v7 = vmul.f32 %v7819_v0, %v7819_v0 }
  0x93   : > { %v613_v6 = vmul.f32 %v7822_v1, %v7822_v1 }
  0x94   : > { %v689_v54 = vsel %vm420_vm0, %v611_v51, 0.0 }
  0x95   : > { %509 = vadd.xlane.f32.xlu1 %v508_v50  ;;  %690 = vadd.xlane.f32.xlu2 %v689_v54  ;;  %v429_v55 = vpop.xlane.xlu2 %428  ;;  %v501_v56 = vpop.xlane.xlu0 %500  ;;  %v695_v11 = vsel %vm420_vm0, %v613_v6, 0.0 }
  0x96   : > { %443 = vadd.xlane.f32.xlu0 %v442_v52  ;;  %v526_v58 = vmul.f32 %v7772_v30, %v429_v55  ;;  %v550_v5 = vmul.f32 %v7772_v30, %v501_v56  ;;  %v504_v15 = vpop.xlane.xlu1 %503 }
  0x97   : > { %v551_v17 = vmul.f32 %v7772_v30, %v504_v15 }
  0x98   : > { %v7814_v62 = vsub.f32 %v7743_v12, %v526_v58  ;;  %v7837_v10 = vsub.f32 %v7746_v13, %v550_v5  ;;  %v623_v12 = vsel %vm420_vm0, %v589_v7, 0.0  ;;  %v7646_v13 = vmov 0  }
  0x99   : > { %1242 = vst.msk [vmem:[#allocation2 + $0x90] sm:$0xf] %vm1204_vm2, %v7646_v13  ;;  %v7859_v25 = vsub.f32 %v7749_v14, %v551_v17 }
  0x9a   : > { %v590_v3 = vmul.f32 %v7814_v62, %v7814_v62  ;;  %v614_v21 = vmul.f32 %v7837_v10, %v7837_v10  ;;  %1205 = vst.msk [vmem:[#allocation2] sm:$0xf] %vm1204_vm2, %v7646_v13 }
  0x9b   : > { %1206 = vst.msk [vmem:[#allocation2 + $0x4] sm:$0xf] %vm1204_vm2, %v7646_v13 }
  0x9c   : > { %v626_v4 = vsel %vm420_vm0, %v590_v3, 0.0  ;;  %1209 = vst.msk [vmem:[#allocation2 + $0xc] sm:$0xf] %vm1204_vm2, %v7646_v13  ;;  %v698_v28 = vsel %vm420_vm0, %v614_v21, 0.0 }
  0x9d   : > { %693 = vadd.xlane.f32.xlu1 %v692_v2  ;;  %434 = vadd.xlane.f32.xlu2 %v433_v63  ;;  %v432_v8 = vpop.xlane.xlu0 %431  ;;  %1210 = vst.msk [vmem:[#allocation2 + $0x10] sm:$0xf] %vm1204_vm2, %v7646_v13 }
  0x9e   : > { %627 = vadd.xlane.f32.xlu0 %v626_v4  ;;  %v527_v19 = vmul.f32 %v7772_v30, %v432_v8  ;;  %1212 = vst.msk [vmem:[#allocation2 + $0x18] sm:$0xf] %vm1204_vm2, %v7646_v13 }
  0x9f   : > { %1213 = vst.msk [vmem:[#allocation2 + $0x1c] sm:$0xf] %vm1204_vm2, %v7646_v13 }
  0xa0   : > { %v7862_v26 = vsub.f32 %v7758_v18, %v527_v19  ;;  %1215 = vst.msk [vmem:[#allocation2 + $0x24] sm:$0xf] %vm1204_vm2, %v7646_v13  ;;  %v615_v18 = vmul.f32 %v7859_v25, %v7859_v25 }
  0xa1   : > { %1216 = vst.msk [vmem:[#allocation2 + $0x28] sm:$0xf] %vm1204_vm2, %v7646_v13 }
  0xa2   : > { %v591_v29 = vmul.f32 %v7862_v26, %v7862_v26  ;;  %1218 = vst.msk [vmem:[#allocation2 + $0x30] sm:$0xf] %vm1204_vm2, %v7646_v13  ;;  %v701_v32 = vsel %vm420_vm0, %v615_v18, 0.0 }
  0xa3   : > { %1219 = vst.msk [vmem:[#allocation2 + $0x34] sm:$0xf] %vm1204_vm2, %v7646_v13 }
  0xa4   : > { %1221 = vst.msk [vmem:[#allocation2 + $0x3c] sm:$0xf] %vm1204_vm2, %v7646_v13  ;;  %v629_v33 = vsel %vm420_vm0, %v591_v29, 0.0 }
  0xa5   : > { %696 = vadd.xlane.f32.xlu2 %v695_v11  ;;  %624 = vadd.xlane.f32.xlu1 %v623_v12  ;;  %v507_v24 = vpop.xlane.xlu0 %506  ;;  %1222 = vst.msk [vmem:[#allocation2 + $0x40] sm:$0xf] %vm1204_vm2, %v7646_v13 }
  0xa6   : > { %449 = vadd.xlane.f32.xlu0 %v448_v16  ;;  %v552_v14 = vmul.f32 %v7772_v30, %v507_v24  ;;  %1224 = vst.msk [vmem:[#allocation2 + $0x48] sm:$0xf] %vm1204_vm2, %v7646_v13 }
  0xa7   : > { %1225 = vst.msk [vmem:[#allocation2 + $0x4c] sm:$0xf] %vm1204_vm2, %v7646_v13 }
  0xa8   : > { %v7889_v31 = vsub.f32 %v7763_v20, %v552_v14  ;;  %1227 = vst.msk [vmem:[#allocation2 + $0x54] sm:$0xf] %vm1204_vm2, %v7646_v13 }
  0xa9   : > { %1228 = vst.msk [vmem:[#allocation2 + $0x58] sm:$0xf] %vm1204_vm2, %v7646_v13 }
  0xaa   : > { %v616_v37 = vmul.f32 %v7889_v31, %v7889_v31  ;;  %1230 = vst.msk [vmem:[#allocation2 + $0x60] sm:$0xf] %vm1204_vm2, %v7646_v13 }
  0xab   : > { %1231 = vst.msk [vmem:[#allocation2 + $0x64] sm:$0xf] %vm1204_vm2, %v7646_v13 }
  0xac   : > { %1233 = vst.msk [vmem:[#allocation2 + $0x6c] sm:$0xf] %vm1204_vm2, %v7646_v13  ;;  %v704_v41 = vsel %vm420_vm0, %v616_v37, 0.0 }
  0xad   : > { %440 = vadd.xlane.f32.xlu2 %v439_v27  ;;  %699 = vadd.xlane.f32.xlu1 %v698_v28  ;;  %v438_v34 = vpop.xlane.xlu0 %437  ;;  %1234 = vst.msk [vmem:[#allocation2 + $0x70] sm:$0xf] %vm1204_vm2, %v7646_v13 }
  0xae   : > { %v529_v20 = vmul.f32 %v7772_v30, %v438_v34  ;;  %1236 = vst.msk [vmem:[#allocation2 + $0x78] sm:$0xf] %vm1204_vm2, %v7646_v13 }
  0xaf   : > { %1237 = vst.msk [vmem:[#allocation2 + $0x7c] sm:$0xf] %vm1204_vm2, %v7646_v13 }
  0xb0   : > { %v7916_v39 = vsub.f32 %v7768_v22, %v529_v20  ;;  %1239 = vst.msk [vmem:[#allocation2 + $0x84] sm:$0xf] %vm1204_vm2, %v7646_v13 }
  0xb1   : > { %1240 = vst.msk [vmem:[#allocation2 + $0x88] sm:$0xf] %vm1204_vm2, %v7646_v13 }
  0xb2   : > { %v593_v22 = vmul.f32 %v7916_v39, %v7916_v39  ;;  %1243 = vst.msk [vmem:[#allocation2 + $0x94] sm:$0xf] %vm1204_vm2, %v7646_v13 }
  0xb3   : > { %1245 = vst.msk [vmem:[#allocation2 + $0x9c] sm:$0xf] %vm1204_vm2, %v7646_v13 }
  0xb4   : > { %1246 = vst.msk [vmem:[#allocation2 + $0xa0] sm:$0xf] %vm1204_vm2, %v7646_v13  ;;  %v635_v42 = vsel %vm420_vm0, %v593_v22, 0.0 }
  0xb5   : > { %702 = vadd.xlane.f32.xlu2 %v701_v32  ;;  %630 = vadd.xlane.f32.xlu1 %v629_v33  ;;  %1248 = vst.msk [vmem:[#allocation2 + $0xa8] sm:$0xf] %vm1204_vm2, %v7646_v13  ;;  %v398_v32 = vld [vmem:[%s7722_s22 + $0x50] sm:$0xff] }
  0xb6   : > { %1249 = vst.msk [vmem:[#allocation2 + $0xac] sm:$0xf] %vm1204_vm2, %v7646_v13 }
  0xb7   : > { %1251 = vst.msk [vmem:[#allocation2 + $0xb4] sm:$0xf] %vm1204_vm2, %v7646_v13 }
  0xb8   : > { %1252 = vst.msk [vmem:[#allocation2 + $0xb8] sm:$0xf] %vm1204_vm2, %v7646_v13 }
  0xb9   : > { %1254 = vst.msk [vmem:[#allocation2 + $0xc0] sm:$0xf] %vm1204_vm2, %v7646_v13 }
  0xba   : > { %1255 = vst.msk [vmem:[#allocation2 + $0xc4] sm:$0xf] %vm1204_vm2, %v7646_v13 }
  0xbb   : > { %1257 = vst.msk [vmem:[#allocation2 + $0xcc] sm:$0xf] %vm1204_vm2, %v7646_v13 }
  0xbc   : > { %1258 = vst.msk [vmem:[#allocation2 + $0xd0] sm:$0xf] %vm1204_vm2, %v7646_v13 }
  0xbd   : > { %446 = vadd.xlane.f32.xlu2 %v445_v40  ;;  %705 = vadd.xlane.f32.xlu1 %v704_v41  ;;  %1244 = vst.msk [vmem:[#allocation2 + $0x98] sm:$0x1] %vm1207_vm3, %v7646_v13 }
  0xbe   : > { %1208 = vst.msk [vmem:[#allocation2 + $0x8] sm:$0x1] %vm1207_vm3, %v7646_v13 }
  0xbf   : > { %1211 = vst.msk [vmem:[#allocation2 + $0x14] sm:$0x1] %vm1207_vm3, %v7646_v13 }
  0xc0   : > { %1214 = vst.msk [vmem:[#allocation2 + $0x20] sm:$0x1] %vm1207_vm3, %v7646_v13 }
  0xc1   : > { %1217 = vst.msk [vmem:[#allocation2 + $0x2c] sm:$0x1] %vm1207_vm3, %v7646_v13 }
  0xc2   : > { %1220 = vst.msk [vmem:[#allocation2 + $0x38] sm:$0x1] %vm1207_vm3, %v7646_v13 }
  0xc3   : > { %1223 = vst.msk [vmem:[#allocation2 + $0x44] sm:$0x1] %vm1207_vm3, %v7646_v13 }
  0xc4   : > { %1226 = vst.msk [vmem:[#allocation2 + $0x50] sm:$0x1] %vm1207_vm3, %v7646_v13 }
  0xc5   : > { %636 = vadd.xlane.f32.xlu1 %v635_v42  ;;  %1229 = vst.msk [vmem:[#allocation2 + $0x5c] sm:$0x1] %vm1207_vm3, %v7646_v13  ;;  %v451_v42 = vsel %vm420_vm0, %v398_v32, 0.0 }
  0xc6   : > { %1232 = vst.msk [vmem:[#allocation2 + $0x68] sm:$0x1] %vm1207_vm3, %v7646_v13 }
  0xc7   : > { %1235 = vst.msk [vmem:[#allocation2 + $0x74] sm:$0x1] %vm1207_vm3, %v7646_v13 }
  0xc8   : > { %1238 = vst.msk [vmem:[#allocation2 + $0x80] sm:$0x1] %vm1207_vm3, %v7646_v13 }
  0xc9   : > { %1241 = vst.msk [vmem:[#allocation2 + $0x8c] sm:$0x1] %vm1207_vm3, %v7646_v13 }
  0xca   : > { %1247 = vst.msk [vmem:[#allocation2 + $0xa4] sm:$0x1] %vm1207_vm3, %v7646_v13 }
  0xcb   : > { %1250 = vst.msk [vmem:[#allocation2 + $0xb0] sm:$0x1] %vm1207_vm3, %v7646_v13 }
  0xcc   : > { %1253 = vst.msk [vmem:[#allocation2 + $0xbc] sm:$0x1] %vm1207_vm3, %v7646_v13 }
  0xcd   : > { %1256 = vst.msk [vmem:[#allocation2 + $0xc8] sm:$0x1] %vm1207_vm3, %v7646_v13 }
  0xce   : > { %1259 = vst.msk [vmem:[#allocation2 + $0xd4] sm:$0x1] %vm1207_vm3, %v7646_v13 }
 0x100   : > { %v688_v43 = vpop.xlane.xlu1 %687  ;;  %v622_v44 = vpop.xlane.xlu0 %621 }
 0x101   : > { %v738_v45 = vmul.f32 %v688_v43, %v7772_v30  ;;  %v716_v50 = vmul.f32 %v622_v44, %v7772_v30  ;;  %v399_v43 = vld [vmem:[%s7722_s22 + $0x58] sm:$0xff]  ;;  %v8044_v44 = vld [vmem:[%s11175_s4] ss:$0 sm:$0xff] }
 0x103   : > { %v770_v51 = vadd.f32 1e-05, %v738_v45  ;;  %v748_v52 = vadd.f32 1e-05, %v716_v50 }
 0x105   : > { %7477 = vrsqrt.f32 %v770_v51  ;;  %vm786_vm4 = vweird.f32 %v748_v52  ;;  %vm1006_vm7 = vweird.f32 %v770_v51 }
 0x106   : > { %7479 = vrsqrt.f32 %v748_v52 }
 0x108   : > { %v510_v53 = vpop.xlane.xlu1 %509  ;;  %v691_v54 = vpop.xlane.xlu2 %690 }
 0x109   : > { %v553_v55 = vmul.f32 %v7772_v30, %v510_v53  ;;  %v444_v56 = vpop.xlane.xlu0 %443  ;;  %v739_v57 = vmul.f32 %v691_v54, %v7772_v30 }
 0x10a   : > { %v531_v6 = vmul.f32 %v7772_v30, %v444_v56 }
 0x10b   : > { %v7478_v58 = vpop.eup %7477  ;;  %v7971_v59 = vsub.f32 %v7789_v46, %v553_v55  ;;  %v7973_v60 = vadd.f32 1e-05, %v739_v57  ;;  %v400_v57 = vld [vmem:[%s7722_s22 + $0x60] sm:$0xff] }
 0x10c   : > { %v7480_v63 = vpop.eup %7479  ;;  %v1001_v2 = vmul.f32 %v7478_v58, %v770_v51  ;;  %vm1007_vm6 = vweird.f32 %v7478_v58  ;;  %v8002_v14 = vsub.f32 %v7794_v48, %v531_v6 }
 0x10d   : > { %v781_v3 = vmul.f32 %v7480_v63, %v748_v52  ;;  %7481 = vrsqrt.f32 %v7973_v60  ;;  %v617_v46 = vmul.f32 %v7971_v59, %v7971_v59  ;;  %vm787_vm5 = vweird.f32 %v7480_v63  ;;  %vm1008_vm9 = vmor %vm1006_vm7, %vm1007_vm6 }
 0x10e   : > { %v1002_v4 = vmul.f32 %v7478_v58, %v1001_v2  ;;  %vm8014_vm8 = vmor %vm786_vm4, %vm787_vm5  ;;  %v595_v52 = vmul.f32 %v8002_v14, %v8002_v14  ;;  %vm1016_vm11 = vweird.f32 %v7973_v60  ;;  %vm1293_vm4 = vsmask.f32 4368 }
 0x10f   : > { %v782_v5 = vmul.f32 %v7480_v63, %v781_v3  ;;  %v707_v11 = vsel %vm420_vm0, %v617_v46, 0.0  ;;  %vm8102_vm7 = vmand %vm1204_vm2, %vm1617_vm10 }
 0x110   : > { %v1003_v7 = vmul.f32 0.5, %v1002_v4  ;;  %v694_v8 = vpop.xlane.xlu1 %693  ;;  %v435_v12 = vpop.xlane.xlu2 %434  ;;  %708 = vadd.xlane.f32.xlu2 %v707_v11 }
 0x111   : > { %v783_v15 = vmul.f32 0.5, %v782_v5  ;;  %v740_v16 = vmul.f32 %v694_v8, %v7772_v30  ;;  %v628_v17 = vpop.xlane.xlu0 %627  ;;  %v528_v19 = vmul.f32 %v7772_v30, %v435_v12  ;;  %v641_v5 = vsel %vm420_vm0, %v595_v52, 0.0 }
 0x112   : > { %v1004_v21 = vsub.f32 1.5, %v1003_v7  ;;  %v718_v24 = vmul.f32 %v628_v17, %v7772_v30  ;;  %v8070_v7 = vsel %vm420_vm0, %v400_v57, 0.0 }
 0x113   : > { %v7999_v27 = vpop.eup %7481  ;;  %v784_v28 = vsub.f32 1.5, %v783_v15  ;;  %v8006_v18 = vadd.f32 1e-05, %v740_v16  ;;  %v8009_v29 = vsub.f32 %v7811_v61, %v528_v19  ;;  %v8027_v61 = vld [vmem:[%s11174_s3] ss:$0 sm:$0xff] }
 0x114   : > { %v1005_v33 = vmul.f32 %v7478_v58, %v1004_v21  ;;  %v1011_v48 = vmul.f32 %v7999_v27, %v7973_v60  ;;  %v8022_v20 = vadd.f32 1e-05, %v718_v24  ;;  %vm1017_vm12 = vweird.f32 %v7999_v27 }
 0x115   : > { %v785_v37 = vmul.f32 %v7480_v63, %v784_v28  ;;  %7483 = vrsqrt.f32 %v8006_v18  ;;  %v592_v40 = vmul.f32 %v8009_v29, %v8009_v29  ;;  %vm1026_vm13 = vweird.f32 %v8006_v18  ;;  %vm1018_vm14 = vmor %vm1016_vm11, %vm1017_vm12 }
 0x116   : > { %v1009_v41 = vsel %vm1008_vm9, %v7478_v58, %v1005_v33  ;;  %v1012_v22 = vmul.f32 %v7999_v27, %v1011_v48  ;;  %7485 = vrsqrt.f32 %v8022_v20  ;;  %vm806_vm15 = vweird.f32 %v8022_v20 }
 0x117   : > { %v1122_v45 = vmul.f32 %v1009_v41, %v7776_v35  ;;  %v789_v50 = vsel %vm8014_vm8, %v7480_v63, %v785_v37  ;;  %v632_v51 = vsel %vm420_vm0, %v592_v40, 0.0  ;;  %v454_v63 = vsel %vm420_vm0, %v399_v43, 0.0 }
 0x118   : > { %v1100_v53 = vmul.f32 %v789_v50, %v7778_v36  ;;  %v1013_v54 = vmul.f32 0.5, %v1012_v22  ;;  %v625_v55 = vpop.xlane.xlu1 %624  ;;  %633 = vadd.xlane.f32.xlu0 %v632_v51  ;;  %v697_v56 = vpop.xlane.xlu2 %696  ;;  %452 = vadd.xlane.f32.xlu2 %v451_v42 }
 0x119   : > { %v1158_v35 = vmul.f32 %v8027_v61, %v1122_v45  ;;  %v717_v58 = vmul.f32 %v625_v55, %v7772_v30  ;;  %v741_v13 = vmul.f32 %v697_v56, %v7772_v30  ;;  %v450_v6 = vpop.xlane.xlu0 %449  ;;  %v1698_v45 = vld [vmem:[#allocation2 + $0x90] sm:$0xf]  ;;  %v1619_v56 = vld [vmem:[#allocation2 + $0xc] sm:$0xf] }
 0x11a   : > { %v1136_v2 = vmul.f32 %v8027_v61, %v1100_v53  ;;  %v1014_v3 = vsub.f32 1.5, %v1013_v54  ;;  %v8090_v32 = vmul.f32 %v7772_v30, %v450_v6 }
 0x11b   : > { %v8063_v36 = vpop.eup %7483  ;;  %v1194_v4 = vadd.f32 %v8044_v44, %v1158_v35  ;;  %v8066_v46 = vadd.f32 1e-05, %v717_v58  ;;  %v8079_v16 = vadd.f32 1e-05, %v741_v13 }
 0x11c   : > { %v8072_v8 = vpop.eup %7485  ;;  %v1172_v11 = vadd.f32 %v8044_v44, %v1136_v2  ;;  %v1015_v12 = vmul.f32 %v7999_v27, %v1014_v3  ;;  %v1021_v15 = vmul.f32 %v8063_v36, %v8006_v18  ;;  %vm1027_vm5 = vweird.f32 %v8063_v36 }
 0x11d   : > { %v1282_v17 = vpack.c.bf16 %v1194_v4, %v1194_v4  ;;  %v801_v19 = vmul.f32 %v8072_v8, %v8022_v20  ;;  %7487 = vrsqrt.f32 %v8066_v46  ;;  %vm807_vm6 = vweird.f32 %v8072_v8  ;;  %vm1028_vm10 = vmor %vm1026_vm13, %vm1027_vm5 }
 0x11e   : > { %v1260_v21 = vpack.c.bf16 %v1172_v11, %v1172_v11  ;;  %v1019_v24 = vsel %vm1018_vm14, %v7999_v27, %v1015_v12  ;;  %v1022_v28 = vmul.f32 %v8063_v36, %v1021_v15  ;;  %7489 = vrsqrt.f32 %v8079_v16  ;;  %vm8120_vm9 = vmor %vm806_vm15, %vm807_vm6 }
 0x11f   : > { %v1483_v33 = vshrl.u32 %v1282_v17, 16  ;;  %v1123_v60 = vmul.f32 %v1019_v24, %v7791_v47  ;;  %v802_v34 = vmul.f32 %v8072_v8, %v801_v19  ;;  %v1486_v41 = vshll.u32 %v1282_v17, 16  ;;  %vm8156_vm13 = vmor %vm1292_vm1, %vm1293_vm4 }
 0x120   : > { %v1296_v48 = vshrl.u32 %v1260_v21, 16  ;;  %v1023_v37 = vmul.f32 0.5, %v1022_v28  ;;  %v700_v40 = vpop.xlane.xlu1 %699  ;;  %455 = vadd.xlane.f32.xlu0 %v454_v63  ;;  %642 = vadd.xlane.f32.xlu2 %v641_v5  ;;  %v441_v47 = vpop.xlane.xlu2 %440  ;;  %v1299_v51 = vshll.u32 %v1260_v21, 16  ;;  %vm796_vm8 = vweird.f32 %v8066_v46  ;;  %vm8164_vm14 = vmand %vm1207_vm3, %vm1292_vm1 }
 0x121   : > { %v8097_v27 = vrot.slane %v1483_v33, 7  ;;  %v1159_v22 = vmul.f32 %v8027_v61, %v1123_v60  ;;  %v803_v42 = vmul.f32 0.5, %v802_v34  ;;  %v742_v53 = vmul.f32 %v700_v40, %v7772_v30  ;;  %v1702_v40 = vld [vmem:[#allocation2 + $0x98] sm:$0x1] }
 0x122   : > { %v8106_v50 = vrot.slane %v1296_v48, 7  ;;  %v1024_v52 = vsub.f32 1.5, %v1023_v37  ;;  %v530_v3 = vmul.f32 %v7772_v30, %v441_v47  ;;  %vm1036_vm12 = vweird.f32 %v8079_v16 }
 0x123   : > { %v8109_v54 = vpop.eup %7487  ;;  %v1488_v55 = vor.u32 %v1486_v41, %v8097_v27  ;;  %v1195_v57 = vadd.f32 %v8044_v44, %v1159_v22  ;;  %v804_v35 = vsub.f32 1.5, %v803_v42  ;;  %v1489_v4 = vrot.slane %v8097_v27, 4 }
 0x124   : > { %v1301_v58 = vor.u32 %v1299_v51, %v8106_v50  ;;  %v1025_v13 = vmul.f32 %v8063_v36, %v1024_v52  ;;  %v791_v2 = vmul.f32 %v8109_v54, %v8066_v46  ;;  %v8135_v11 = vpop.eup %7489  ;;  %v8141_v19 = vadd.f32 1e-05, %v742_v53 }
 0x125   : > { %v1699_v5 = vsel %vm8102_vm7, %v1488_v55, %v1698_v45  ;;  %v1283_v6 = vpack.c.bf16 %v1195_v57, %v1195_v57  ;;  %v805_v20 = vmul.f32 %v8072_v8, %v804_v35  ;;  %v1302_v21 = vrot.slane %v8106_v50, 4  ;;  %v1709_v50 = vld [vmem:[#allocation2 + $0xa4] sm:$0x1] }
 0x126   : > { %1700 = vst [vmem:[#allocation2 + $0x90] sm:$0xf] %v1699_v5  ;;  %v1620_v12 = vsel %vm8102_vm7, %v1301_v58, %v1619_v56  ;;  %v1029_v15 = vsel %vm1028_vm10, %v8063_v36, %v1025_v13  ;;  %v792_v17 = vmul.f32 %v8109_v54, %v791_v2  ;;  %vm797_vm11 = vweird.f32 %v8109_v54 }
 0x127   : > { %1621 = vst [vmem:[#allocation2 + $0xc] sm:$0xf] %v1620_v12  ;;  %v1491_v24 = vshrl.u32 %v1283_v6, 16  ;;  %v1124_v18 = vmul.f32 %v1029_v15, %v7796_v49  ;;  %v809_v28 = vsel %vm8120_vm9, %v8072_v8, %v805_v20  ;;  %v1031_v36 = vmul.f32 %v8135_v11, %v8079_v16  ;;  %vm8178_vm3 = vmor %vm796_vm8, %vm797_vm11 }
 0x128   : > { %v1102_v33 = vmul.f32 %v809_v28, %v7814_v62  ;;  %v793_v60 = vmul.f32 0.5, %v792_v17  ;;  %v631_v34 = vpop.xlane.xlu1 %630  ;;  %458 = vadd.xlane.f32.xlu0 %v8070_v7  ;;  %v1494_v48 = vshll.u32 %v1283_v6, 16  ;;  %7491 = vrsqrt.f32 %v8141_v19  ;;  %v703_v15 = vpop.xlane.xlu2 %702 }
 0x129   : > { %v1493_v8 = vrot.slane %v1491_v24, 7  ;;  %v1160_v62 = vmul.f32 %v8027_v61, %v1124_v18  ;;  %v1032_v41 = vmul.f32 %v8135_v11, %v1031_v36  ;;  %v8171_v22 = vsub.f32 %v7850_v23, %v530_v3 }
 0x12a   : > { %v1138_v7 = vmul.f32 %v8027_v61, %v1102_v33  ;;  %v794_v27 = vsub.f32 1.5, %v793_v60  ;;  %v719_v52 = vmul.f32 %v631_v34, %v7772_v30  ;;  %vm1037_vm15 = vweird.f32 %v8135_v11  ;;  %v1705_v33 = vld [vmem:[#allocation2 + $0x9c] sm:$0xf] }
 0x12b   : > { %v1496_v42 = vor.u32 %v1494_v48, %v1493_v8  ;;  %v1498_v47 = vrot.slane %v1493_v8, 4  ;;  %v1196_v45 = vadd.f32 %v8044_v44, %v1160_v62  ;;  %v1033_v23 = vmul.f32 0.5, %v1032_v41  ;;  %vm1038_vm4 = vmor %vm1036_vm12, %vm1037_vm15  ;;  %v1628_v8 = vld [vmem:[#allocation2 + $0x18] sm:$0xf] }
 0x12c   : > { %v1174_v53 = vadd.f32 %v8044_v44, %v1138_v7  ;;  %v795_v55 = vmul.f32 %v8109_v54, %v794_v27  ;;  %v8190_v35 = vadd.f32 1e-05, %v719_v52  ;;  %v594_v2 = vmul.f32 %v8171_v22, %v8171_v22 }
 0x12d   : > { %v1497_v56 = vsel %vm8156_vm13, %v1489_v4, %v1496_v42  ;;  %v1703_v57 = vsel %vm8164_vm14, %v1498_v47, %v1702_v40  ;;  %v1284_v46 = vpack.c.bf16 %v1196_v45, %v1196_v45  ;;  %v1034_v63 = vsub.f32 1.5, %v1033_v23 }
 0x12e   : > { %1701 = vst.msk [vmem:[#allocation2 + $0x94] sm:$0xf] %vm1204_vm2, %v1497_v56  ;;  %v1262_v58 = vpack.c.bf16 %v1174_v53, %v1174_v53  ;;  %v799_v13 = vsel %vm8178_vm3, %v8109_v54, %v795_v55  ;;  %v8198_v3 = vpop.eup %7491  ;;  %vm1046_vm1 = vweird.f32 %v8141_v19  ;;  %7493 = vrsqrt.f32 %v8190_v35 }
 0x12f   : > { %1704 = vst [vmem:[#allocation2 + $0x98] sm:$0x1] %v1703_v57  ;;  %v1500_v4 = vshrl.u32 %v1284_v46, 16  ;;  %v1101_v5 = vmul.f32 %v799_v13, %v7819_v0  ;;  %v1035_v20 = vmul.f32 %v8135_v11, %v1034_v63  ;;  %v1041_v54 = vmul.f32 %v8198_v3, %v8141_v19  ;;  %v8260_v19 = vld [vmem:[%s7722_s22 + $0x68] sm:$0xff] }
 0x130   : > { %v1313_v6 = vshrl.u32 %v1262_v58, 16  ;;  %v8208_v12 = vsub.f32 %v7834_v9, %v8090_v32  ;;  %v1503_v24 = vshll.u32 %v1284_v46, 16  ;;  %v1316_v18 = vshll.u32 %v1262_v58, 16  ;;  %v706_v28 = vpop.xlane.xlu1 %705 }
 0x131   : > { %v8210_v17 = vrot.slane %v1500_v4, 7  ;;  %v1137_v0 = vmul.f32 %v8027_v61, %v1101_v5  ;;  %v1039_v36 = vsel %vm1038_vm4, %v8135_v11, %v1035_v20  ;;  %v1042_v9 = vmul.f32 %v8198_v3, %v1041_v54 }
 0x132   : > { %v8217_v60 = vrot.slane %v1313_v6, 7  ;;  %v638_v32 = vsel %vm420_vm0, %v594_v2, 0.0  ;;  %v1125_v62 = vmul.f32 %v1039_v36, %v7822_v1  ;;  %vm1047_vm5 = vweird.f32 %v8198_v3  ;;  %v1625_v6 = vld [vmem:[#allocation2 + $0x14] sm:$0x1] }
 0x133   : > { %v1505_v34 = vor.u32 %v1503_v24, %v8210_v17  ;;  %v1173_v48 = vadd.f32 %v8044_v44, %v1137_v0  ;;  %639 = vadd.xlane.f32.xlu1 %v638_v32  ;;  %v1043_v40 = vmul.f32 0.5, %v1042_v9  ;;  %vm816_vm6 = vweird.f32 %v8190_v35  ;;  %vm8246_vm8 = vmor %vm1046_vm1, %vm1047_vm5 }
 0x134   : > { %v1318_v16 = vor.u32 %v1316_v18, %v8217_v60  ;;  %v743_v11 = vmul.f32 %v703_v15, %v7772_v30  ;;  %v8229_v7 = vpop.eup %7493  ;;  %v1161_v42 = vmul.f32 %v8027_v61, %v1125_v62  ;;  %v744_v1 = vmul.f32 %v706_v28, %v7772_v30  ;;  %v447_v15 = vpop.xlane.xlu2 %446 }
 0x135   : > { %v1706_v27 = vsel %vm8102_vm7, %v1505_v34, %v1705_v33  ;;  %v1261_v41 = vpack.c.bf16 %v1173_v48, %v1173_v48  ;;  %v1506_v47 = vrot.slane %v8210_v17, 4  ;;  %v1044_v51 = vsub.f32 1.5, %v1043_v40  ;;  %v1765_v34 = vld [vmem:[%s11172_s1] sm:$0x3] }
 0x136   : > { %1707 = vst [vmem:[#allocation2 + $0x9c] sm:$0xf] %v1706_v27  ;;  %v1629_v45 = vsel %vm8102_vm7, %v1318_v16, %v1628_v8  ;;  %v811_v52 = vmul.f32 %v8229_v7, %v8190_v35  ;;  %v1319_v53 = vrot.slane %v8217_v60, 4  ;;  %v1197_v23 = vadd.f32 %v8044_v44, %v1161_v42 }
 0x137   : > { %1630 = vst [vmem:[#allocation2 + $0x18] sm:$0xf] %v1629_v45  ;;  %v1304_v55 = vshrl.u32 %v1261_v41, 16  ;;  %v8250_v57 = vadd.f32 1e-05, %v743_v11  ;;  %v1045_v46 = vmul.f32 %v8198_v3, %v1044_v51  ;;  %v597_v63 = vmul.f32 %v8208_v12, %v8208_v12  ;;  %v7406_v45 = vld [vmem:[#allocation2] sm:$0xff] }
 0x138   : > { %v812_v58 = vmul.f32 %v8229_v7, %v811_v52  ;;  %v8254_v13 = vadd.f32 1e-05, %v744_v1  ;;  %v1307_v4 = vshll.u32 %v1261_v41, 16  ;;  %v1285_v5 = vpack.c.bf16 %v1197_v23, %v1197_v23  ;;  %v637_v33 = vpop.xlane.xlu1 %636 }
 0x139   : > { %v1306_v2 = vrot.slane %v1304_v55, 7  ;;  %7495 = vrsqrt.f32 %v8250_v57  ;;  %v1049_v20 = vsel %vm8246_vm8, %v8198_v3, %v1045_v46  ;;  %vm817_vm9 = vweird.f32 %v8229_v7 }
 0x13a   : > { %v813_v54 = vmul.f32 0.5, %v812_v58  ;;  %7497 = vrsqrt.f32 %v8254_v13  ;;  %v1508_v0 = vshrl.u32 %v1285_v5, 16  ;;  %v1511_v28 = vshll.u32 %v1285_v5, 16  ;;  %vm8285_vm11 = vmor %vm816_vm6, %vm817_vm9 }
 0x13b   : > { %v1309_v24 = vor.u32 %v1307_v4, %v1306_v2  ;;  %v1311_v18 = vrot.slane %v1306_v2, 4  ;;  %v1126_v36 = vmul.f32 %v1049_v20, %v7837_v10  ;;  %vm1056_vm10 = vweird.f32 %v8250_v57 }
 0x13c   : > { %v814_v9 = vsub.f32 1.5, %v813_v54  ;;  %v647_v32 = vsel %vm420_vm0, %v597_v63, 0.0  ;;  %v460_v3 = vsel %vm420_vm0, %v8260_v19, 0.0  ;;  %v1510_v48 = vrot.slane %v1508_v0, 7 }
 0x13d   : > { %v1310_v8 = vsel %vm8156_vm13, %v1302_v21, %v1309_v24  ;;  %v1626_v10 = vsel %vm8164_vm14, %v1311_v18, %v1625_v6  ;;  %648 = vadd.xlane.f32.xlu0 %v647_v32  ;;  %461 = vadd.xlane.f32.xlu1 %v460_v3  ;;  %v532_v16 = vmul.f32 %v7772_v30, %v447_v15  ;;  %vm2267_vm12 = vcmask 1041408   ;;  %v7091_v6 = vld [vmem:[%s11172_s1 + $0x4] sm:$0x3]  ;;  %v2580_v15 = vld [vmem:[#allocation2] sm:$0xe] }
 0x13e   : > { %1622 = vst.msk [vmem:[#allocation2 + $0x10] sm:$0xf] %vm1204_vm2, %v1310_v8  ;;  %v1162_v21 = vmul.f32 %v8027_v61, %v1126_v36  ;;  %v815_v40 = vmul.f32 %v8229_v7, %v814_v9  ;;  %v721_v11 = vmul.f32 %v637_v33, %v7772_v30  ;;  %v1513_v27 = vor.u32 %v1511_v28, %v1510_v48  ;;  %v8343_v33 = vld [vmem:[#allocation2 + $0x4] sm:$0xf]  ;;  %v8350_v3 = vld [vmem:[#allocation2 + $0x8] sm:$0x1] }
 0x13f   : > { %v8294_v35 = vpop.eup %7495  ;;  %1627 = vst [vmem:[#allocation2 + $0x14] sm:$0x1] %v1626_v10  ;;  %v1515_v41 = vrot.slane %v1510_v48, 4  ;;  %v8297_v42 = vsub.f32 %v7907_v38, %v532_v16  ;;  %v8300_v1 = vsel %vm2267_vm12, %v1765_v34, 0  ;;  %vm1066_vm3 = vweird.f32 %v8254_v13  ;;  %v8313_v38 = vld [vmem:[%s7722_s22 + $0x70] sm:$0xff] }
 0x140   : > { %v8302_v51 = vpop.eup %7497  ;;  %v1198_v52 = vadd.f32 %v8044_v44, %v1162_v21  ;;  %v819_v55 = vsel %vm8285_vm11, %v8229_v7, %v815_v40  ;;  %v1051_v23 = vmul.f32 %v8294_v35, %v8250_v57  ;;  %2498 = vmatpush.bf16.msra.mxu1 %v8300_v1  ;;  %v1514_v56 = vsel %vm8156_vm13, %v1506_v47, %v1513_v27  ;;  %v1712_v34 = vld [vmem:[#allocation2 + $0xa8] sm:$0xf] }
 0x141   : > { %v1710_v46 = vsel %vm8164_vm14, %v1515_v41, %v1709_v50  ;;  %v1103_v58 = vmul.f32 %v819_v55, %v7862_v26  ;;  %v1061_v7 = vmul.f32 %v8302_v51, %v8254_v13  ;;  %1708 = vst.msk [vmem:[#allocation2 + $0xa0] sm:$0xf] %vm1204_vm2, %v1514_v56  ;;  %vm1057_vm15 = vweird.f32 %v8294_v35 }
 0x142   : > { %v1286_v63 = vpack.c.bf16 %v1198_v52, %v1198_v52  ;;  %v1052_v2 = vmul.f32 %v8294_v35, %v1051_v23  ;;  %v8327_v4 = vadd.f32 1e-05, %v721_v11  ;;  %1711 = vst [vmem:[#allocation2 + $0xa4] sm:$0x1] %v1710_v46  ;;  %v463_v26 = vsel %vm420_vm0, %v8313_v38, 0.0  ;;  %vm8356_vm5 = vmor %vm1056_vm10, %vm1057_vm15 }
 0x143   : > { %v1139_v17 = vmul.f32 %v8027_v61, %v1103_v58  ;;  %v1062_v47 = vmul.f32 %v8302_v51, %v1061_v7  ;;  %7059 = vmatmul.msk.bf16.vlgmr.msra.gmra.mxu1 %vm420_vm0, %v7406_v45  ;;  %v596_v5 = vmul.f32 %v8297_v42, %v8297_v42  ;;  %vm1067_vm1 = vweird.f32 %v8302_v51 }
 0x144   : > { %v1517_v20 = vshrl.u32 %v1286_v63, 16  ;;  %v1053_v54 = vmul.f32 0.5, %v1052_v2  ;;  %7499 = vrsqrt.f32 %v8327_v4  ;;  %v1520_v24 = vshll.u32 %v1286_v63, 16  ;;  %vm8369_vm9 = vmor %vm1066_vm3, %vm1067_vm1 }
 0x145   : > { %v1175_v18 = vadd.f32 %v8044_v44, %v1139_v17  ;;  %v1063_v0 = vmul.f32 0.5, %v1062_v47  ;;  %464 = vadd.xlane.f32.xlu1 %v463_v26  ;;  %v644_v28 = vsel %vm420_vm0, %v596_v5, 0.0  ;;  %v8348_v32 = vsel %vm2267_vm12, %v7091_v6, 0  ;;  %v6978_v17 = vld [vmem:[%s11172_s1 + $0x2] sm:$0x3]  ;;  %v7407_v10 = vld [vmem:[#allocation2 + $0xc] sm:$0xff] }
 0x146   : > { %v8345_v36 = vrot.slane %v1517_v20, 7  ;;  %v1054_v9 = vsub.f32 1.5, %v1053_v54  ;;  %645 = vadd.xlane.f32.xlu2 %v644_v28  ;;  %vm2628_vm4 = vcmask 1042432   ;;  %vm836_vm6 = vweird.f32 %v8327_v4  ;;  %2851 = vmatpush.bf16.msra.mxu2 %v8348_v32  ;;  %v1632_v47 = vld [vmem:[#allocation2 + $0x20] sm:$0x1] }
 0x147   : > { %v1263_v8 = vpack.c.bf16 %v1175_v18, %v1175_v18  ;;  %v1064_v48 = vsub.f32 1.5, %v1063_v0  ;;  %vm2629_vm8 = vcmask 1046532   ;;  %v7075_v62 = vrot.slane %v2580_v15, 9  ;;  %v1733_v0 = vld [vmem:[#allocation2] sm:$0xf] }
 0x148   : > { %v1522_v16 = vor.u32 %v1520_v24, %v8345_v36  ;;  %v1523_v50 = vrot.slane %v8345_v36, 4  ;;  %v1055_v21 = vmul.f32 %v8294_v35, %v1054_v9  ;;  %v2633_v40 = vrot.slane %v8343_v33, 5  ;;  %vm8376_vm10 = vmor %vm2628_vm4, %vm2629_vm8 }
 0x149   : > { %v1321_v11 = vshrl.u32 %v1263_v8, 16  ;;  %v1324_v27 = vshll.u32 %v1263_v8, 16  ;;  %v1065_v41 = vmul.f32 %v8302_v51, %v1064_v48  ;;  %v2636_v52 = vrot.slane %v8350_v3, 5 }
 0x14a   : > { %v8381_v55 = vpop.eup %7499  ;;  %v1713_v13 = vsel %vm8102_vm7, %v1522_v16, %v1712_v34  ;;  %v1059_v23 = vsel %vm8356_vm5, %v8294_v35, %v1055_v21  ;;  %v2634_v56 = vsel %vm8376_vm10, %v7075_v62, %v2633_v40  ;;  %v2635_v46 = vrot.slane %v2633_v40, 4  ;;  %v8400_v35 = vld [vmem:[%s7722_s22 + $0x78] sm:$0xff]  ;;  %v2581_v40 = vld [vmem:[#allocation2 + $0xc] sm:$0xe] }
 0x14b   : > { %1714 = vst [vmem:[#allocation2 + $0xa8] sm:$0xf] %v1713_v13  ;;  %v1323_v58 = vrot.slane %v1321_v11, 7  ;;  %v1127_v7 = vmul.f32 %v1059_v23, %v7859_v25  ;;  %v1069_v63 = vsel %vm8369_vm9, %v8302_v51, %v1065_v41  ;;  %v831_v2 = vmul.f32 %v8381_v55, %v8327_v4 }
 0x14c   : > { %v1128_v26 = vmul.f32 %v1069_v63, %v7889_v31  ;;  %vm837_vm11 = vweird.f32 %v8381_v55  ;;  %v2637_v25 = vsel %vm8376_vm10, %v2635_v46, %v2636_v52  ;;  %v2745_v5 = vunpack.c.l.b16 %v2634_v56  ;;  %v1757_v56 = vld [vmem:[#allocation2 + $0x90] sm:$0xf] }
 0x14d   : > { %v1326_v6 = vor.u32 %v1324_v27, %v1323_v58  ;;  %v1328_v51 = vrot.slane %v1323_v58, 4  ;;  %v1163_v20 = vmul.f32 %v8027_v61, %v1127_v7  ;;  %v832_v54 = vmul.f32 %v8381_v55, %v831_v2  ;;  %vm8426_vm1 = vmor %vm836_vm6, %vm837_vm11 }
 0x14e   : > { %v1164_v15 = vmul.f32 %v8027_v61, %v1128_v26  ;;  %v2746_v24 = vunpack.c.l.b16 %v2637_v25  ;;  %v2269_v18 = vsel %vm2267_vm12, %v6978_v17, 0  ;;  %v466_v31 = vsel %vm420_vm0, %v8400_v35, 0.0 }
 0x14f   : > { %v1327_v28 = vsel %vm8156_vm13, %v1319_v53, %v1326_v6  ;;  %v1633_v9 = vsel %vm8164_vm14, %v1328_v51, %v1632_v47  ;;  %v1199_v34 = vadd.f32 %v8044_v44, %v1163_v20  ;;  %v833_v8 = vmul.f32 0.5, %v832_v54  ;;  %2278 = vmatpush.bf16.msra.mxu0 %v2269_v18  ;;  %7454 = vmatpush.bf16.msra.mxu3 %v2269_v18  ;;  %v1719_v20 = vld [vmem:[#allocation2 + $0xb4] sm:$0xf] }
 0x150   : > { %1631 = vst.msk [vmem:[#allocation2 + $0x1c] sm:$0xf] %vm1204_vm2, %v1327_v28  ;;  %v1200_v48 = vadd.f32 %v8044_v44, %v1164_v15  ;;  %v2777_v62 = vpack.c.b16 %v2746_v24, %v2745_v5  ;;  %467 = vadd.xlane.f32.xlu2 %v466_v31  ;;  %vm1782_vm3 = vsmask.f32 3328  ;;  %vm1783_vm15 = vsmask.f32 7440 }
 0x151   : > { %1634 = vst [vmem:[#allocation2 + $0x20] sm:$0x1] %v1633_v9  ;;  %v1287_v60 = vpack.c.bf16 %v1199_v34, %v1199_v34  ;;  %v834_v53 = vsub.f32 1.5, %v833_v8  ;;  %v1786_v16 = vshrl.u32 %v1733_v0, 16  ;;  %v1789_v21 = vshll.u32 %v1733_v0, 16  ;;  %vm8454_vm4 = vmor %vm1782_vm3, %vm1783_vm15 }
 0x152   : > { %v1288_v57 = vpack.c.bf16 %v1200_v48, %v1200_v48  ;;  %7092 = vmatmul.msk.bf16.vlgmr.msra.gmra.mxu2 %vm420_vm0, %v2777_v62  ;;  %v1795_v11 = vshll.u32 %v8343_v33, 16  ;;  %v1805_v27 = vshll.u32 %v8350_v3, 16  ;;  %v1716_v3 = vld [vmem:[#allocation2 + $0xb0] sm:$0x1]  ;;  %v2074_v5 = vshrl.u32 %v1757_v56, 16 }
 0x153   : > { %7455 = vmatpush.bf16.msrb.mxu3 %v8300_v1  ;;  %v1799_v1 = vshrl.u32 %v8343_v33, 16  ;;  %v1525_v41 = vshrl.u32 %v1287_v60, 16  ;;  %v1528_v52 = vshll.u32 %v1287_v60, 16  ;;  %v835_v13 = vmul.f32 %v8381_v55, %v834_v53  ;;  %7060 = vmatmul.msk.bf16.gmra.mxu1 %vm420_vm0, %v7407_v10  ;;  %v8464_v8 = vld [vmem:[#allocation2 + $0x98] sm:$0x1] }
 0x154   : > { %v1788_v23 = vrot.slane %v1786_v16, 4  ;;  %v1534_v4 = vshrl.u32 %v1288_v57, 16  ;;  %v1537_v46 = vshll.u32 %v1288_v57, 16  ;;  %v1791_v58 = vrot.slane %v1789_v21, 5 }
 0x155   : > { %v1797_v7 = vrot.slane %v1795_v11, 5  ;;  %v1527_v63 = vrot.slane %v1525_v41, 7  ;;  %v839_v2 = vsel %vm8426_vm1, %v8381_v55, %v835_v13  ;;  %v1801_v33 = vrot.slane %v1799_v1, 4  ;;  %v8444_v55 = vld [vmem:[#allocation2 + $0x94] sm:$0xf] }
 0x156   : > { %v1807_v17 = vrot.slane %v1805_v27, 5  ;;  %v8439_v47 = vrot.slane %v1534_v4, 7  ;;  %v1105_v26 = vmul.f32 %v839_v2, %v7916_v39  ;;  %v1792_v25 = vor.u32 %v1791_v58, %v1788_v23  ;;  %v1736_v41 = vld [vmem:[#allocation2 + $0x10] sm:$0xf]  ;;  %v1735_v4 = vld [vmem:[#allocation2 + $0xc] sm:$0xf] }
 0x157   : > { %v1530_v6 = vor.u32 %v1528_v52, %v1527_v63  ;;  %v1532_v51 = vrot.slane %v1527_v63, 4  ;;  %v1802_v54 = vor.u32 %v1801_v33, %v1797_v7  ;;  %v2077_v15 = vshll.u32 %v1757_v56, 16  ;;  %v8474_v56 = vld [vmem:[#allocation2 + $0x14] sm:$0x1]  ;;  %v7408_v63 = vld [vmem:[#allocation2 + $0x18] sm:$0xff] }
 0x158   : > { %v1539_v24 = vor.u32 %v1537_v46, %v8439_v47  ;;  %v1141_v18 = vmul.f32 %v8027_v61, %v1105_v26  ;;  %v1793_v31 = vrot.slane %v1792_v25, 4  ;;  %v2076_v34 = vrot.slane %v2074_v5, 4  ;;  %v1639_v26 = vld [vmem:[#allocation2 + $0x2c] sm:$0x1] }
 0x159   : > { %v1531_v0 = vsel %vm8156_vm13, %v1523_v50, %v1530_v6  ;;  %v1717_v39 = vsel %vm8164_vm14, %v1532_v51, %v1716_v3  ;;  %v1803_v9 = vrot.slane %v1802_v54, 4  ;;  %v2079_v10 = vrot.slane %v2077_v15, 5 }
 0x15a   : > { %1715 = vst.msk [vmem:[#allocation2 + $0xac] sm:$0xf] %vm1204_vm2, %v1531_v0  ;;  %v1720_v61 = vsel %vm8102_vm7, %v1539_v24, %v1719_v20  ;;  %v1177_v36 = vadd.f32 %v8044_v44, %v1141_v18  ;;  %v1798_v50 = vsel %vm8454_vm4, %v1793_v31, %v1797_v7  ;;  %v2083_v60 = vshll.u32 %v8444_v55, 16  ;;  %v8471_v44 = vld [vmem:[%s7722_s22 + $0x80] sm:$0xff] }
 0x15b   : > { %1718 = vst [vmem:[#allocation2 + $0xb0] sm:$0x1] %v1717_v39  ;;  %v1808_v48 = vsel %vm8454_vm4, %v1803_v9, %v1807_v17  ;;  %v2171_v62 = vunpack.c.l.b16 %v1798_v50  ;;  %v2087_v53 = vshrl.u32 %v8444_v55, 16  ;;  %v2080_v57 = vor.u32 %v2079_v10, %v2076_v34  ;;  %v1759_v9 = vld [vmem:[#allocation2 + $0x9c] sm:$0xf] }
 0x15c   : > { %1721 = vst [vmem:[#allocation2 + $0xb4] sm:$0xf] %v1720_v61  ;;  %v1265_v16 = vpack.c.bf16 %v1177_v36, %v1177_v36  ;;  %v2172_v21 = vunpack.c.l.b16 %v1808_v48  ;;  %v2085_v11 = vrot.slane %v2083_v60, 5  ;;  %v2093_v27 = vshll.u32 %v8464_v8, 16 }
 0x15d   : > { %v2089_v1 = vrot.slane %v2087_v53, 4  ;;  %v2081_v23 = vrot.slane %v2080_v57, 4  ;;  %v469_v7 = vsel %vm420_vm0, %v8471_v44, 0.0  ;;  %v7076_v17 = vrot.slane %v2581_v40, 9  ;;  %v8493_v53 = vld [vmem:[#allocation2 + $0xa0] sm:$0xf] }
 0x15e   : > { %v1338_v52 = vshrl.u32 %v1265_v16, 16  ;;  %v2203_v13 = vpack.c.b16 %v2172_v21, %v2171_v62  ;;  %v1341_v46 = vshll.u32 %v1265_v16, 16  ;;  %470 = vadd.xlane.f32.xlu2 %v469_v7  ;;  %v2640_v3 = vrot.slane %v1736_v41, 5  ;;  %v8495_v57 = vld [vmem:[#allocation2 + $0xa4] sm:$0x1] }
 0x15f   : > { %v2090_v58 = vor.u32 %v2089_v1, %v2085_v11  ;;  %v2086_v33 = vsel %vm8454_vm4, %v2081_v23, %v2085_v11  ;;  %v2095_v5 = vrot.slane %v2093_v27, 5  ;;  %v2643_v6 = vrot.slane %v8474_v56, 5  ;;  %v1738_v23 = vld [vmem:[#allocation2 + $0x1c] sm:$0xf]  ;;  %v2582_v7 = vld [vmem:[#allocation2 + $0x18] sm:$0xe] }
 0x160   : > { %v1340_v2 = vrot.slane %v1338_v52, 7  ;;  %6979 = vmatmul.msk.bf16.vlgmr.msra.gmra.mxu0 %vm420_vm0, %v2203_v13  ;;  %v1810_v51 = vshrl.u32 %v1735_v4, 16  ;;  %v2641_v15 = vsel %vm8376_vm10, %v7076_v17, %v2640_v3  ;;  %v2642_v24 = vrot.slane %v2640_v3, 4  ;;  %v1768_v3 = vld [vmem:[#allocation2 + $0x20] sm:$0x1] }
 0x161   : > { %v2091_v25 = vrot.slane %v2090_v58, 4  ;;  %v2195_v31 = vunpack.c.l.b16 %v2086_v33  ;;  %v1813_v39 = vshll.u32 %v1735_v4, 16  ;;  %v1819_v50 = vshll.u32 %v1736_v41, 16 }
 0x162   : > { %v8482_v20 = vor.u32 %v1341_v46, %v1340_v2  ;;  %v1345_v54 = vrot.slane %v1340_v2, 4  ;;  %v1812_v0 = vrot.slane %v1810_v51, 4  ;;  %v2644_v36 = vsel %vm8376_vm10, %v2642_v24, %v2643_v6  ;;  %v1737_v6 = vld [vmem:[#allocation2 + $0x18] sm:$0xf] }
 0x163   : > { %v2096_v18 = vsel %vm8454_vm4, %v2091_v25, %v2095_v5  ;;  %7061 = vmatmul.msk.bf16.gmra.mxu1 %vm420_vm0, %v7408_v63  ;;  %v2747_v10 = vunpack.c.l.b16 %v2641_v15  ;;  %v2748_v48 = vunpack.c.l.b16 %v2644_v36  ;;  %v1815_v62 = vrot.slane %v1813_v39, 5 }
 0x164   : > { %v1640_v34 = vsel %vm8164_vm14, %v1345_v54, %v1639_v26  ;;  %v2196_v61 = vunpack.c.l.b16 %v2096_v18  ;;  %v1823_v60 = vshrl.u32 %v1736_v41, 16  ;;  %v1821_v21 = vrot.slane %v1819_v50, 5 }
 0x165   : > { %1641 = vst [vmem:[#allocation2 + $0x2c] sm:$0x1] %v1640_v34  ;;  %v2098_v40 = vshrl.u32 %v1759_v9, 16  ;;  %v2101_v11 = vshll.u32 %v1759_v9, 16  ;;  %v2778_v1 = vpack.c.b16 %v2748_v48, %v2747_v10  ;;  %v1816_v27 = vor.u32 %v1815_v62, %v1812_v0 }
 0x166   : > { %v2215_v16 = vpack.c.b16 %v2196_v61, %v2195_v31  ;;  %v1825_v52 = vrot.slane %v1823_v60, 4  ;;  %v1829_v13 = vshll.u32 %v8474_v56, 16  ;;  %v2107_v41 = vshll.u32 %v8493_v53, 16 }
 0x167   : > { %v2100_v4 = vrot.slane %v2098_v40, 4  ;;  %v2103_v46 = vrot.slane %v2101_v11, 5  ;;  %v2111_v58 = vshrl.u32 %v8493_v53, 16  ;;  %v2717_v63 = vrot.slane %v8444_v55, 5  ;;  %7093 = vmatmul.msk.bf16.gmra.mxu2 %vm420_vm0, %v2778_v1  ;;  %v1761_v40 = vld [vmem:[#allocation2 + $0xa8] sm:$0xf] }
 0x168   : > { %6991 = vmatmul.msk.bf16.vlgmr.msra.gmra.mxu3 %vm420_vm0, %v2215_v16  ;;  %v1817_v2 = vrot.slane %v1816_v27, 4  ;;  %v1826_v33 = vor.u32 %v1825_v52, %v1821_v21  ;;  %v2117_v17 = vshll.u32 %v8495_v57, 16  ;;  %v2109_v26 = vrot.slane %v2107_v41, 5 }
 0x169   : > { %7456 = vmatpush.bf16.msra.mxu3 %v8348_v32  ;;  %v2104_v56 = vor.u32 %v2103_v46, %v2100_v4  ;;  %v2113_v25 = vrot.slane %v2111_v58, 4  ;;  %v2647_v5 = vrot.slane %v1738_v23, 5  ;;  %v1831_v15 = vrot.slane %v1829_v13, 5  ;;  %v8517_v13 = vld [vmem:[#allocation2 + $0xac] sm:$0xf] }
 0x16a   : > { %v1822_v51 = vsel %vm8454_vm4, %v1817_v2, %v1821_v21  ;;  %v1827_v54 = vrot.slane %v1826_v33, 4  ;;  %v7077_v24 = vrot.slane %v2582_v7, 9  ;;  %v2119_v0 = vrot.slane %v2117_v17, 5 }
 0x16b   : > { %v2173_v18 = vunpack.c.l.b16 %v1822_v51  ;;  %v2114_v31 = vor.u32 %v2113_v25, %v2109_v26  ;;  %v2650_v39 = vrot.slane %v1768_v3, 5  ;;  %v2105_v34 = vrot.slane %v2104_v56, 4 }
 0x16c   : > { %v1832_v9 = vsel %vm8454_vm4, %v1827_v54, %v1831_v15  ;;  %v2649_v32 = vrot.slane %v2647_v5, 4  ;;  %v1834_v61 = vshrl.u32 %v1737_v6, 16  ;;  %v2648_v10 = vsel %vm8376_vm10, %v7077_v24, %v2647_v5  ;;  %v1780_v54 = vld [vmem:[#allocation2 + $0xb0] sm:$0x1] }
 0x16d   : > { %v2174_v36 = vunpack.c.l.b16 %v1832_v9  ;;  %v2115_v50 = vrot.slane %v2114_v31, 4  ;;  %v1837_v48 = vshll.u32 %v1737_v6, 16  ;;  %v2110_v62 = vsel %vm8454_vm4, %v2105_v34, %v2109_v26  ;;  %v2592_v9 = vld [vmem:[#allocation2 + $0x90] sm:$0xe] }
 0x16e   : > { %v2651_v60 = vsel %vm8376_vm10, %v2649_v32, %v2650_v39  ;;  %v1836_v16 = vrot.slane %v1834_v61, 4  ;;  %v1843_v21 = vshll.u32 %v1738_v23, 16  ;;  %v2749_v46 = vunpack.c.l.b16 %v2648_v10 }
 0x16f   : > { %v2204_v11 = vpack.c.b16 %v2174_v36, %v2173_v18  ;;  %v2120_v1 = vsel %vm8454_vm4, %v2115_v50, %v2119_v0  ;;  %v2750_v27 = vunpack.c.l.b16 %v2651_v60  ;;  %v1839_v52 = vrot.slane %v1837_v48, 5 }
 0x170   : > { %v2198_v4 = vunpack.c.l.b16 %v2120_v1  ;;  %v1845_v41 = vrot.slane %v1843_v21, 5  ;;  %v1847_v58 = vshrl.u32 %v1738_v23, 16  ;;  %v2197_v7 = vunpack.c.l.b16 %v2110_v62 }
 0x171   : > { %6980 = vmatmul.msk.bf16.gmra.mxu0 %vm420_vm0, %v2204_v11  ;;  %v1840_v2 = vor.u32 %v1839_v52, %v1836_v16  ;;  %v2122_v33 = vshrl.u32 %v1761_v40, 16  ;;  %v2125_v17 = vshll.u32 %v1761_v40, 16  ;;  %v1853_v26 = vshll.u32 %v1768_v3, 16 }
 0x172   : > { %v1849_v56 = vrot.slane %v1847_v58, 4  ;;  %v2131_v25 = vshll.u32 %v8517_v13, 16  ;;  %v2719_v5 = vrot.slane %v2717_v63, 4  ;;  %v2216_v6 = vpack.c.b16 %v2198_v4, %v2197_v7  ;;  %v2594_v7 = vld [vmem:[#allocation2 + $0xa8] sm:$0xe] }
 0x173   : > { %v2779_v51 = vpack.c.b16 %v2750_v27, %v2749_v46  ;;  %v2135_v15 = vshrl.u32 %v8517_v13, 16  ;;  %v2124_v23 = vrot.slane %v2122_v33, 4  ;;  %v2127_v18 = vrot.slane %v2125_v17, 5 }
 0x174   : > { %v1850_v24 = vor.u32 %v1849_v56, %v1845_v41  ;;  %v2133_v31 = vrot.slane %v2131_v25, 5  ;;  %v1841_v0 = vrot.slane %v1840_v2, 4  ;;  %v2720_v34 = vrot.slane %v8464_v8, 5  ;;  %v2593_v8 = vld [vmem:[#allocation2 + $0x9c] sm:$0xe] }
 0x175   : > { %v2137_v39 = vrot.slane %v2135_v15, 4  ;;  %v1855_v32 = vrot.slane %v1853_v26, 5  ;;  %v2141_v61 = vshll.u32 %v1780_v54, 16  ;;  %v2128_v48 = vor.u32 %v2127_v18, %v2124_v23 }
 0x176   : > { %v1851_v3 = vrot.slane %v1850_v24, 4  ;;  %v1846_v36 = vsel %vm8454_vm4, %v1841_v0, %v1845_v41  ;;  %v7087_v62 = vrot.slane %v2592_v9, 9  ;;  %v2721_v60 = vsel %vm8376_vm10, %v2719_v5, %v2720_v34 }
 0x177   : > { %v2138_v50 = vor.u32 %v2137_v39, %v2133_v31  ;;  %7094 = vmatmul.msk.bf16.gmra.mxu2 %vm420_vm0, %v2779_v51  ;;  %v2724_v40 = vrot.slane %v8493_v53, 5  ;;  %v2143_v11 = vrot.slane %v2141_v61, 5  ;;  %v2175_v27 = vunpack.c.l.b16 %v1846_v36 }
 0x178   : > { %6992 = vmatmul.msk.bf16.gmra.mxu3 %vm420_vm0, %v2216_v6  ;;  %v1856_v10 = vsel %vm8454_vm4, %v1851_v3, %v1855_v32  ;;  %v2718_v1 = vsel %vm8376_vm10, %v7087_v62, %v2717_v63  ;;  %v7088_v52 = vrot.slane %v2593_v8, 9  ;;  %v2129_v4 = vrot.slane %v2128_v48, 4 }
 0x179   : > { %v2176_v16 = vunpack.c.l.b16 %v1856_v10  ;;  %v2139_v21 = vrot.slane %v2138_v50, 4  ;;  %v2769_v41 = vunpack.c.l.b16 %v2718_v1  ;;  %v2770_v58 = vunpack.c.l.b16 %v2721_v60 }
 0x17a   : > { %v2725_v33 = vsel %vm8376_vm10, %v7088_v52, %v2724_v40  ;;  %v2726_v53 = vrot.slane %v2724_v40, 4  ;;  %v2727_v17 = vrot.slane %v8495_v57, 5  ;;  %v2134_v55 = vsel %vm8454_vm4, %v2129_v4, %v2133_v31 }
 0x17b   : > { %v2144_v46 = vsel %vm8454_vm4, %v2139_v21, %v2143_v11  ;;  %v2205_v2 = vpack.c.b16 %v2176_v16, %v2175_v27  ;;  %v8545_v63 = vpack.c.b16 %v2770_v58, %v2769_v41  ;;  %v7089_v25 = vrot.slane %v2594_v7, 9  ;;  %v7607_v16 = vld [vmem:[%s7722_s22 + $0x50] sm:$0xff] }
 0x17c   : > { %v2200_v56 = vunpack.c.l.b16 %v2144_v46  ;;  %v2728_v26 = vsel %vm8376_vm10, %v2726_v53, %v2727_v17  ;;  %v2731_v5 = vrot.slane %v8517_v13, 5  ;;  %v2771_v6 = vunpack.c.l.b16 %v2725_v33 }
 0x17d   : > { %v2772_v51 = vunpack.c.l.b16 %v2728_v26  ;;  %v2199_v15 = vunpack.c.l.b16 %v2134_v55  ;;  %v2734_v23 = vrot.slane %v1780_v54, 5  ;;  %v7608_v55 = vld [vmem:[%s7722_s22 + $0x58] sm:$0xff]  ;;  %v8578_v26 = vld [vmem:[%s11174_s3] ss:$0 sm:$0xff] }
 0x17e   : > { %v2732_v57 = vsel %vm8376_vm10, %v7089_v25, %v2731_v5  ;;  %v2733_v24 = vrot.slane %v2731_v5, 4 }
 0x17f   : > { %v8553_v18 = vpack.c.b16 %v2772_v51, %v2771_v6  ;;  %v2217_v31 = vpack.c.b16 %v2200_v56, %v2199_v15  ;;  %v2773_v13 = vunpack.c.l.b16 %v2732_v57 }
 0x180   : > { %v2735_v39 = vsel %vm8376_vm10, %v2733_v24, %v2734_v23 }
 0x181   : > { %6981 = vmatmul.msk.bf16.gmra.mxu0 %vm420_vm0, %v2205_v2  ;;  %v2774_v34 = vunpack.c.l.b16 %v2735_v39 }
 0x183   : > { %v709_v0 = vpop.xlane.xlu2 %708  ;;  %v8558_v32 = vpack.c.b16 %v2774_v34, %v2773_v13 }
 0x184   : > { %v745_v9 = vmul.f32 %v709_v0, %v7772_v30 }
 0x186   : > { %v777_v3 = vadd.f32 1e-05, %v745_v9 }
 0x188   : > { %6993 = vmatmul.msk.bf16.gmra.mxu3 %vm420_vm0, %v2217_v31  ;;  %7501 = vrsqrt.f32 %v777_v3  ;;  %vm1076_vm6 = vweird.f32 %v777_v3 }
 0x18b   : > { %v634_v61 = vpop.xlane.xlu0 %633  ;;  %v453_v62 = vpop.xlane.xlu2 %452 }
 0x18c   : > { %v720_v54 = vmul.f32 %v634_v61, %v7772_v30  ;;  %v534_v60 = vmul.f32 %v7772_v30, %v453_v62  ;;  %v1723_v61 = vld [vmem:[#allocation2 + $0xbc] sm:$0x1] }
 0x18e   : > { %v752_v36 = vadd.f32 1e-05, %v720_v54  ;;  %v7502_v50 = vpop.eup %7501  ;;  %v8564_v21 = vsub.f32 %v7607_v16, %v534_v60 }
 0x18f   : > { %v1071_v10 = vmul.f32 %v7502_v50, %v777_v3  ;;  %vm1077_vm5 = vweird.f32 %v7502_v50 }
 0x190   : > { %7503 = vrsqrt.f32 %v752_v36  ;;  %v598_v52 = vmul.f32 %v8564_v21, %v8564_v21  ;;  %vm1078_vm8 = vmor %vm1076_vm6, %vm1077_vm5  ;;  %vm826_vm11 = vweird.f32 %v752_v36 }
 0x191   : > { %v1072_v48 = vmul.f32 %v7502_v50, %v1071_v10 }
 0x192   : > { %v650_v58 = vsel %vm420_vm0, %v598_v52, 0.0 }
 0x193   : > { %v1073_v8 = vmul.f32 0.5, %v1072_v48  ;;  %v456_v40 = vpop.xlane.xlu0 %455  ;;  %651 = vadd.xlane.f32.xlu0 %v650_v58  ;;  %v643_v2 = vpop.xlane.xlu2 %642  ;;  %v1540_v48 = vrot.slane %v8439_v47, 4 }
 0x194   : > { %v535_v46 = vmul.f32 %v7772_v30, %v456_v40  ;;  %v723_v17 = vmul.f32 %v643_v2, %v7772_v30 }
 0x195   : > { %v1074_v1 = vsub.f32 1.5, %v1073_v8 }
 0x196   : > { %v7504_v11 = vpop.eup %7503  ;;  %v8573_v56 = vsub.f32 %v7608_v55, %v535_v46  ;;  %v755_v6 = vadd.f32 1e-05, %v723_v17  ;;  %v1763_v55 = vld [vmem:[#allocation2 + $0xb4] sm:$0xf] }
 0x197   : > { %v821_v27 = vmul.f32 %v7504_v11, %v752_v36  ;;  %v1075_v4 = vmul.f32 %v7502_v50, %v1074_v1  ;;  %vm827_vm9 = vweird.f32 %v7504_v11 }
 0x198   : > { %7505 = vrsqrt.f32 %v755_v6  ;;  %vm828_vm3 = vmor %vm826_vm11, %vm827_vm9  ;;  %v599_v57 = vmul.f32 %v8573_v56, %v8573_v56  ;;  %vm856_vm15 = vweird.f32 %v755_v6 }
 0x199   : > { %v822_v41 = vmul.f32 %v7504_v11, %v821_v27  ;;  %v1079_v7 = vsel %vm1078_vm8, %v7502_v50, %v1075_v4 }
 0x19a   : > { %v1129_v33 = vmul.f32 %v1079_v7, %v7971_v59  ;;  %v8584_v59 = vld [vmem:[%s11175_s4] ss:$0 sm:$0xff]  ;;  %v653_v0 = vsel %vm420_vm0, %v599_v57, 0.0  ;;  %v8605_v7 = vld [vmem:[%s7722_s22 + $0x88] sm:$0xff] }
 0x19b   : > { %v823_v53 = vmul.f32 0.5, %v822_v41  ;;  %654 = vadd.xlane.f32.xlu1 %v653_v0  ;;  %v459_v50 = vpop.xlane.xlu0 %458  ;;  %v1635_v41 = vld [vmem:[#allocation2 + $0x24] sm:$0xf]  ;;  %v472_v17 = vsel %vm420_vm0, %v8605_v7, 0.0 }
 0x19c   : > { %v1165_v25 = vmul.f32 %v8578_v26, %v1129_v33  ;;  %v536_v58 = vmul.f32 %v7772_v30, %v459_v50  ;;  %473 = vadd.xlane.f32.xlu0 %v472_v17 }
 0x19d   : > { %v824_v5 = vsub.f32 1.5, %v823_v53 }
 0x19e   : > { %v1201_v51 = vadd.f32 %v8584_v59, %v1165_v25  ;;  %v7506_v13 = vpop.eup %7505 }
 0x19f   : > { %v825_v15 = vmul.f32 %v7504_v11, %v824_v5  ;;  %v851_v36 = vmul.f32 %v7506_v13, %v755_v6  ;;  %vm857_vm1 = vweird.f32 %v7506_v13 }
 0x1a0   : > { %v1289_v24 = vpack.c.bf16 %v1201_v51, %v1201_v51  ;;  %vm858_vm5 = vmor %vm856_vm15, %vm857_vm1 }
 0x1a1   : > { %v829_v23 = vsel %vm828_vm3, %v7504_v11, %v825_v15  ;;  %v852_v16 = vmul.f32 %v7506_v13, %v851_v36  ;;  %v8629_v36 = vld [vmem:[%s7722_s22 + $0x90] sm:$0xff] }
 0x1a2   : > { %v1104_v31 = vmul.f32 %v829_v23, %v8009_v29  ;;  %v1542_v39 = vshrl.u32 %v1289_v24, 16  ;;  %v1545_v3 = vshll.u32 %v1289_v24, 16  ;;  %v7611_v24 = vld [vmem:[%s7722_s22 + $0x60] sm:$0xff] }
 0x1a3   : > { %v853_v52 = vmul.f32 0.5, %v852_v16  ;;  %v8616_v23 = vsub.f32 %v7611_v24, %v536_v58 }
 0x1a4   : > { %v1140_v9 = vmul.f32 %v8578_v26, %v1104_v31  ;;  %v1544_v34 = vrot.slane %v1542_v39, 7  ;;  %v2149_v39 = vshll.u32 %v1763_v55, 16 }
 0x1a5   : > { %v854_v46 = vsub.f32 1.5, %v853_v52 }
 0x1a6   : > { %v1176_v54 = vadd.f32 %v8584_v59, %v1140_v9  ;;  %v640_v10 = vpop.xlane.xlu1 %639  ;;  %v1547_v62 = vor.u32 %v1545_v3, %v1544_v34  ;;  %v1549_v60 = vrot.slane %v1544_v34, 4 }
 0x1a7   : > { %v722_v29 = vmul.f32 %v640_v10, %v7772_v30  ;;  %v855_v53 = vmul.f32 %v7506_v13, %v854_v46  ;;  %v2151_v10 = vrot.slane %v2149_v39, 5 }
 0x1a8   : > { %v1264_v8 = vpack.c.bf16 %v1176_v54, %v1176_v54  ;;  %v1548_v40 = vsel %vm8156_vm13, %v1540_v48, %v1547_v62  ;;  %v1724_v11 = vsel %vm8164_vm14, %v1549_v60, %v1723_v61 }
 0x1a9   : > { %v8599_v1 = vadd.f32 1e-05, %v722_v29  ;;  %1722 = vst.msk [vmem:[#allocation2 + $0xb8] sm:$0xf] %vm1204_vm2, %v1548_v40  ;;  %v859_v6 = vsel %vm858_vm5, %v7506_v13, %v855_v53  ;;  %v475_v29 = vsel %vm420_vm0, %v8629_v36, 0.0 }
 0x1aa   : > { %v1330_v27 = vshrl.u32 %v1264_v8, 16  ;;  %1725 = vst [vmem:[#allocation2 + $0xbc] sm:$0x1] %v1724_v11  ;;  %v1333_v4 = vshll.u32 %v1264_v8, 16  ;;  %v1107_v57 = vmul.f32 %v859_v6, %v8002_v14  ;;  %v600_v14 = vmul.f32 %v8616_v23, %v8616_v23  ;;  %476 = vadd.xlane.f32.xlu0 %v475_v29 }
 0x1ab   : > { %7507 = vrsqrt.f32 %v8599_v1  ;;  %vm846_vm8 = vweird.f32 %v8599_v1 }
 0x1ac   : > { %v1332_v47 = vrot.slane %v1330_v27, 7  ;;  %v1143_v9 = vmul.f32 %v8578_v26, %v1107_v57  ;;  %v656_v62 = vsel %vm420_vm0, %v600_v14, 0.0  ;;  %v8638_v27 = vld [vmem:[#allocation2 + $0x2c] sm:$0x1] }
 0x1ad   : > { %657 = vadd.xlane.f32.xlu1 %v656_v62  ;;  %v1877_v24 = vshll.u32 %v8638_v27, 16  ;;  %v8673_v14 = vld [vmem:[%s7722_s22 + $0xa8] sm:$0xff] }
 0x1ae   : > { %v1335_v2 = vor.u32 %v1333_v4, %v1332_v47  ;;  %v1336_v33 = vrot.slane %v1332_v47, 4  ;;  %v1179_v3 = vadd.f32 %v8584_v59, %v1143_v9  ;;  %v8642_v47 = vld [vmem:[%s7722_s22 + $0x98] sm:$0xff] }
 0x1b0   : > { %v1344_v25 = vsel %vm8156_vm13, %v1336_v33, %v8482_v20  ;;  %v1636_v5 = vsel %vm8102_vm7, %v1335_v2, %v1635_v41  ;;  %v649_v51 = vpop.xlane.xlu0 %648  ;;  %v2146_v20 = vshrl.u32 %v1763_v55, 16  ;;  %v462_v54 = vpop.xlane.xlu1 %461  ;;  %v1267_v48 = vpack.c.bf16 %v1179_v3, %v1179_v3 }
 0x1b1   : > { %v7508_v15 = vpop.eup %7507  ;;  %1637 = vst [vmem:[#allocation2 + $0x24] sm:$0xf] %v1636_v5  ;;  %v725_v31 = vmul.f32 %v649_v51, %v7772_v30  ;;  %v537_v60 = vmul.f32 %v7772_v30, %v462_v54  ;;  %v478_v5 = vsel %vm420_vm0, %v8642_v47, 0.0  ;;  %v8688_v62 = vld [vmem:[#allocation2 + $0xbc] sm:$0x1] }
 0x1b2   : > { %1638 = vst.msk [vmem:[#allocation2 + $0x28] sm:$0xf] %vm1204_vm2, %v1344_v25  ;;  %v841_v0 = vmul.f32 %v7508_v15, %v8599_v1  ;;  %v2148_v50 = vrot.slane %v2146_v20, 4  ;;  %vm847_vm6 = vweird.f32 %v7508_v15  ;;  %v1355_v16 = vshrl.u32 %v1267_v48, 16 }
 0x1b3   : > { %v8622_v13 = vadd.f32 1e-05, %v725_v31  ;;  %v8636_v40 = vsub.f32 %v8260_v19, %v537_v60  ;;  %vm848_vm9 = vmor %vm846_vm8, %vm847_vm6  ;;  %v1646_v19 = vld [vmem:[#allocation2 + $0x38] sm:$0x1]  ;;  %v2657_v1 = vrot.slane %v8638_v27, 5  ;;  %v1358_v51 = vshll.u32 %v1267_v48, 16 }
 0x1b4   : > { %v842_v34 = vmul.f32 %v7508_v15, %v841_v0  ;;  %v1357_v41 = vrot.slane %v1355_v16, 7  ;;  %v2152_v2 = vor.u32 %v2151_v10, %v2148_v50  ;;  %v8684_v10 = vsel %vm420_vm0, %v8673_v14, 0.0  ;;  %v8686_v48 = vld [vmem:[#allocation2 + $0xb8] sm:$0xf] }
 0x1b5   : > { %7509 = vrsqrt.f32 %v8622_v13  ;;  %v601_v58 = vmul.f32 %v8636_v40, %v8636_v40  ;;  %vm876_vm11 = vweird.f32 %v8622_v13  ;;  %479 = vadd.xlane.f32.xlu1 %v478_v5  ;;  %v2155_v29 = vshll.u32 %v8686_v48, 16 }
 0x1b6   : > { %v843_v61 = vmul.f32 0.5, %v842_v34  ;;  %v1362_v55 = vrot.slane %v1357_v41, 4  ;;  %v2153_v20 = vrot.slane %v2152_v2, 4  ;;  %v8665_v39 = vor.u32 %v1358_v51, %v1357_v41  ;;  %v8670_v34 = vld [vmem:[%s7722_s22 + $0xa0] sm:$0xff] }
 0x1b7   : > { %v659_v6 = vsel %vm420_vm0, %v601_v58, 0.0  ;;  %v481_v50 = vsel %vm420_vm0, %v8670_v34, 0.0 }
 0x1b8   : > { %v844_v8 = vsub.f32 1.5, %v843_v61  ;;  %660 = vadd.xlane.f32.xlu2 %v659_v6  ;;  %v1647_v31 = vsel %vm8164_vm14, %v1362_v55, %v1646_v19  ;;  %v2157_v55 = vrot.slane %v2155_v29, 5  ;;  %v2583_v51 = vld [vmem:[#allocation2 + $0x24] sm:$0xe] }
 0x1b9   : > { %v646_v11 = vpop.xlane.xlu2 %645  ;;  %1648 = vst [vmem:[#allocation2 + $0x38] sm:$0x1] %v1647_v31  ;;  %v7409_v3 = vld [vmem:[#allocation2 + $0x24] sm:$0xff] }
 0x1ba   : > { %v845_v52 = vmul.f32 %v7508_v15, %v844_v8  ;;  %v724_v4 = vmul.f32 %v646_v11, %v7772_v30  ;;  %7062 = vmatmul.msk.bf16.gmra.mxu1 %vm420_vm0, %v7409_v3  ;;  %v2165_v8 = vshll.u32 %v8688_v62, 16  ;;  %v8694_v16 = vld [vmem:[#allocation2 + $0x28] sm:$0xf] }
 0x1bb   : > { %v8645_v46 = vpop.eup %7509  ;;  %v2654_v58 = vrot.slane %v8694_v16, 5  ;;  %v1867_v2 = vshll.u32 %v8694_v16, 16 }
 0x1bc   : > { %v849_v33 = vsel %vm848_vm9, %v7508_v15, %v845_v52  ;;  %v871_v53 = vmul.f32 %v8645_v46, %v8622_v13  ;;  %v8651_v17 = vadd.f32 1e-05, %v724_v4  ;;  %v465_v15 = vpop.xlane.xlu1 %464  ;;  %vm877_vm3 = vweird.f32 %v8645_v46 }
 0x1bd   : > { %v1106_v25 = vmul.f32 %v849_v33, %v8171_v22  ;;  %v538_v0 = vmul.f32 %v7772_v30, %v465_v15  ;;  %vm8700_vm1 = vmor %vm876_vm11, %vm877_vm3  ;;  %482 = vadd.xlane.f32.xlu1 %v481_v50 }
 0x1be   : > { %v872_v57 = vmul.f32 %v8645_v46, %v871_v53  ;;  %7511 = vrsqrt.f32 %v8651_v17  ;;  %vm866_vm15 = vweird.f32 %v8651_v17 }
 0x1bf   : > { %v1142_v22 = vmul.f32 %v8578_v26, %v1106_v25  ;;  %v8677_v54 = vsub.f32 %v8313_v38, %v538_v0  ;;  %v2159_v38 = vshrl.u32 %v8686_v48, 16 }
 0x1c0   : > { %v873_v9 = vmul.f32 0.5, %v872_v57 }
 0x1c1   : > { %v1178_v61 = vadd.f32 %v8584_v59, %v1142_v22  ;;  %v602_v4 = vmul.f32 %v8677_v54, %v8677_v54  ;;  %v2161_v25 = vrot.slane %v2159_v38, 4  ;;  %v2158_v22 = vsel %vm8454_vm4, %v2153_v20, %v2157_v55  ;;  %v1739_v20 = vld [vmem:[#allocation2 + $0x24] sm:$0xf] }
 0x1c2   : > { %v874_v60 = vsub.f32 1.5, %v873_v9  ;;  %v2201_v38 = vunpack.c.l.b16 %v2158_v22 }
 0x1c3   : > { %v1266_v11 = vpack.c.bf16 %v1178_v61, %v1178_v61  ;;  %v468_v41 = vpop.xlane.xlu2 %467  ;;  %v662_v15 = vsel %vm420_vm0, %v602_v4, 0.0  ;;  %v2162_v61 = vor.u32 %v2161_v25, %v2157_v55  ;;  %v2656_v55 = vrot.slane %v2654_v58, 4 }
 0x1c4   : > { %v7512_v19 = vpop.eup %7511  ;;  %v875_v33 = vmul.f32 %v8645_v46, %v874_v60  ;;  %v539_v53 = vmul.f32 %v7772_v30, %v468_v41  ;;  %663 = vadd.xlane.f32.xlu2 %v662_v15  ;;  %v1642_v60 = vld [vmem:[#allocation2 + $0x30] sm:$0xf] }
 0x1c5   : > { %v1347_v13 = vshrl.u32 %v1266_v11, 16  ;;  %v1350_v5 = vshll.u32 %v1266_v11, 16  ;;  %v861_v6 = vmul.f32 %v7512_v19, %v8651_v17  ;;  %vm867_vm5 = vweird.f32 %v7512_v19 }
 0x1c6   : > { %v879_v57 = vsel %vm8700_vm1, %v8645_v46, %v875_v33  ;;  %v8716_v31 = vsub.f32 %v8400_v35, %v539_v53  ;;  %v2167_v46 = vrot.slane %v2165_v8, 5  ;;  %v7078_v11 = vrot.slane %v2583_v51, 9  ;;  %vm8736_vm6 = vmor %vm866_vm15, %vm867_vm5 }
 0x1c7   : > { %v1349_v0 = vrot.slane %v1347_v13, 7  ;;  %v1109_v9 = vmul.f32 %v879_v57, %v8208_v12  ;;  %v862_v3 = vmul.f32 %v7512_v19, %v861_v6  ;;  %v2163_v12 = vrot.slane %v2162_v61, 4 }
 0x1c8   : > { %v603_v29 = vmul.f32 %v8716_v31, %v8716_v31  ;;  %v2655_v53 = vsel %vm8376_vm10, %v7078_v11, %v2654_v58  ;;  %v1858_v51 = vshrl.u32 %v1739_v20, 16  ;;  %v1871_v61 = vshrl.u32 %v8694_v16, 16 }
 0x1c9   : > { %v1352_v52 = vor.u32 %v1350_v5, %v1349_v0  ;;  %v1353_v35 = vrot.slane %v1349_v0, 4  ;;  %v1145_v4 = vmul.f32 %v8578_v26, %v1109_v9  ;;  %v863_v41 = vmul.f32 0.5, %v862_v3 }
 0x1ca   : > { %v665_v33 = vsel %vm420_vm0, %v603_v29, 0.0  ;;  %v2168_v58 = vsel %vm8454_vm4, %v2163_v12, %v2167_v46  ;;  %v2751_v6 = vunpack.c.l.b16 %v2655_v53  ;;  %v1860_v0 = vrot.slane %v1858_v51, 4  ;;  %v8751_v46 = vld [vmem:[#allocation2 + $0xb4] sm:$0xe]  ;;  %v8760_v53 = vld [vmem:[#allocation2 + $0x38] sm:$0x1] }
 0x1cb   : > { %v1361_v50 = vsel %vm8156_vm13, %v1353_v35, %v8665_v39  ;;  %v1643_v8 = vsel %vm8102_vm7, %v1352_v52, %v1642_v60  ;;  %v1181_v25 = vadd.f32 %v8584_v59, %v1145_v4  ;;  %v864_v13 = vsub.f32 1.5, %v863_v41  ;;  %666 = vadd.xlane.f32.xlu0 %v665_v33 }
 0x1cc   : > { %1644 = vst [vmem:[#allocation2 + $0x30] sm:$0xf] %v1643_v8  ;;  %v2658_v39 = vsel %vm8376_vm10, %v2656_v55, %v2657_v1  ;;  %v2202_v22 = vunpack.c.l.b16 %v2168_v58  ;;  %v1861_v9 = vshll.u32 %v1739_v20, 16  ;;  %v1869_v3 = vrot.slane %v1867_v2, 5  ;;  %485 = vadd.xlane.f32.xlu2 %v8684_v10  ;;  %v1653_v2 = vld [vmem:[#allocation2 + $0x44] sm:$0x1] }
 0x1cd   : > { %1645 = vst.msk [vmem:[#allocation2 + $0x34] sm:$0xf] %vm1204_vm2, %v1361_v50  ;;  %v1269_v57 = vpack.c.bf16 %v1181_v25, %v1181_v25  ;;  %v865_v15 = vmul.f32 %v7512_v19, %v864_v13  ;;  %v2752_v17 = vunpack.c.l.b16 %v2658_v39  ;;  %v1873_v4 = vrot.slane %v1871_v61, 4 }
 0x1ce   : > { %v2218_v1 = vpack.c.b16 %v2202_v22, %v2201_v38  ;;  %v1863_v35 = vrot.slane %v1861_v9, 5  ;;  %v1879_v16 = vrot.slane %v1877_v24, 5  ;;  %v7090_v38 = vrot.slane %v8751_v46, 9 }
 0x1cf   : > { %v1372_v60 = vshrl.u32 %v1269_v57, 16  ;;  %v869_v29 = vsel %vm8736_vm6, %v7512_v19, %v865_v15  ;;  %v2780_v52 = vpack.c.b16 %v2752_v17, %v2751_v6  ;;  %v1874_v19 = vor.u32 %v1873_v4, %v1869_v3 }
 0x1d0   : > { %v1108_v11 = vmul.f32 %v869_v29, %v8297_v42  ;;  %6994 = vmatmul.msk.bf16.gmra.mxu3 %vm420_vm0, %v2218_v1  ;;  %v1864_v10 = vor.u32 %v1863_v35, %v1860_v0  ;;  %v1375_v33 = vshll.u32 %v1269_v57, 16  ;;  %v2500_v57 = vpop.f32.mrf.mxu1  ;;  %v2664_v29 = vrot.slane %v8760_v53, 5 }
 0x1d1   : > { %v1374_v41 = vrot.slane %v1372_v60, 7  ;;  %7095 = vmatmul.msk.bf16.gmra.mxu2 %vm420_vm0, %v2780_v52  ;;  %v471_v12 = vpop.xlane.xlu2 %470  ;;  %v1875_v8 = vrot.slane %v1874_v19, 4 }
 0x1d2   : > { %v1144_v20 = vmul.f32 %v8578_v26, %v1108_v11  ;;  %v540_v27 = vmul.f32 %v7772_v30, %v471_v12  ;;  %v1865_v24 = vrot.slane %v1864_v10, 4 }
 0x1d3   : > { %v1379_v42 = vrot.slane %v1374_v41, 4  ;;  %v2584_v55 = vld [vmem:[#allocation2 + $0x30] sm:$0xe]  ;;  %v1377_v5 = vor.u32 %v1375_v33, %v1374_v41  ;;  %v1880_v17 = vsel %vm8454_vm4, %v1875_v8, %v1879_v16  ;;  %v1649_v33 = vld [vmem:[#allocation2 + $0x3c] sm:$0xf] }
 0x1d4   : > { %v1180_v50 = vadd.f32 %v8584_v59, %v1144_v20  ;;  %v7410_v25 = vld [vmem:[#allocation2 + $0x30] sm:$0xff]  ;;  %v7079_v39 = vrot.slane %v2584_v55, 9  ;;  %v8767_v15 = vsub.f32 %v8471_v44, %v540_v27  ;;  %v1870_v22 = vsel %vm8454_vm4, %v1865_v24, %v1869_v3 }
 0x1d5   : > { %v1742_v13 = vld [vmem:[#allocation2 + $0x34] sm:$0xf]  ;;  %v1654_v58 = vsel %vm8164_vm14, %v1379_v42, %v1653_v2  ;;  %v1741_v0 = vld [vmem:[#allocation2 + $0x30] sm:$0xf]  ;;  %v2177_v9 = vunpack.c.l.b16 %v1870_v22  ;;  %v2178_v61 = vunpack.c.l.b16 %v1880_v17  ;;  %7063 = vmatmul.msk.bf16.gmra.mxu1 %vm420_vm0, %v7410_v25  ;;  %v2853_v52 = vpop.f32.mrf.mxu2  ;;  %v1901_v25 = vshll.u32 %v8760_v53, 16 }
 0x1d6   : > { %v2661_v6 = vrot.slane %v1742_v13, 5  ;;  %1655 = vst [vmem:[#allocation2 + $0x44] sm:$0x1] %v1654_v58  ;;  %v1268_v51 = vpack.c.bf16 %v1180_v50, %v1180_v50  ;;  %v604_v44 = vmul.f32 %v8767_v15, %v8767_v15  ;;  %v1882_v41 = vshrl.u32 %v1741_v0, 16 }
 0x1d7   : > { %v2206_v35 = vpack.c.b16 %v2178_v61, %v2177_v9  ;;  %v1885_v16 = vshll.u32 %v1741_v0, 16  ;;  %v1891_v19 = vshll.u32 %v1742_v13, 16  ;;  %v1895_v50 = vshrl.u32 %v1742_v13, 16  ;;  %v7418_v61 = vld [vmem:[#allocation2 + $0x90] sm:$0xff] }
 0x1d8   : > { %v2663_v60 = vrot.slane %v2661_v6, 4  ;;  %v1364_v1 = vshrl.u32 %v1268_v51, 16  ;;  %v1367_v11 = vshll.u32 %v1268_v51, 16  ;;  %v2662_v3 = vsel %vm8376_vm10, %v7079_v39, %v2661_v6 }
 0x1d9   : > { %v668_v20 = vsel %vm420_vm0, %v604_v44, 0.0  ;;  %6982 = vmatmul.msk.bf16.gmra.mxu0 %vm420_vm0, %v2206_v35  ;;  %v2753_v42 = vunpack.c.l.b16 %v2662_v3  ;;  %v1884_v12 = vrot.slane %v1882_v41, 4  ;;  %v1887_v55 = vrot.slane %v1885_v16, 5 }
 0x1da   : > { %v2665_v4 = vsel %vm8376_vm10, %v2663_v60, %v2664_v29  ;;  %v1366_v2 = vrot.slane %v1364_v1, 7  ;;  %669 = vadd.xlane.f32.xlu0 %v668_v20  ;;  %v1893_v8 = vrot.slane %v1891_v19, 5  ;;  %v1897_v51 = vrot.slane %v1895_v50, 4 }
 0x1db   : > { %v2754_v10 = vunpack.c.l.b16 %v2665_v4  ;;  %v1888_v6 = vor.u32 %v1887_v55, %v1884_v12  ;;  %v2738_v22 = vrot.slane %v8686_v48, 5  ;;  %v2741_v13 = vrot.slane %v8688_v62, 5  ;;  %v8795_v48 = vpop.f32.mrf.mxu1 }
 0x1dc   : > { %v1369_v27 = vor.u32 %v1367_v11, %v1366_v2  ;;  %v1370_v24 = vrot.slane %v1366_v2, 4  ;;  %v1898_v29 = vor.u32 %v1897_v51, %v1893_v8  ;;  %v1903_v11 = vrot.slane %v1901_v25, 5 }
 0x1dd   : > { %v2280_v58 = vpop.f32.mrf.mxu0  ;;  %v2781_v39 = vpack.c.b16 %v2754_v10, %v2753_v42  ;;  %v1889_v60 = vrot.slane %v1888_v6, 4  ;;  %v2739_v53 = vsel %vm8376_vm10, %v7090_v38, %v2738_v22  ;;  %v2740_v1 = vrot.slane %v2738_v22, 4  ;;  %v8804_v44 = vpop.f32.mrf.mxu2  ;;  %v1771_v2 = vld [vmem:[#allocation2 + $0x44] sm:$0x1] }
 0x1de   : > { %v1378_v17 = vsel %vm8156_vm13, %v1370_v24, %v1377_v5  ;;  %v1650_v0 = vsel %vm8102_vm7, %v1369_v27, %v1649_v33  ;;  %v2501_v9 = vadd.f32 %v2500_v57, %v2280_v58  ;;  %v1899_v57 = vrot.slane %v1898_v29, 4 }
 0x1df   : > { %1651 = vst [vmem:[#allocation2 + $0x3c] sm:$0xf] %v1650_v0  ;;  %v1894_v62 = vsel %vm8454_vm4, %v1889_v60, %v1893_v8  ;;  %v2742_v46 = vsel %vm8376_vm10, %v2740_v1, %v2741_v13  ;;  %v2775_v38 = vunpack.c.l.b16 %v2739_v53  ;;  %v2671_v25 = vrot.slane %v1771_v2, 5 }
 0x1e0   : > { %1652 = vst.msk [vmem:[#allocation2 + $0x40] sm:$0xf] %vm1204_vm2, %v1378_v17  ;;  %v8797_v5 = vadd.f32 %v2853_v52, %v2501_v9  ;;  %7071 = vmatmul.msk.bf16.vlgmr.msrb.gmra.mxu3 %vm420_vm0, %v7418_v61  ;;  %v2776_v3 = vunpack.c.l.b16 %v2742_v46  ;;  %v1904_v52 = vsel %vm8454_vm4, %v1899_v57, %v1903_v11  ;;  %v2179_v35 = vunpack.c.l.b16 %v1894_v62 }
 0x1e1   : > { %7096 = vmatmul.msk.bf16.gmra.mxu2 %vm420_vm0, %v2781_v39  ;;  %v2180_v4 = vunpack.c.l.b16 %v1904_v52  ;;  %v1925_v6 = vshll.u32 %v1771_v2, 16 }
 0x1e2   : > { %v8809_v41 = vpack.c.b16 %v2776_v3, %v2775_v38  ;;  %v7419_v38 = vld [vmem:[#allocation2 + $0x9c] sm:$0xff] }
 0x1e3   : > { %v2207_v19 = vpack.c.b16 %v2180_v4, %v2179_v35  ;;  %v2505_v51 = vpop.f32.mrf.mxu1  ;;  %v1927_v11 = vrot.slane %v1925_v6, 5  ;;  %v7421_v6 = vld [vmem:[#allocation2 + $0xb4] sm:$0xff] }
 0x1e5   : > { %v8811_v16 = vpop.f32.mrf.mxu0 }
 0x1e6   : > { %v2585_v20 = vld [vmem:[#allocation2 + $0x3c] sm:$0xe] }
 0x1e7   : > { %v1743_v10 = vld [vmem:[#allocation2 + $0x3c] sm:$0xf]  ;;  %v1744_v42 = vld [vmem:[#allocation2 + $0x40] sm:$0xf]  ;;  %v7080_v12 = vrot.slane %v2585_v20, 9 }
 0x1e8   : > { %v7411_v33 = vld [vmem:[#allocation2 + $0x3c] sm:$0xff]  ;;  %v1906_v55 = vshrl.u32 %v1743_v10, 16  ;;  %v1909_v50 = vshll.u32 %v1743_v10, 16  ;;  %v2668_v27 = vrot.slane %v1744_v42, 5  ;;  %v1915_v24 = vshll.u32 %v1744_v42, 16 }
 0x1e9   : > { %v1919_v8 = vshrl.u32 %v1744_v42, 16  ;;  %7064 = vmatmul.msk.bf16.gmra.mxu1 %vm420_vm0, %v7411_v33  ;;  %6983 = vmatmul.msk.bf16.gmra.mxu0 %vm420_vm0, %v2207_v19 }
 0x1ea   : > { %v1908_v58 = vrot.slane %v1906_v55, 4  ;;  %v1911_v39 = vrot.slane %v1909_v50, 5  ;;  %v2669_v22 = vsel %vm8376_vm10, %v7080_v12, %v2668_v27  ;;  %v2670_v17 = vrot.slane %v2668_v27, 4  ;;  %v2858_v61 = vpop.f32.mrf.mxu2 }
 0x1eb   : > { %v1917_v0 = vrot.slane %v1915_v24, 5  ;;  %v1921_v9 = vrot.slane %v1919_v8, 4  ;;  %v2755_v53 = vunpack.c.l.b16 %v2669_v22  ;;  %v8827_v19 = vpop.f32.mrf.mxu1  ;;  %v7420_v24 = vld [vmem:[#allocation2 + $0xa8] sm:$0xff] }
 0x1ec   : > { %v1912_v13 = vor.u32 %v1911_v39, %v1908_v58  ;;  %v2672_v60 = vsel %vm8376_vm10, %v2670_v17, %v2671_v25  ;;  %11216 = vst [vmem:[#allocation3_spill] sm:$0xff] %v8827_v19 }
 0x1ed   : > { %v1922_v29 = vor.u32 %v1921_v9, %v1917_v0  ;;  %v2756_v1 = vunpack.c.l.b16 %v2672_v60 }
 0x1ee   : > { %v1913_v62 = vrot.slane %v1912_v13, 4  ;;  %v2285_v46 = vpop.f32.mrf.mxu0 }
 0x1ef   : > { %v1923_v57 = vrot.slane %v1922_v29, 4  ;;  %v2782_v3 = vpack.c.b16 %v2756_v1, %v2755_v53  ;;  %v2506_v52 = vadd.f32 %v2505_v51, %v2285_v46 }
 0x1f0   : > { %v1918_v35 = vsel %vm8454_vm4, %v1913_v62, %v1917_v0  ;;  %7072 = vmatmul.msk.bf16.gmra.mxu3 %vm420_vm0, %v7419_v38 }
 0x1f1   : > { %v1928_v4 = vsel %vm8454_vm4, %v1923_v57, %v1927_v11  ;;  %v8824_v2 = vadd.f32 %v2858_v61, %v2506_v52  ;;  %7097 = vmatmul.msk.bf16.gmra.mxu2 %vm420_vm0, %v2782_v3  ;;  %v2181_v20 = vunpack.c.l.b16 %v1918_v35  ;;  %v8840_v61 = vpop.f32.mrf.mxu3 }
 0x1f2   : > { %v2182_v10 = vunpack.c.l.b16 %v1928_v4  ;;  %v8829_v33 = vpop.f32.mrf.mxu2 }
 0x1f3   : > { %11217 = vst [vmem:[#allocation4_spill] sm:$0xff] %v8829_v33  ;;  %v2510_v55 = vpop.f32.mrf.mxu1 }
 0x1f4   : > { %v2208_v12 = vpack.c.b16 %v2182_v10, %v2181_v20 }
 0x1f6   : > { %v8831_v42 = vpop.f32.mrf.mxu0 }
 0x1f9   : > { %6984 = vmatmul.msk.bf16.gmra.mxu0 %vm420_vm0, %v2208_v12  ;;  %v8844_v46 = vpop.f32.mrf.mxu3 }
 0x1fa   : > { %v2863_v27 = vpop.f32.mrf.mxu2 }
 0x1fe   : > { %v2290_v50 = vpop.f32.mrf.mxu0 }
 0x1ff   : > { %v2511_v8 = vadd.f32 %v2510_v55, %v2290_v50 }
 0x200   : > { %7073 = vmatmul.msk.bf16.gmra.mxu3 %vm420_vm0, %v7420_v24 }
 0x201   : > { %v8835_v25 = vadd.f32 %v2863_v27, %v2511_v8 }
 0x206   : > { %v652_v58 = vpop.xlane.xlu0 %651 }
 0x207   : > { %v726_v39 = vmul.f32 %v652_v58, %v7772_v30 }
 0x209   : > { %v758_v51 = vadd.f32 1e-05, %v726_v39  ;;  %v8855_v39 = vpop.f32.mrf.mxu3 }
 0x20b   : > { %7513 = vrsqrt.f32 %v758_v51  ;;  %vm886_vm9 = vweird.f32 %v758_v51 }
 0x20e   : > { %v655_v22 = vpop.xlane.xlu1 %654 }
 0x20f   : > { %v727_v17 = vmul.f32 %v655_v22, %v7772_v30  ;;  %v474_v4 = vpop.xlane.xlu0 %473 }
 0x210   : > { %7074 = vmatmul.msk.bf16.gmra.mxu3 %vm420_vm0, %v7421_v6  ;;  %v541_v12 = vmul.f32 %v7772_v30, %v474_v4 }
 0x211   : > { %v7514_v0 = vpop.eup %7513  ;;  %v759_v13 = vadd.f32 1e-05, %v727_v17  ;;  %v1656_v17 = vld [vmem:[#allocation2 + $0x48] sm:$0xf] }
 0x212   : > { %v881_v9 = vmul.f32 %v7514_v0, %v758_v51  ;;  %vm887_vm8 = vweird.f32 %v7514_v0  ;;  %v8853_v58 = vsub.f32 %v8605_v7, %v541_v12 }
 0x213   : > { %7515 = vrsqrt.f32 %v759_v13  ;;  %vm888_vm11 = vmor %vm886_vm9, %vm887_vm8  ;;  %vm896_vm15 = vweird.f32 %v759_v13 }
 0x214   : > { %v882_v60 = vmul.f32 %v7514_v0, %v881_v9 }
 0x216   : > { %v883_v29 = vmul.f32 0.5, %v882_v60  ;;  %v605_v60 = vmul.f32 %v8853_v58, %v8853_v58 }
 0x218   : > { %v884_v53 = vsub.f32 1.5, %v883_v29 }
 0x219   : > { %v7516_v1 = vpop.eup %7515 }
 0x21a   : > { %v885_v62 = vmul.f32 %v7514_v0, %v884_v53  ;;  %v891_v57 = vmul.f32 %v7516_v1, %v759_v13  ;;  %vm897_vm3 = vweird.f32 %v7516_v1 }
 0x21b   : > { %vm898_vm1 = vmor %vm896_vm15, %vm897_vm3 }
 0x21c   : > { %v889_v11 = vsel %vm888_vm11, %v7514_v0, %v885_v62  ;;  %v892_v3 = vmul.f32 %v7516_v1, %v891_v57  ;;  %v671_v57 = vsel %vm420_vm0, %v605_v60, 0.0 }
 0x21d   : > { %v1110_v38 = vmul.f32 %v889_v11, %v8564_v21  ;;  %v477_v29 = vpop.xlane.xlu0 %476  ;;  %672 = vadd.xlane.f32.xlu1 %v671_v57 }
 0x21e   : > { %v893_v35 = vmul.f32 0.5, %v892_v3  ;;  %v542_v53 = vmul.f32 %v7772_v30, %v477_v29 }
 0x21f   : > { %v1146_v52 = vmul.f32 %v8578_v26, %v1110_v38 }
 0x220   : > { %7104 = vmatmul.msk.bf16.vlgmr.msra.gmra.mxu3 %vm420_vm0, %v8545_v63  ;;  %v894_v10 = vsub.f32 1.5, %v893_v35  ;;  %v658_v50 = vpop.xlane.xlu1 %657  ;;  %v8869_v38 = vsub.f32 %v8629_v36, %v542_v53  ;;  %v1660_v36 = vld [vmem:[#allocation2 + $0x50] sm:$0x1] }
 0x221   : > { %v1182_v20 = vadd.f32 %v8584_v59, %v1146_v52  ;;  %v728_v21 = vmul.f32 %v658_v50, %v7772_v30 }
 0x222   : > { %v895_v63 = vmul.f32 %v7516_v1, %v894_v10 }
 0x223   : > { %v1270_v55 = vpack.c.bf16 %v1182_v20, %v1182_v20  ;;  %v760_v22 = vadd.f32 1e-05, %v728_v21  ;;  %v606_v20 = vmul.f32 %v8869_v38, %v8869_v38 }
 0x224   : > { %v899_v24 = vsel %vm898_vm1, %v7516_v1, %v895_v63  ;;  %v8880_v63 = vpop.f32.mrf.mxu3 }
 0x225   : > { %v1381_v27 = vshrl.u32 %v1270_v55, 16  ;;  %v1111_v8 = vmul.f32 %v899_v24, %v8573_v56  ;;  %v1384_v51 = vshll.u32 %v1270_v55, 16  ;;  %7517 = vrsqrt.f32 %v760_v22 }
 0x226   : > { %v674_v50 = vsel %vm420_vm0, %v606_v20, 0.0  ;;  %vm906_vm6 = vweird.f32 %v760_v22  ;;  %v4621_v20 = vld [vmem:[#allocation2 + $0x94] sm:$0xf] }
 0x227   : > { %v1383_v6 = vrot.slane %v1381_v27, 7  ;;  %v1147_v0 = vmul.f32 %v8578_v26, %v1111_v8  ;;  %675 = vadd.xlane.f32.xlu2 %v674_v50 }
 0x228   : > { %v480_v11 = vpop.xlane.xlu1 %479 }
 0x229   : > { %v1386_v9 = vor.u32 %v1384_v51, %v1383_v6  ;;  %v1183_v13 = vadd.f32 %v8584_v59, %v1147_v0  ;;  %v543_v3 = vmul.f32 %v7772_v30, %v480_v11  ;;  %v1387_v24 = vrot.slane %v1383_v6, 4 }
 0x22b   : > { %v661_v56 = vpop.xlane.xlu2 %660  ;;  %v1657_v7 = vsel %vm8102_vm7, %v1386_v9, %v1656_v17  ;;  %v1271_v62 = vpack.c.bf16 %v1183_v13, %v1183_v13  ;;  %v7518_v35 = vpop.eup %7517  ;;  %v8875_v4 = vsub.f32 %v8642_v47, %v543_v3 }
 0x22c   : > { %v729_v1 = vmul.f32 %v661_v56, %v7772_v30  ;;  %1658 = vst [vmem:[#allocation2 + $0x48] sm:$0xf] %v1657_v7  ;;  %v901_v55 = vmul.f32 %v7518_v35, %v760_v22  ;;  %vm907_vm5 = vweird.f32 %v7518_v35 }
 0x22d   : > { %v1389_v52 = vshrl.u32 %v1271_v62, 16  ;;  %v1392_v12 = vshll.u32 %v1271_v62, 16  ;;  %v607_v27 = vmul.f32 %v8875_v4, %v8875_v4  ;;  %vm908_vm8 = vmor %vm906_vm6, %vm907_vm5 }
 0x22e   : > { %v902_v8 = vmul.f32 %v7518_v35, %v901_v55 }
 0x22f   : > { %v1391_v10 = vrot.slane %v1389_v52, 7  ;;  %v677_v51 = vsel %vm420_vm0, %v607_v27, 0.0  ;;  %v4622_v27 = vld [vmem:[#allocation2 + $0x98] sm:$0x1] }
 0x230   : > { %7105 = vmatmul.msk.bf16.gmra.mxu3 %vm420_vm0, %v8553_v18  ;;  %v8872_v18 = vadd.f32 1e-05, %v729_v1  ;;  %v903_v13 = vmul.f32 0.5, %v902_v8  ;;  %v483_v60 = vpop.xlane.xlu1 %482  ;;  %678 = vadd.xlane.f32.xlu0 %v677_v51  ;;  %v5255_v8 = vld [vmem:[#allocation2 + $0x9c] sm:$0xe] }
 0x231   : > { %v1394_v21 = vor.u32 %v1392_v12, %v1391_v10  ;;  %v1396_v47 = vrot.slane %v1391_v10, 4  ;;  %v544_v6 = vmul.f32 %v7772_v30, %v483_v60 }
 0x232   : > { %7519 = vrsqrt.f32 %v8872_v18  ;;  %v904_v7 = vsub.f32 1.5, %v903_v13  ;;  %vm916_vm11 = vweird.f32 %v8872_v18 }
 0x233   : > { %v1395_v0 = vsel %vm8156_vm13, %v1387_v24, %v1394_v21  ;;  %v1661_v9 = vsel %vm8164_vm14, %v1396_v47, %v1660_v36  ;;  %v8897_v62 = vsub.f32 %v8670_v34, %v544_v6  ;;  %v4624_v34 = vld [vmem:[#allocation2 + $0xa0] sm:$0xf]  ;;  %v8905_v36 = vpop.f32.mrf.mxu3  ;;  %v5254_v24 = vld [vmem:[#allocation2 + $0x90] sm:$0xe]  ;;  %v4625_v6 = vld [vmem:[#allocation2 + $0xa4] sm:$0x1] }
 0x234   : > { %1659 = vst.msk [vmem:[#allocation2 + $0x4c] sm:$0xf] %vm1204_vm2, %v1395_v0  ;;  %v905_v57 = vmul.f32 %v7518_v35, %v904_v7  ;;  %v5387_v51 = vrot.slane %v4624_v34, 5 }
 0x235   : > { %1662 = vst [vmem:[#allocation2 + $0x50] sm:$0x1] %v1661_v9  ;;  %v608_v3 = vmul.f32 %v8897_v62, %v8897_v62  ;;  %v5383_v9 = vrot.slane %v4622_v27, 5 }
 0x236   : > { %v909_v10 = vsel %vm908_vm8, %v7518_v35, %v905_v57  ;;  %v5380_v35 = vrot.slane %v4621_v20, 5  ;;  %v7189_v20 = vld [vmem:[%s11172_s1 + $0x8] sm:$0x3] }
 0x237   : > { %v664_v17 = vpop.xlane.xlu2 %663  ;;  %v1112_v22 = vmul.f32 %v909_v10, %v8616_v23  ;;  %v680_v50 = vsel %vm420_vm0, %v608_v3, 0.0  ;;  %v7347_v23 = vrot.slane %v5254_v24, 9  ;;  %v8926_v3 = vld [vmem:[%s7722_s22 + $0xf0] sm:$0xff] }
 0x238   : > { %v730_v29 = vmul.f32 %v664_v17, %v7772_v30  ;;  %v7520_v56 = vpop.eup %7519  ;;  %681 = vadd.xlane.f32.xlu1 %v680_v50  ;;  %v8945_v50 = vld [vmem:[%s11174_s3] ss:$0 sm:$0xff] }
 0x239   : > { %v911_v53 = vmul.f32 %v7520_v56, %v8872_v18  ;;  %vm917_vm9 = vweird.f32 %v7520_v56  ;;  %v7348_v18 = vrot.slane %v5255_v8, 9  ;;  %v5381_v7 = vsel %vm8376_vm10, %v7347_v23, %v5380_v35 }
 0x23a   : > { %v8894_v1 = vadd.f32 1e-05, %v730_v29  ;;  %vm918_vm3 = vmor %vm916_vm11, %vm917_vm9  ;;  %v5390_v23 = vrot.slane %v4625_v6, 5 }
 0x23b   : > { %v912_v11 = vmul.f32 %v7520_v56, %v911_v53  ;;  %v5389_v53 = vrot.slane %v5387_v51, 4 }
 0x23c   : > { %7521 = vrsqrt.f32 %v8894_v1  ;;  %vm926_vm15 = vweird.f32 %v8894_v1 }
 0x23d   : > { %v913_v12 = vmul.f32 0.5, %v912_v11 }
 0x23e   : > { %v667_v52 = vpop.xlane.xlu0 %666 }
 0x23f   : > { %v731_v55 = vmul.f32 %v667_v52, %v7772_v30  ;;  %v914_v21 = vsub.f32 1.5, %v913_v12  ;;  %v486_v52 = vpop.xlane.xlu2 %485  ;;  %v511_v12 = vsel %vm420_vm0, %v8926_v3, 0.0 }
 0x240   : > { %7106 = vmatmul.msk.bf16.gmra.mxu3 %vm420_vm0, %v8558_v32  ;;  %v1148_v32 = vmul.f32 %v8578_v26, %v1112_v22  ;;  %v5382_v26 = vrot.slane %v5380_v35, 4  ;;  %512 = vadd.xlane.f32.xlu0 %v511_v12 }
 0x241   : > { %v8909_v47 = vadd.f32 1e-05, %v731_v55  ;;  %v915_v0 = vmul.f32 %v7520_v56, %v914_v21  ;;  %v545_v55 = vmul.f32 %v7772_v30, %v486_v52  ;;  %v5442_v21 = vunpack.c.l.b16 %v5381_v7 }
 0x242   : > { %v8913_v17 = vpop.eup %7521  ;;  %v1184_v13 = vadd.f32 %v8584_v59, %v1148_v32  ;;  %v5384_v10 = vsel %vm8376_vm10, %v5382_v26, %v5383_v9  ;;  %v8952_v9 = vpop.f32.mrf.mxu1  ;;  %v8959_v26 = vld [vmem:[%s11175_s4] ss:$0 sm:$0xff]  ;;  %v5391_v52 = vsel %vm8376_vm10, %v5389_v53, %v5390_v23 }
 0x243   : > { %7523 = vrsqrt.f32 %v8909_v47  ;;  %v921_v60 = vmul.f32 %v8913_v17, %v8894_v1  ;;  %v919_v29 = vsel %vm918_vm3, %v7520_v56, %v915_v0  ;;  %vm927_vm1 = vweird.f32 %v8913_v17  ;;  %v8932_v56 = vld [vmem:[%s7722_s22 + $0xf8] sm:$0xff]  ;;  %11218 = vst [vmem:[#allocation5_spill] sm:$0xff] %v8952_v9  ;;  %v8984_v53 = vpop.f32.mrf.mxu0 }
 0x244   : > { %v1272_v57 = vpack.c.bf16 %v1184_v13, %v1184_v13  ;;  %v1113_v59 = vmul.f32 %v919_v29, %v8636_v40  ;;  %v3782_v40 = vsel %vm2267_vm12, %v7189_v20, 0  ;;  %v514_v34 = vsel %vm420_vm0, %v8932_v56, 0.0  ;;  %v8954_v13 = vpop.f32.mrf.mxu3  ;;  %vm928_vm6 = vmor %vm926_vm15, %vm927_vm1  ;;  %11221 = vst [vmem:[#allocation8_spill] sm:$0xff] %v8984_v53 }
 0x245   : > { %v922_v11 = vmul.f32 %v8913_v17, %v921_v60  ;;  %3791 = vmatpush.bf16.msrb.mxu0 %v3782_v40  ;;  %515 = vadd.xlane.f32.xlu1 %v514_v34  ;;  %v5443_v32 = vunpack.c.l.b16 %v5384_v10  ;;  %v5388_v0 = vsel %vm8376_vm10, %v7348_v18, %v5387_v51  ;;  %v8966_v51 = vpop.f32.mrf.mxu2  ;;  %v1663_v18 = vld [vmem:[#allocation2 + $0x54] sm:$0xf]  ;;  %vm936_vm5 = vweird.f32 %v8909_v47 }
 0x246   : > { %v1398_v22 = vshrl.u32 %v1272_v57, 16  ;;  %v1149_v27 = vmul.f32 %v8945_v50, %v1113_v59  ;;  %v1401_v8 = vshll.u32 %v1272_v57, 16  ;;  %v8964_v59 = vld [vmem:[#allocation2 + $0xac] sm:$0xf]  ;;  %11219 = vst [vmem:[#allocation6_spill] sm:$0xff] %v8966_v51  ;;  %v8970_v6 = vsub.f32 %v8673_v14, %v545_v55 }
 0x247   : > { %v923_v24 = vmul.f32 0.5, %v922_v11  ;;  %v8972_v11 = vpack.c.b16 %v5443_v32, %v5442_v21  ;;  %v5444_v34 = vunpack.c.l.b16 %v5388_v0  ;;  %v4628_v55 = vld [vmem:[#allocation2 + $0xb0] sm:$0x1] }
 0x248   : > { %v1400_v60 = vrot.slane %v1398_v22, 7  ;;  %v1185_v29 = vadd.f32 %v8959_v26, %v1149_v27  ;;  %v5445_v27 = vunpack.c.l.b16 %v5391_v52  ;;  %v5397_v52 = vrot.slane %v4628_v55, 5  ;;  %v1746_v55 = vld [vmem:[#allocation2 + $0x4c] sm:$0xf] }
 0x249   : > { %v8948_v35 = vpop.eup %7523  ;;  %v924_v7 = vsub.f32 1.5, %v923_v24  ;;  %11220 = vst [vmem:[#allocation7_spill] sm:$0xff] %v8972_v11  ;;  %v11183_v24 = vrot.slane %v8964_v59, 5 }
 0x24a   : > { %v931_v57 = vmul.f32 %v8948_v35, %v8909_v47  ;;  %v1403_v20 = vor.u32 %v1401_v8, %v1400_v60  ;;  %v1273_v10 = vpack.c.bf16 %v1185_v29, %v1185_v29  ;;  %vm937_vm8 = vweird.f32 %v8948_v35 }
 0x24b   : > { %v925_v12 = vmul.f32 %v8913_v17, %v924_v7  ;;  %v8995_v29 = vpack.c.b16 %v5445_v27, %v5444_v34  ;;  %vm9004_vm9 = vmor %vm936_vm5, %vm937_vm8  ;;  %v609_v34 = vmul.f32 %v8970_v6, %v8970_v6  ;;  %v9013_v27 = vld [vmem:[#allocation2 + $0x50] sm:$0x1] }
 0x24c   : > { %v932_v22 = vmul.f32 %v8948_v35, %v931_v57  ;;  %v1664_v21 = vsel %vm8102_vm7, %v1403_v20, %v1663_v18  ;;  %v1406_v8 = vshrl.u32 %v1273_v10, 16  ;;  %v1409_v57 = vshll.u32 %v1273_v10, 16  ;;  %v1667_v20 = vld [vmem:[#allocation2 + $0x5c] sm:$0x1] }
 0x24d   : > { %v670_v40 = vpop.xlane.xlu0 %669  ;;  %v929_v32 = vsel %vm928_vm6, %v8913_v17, %v925_v12  ;;  %1665 = vst [vmem:[#allocation2 + $0x54] sm:$0xf] %v1664_v21  ;;  %v5396_v18 = vrot.slane %v11183_v24, 4  ;;  %v1404_v17 = vrot.slane %v1400_v60, 4  ;;  %v2515_v60 = vpop.f32.mrf.mxu1  ;;  %v683_v11 = vsel %vm420_vm0, %v609_v34, 0.0 }
 0x24e   : > { %v732_v14 = vmul.f32 %v670_v40, %v7772_v30  ;;  %v1114_v1 = vmul.f32 %v929_v32, %v8677_v54  ;;  %v933_v0 = vmul.f32 0.5, %v932_v22  ;;  %11222 = vst [vmem:[#allocation9_spill] sm:$0xff] %v8995_v29  ;;  %v1408_v7 = vrot.slane %v1406_v8, 7  ;;  %v7412_v22 = vld [vmem:[#allocation2 + $0x48] sm:$0xff]  ;;  %684 = vadd.xlane.f32.xlu2 %v683_v11 }
 0x24f   : > { %v9017_v47 = vsel %vm8376_vm10, %v5396_v18, %v5397_v52  ;;  %7065 = vmatmul.msk.bf16.gmra.mxu1 %vm420_vm0, %v7412_v22  ;;  %v1939_v54 = vshll.u32 %v1746_v55, 16 }
 0x250   : > { %v8991_v23 = vadd.f32 1e-05, %v732_v14  ;;  %7107 = vmatmul.msk.bf16.gmra.mxu3 %vm420_vm0, %v8809_v41  ;;  %v1150_v12 = vmul.f32 %v8945_v50, %v1114_v1  ;;  %v934_v40 = vsub.f32 1.5, %v933_v0  ;;  %v1411_v41 = vor.u32 %v1409_v57, %v1408_v7  ;;  %v2586_v1 = vld [vmem:[#allocation2 + $0x48] sm:$0xe] }
 0x251   : > { %v1413_v10 = vrot.slane %v1408_v7, 4  ;;  %v2675_v0 = vrot.slane %v1746_v55, 5  ;;  %v2678_v7 = vrot.slane %v9013_v27, 5  ;;  %v1745_v57 = vld [vmem:[#allocation2 + $0x48] sm:$0xf]  ;;  %v7081_v18 = vrot.slane %v2586_v1, 9 }
 0x252   : > { %7525 = vrsqrt.f32 %v8991_v23  ;;  %v1186_v21 = vadd.f32 %v8959_v26, %v1150_v12  ;;  %v935_v8 = vmul.f32 %v8948_v35, %v934_v40  ;;  %v1412_v24 = vsel %vm8156_vm13, %v1404_v17, %v1411_v41 }
 0x253   : > { %v9011_v14 = vpop.f32.mrf.mxu3  ;;  %v1668_v29 = vsel %vm8164_vm14, %v1413_v10, %v1667_v20  ;;  %1666 = vst.msk [vmem:[#allocation2 + $0x58] sm:$0xf] %vm1204_vm2, %v1412_v24  ;;  %v2677_v40 = vrot.slane %v2675_v0, 4  ;;  %v1930_v51 = vshrl.u32 %v1745_v57, 16  ;;  %v2676_v20 = vsel %vm8376_vm10, %v7081_v18, %v2675_v0  ;;  %v1670_v18 = vld [vmem:[#allocation2 + $0x60] sm:$0xf] }
 0x254   : > { %v2868_v32 = vpop.f32.mrf.mxu2  ;;  %v1274_v52 = vpack.c.bf16 %v1186_v21, %v1186_v21  ;;  %v939_v12 = vsel %vm9004_vm9, %v8948_v35, %v935_v8  ;;  %1669 = vst [vmem:[#allocation2 + $0x5c] sm:$0x1] %v1668_v29  ;;  %v1933_v10 = vshll.u32 %v1745_v57, 16  ;;  %vm946_vm11 = vweird.f32 %v8991_v23 }
 0x255   : > { %v1115_v17 = vmul.f32 %v939_v12, %v8716_v31  ;;  %v2679_v21 = vsel %vm8376_vm10, %v2677_v40, %v2678_v7  ;;  %v2757_v31 = vunpack.c.l.b16 %v2676_v20  ;;  %v1932_v57 = vrot.slane %v1930_v51, 4  ;;  %v9049_v7 = vpop.f32.mrf.mxu1 }
 0x256   : > { %v2295_v41 = vpop.f32.mrf.mxu0  ;;  %v1415_v22 = vshrl.u32 %v1274_v52, 16  ;;  %v1418_v35 = vshll.u32 %v1274_v52, 16  ;;  %v2758_v0 = vunpack.c.l.b16 %v2679_v21  ;;  %11225 = vst [vmem:[#allocation10_spill] sm:$0xff] %v9049_v7  ;;  %v1935_v52 = vrot.slane %v1933_v10, 5  ;;  %v2587_v10 = vld [vmem:[#allocation2 + $0x54] sm:$0xe] }
 0x257   : > { %v2516_v24 = vadd.f32 %v2515_v60, %v2295_v41  ;;  %v1151_v11 = vmul.f32 %v8945_v50, %v1115_v17  ;;  %v7108_v17 = vld [vmem:[%s11172_s1 + $0x6] sm:$0x3]  ;;  %v1941_v51 = vrot.slane %v1939_v54, 5  ;;  %v1943_v20 = vshrl.u32 %v1746_v55, 16 }
 0x258   : > { %v9035_v34 = vpop.eup %7525  ;;  %v9042_v8 = vrot.slane %v1415_v22, 7  ;;  %v2783_v41 = vpack.c.b16 %v2758_v0, %v2757_v31  ;;  %v3128_v55 = vsel %vm2267_vm12, %v7108_v17, 0 }
 0x259   : > { %v941_v29 = vmul.f32 %v9035_v34, %v8991_v23  ;;  %v9044_v1 = vadd.f32 %v2868_v32, %v2516_v24  ;;  %v1187_v60 = vadd.f32 %v8959_v26, %v1151_v11  ;;  %vm947_vm3 = vweird.f32 %v9035_v34  ;;  %3137 = vmatpush.bf16.msrb.mxu3 %v3128_v55 }
 0x25a   : > { %v1420_v32 = vor.u32 %v1418_v35, %v9042_v8  ;;  %v1936_v11 = vor.u32 %v1935_v52, %v1932_v57  ;;  %7098 = vmatmul.msk.bf16.gmra.mxu2 %vm420_vm0, %v2783_v41  ;;  %v1945_v9 = vrot.slane %v1943_v20, 4  ;;  %v1949_v35 = vshll.u32 %v9013_v27, 16  ;;  %vm9076_vm15 = vmor %vm946_vm11, %vm947_vm3  ;;  %v7422_v52 = vld [vmem:[#allocation2 + $0xc] sm:$0xff] }
 0x25b   : > { %v942_v12 = vmul.f32 %v9035_v34, %v941_v29  ;;  %v9051_v40 = vpop.f32.mrf.mxu3  ;;  %v1275_v24 = vpack.c.bf16 %v1187_v60, %v1187_v60  ;;  %v9060_v29 = vld [vmem:[#allocation2 + $0x58] sm:$0xf]  ;;  %v9067_v54 = vld [vmem:[#allocation2 + $0x5c] sm:$0x1]  ;;  %v7082_v23 = vrot.slane %v2587_v10, 9 }
 0x25c   : > { %v9057_v22 = vpop.f32.mrf.mxu2  ;;  %v1671_v7 = vsel %vm8102_vm7, %v1420_v32, %v1670_v18  ;;  %v1937_v60 = vrot.slane %v1936_v11, 4  ;;  %v1946_v27 = vor.u32 %v1945_v9, %v1941_v51  ;;  %v1951_v55 = vrot.slane %v1949_v35, 5 }
 0x25d   : > { %11226 = vst [vmem:[#allocation11_spill] sm:$0xff] %v9057_v22  ;;  %v943_v21 = vmul.f32 0.5, %v942_v12  ;;  %v1423_v31 = vshrl.u32 %v1275_v24, 16  ;;  %v1421_v12 = vrot.slane %v9042_v8, 4  ;;  %v1426_v32 = vshll.u32 %v1275_v24, 16  ;;  %v7413_v8 = vld [vmem:[#allocation2 + $0x54] sm:$0xff] }
 0x25e   : > { %1672 = vst [vmem:[#allocation2 + $0x60] sm:$0xf] %v1671_v7  ;;  %v9069_v57 = vpop.f32.mrf.mxu0  ;;  %v2682_v7 = vrot.slane %v9060_v29, 5  ;;  %v1942_v20 = vsel %vm8454_vm4, %v1937_v60, %v1941_v51  ;;  %v1947_v11 = vrot.slane %v1946_v27, 4  ;;  %v2685_v22 = vrot.slane %v9067_v54, 5 }
 0x25f   : > { %v944_v0 = vsub.f32 1.5, %v943_v21  ;;  %11227 = vst [vmem:[#allocation12_spill] sm:$0xff] %v9069_v57  ;;  %v1425_v17 = vrot.slane %v1423_v31, 7  ;;  %v1674_v21 = vld [vmem:[#allocation2 + $0x68] sm:$0x1]  ;;  %v2520_v31 = vpop.f32.mrf.mxu1  ;;  %v2183_v27 = vunpack.c.l.b16 %v1942_v20  ;;  %7066 = vmatmul.msk.bf16.gmra.mxu1 %vm420_vm0, %v7413_v8 }
 0x260   : > { %7173 = vmatmul.msk.bf16.vlgmr.msrb.gmra.mxu3 %vm420_vm0, %v7422_v52  ;;  %v2684_v53 = vrot.slane %v2682_v7, 4  ;;  %v1747_v51 = vld [vmem:[#allocation2 + $0x54] sm:$0xf]  ;;  %v1952_v35 = vsel %vm8454_vm4, %v1947_v11, %v1951_v55  ;;  %v2683_v52 = vsel %vm8376_vm10, %v7082_v23, %v2682_v7 }
 0x261   : > { %v945_v41 = vmul.f32 %v9035_v34, %v944_v0  ;;  %v1428_v9 = vor.u32 %v1426_v32, %v1425_v17  ;;  %v1430_v57 = vrot.slane %v1425_v17, 4  ;;  %v2184_v18 = vunpack.c.l.b16 %v1952_v35 }
 0x262   : > { %v1954_v20 = vshrl.u32 %v1747_v51, 16  ;;  %v1957_v11 = vshll.u32 %v1747_v51, 16  ;;  %v2759_v23 = vunpack.c.l.b16 %v2683_v52 }
 0x263   : > { %v949_v24 = vsel %vm9076_vm15, %v9035_v34, %v945_v41  ;;  %v9089_v0 = vpop.f32.mrf.mxu3  ;;  %v1429_v17 = vsel %vm8156_vm13, %v1421_v12, %v1428_v9  ;;  %v1675_v34 = vsel %vm8164_vm14, %v1430_v57, %v1674_v21  ;;  %v2209_v7 = vpack.c.b16 %v2184_v18, %v2183_v27 }
 0x264   : > { %v1116_v60 = vmul.f32 %v949_v24, %v8767_v15  ;;  %v2873_v10 = vpop.f32.mrf.mxu2  ;;  %v2686_v15 = vsel %vm8376_vm10, %v2684_v53, %v2685_v22  ;;  %1673 = vst.msk [vmem:[#allocation2 + $0x64] sm:$0xf] %vm1204_vm2, %v1429_v17  ;;  %v1963_v12 = vshll.u32 %v9060_v29, 16  ;;  %v1967_v57 = vshrl.u32 %v9060_v29, 16 }
 0x265   : > { %v2760_v41 = vunpack.c.l.b16 %v2686_v15  ;;  %1676 = vst [vmem:[#allocation2 + $0x68] sm:$0x1] %v1675_v34  ;;  %v1956_v9 = vrot.slane %v1954_v20, 4  ;;  %6985 = vmatmul.msk.bf16.gmra.mxu0 %vm420_vm0, %v2209_v7  ;;  %v1959_v53 = vrot.slane %v1957_v11, 5 }
 0x266   : > { %v1152_v32 = vmul.f32 %v8945_v50, %v1116_v60  ;;  %v2300_v55 = vpop.f32.mrf.mxu0  ;;  %v1965_v22 = vrot.slane %v1963_v12, 5  ;;  %v1969_v24 = vrot.slane %v1967_v57, 4  ;;  %v1973_v60 = vshll.u32 %v9067_v54, 16  ;;  %v1677_v12 = vld [vmem:[#allocation2 + $0x6c] sm:$0xf] }
 0x267   : > { %v2521_v8 = vadd.f32 %v2520_v31, %v2300_v55  ;;  %v2784_v27 = vpack.c.b16 %v2760_v41, %v2759_v23  ;;  %v1960_v17 = vor.u32 %v1959_v53, %v1956_v9  ;;  %v9114_v15 = vpop.f32.mrf.mxu1 }
 0x268   : > { %v1188_v21 = vadd.f32 %v8959_v26, %v1152_v32  ;;  %v1970_v34 = vor.u32 %v1969_v24, %v1965_v22  ;;  %11230 = vst [vmem:[#allocation13_spill] sm:$0xff] %v9114_v15  ;;  %v1975_v32 = vrot.slane %v1973_v60, 5  ;;  %v7423_v24 = vld [vmem:[#allocation2 + $0x18] sm:$0xff]  ;;  %v2588_v60 = vld [vmem:[#allocation2 + $0x60] sm:$0xe] }
 0x269   : > { %v9110_v35 = vadd.f32 %v2873_v10, %v2521_v8  ;;  %v1961_v54 = vrot.slane %v1960_v17, 4  ;;  %v1749_v8 = vld [vmem:[#allocation2 + $0x60] sm:$0xf]  ;;  %v7083_v15 = vrot.slane %v2588_v60, 9 }
 0x26a   : > { %v1276_v51 = vpack.c.bf16 %v1188_v21, %v1188_v21  ;;  %v1971_v52 = vrot.slane %v1970_v34, 4  ;;  %7099 = vmatmul.msk.bf16.gmra.mxu2 %vm420_vm0, %v2784_v27 }
 0x26b   : > { %v9112_v18 = vpop.f32.mrf.mxu3  ;;  %v1750_v11 = vld [vmem:[#allocation2 + $0x64] sm:$0xf]  ;;  %v1966_v53 = vsel %vm8454_vm4, %v1961_v54, %v1965_v22 }
 0x26c   : > { %v1432_v29 = vshrl.u32 %v1276_v51, 16  ;;  %v1435_v31 = vshll.u32 %v1276_v51, 16  ;;  %v9116_v20 = vpop.f32.mrf.mxu2  ;;  %v1774_v10 = vld [vmem:[#allocation2 + $0x68] sm:$0x1]  ;;  %v2689_v41 = vrot.slane %v1750_v11, 5  ;;  %v1987_v55 = vshll.u32 %v1750_v11, 16 }
 0x26d   : > { %11231 = vst [vmem:[#allocation14_spill] sm:$0xff] %v9116_v20  ;;  %v1976_v57 = vsel %vm8454_vm4, %v1971_v52, %v1975_v32  ;;  %v1991_v23 = vshrl.u32 %v1750_v11, 16  ;;  %v7414_v27 = vld [vmem:[#allocation2 + $0x60] sm:$0xff]  ;;  %v2692_v34 = vrot.slane %v1774_v10, 5  ;;  %v1978_v52 = vshrl.u32 %v1749_v8, 16 }
 0x26e   : > { %v9118_v7 = vrot.slane %v1432_v29, 7  ;;  %v9123_v21 = vpop.f32.mrf.mxu0  ;;  %v2186_v51 = vunpack.c.l.b16 %v1976_v57  ;;  %v2691_v17 = vrot.slane %v2689_v41, 4  ;;  %v1981_v32 = vshll.u32 %v1749_v8, 16 }
 0x26f   : > { %11232 = vst [vmem:[#allocation15_spill] sm:$0xff] %v9123_v21  ;;  %v1989_v20 = vrot.slane %v1987_v55, 5  ;;  %v2185_v11 = vunpack.c.l.b16 %v1966_v53  ;;  %v1993_v54 = vrot.slane %v1991_v23, 4  ;;  %7067 = vmatmul.msk.bf16.gmra.mxu1 %vm420_vm0, %v7414_v27  ;;  %v1980_v21 = vrot.slane %v1978_v52, 4 }
 0x270   : > { %v1437_v9 = vor.u32 %v1435_v31, %v9118_v7  ;;  %7174 = vmatmul.msk.bf16.gmra.mxu3 %vm420_vm0, %v7423_v24  ;;  %v2693_v22 = vsel %vm8376_vm10, %v2691_v17, %v2692_v34  ;;  %v1983_v8 = vrot.slane %v1981_v32, 5  ;;  %v1997_v60 = vshll.u32 %v1774_v10, 16  ;;  %v7424_v10 = vld [vmem:[#allocation2 + $0x24] sm:$0xff] }
 0x271   : > { %v2210_v57 = vpack.c.b16 %v2186_v51, %v2185_v11  ;;  %v2762_v24 = vunpack.c.l.b16 %v2693_v22  ;;  %v1994_v55 = vor.u32 %v1993_v54, %v1989_v20 }
 0x272   : > { %v1678_v29 = vsel %vm8102_vm7, %v1437_v9, %v1677_v12  ;;  %v2690_v12 = vsel %vm8376_vm10, %v7083_v15, %v2689_v41  ;;  %v2525_v9 = vpop.f32.mrf.mxu1  ;;  %v1984_v51 = vor.u32 %v1983_v8, %v1980_v21  ;;  %v1999_v15 = vrot.slane %v1997_v60, 5 }
 0x273   : > { %1679 = vst [vmem:[#allocation2 + $0x6c] sm:$0xf] %v1678_v29  ;;  %v9131_v31 = vpop.f32.mrf.mxu3  ;;  %v2761_v19 = vunpack.c.l.b16 %v2690_v12  ;;  %v1995_v27 = vrot.slane %v1994_v55, 4  ;;  %v11233_v8 = vrot.slane %v8964_v59, 5  ;;  %v2561_v59 = vadd.f32 %v9089_v0, %v8840_v61 }
 0x274   : > { %v2878_v53 = vpop.f32.mrf.mxu2  ;;  %v1985_v41 = vrot.slane %v1984_v51, 4  ;;  %v7426_v51 = vld [vmem:[#allocation2 + $0x3c] sm:$0xff] }
 0x275   : > { %6986 = vmatmul.msk.bf16.gmra.mxu0 %vm420_vm0, %v2210_v57  ;;  %v2785_v23 = vpack.c.b16 %v2762_v24, %v2761_v19  ;;  %v2000_v52 = vsel %vm8454_vm4, %v1995_v27, %v1999_v15  ;;  %v7425_v57 = vld [vmem:[#allocation2 + $0x30] sm:$0xff] }
 0x276   : > { %v2305_v29 = vpop.f32.mrf.mxu0  ;;  %v1990_v32 = vsel %vm8454_vm4, %v1985_v41, %v1989_v20  ;;  %v2188_v11 = vunpack.c.l.b16 %v2000_v52  ;;  %v11303_v45 = vld [vmem:[#allocation15_spill] sm:$0xff] }
 0x277   : > { %v2526_v33 = vadd.f32 %v2525_v9, %v2305_v29  ;;  %v5256_v9 = vld [vmem:[#allocation2 + $0xa8] sm:$0xe]  ;;  %v5447_v29 = vunpack.c.l.b16 %v9017_v47 }
 0x278   : > { %v7349_v24 = vrot.slane %v5256_v9, 9 }
 0x279   : > { %v9139_v17 = vadd.f32 %v2878_v53, %v2526_v33  ;;  %v2187_v33 = vunpack.c.l.b16 %v1990_v32 }
 0x27a   : > { %7100 = vmatmul.msk.bf16.gmra.mxu2 %vm420_vm0, %v2785_v23  ;;  %v5395_v55 = vsel %vm8376_vm10, %v7349_v24, %v11233_v8 }
 0x27b   : > { %v9141_v34 = vpop.f32.mrf.mxu3  ;;  %v2211_v21 = vpack.c.b16 %v2188_v11, %v2187_v33  ;;  %v5446_v60 = vunpack.c.l.b16 %v5395_v55 }
 0x27d   : > { %v9167_v23 = vpack.c.b16 %v5447_v29, %v5446_v60 }
 0x27f   : > { %11234 = vst [vmem:[#allocation16_spill] sm:$0xff] %v9167_v23 }
 0x280   : > { %7175 = vmatmul.msk.bf16.gmra.mxu3 %vm420_vm0, %v7424_v10  ;;  %v7427_v10 = vld [vmem:[#allocation2 + $0x48] sm:$0xff] }
 0x283   : > { %v9149_v19 = vpop.f32.mrf.mxu3 }
 0x285   : > { %6987 = vmatmul.msk.bf16.gmra.mxu0 %vm420_vm0, %v2211_v21 }
 0x28b   : > { %v2572_v22 = vpop.f32.mrf.mxu3 }
 0x28c   : > { %v9153_v54 = vadd.f32 %v2572_v22, %v8954_v13  ;;  %v2563_v22 = vadd.f32 %v9112_v18, %v8844_v46  ;;  %v2566_v18 = vadd.f32 %v9131_v31, %v8855_v39 }
 0x290   : > { %7176 = vmatmul.msk.bf16.gmra.mxu3 %vm420_vm0, %v7425_v57 }
 0x293   : > { %v2575_v12 = vpop.f32.mrf.mxu3 }
 0x294   : > { %v9157_v20 = vadd.f32 %v2575_v12, %v9011_v14  ;;  %v673_v14 = vpop.xlane.xlu1 %672 }
 0x295   : > { %v733_v27 = vmul.f32 %v673_v14, %v7772_v30 }
 0x297   : > { %v765_v15 = vadd.f32 1e-05, %v733_v27 }
 0x299   : > { %7527 = vrsqrt.f32 %v765_v15  ;;  %vm956_vm5 = vweird.f32 %v765_v15 }
 0x29a   : > { %v676_v47 = vpop.xlane.xlu2 %675 }
 0x29b   : > { %v2577_v53 = vpop.f32.mrf.mxu3 }
 0x29c   : > { %v9165_v13 = vadd.f32 %v2577_v53, %v9051_v40  ;;  %v734_v40 = vmul.f32 %v676_v47, %v7772_v30 }
 0x29e   : > { %v766_v32 = vadd.f32 1e-05, %v734_v40 }
 0x29f   : > { %v7528_v11 = vpop.eup %7527 }
 0x2a0   : > { %7177 = vmatmul.msk.bf16.gmra.mxu3 %vm420_vm0, %v7426_v51  ;;  %v951_v33 = vmul.f32 %v7528_v11, %v765_v15  ;;  %7529 = vrsqrt.f32 %v766_v32  ;;  %vm957_vm1 = vweird.f32 %v7528_v11  ;;  %vm966_vm8 = vweird.f32 %v766_v32 }
 0x2a1   : > { %vm958_vm6 = vmor %vm956_vm5, %vm957_vm1 }
 0x2a2   : > { %v952_v57 = vmul.f32 %v7528_v11, %v951_v33 }
 0x2a3   : > { %v2913_v41 = vpop.f32.mrf.mxu3  ;;  %v679_v21 = vpop.xlane.xlu0 %678 }
 0x2a4   : > { %v9173_v52 = vadd.f32 %v2913_v41, %v2561_v59  ;;  %v735_v61 = vmul.f32 %v679_v21, %v7772_v30  ;;  %v953_v12 = vmul.f32 0.5, %v952_v57 }
 0x2a6   : > { %v767_v24 = vadd.f32 1e-05, %v735_v61  ;;  %v7530_v8 = vpop.eup %7529  ;;  %v954_v55 = vsub.f32 1.5, %v953_v12 }
 0x2a7   : > { %v961_v29 = vmul.f32 %v7530_v8, %v766_v32  ;;  %vm967_vm9 = vweird.f32 %v7530_v8  ;;  %v1751_v32 = vld [vmem:[#allocation2 + $0x6c] sm:$0xf] }
 0x2a8   : > { %7531 = vrsqrt.f32 %v767_v24  ;;  %v955_v53 = vmul.f32 %v7528_v11, %v954_v55  ;;  %vm968_vm11 = vmor %vm966_vm8, %vm967_vm9  ;;  %v1438_v55 = vrot.slane %v9118_v7, 4  ;;  %vm976_vm15 = vweird.f32 %v767_v24 }
 0x2a9   : > { %v962_v51 = vmul.f32 %v7530_v8, %v961_v29  ;;  %v2568_v29 = vadd.f32 %v9141_v34, %v8880_v63 }
 0x2aa   : > { %v959_v14 = vsel %vm958_vm6, %v7528_v11, %v955_v53 }
 0x2ab   : > { %v2915_v0 = vpop.f32.mrf.mxu3  ;;  %v682_v60 = vpop.xlane.xlu1 %681  ;;  %v1117_v27 = vmul.f32 %v959_v14, %v8853_v58  ;;  %v963_v59 = vmul.f32 0.5, %v962_v51 }
 0x2ac   : > { %v9180_v9 = vadd.f32 %v2915_v0, %v2563_v22  ;;  %v736_v46 = vmul.f32 %v682_v60, %v7772_v30  ;;  %v7428_v22 = vld [vmem:[#allocation2 + $0x54] sm:$0xff] }
 0x2ad   : > { %v1153_v15 = vmul.f32 %v8945_v50, %v1117_v27  ;;  %v964_v33 = vsub.f32 1.5, %v963_v59  ;;  %v2002_v27 = vshrl.u32 %v1751_v32, 16 }
 0x2ae   : > { %11235 = vst [vmem:[#allocation17_spill] sm:$0xff] %v9180_v9  ;;  %v9186_v47 = vadd.f32 1e-05, %v736_v46  ;;  %v7532_v40 = vpop.eup %7531 }
 0x2af   : > { %v971_v21 = vmul.f32 %v7532_v40, %v767_v24  ;;  %v1189_v39 = vadd.f32 %v8959_v26, %v1153_v15  ;;  %v965_v31 = vmul.f32 %v7530_v8, %v964_v33  ;;  %vm977_vm3 = vweird.f32 %v7532_v40  ;;  %v1681_v15 = vld [vmem:[#allocation2 + $0x74] sm:$0x1] }
 0x2b0   : > { %7178 = vmatmul.msk.bf16.gmra.mxu3 %vm420_vm0, %v7427_v10  ;;  %7533 = vrsqrt.f32 %v9186_v47  ;;  %vm978_vm1 = vmor %vm976_vm15, %vm977_vm3  ;;  %v2005_v24 = vshll.u32 %v1751_v32, 16  ;;  %vm986_vm5 = vweird.f32 %v9186_v47 }
 0x2b1   : > { %v972_v58 = vmul.f32 %v7532_v40, %v971_v21  ;;  %v1277_v61 = vpack.c.bf16 %v1189_v39, %v1189_v39  ;;  %v969_v0 = vsel %vm968_vm11, %v7530_v8, %v965_v31 }
 0x2b2   : > { %v1118_v53 = vmul.f32 %v969_v0, %v8869_v38 }
 0x2b3   : > { %v2918_v41 = vpop.f32.mrf.mxu3  ;;  %v513_v11 = vpop.xlane.xlu0 %512  ;;  %v973_v12 = vmul.f32 0.5, %v972_v58  ;;  %v1440_v51 = vshrl.u32 %v1277_v61, 16  ;;  %v1443_v38 = vshll.u32 %v1277_v61, 16 }
 0x2b4   : > { %v9188_v10 = vadd.f32 %v2918_v41, %v2566_v18  ;;  %v554_v57 = vmul.f32 %v7772_v30, %v513_v11  ;;  %v1154_v8 = vmul.f32 %v8945_v50, %v1118_v53 }
 0x2b5   : > { %v974_v46 = vsub.f32 1.5, %v973_v12  ;;  %v1442_v7 = vrot.slane %v1440_v51, 7 }
 0x2b6   : > { %v9200_v60 = vsub.f32 %v8926_v3, %v554_v57  ;;  %v7534_v59 = vpop.eup %7533  ;;  %v1190_v33 = vadd.f32 %v8959_v26, %v1154_v8 }
 0x2b7   : > { %v975_v34 = vmul.f32 %v7532_v40, %v974_v46  ;;  %v981_v3 = vmul.f32 %v7534_v59, %v9186_v47  ;;  %v1445_v39 = vor.u32 %v1443_v38, %v1442_v7  ;;  %v1447_v31 = vrot.slane %v1442_v7, 4  ;;  %v2589_v7 = vld [vmem:[#allocation2 + $0x6c] sm:$0xe] }
 0x2b8   : > { %v516_v14 = vpop.xlane.xlu1 %515  ;;  %v618_v63 = vmul.f32 %v9200_v60, %v9200_v60  ;;  %v1278_v61 = vpack.c.bf16 %v1190_v33, %v1190_v33  ;;  %v2004_v46 = vrot.slane %v2002_v27, 4  ;;  %vm987_vm6 = vweird.f32 %v7534_v59 }
 0x2b9   : > { %v555_v21 = vmul.f32 %v7772_v30, %v516_v14  ;;  %v979_v58 = vsel %vm978_vm1, %v7532_v40, %v975_v34  ;;  %v982_v11 = vmul.f32 %v7534_v59, %v981_v3  ;;  %v1682_v53 = vsel %vm8164_vm14, %v1447_v31, %v1681_v15  ;;  %vm988_vm8 = vmor %vm986_vm5, %vm987_vm6 }
 0x2ba   : > { %v1119_v0 = vmul.f32 %v979_v58, %v8875_v4  ;;  %v1449_v32 = vshrl.u32 %v1278_v61, 16  ;;  %1683 = vst [vmem:[#allocation2 + $0x74] sm:$0x1] %v1682_v53  ;;  %v2571_v38 = vadd.f32 %v9149_v19, %v8905_v36 }
 0x2bb   : > { %v2920_v18 = vpop.f32.mrf.mxu3  ;;  %v983_v51 = vmul.f32 0.5, %v982_v11 }
 0x2bc   : > { %v9203_v41 = vadd.f32 %v2920_v18, %v2568_v29  ;;  %v1446_v29 = vsel %vm8156_vm13, %v1438_v55, %v1445_v39  ;;  %v1155_v40 = vmul.f32 %v8945_v50, %v1119_v0  ;;  %v9221_v18 = vsub.f32 %v8932_v56, %v555_v21  ;;  %v1684_v56 = vld [vmem:[#allocation2 + $0x78] sm:$0xf]  ;;  %v7429_v21 = vld [vmem:[#allocation2 + $0x60] sm:$0xff] }
 0x2bd   : > { %1680 = vst.msk [vmem:[#allocation2 + $0x70] sm:$0xf] %vm1204_vm2, %v1446_v29  ;;  %v984_v4 = vsub.f32 1.5, %v983_v51  ;;  %v2007_v55 = vrot.slane %v2005_v24, 5  ;;  %v1451_v8 = vrot.slane %v1449_v32, 7  ;;  %v7084_v39 = vrot.slane %v2589_v7, 9  ;;  %v9242_v32 = vpop.f32.mrf.mxu1 }
 0x2be   : > { %11236 = vst [vmem:[#allocation18_spill] sm:$0xff] %v9203_v41  ;;  %v1191_v27 = vadd.f32 %v8959_v26, %v1155_v40  ;;  %v619_v47 = vmul.f32 %v9221_v18, %v9221_v18 }
 0x2bf   : > { %v985_v34 = vmul.f32 %v7534_v59, %v984_v4  ;;  %v2008_v31 = vor.u32 %v2007_v55, %v2004_v46  ;;  %11237 = vst [vmem:[#allocation19_spill] sm:$0xff] %v9242_v32  ;;  %v1455_v40 = vrot.slane %v1451_v8, 4 }
 0x2c0   : > { %7179 = vmatmul.msk.bf16.gmra.mxu3 %vm420_vm0, %v7428_v22  ;;  %v710_v22 = vsel %vm420_vm0, %v618_v63, 0.0  ;;  %v1452_v63 = vshll.u32 %v1278_v61, 16  ;;  %v1279_v15 = vpack.c.bf16 %v1191_v27, %v1191_v27 }
 0x2c1   : > { %711 = vadd.xlane.f32.xlu2 %v710_v22  ;;  %v685_v57 = vpop.xlane.xlu2 %684  ;;  %v989_v22 = vsel %vm988_vm8, %v7534_v59, %v985_v34  ;;  %v1775_v53 = vld [vmem:[#allocation2 + $0x74] sm:$0x1]  ;;  %v2009_v55 = vrot.slane %v2008_v31, 4 }
 0x2c2   : > { %v737_v12 = vmul.f32 %v685_v57, %v7772_v30  ;;  %v1454_v3 = vor.u32 %v1452_v63, %v1451_v8  ;;  %v1457_v11 = vshrl.u32 %v1279_v15, 16  ;;  %v1460_v36 = vshll.u32 %v1279_v15, 16 }
 0x2c3   : > { %v2923_v33 = vpop.f32.mrf.mxu3  ;;  %v1120_v19 = vmul.f32 %v989_v22, %v8897_v62  ;;  %v713_v57 = vsel %vm420_vm0, %v619_v47, 0.0  ;;  %v1688_v62 = vld [vmem:[#allocation2 + $0x80] sm:$0x1] }
 0x2c4   : > { %v9223_v14 = vadd.f32 1e-05, %v737_v12  ;;  %v9232_v24 = vadd.f32 %v2923_v33, %v2571_v38  ;;  %v1685_v58 = vsel %vm8102_vm7, %v1454_v3, %v1684_v56  ;;  %v7415_v61 = vld [vmem:[#allocation2 + $0x6c] sm:$0xff]  ;;  %v1459_v59 = vrot.slane %v1457_v11, 7  ;;  %714 = vadd.xlane.f32.xlu0 %v713_v57 }
 0x2c5   : > { %1686 = vst [vmem:[#allocation2 + $0x78] sm:$0xf] %v1685_v58  ;;  %v1752_v0 = vld [vmem:[#allocation2 + $0x70] sm:$0xf]  ;;  %v1156_v29 = vmul.f32 %v8945_v50, %v1120_v19  ;;  %7068 = vmatmul.msk.bf16.gmra.mxu1 %vm420_vm0, %v7415_v61  ;;  %v2699_v56 = vrot.slane %v1775_v53, 5  ;;  %v9255_v58 = vpop.f32.mrf.mxu2 }
 0x2c6   : > { %7535 = vrsqrt.f32 %v9223_v14  ;;  %v2696_v51 = vrot.slane %v1752_v0, 5  ;;  %v2011_v46 = vshll.u32 %v1752_v0, 16  ;;  %v2015_v63 = vshrl.u32 %v1752_v0, 16  ;;  %11238 = vst [vmem:[#allocation20_spill] sm:$0xff] %v9255_v58 }
 0x2c7   : > { %v1462_v27 = vor.u32 %v1460_v36, %v1459_v59  ;;  %v1464_v7 = vrot.slane %v1459_v59, 4  ;;  %v1192_v38 = vadd.f32 %v8959_v26, %v1156_v29  ;;  %vm996_vm11 = vweird.f32 %v9223_v14 }
 0x2c8   : > { %v2697_v3 = vsel %vm8376_vm10, %v7084_v39, %v2696_v51  ;;  %v2698_v15 = vrot.slane %v2696_v51, 4  ;;  %v2013_v8 = vrot.slane %v2011_v46, 5  ;;  %v2017_v31 = vrot.slane %v2015_v63, 4 }
 0x2c9   : > { %v1463_v33 = vsel %vm8156_vm13, %v1455_v40, %v1462_v27  ;;  %v1689_v47 = vsel %vm8164_vm14, %v1464_v7, %v1688_v62  ;;  %v2763_v57 = vunpack.c.l.b16 %v2697_v3  ;;  %v2021_v46 = vshll.u32 %v1775_v53, 16  ;;  %v1691_v27 = vld [vmem:[#allocation2 + $0x84] sm:$0xf]  ;;  %v9270_v3 = vpop.f32.mrf.mxu0 }
 0x2ca   : > { %1687 = vst.msk [vmem:[#allocation2 + $0x7c] sm:$0xf] %vm1204_vm2, %v1463_v33  ;;  %v2700_v36 = vsel %vm8376_vm10, %v2698_v15, %v2699_v56  ;;  %v2018_v0 = vor.u32 %v2017_v31, %v2013_v8  ;;  %v2014_v51 = vsel %vm8454_vm4, %v2009_v55, %v2013_v8  ;;  %v7430_v33 = vld [vmem:[#allocation2 + $0x6c] sm:$0xff] }
 0x2cb   : > { %v2925_v22 = vpop.f32.mrf.mxu3  ;;  %1690 = vst [vmem:[#allocation2 + $0x80] sm:$0x1] %v1689_v47  ;;  %v2764_v61 = vunpack.c.l.b16 %v2700_v36  ;;  %v2023_v56 = vrot.slane %v2021_v46, 5  ;;  %v2189_v8 = vunpack.c.l.b16 %v2014_v51 }
 0x2cc   : > { %v9239_v12 = vpop.eup %7535  ;;  %v9260_v39 = vadd.f32 %v2925_v22, %v9153_v54  ;;  %v1753_v40 = vld [vmem:[#allocation2 + $0x78] sm:$0xf]  ;;  %v2019_v54 = vrot.slane %v2018_v0, 4  ;;  %11240 = vst [vmem:[#allocation22_spill] sm:$0xff] %v9270_v3  ;;  %v1726_v3 = vld [vmem:[#allocation2 + $0xc0] sm:$0xf] }
 0x2cd   : > { %v991_v4 = vmul.f32 %v9239_v12, %v9223_v14  ;;  %vm997_vm9 = vweird.f32 %v9239_v12  ;;  %v2026_v63 = vshrl.u32 %v1753_v40, 16 }
 0x2ce   : > { %11239 = vst [vmem:[#allocation21_spill] sm:$0xff] %v9260_v39  ;;  %vm998_vm3 = vmor %vm996_vm11, %vm997_vm9  ;;  %v2024_v55 = vsel %vm8454_vm4, %v2019_v54, %v2023_v56 }
 0x2cf   : > { %v992_v34 = vmul.f32 %v9239_v12, %v991_v4  ;;  %v2786_v4 = vpack.c.b16 %v2764_v61, %v2763_v57  ;;  %v2028_v14 = vrot.slane %v2026_v63, 4  ;;  %v2190_v31 = vunpack.c.l.b16 %v2024_v55 }
 0x2d0   : > { %7180 = vmatmul.msk.bf16.gmra.mxu3 %vm420_vm0, %v7429_v21  ;;  %v1280_v21 = vpack.c.bf16 %v1192_v38, %v1192_v38  ;;  %v2530_v38 = vpop.f32.mrf.mxu1 }
 0x2d1   : > { %v993_v11 = vmul.f32 0.5, %v992_v34  ;;  %v2029_v34 = vshll.u32 %v1753_v40, 16  ;;  %7101 = vmatmul.msk.bf16.gmra.mxu2 %vm420_vm0, %v2786_v4  ;;  %v1754_v36 = vld [vmem:[#allocation2 + $0x7c] sm:$0xf]  ;;  %v2212_v46 = vpack.c.b16 %v2190_v31, %v2189_v8 }
 0x2d2   : > { %v1466_v19 = vshrl.u32 %v1280_v21, 16  ;;  %v1469_v59 = vshll.u32 %v1280_v21, 16  ;;  %v1776_v0 = vld [vmem:[#allocation2 + $0x80] sm:$0x1] }
 0x2d3   : > { %v994_v29 = vsub.f32 1.5, %v993_v11  ;;  %v2928_v22 = vpop.f32.mrf.mxu3  ;;  %v7416_v11 = vld [vmem:[#allocation2 + $0x78] sm:$0xff]  ;;  %v2031_v57 = vrot.slane %v2029_v34, 5  ;;  %v2706_v54 = vrot.slane %v1776_v0, 5  ;;  %6988 = vmatmul.msk.bf16.gmra.mxu0 %vm420_vm0, %v2212_v46 }
 0x2d4   : > { %v9266_v62 = vrot.slane %v1466_v19, 7  ;;  %v2590_v19 = vld [vmem:[#allocation2 + $0x78] sm:$0xe] }
 0x2d5   : > { %v995_v7 = vmul.f32 %v9239_v12, %v994_v29  ;;  %v2035_v29 = vshll.u32 %v1754_v36, 16  ;;  %v7085_v40 = vrot.slane %v2590_v19, 9  ;;  %7069 = vmatmul.msk.bf16.gmra.mxu1 %vm420_vm0, %v7416_v11  ;;  %v2032_v34 = vor.u32 %v2031_v57, %v2028_v14 }
 0x2d6   : > { %v1471_v15 = vor.u32 %v1469_v59, %v9266_v62  ;;  %v2703_v59 = vrot.slane %v1754_v36, 5 }
 0x2d7   : > { %v999_v53 = vsel %vm998_vm3, %v9239_v12, %v995_v7  ;;  %v9283_v12 = vadd.f32 %v2928_v22, %v9157_v20  ;;  %v2037_v63 = vrot.slane %v2035_v29, 5  ;;  %v2045_v7 = vshll.u32 %v1776_v0, 16 }
 0x2d8   : > { %v1692_v47 = vsel %vm8102_vm7, %v1471_v15, %v1691_v27  ;;  %v1121_v21 = vmul.f32 %v999_v53, %v8970_v6  ;;  %v2039_v6 = vshrl.u32 %v1754_v36, 16  ;;  %v2705_v4 = vrot.slane %v2703_v59, 4 }
 0x2d9   : > { %1693 = vst [vmem:[#allocation2 + $0x84] sm:$0xf] %v1692_v47  ;;  %v2704_v56 = vsel %vm8376_vm10, %v7085_v40, %v2703_v59  ;;  %v7222_v47 = vld [vmem:[%s11172_s1 + $0xa] sm:$0x3]  ;;  %v2047_v36 = vrot.slane %v2045_v7, 5  ;;  %v2033_v0 = vrot.slane %v2032_v34, 4 }
 0x2da   : > { %v1157_v51 = vmul.f32 %v8945_v50, %v1121_v21  ;;  %v2041_v20 = vrot.slane %v2039_v6, 4  ;;  %v2707_v50 = vsel %vm8376_vm10, %v2705_v4, %v2706_v54  ;;  %v2765_v31 = vunpack.c.l.b16 %v2704_v56 }
 0x2db   : > { %v2766_v55 = vunpack.c.l.b16 %v2707_v50  ;;  %v2930_v22 = vpop.f32.mrf.mxu3  ;;  %v4180_v59 = vsel %vm2267_vm12, %v7222_v47, 0  ;;  %v2038_v40 = vsel %vm8454_vm4, %v2033_v0, %v2037_v63 }
 0x2dc   : > { %v1193_v27 = vadd.f32 %v8959_v26, %v1157_v51  ;;  %v2042_v8 = vor.u32 %v2041_v20, %v2037_v63  ;;  %v9302_v14 = vadd.f32 %v2930_v22, %v9165_v13  ;;  %4189 = vmatpush.bf16.msrb.mxu1 %v4180_v59  ;;  %v7239_v13 = vld [vmem:[%s11172_s1 + $0xc] sm:$0x3]  ;;  %v2191_v63 = vunpack.c.l.b16 %v2038_v40 }
 0x2dd   : > { %v2883_v61 = vpop.f32.mrf.mxu2  ;;  %v2787_v46 = vpack.c.b16 %v2766_v55, %v2765_v31  ;;  %v4467_v54 = vsel %vm2267_vm12, %v7239_v13, 0 }
 0x2de   : > { %v1281_v15 = vpack.c.bf16 %v1193_v27, %v1193_v27  ;;  %v2043_v11 = vrot.slane %v2042_v8, 4  ;;  %v1472_v27 = vrot.slane %v9266_v62, 4  ;;  %4476 = vmatpush.bf16.msrb.mxu2 %v4467_v54  ;;  %v7431_v8 = vld [vmem:[#allocation2 + $0x78] sm:$0xff] }
 0x2e0   : > { %7181 = vmatmul.msk.bf16.gmra.mxu3 %vm420_vm0, %v7430_v33  ;;  %v9294_v33 = vpop.f32.mrf.mxu1  ;;  %v1474_v21 = vshrl.u32 %v1281_v15, 16  ;;  %v1477_v51 = vshll.u32 %v1281_v15, 16  ;;  %v2048_v6 = vsel %vm8454_vm4, %v2043_v11, %v2047_v36  ;;  %v1755_v50 = vld [vmem:[#allocation2 + $0x84] sm:$0xf]  ;;  %v3252_v36 = vld [vmem:[#allocation2 + $0x10] sm:$0xf] }
 0x2e1   : > { %11241 = vst [vmem:[#allocation23_spill] sm:$0xff] %v9294_v33  ;;  %v2192_v56 = vunpack.c.l.b16 %v2048_v6  ;;  %7102 = vmatmul.msk.bf16.gmra.mxu2 %vm420_vm0, %v2787_v46  ;;  %v2053_v47 = vshll.u32 %v1755_v50, 16  ;;  %v2591_v11 = vld [vmem:[#allocation2 + $0x84] sm:$0xe]  ;;  %v3971_v13 = vrot.slane %v3252_v36, 5 }
 0x2e2   : > { %v2310_v53 = vpop.f32.mrf.mxu0  ;;  %v1476_v29 = vrot.slane %v1474_v21, 7  ;;  %v7086_v6 = vrot.slane %v2591_v11, 9  ;;  %v3309_v11 = vshll.u32 %v3252_v36, 16 }
 0x2e3   : > { %v2531_v26 = vadd.f32 %v2530_v38, %v2310_v53  ;;  %v7320_v38 = vld [vmem:[%s11172_s1 + $0xe] sm:$0x3]  ;;  %v3139_v62 = vpop.f32.mrf.mxu3  ;;  %v2213_v55 = vpack.c.b16 %v2192_v56, %v2191_v63  ;;  %v2055_v59 = vrot.slane %v2053_v47, 5 }
 0x2e4   : > { %v5121_v4 = vsel %vm2267_vm12, %v7320_v38, 0  ;;  %v1479_v20 = vor.u32 %v1477_v51, %v1476_v29  ;;  %v1481_v7 = vrot.slane %v1476_v29, 4  ;;  %v9329_v22 = vadd.f32 %v3139_v62, %v8797_v5  ;;  %v7353_v38 = vld [vmem:[%s11172_s1 + $0x10] sm:$0x3] }
 0x2e5   : > { %v9299_v19 = vadd.f32 %v2883_v61, %v2531_v26  ;;  %v9304_v57 = vpop.f32.mrf.mxu2  ;;  %v1695_v61 = vld [vmem:[#allocation2 + $0x8c] sm:$0x1]  ;;  %5130 = vmatpush.bf16.msra.mxu3 %v5121_v4  ;;  %v2050_v26 = vshrl.u32 %v1755_v50, 16  ;;  %6989 = vmatmul.msk.bf16.gmra.mxu0 %vm420_vm0, %v2213_v55  ;;  %v5519_v5 = vsel %vm2267_vm12, %v7353_v38, 0  ;;  %v3313_v38 = vshrl.u32 %v3252_v36, 16 }
 0x2e6   : > { %11242 = vst [vmem:[#allocation24_spill] sm:$0xff] %v9304_v57  ;;  %v1480_v34 = vsel %vm8156_vm13, %v1472_v27, %v1479_v20  ;;  %v1696_v15 = vsel %vm8164_vm14, %v1481_v7, %v1695_v61  ;;  %5528 = vmatpush.bf16.msra.mxu0 %v5519_v5 }
 0x2e7   : > { %1694 = vst.msk [vmem:[#allocation2 + $0x88] sm:$0xf] %vm1204_vm2, %v1480_v34  ;;  %v2052_v0 = vrot.slane %v2050_v26, 4 }
 0x2e8   : > { %1697 = vst [vmem:[#allocation2 + $0x8c] sm:$0x1] %v1696_v15  ;;  %v2535_v21 = vpop.f32.mrf.mxu1 }
 0x2e9   : > { %v2056_v7 = vor.u32 %v2055_v59, %v2052_v0 }
 0x2ea   : > { %v9324_v53 = vpop.f32.mrf.mxu0 }
 0x2eb   : > { %11243 = vst [vmem:[#allocation25_spill] sm:$0xff] %v9324_v53  ;;  %v9338_v20 = vpop.f32.mrf.mxu3 }
 0x2ed   : > { %v2888_v31 = vpop.f32.mrf.mxu2 }
 0x2ee   : > { %v7417_v51 = vld [vmem:[#allocation2 + $0x84] sm:$0xff] }
 0x2ef   : > { %v1756_v46 = vld [vmem:[#allocation2 + $0x88] sm:$0xf]  ;;  %v1777_v40 = vld [vmem:[#allocation2 + $0x8c] sm:$0x1]  ;;  %7070 = vmatmul.msk.bf16.gmra.mxu1 %vm420_vm0, %v7417_v51 }
 0x2f0   : > { %7182 = vmatmul.msk.bf16.gmra.mxu3 %vm420_vm0, %v7431_v8  ;;  %v2710_v4 = vrot.slane %v1756_v46, 5  ;;  %v2059_v54 = vshll.u32 %v1756_v46, 16  ;;  %v2063_v27 = vshrl.u32 %v1756_v46, 16  ;;  %v2713_v15 = vrot.slane %v1777_v40, 5  ;;  %v3253_v8 = vld [vmem:[#allocation2 + $0x14] sm:$0x1]  ;;  %v9344_v26 = vpop.f32.mrf.mxu1 }
 0x2f1   : > { %v2069_v55 = vshll.u32 %v1777_v40, 16  ;;  %11244 = vst [vmem:[#allocation26_spill] sm:$0xff] %v9344_v26  ;;  %v3905_v46 = vld [vmem:[#allocation2 + $0xc] sm:$0xe]  ;;  %v3974_v5 = vrot.slane %v3253_v8, 5 }
 0x2f2   : > { %v2315_v29 = vpop.f32.mrf.mxu0  ;;  %v2711_v50 = vsel %vm8376_vm10, %v7086_v6, %v2710_v4  ;;  %v2712_v34 = vrot.slane %v2710_v4, 4  ;;  %v2061_v63 = vrot.slane %v2059_v54, 5  ;;  %v2065_v62 = vrot.slane %v2063_v27, 4  ;;  %v3251_v6 = vld [vmem:[#allocation2 + $0xc] sm:$0xf] }
 0x2f3   : > { %v2536_v61 = vadd.f32 %v2535_v21, %v2315_v29  ;;  %v3973_v21 = vrot.slane %v3971_v13, 4  ;;  %v2057_v29 = vrot.slane %v2056_v7, 4  ;;  %v2071_v27 = vrot.slane %v2069_v55, 5  ;;  %v3144_v7 = vpop.f32.mrf.mxu3 }
 0x2f4   : > { %v2714_v47 = vsel %vm8376_vm10, %v2712_v34, %v2713_v15  ;;  %v2066_v51 = vor.u32 %v2065_v62, %v2061_v63  ;;  %v7206_v34 = vrot.slane %v3905_v46, 9  ;;  %v3300_v15 = vshrl.u32 %v3251_v6, 16  ;;  %v7432_v62 = vld [vmem:[#allocation2 + $0x84] sm:$0xff] }
 0x2f5   : > { %v9340_v56 = vadd.f32 %v2888_v31, %v2536_v61  ;;  %v9348_v0 = vpop.f32.mrf.mxu2  ;;  %v2767_v31 = vunpack.c.l.b16 %v2711_v50  ;;  %v2768_v59 = vunpack.c.l.b16 %v2714_v47  ;;  %v2062_v4 = vsel %vm8454_vm4, %v2057_v29, %v2061_v63 }
 0x2f6   : > { %11245 = vst [vmem:[#allocation27_spill] sm:$0xff] %v9348_v0  ;;  %v2067_v54 = vrot.slane %v2066_v51, 4  ;;  %v3975_v36 = vsel %vm8376_vm10, %v3973_v21, %v3974_v5  ;;  %v3303_v47 = vshll.u32 %v3251_v6, 16  ;;  %v3311_v0 = vrot.slane %v3309_v11, 5 }
 0x2f7   : > { %v2788_v40 = vpack.c.b16 %v2768_v59, %v2767_v31  ;;  %v3315_v31 = vrot.slane %v3313_v38, 4  ;;  %v9360_v59 = vadd.f32 %v3144_v7, %v8824_v2  ;;  %v2193_v63 = vunpack.c.l.b16 %v2062_v4 }
 0x2f8   : > { %v2072_v50 = vsel %vm8454_vm4, %v2067_v54, %v2071_v27  ;;  %v3972_v29 = vsel %vm8376_vm10, %v7206_v34, %v3971_v13  ;;  %v4084_v21 = vunpack.c.l.b16 %v3975_v36  ;;  %v3302_v5 = vrot.slane %v3300_v15, 4  ;;  %v3255_v27 = vld [vmem:[#allocation2 + $0x1c] sm:$0xf]  ;;  %v2540_v6 = vpop.f32.mrf.mxu1 }
 0x2f9   : > { %7103 = vmatmul.msk.bf16.gmra.mxu2 %vm420_vm0, %v2788_v40  ;;  %v2194_v55 = vunpack.c.l.b16 %v2072_v50  ;;  %v4083_v46 = vunpack.c.l.b16 %v3972_v29  ;;  %v3305_v40 = vrot.slane %v3303_v47, 5  ;;  %v3316_v54 = vor.u32 %v3315_v31, %v3311_v0 }
 0x2fa   : > { %v9350_v61 = vpop.f32.mrf.mxu0  ;;  %v3319_v4 = vshll.u32 %v3253_v8, 16  ;;  %v3978_v50 = vrot.slane %v3255_v27, 5  ;;  %v3333_v29 = vshll.u32 %v3255_v27, 16  ;;  %v3337_v8 = vshrl.u32 %v3255_v27, 16 }
 0x2fb   : > { %11246 = vst [vmem:[#allocation28_spill] sm:$0xff] %v9350_v61  ;;  %v2214_v51 = vpack.c.b16 %v2194_v55, %v2193_v63  ;;  %v4115_v38 = vpack.c.b16 %v4084_v21, %v4083_v46  ;;  %v9366_v26 = vpop.f32.mrf.mxu3  ;;  %v3306_v13 = vor.u32 %v3305_v40, %v3302_v5  ;;  %v3317_v34 = vrot.slane %v3316_v54, 4  ;;  %v3906_v55 = vld [vmem:[#allocation2 + $0x18] sm:$0xe] }
 0x2fc   : > { %v3321_v15 = vrot.slane %v3319_v4, 5  ;;  %v3980_v47 = vrot.slane %v3978_v50, 4  ;;  %v7438_v46 = vld [vmem:[#allocation2 + $0x18] sm:$0xff]  ;;  %v7207_v40 = vrot.slane %v3906_v55, 9 }
 0x2fd   : > { %6990 = vmatmul.msk.bf16.gmra.mxu0 %vm420_vm0, %v2214_v51  ;;  %v2893_v2 = vpop.f32.mrf.mxu2  ;;  %v3307_v31 = vrot.slane %v3306_v13, 4  ;;  %v3254_v51 = vld [vmem:[#allocation2 + $0x18] sm:$0xf]  ;;  %v3339_v13 = vrot.slane %v3337_v8, 4 }
 0x2fe   : > { %v3322_v63 = vsel %vm8454_vm4, %v3317_v34, %v3321_v15  ;;  %v3327_v4 = vshll.u32 %v3254_v51, 16 }
 0x2ff   : > { %7223 = vmatmul.msk.bf16.vlgmr.msrb.gmra.mxu1 %vm420_vm0, %v4115_v38  ;;  %v3686_v5 = vunpack.c.l.b16 %v3322_v63  ;;  %v3324_v38 = vshrl.u32 %v3254_v51, 16 }
 0x300   : > { %7183 = vmatmul.msk.bf16.gmra.mxu3 %vm420_vm0, %v7432_v62  ;;  %v3256_v62 = vld [vmem:[#allocation2 + $0x20] sm:$0x1]  ;;  %v3329_v55 = vrot.slane %v3327_v4, 5 }
 0x301   : > { %v3981_v21 = vrot.slane %v3256_v62, 5  ;;  %v3326_v63 = vrot.slane %v3324_v38, 4  ;;  %v3343_v8 = vshll.u32 %v3256_v62, 16 }
 0x302   : > { %v2320_v11 = vpop.f32.mrf.mxu0 }
 0x303   : > { %v2541_v7 = vadd.f32 %v2540_v6, %v2320_v11  ;;  %v3312_v6 = vsel %vm8454_vm4, %v3307_v31, %v3311_v0  ;;  %v3982_v54 = vsel %vm8376_vm10, %v3980_v47, %v3981_v21  ;;  %v3149_v11 = vpop.f32.mrf.mxu3  ;;  %v3979_v0 = vsel %vm8376_vm10, %v7207_v40, %v3978_v50  ;;  %v3257_v40 = vld [vmem:[#allocation2 + $0x24] sm:$0xf] }
 0x304   : > { %v9379_v27 = vadd.f32 %v3149_v11, %v8835_v25  ;;  %v3685_v34 = vunpack.c.l.b16 %v3312_v6  ;;  %v4086_v15 = vunpack.c.l.b16 %v3982_v54  ;;  %v4085_v47 = vunpack.c.l.b16 %v3979_v0  ;;  %v3259_v11 = vld [vmem:[#allocation2 + $0x2c] sm:$0x1] }
 0x305   : > { %v9369_v36 = vadd.f32 %v2893_v2, %v2541_v7  ;;  %v7433_v2 = vld [vmem:[#allocation2 + $0x90] sm:$0xff]  ;;  %v3335_v7 = vrot.slane %v3333_v29, 5  ;;  %v3330_v6 = vor.u32 %v3329_v55, %v3326_v63  ;;  %v3345_v54 = vrot.slane %v3343_v8, 5 }
 0x306   : > { %v3717_v31 = vpack.c.b16 %v3686_v5, %v3685_v34  ;;  %v4116_v29 = vpack.c.b16 %v4086_v15, %v4085_v47  ;;  %v3907_v5 = vld [vmem:[#allocation2 + $0x24] sm:$0xe]  ;;  %v3348_v38 = vshrl.u32 %v3257_v40, 16  ;;  %v3351_v4 = vshll.u32 %v3257_v40, 16  ;;  %v7434_v40 = vld [vmem:[#allocation2 + $0x9c] sm:$0xff] }
 0x307   : > { %v3340_v21 = vor.u32 %v3339_v13, %v3335_v7  ;;  %v3331_v13 = vrot.slane %v3330_v6, 4  ;;  %v7208_v15 = vrot.slane %v3907_v5, 9  ;;  %v7439_v47 = vld [vmem:[#allocation2 + $0x24] sm:$0xff] }
 0x308   : > { %v3353_v8 = vrot.slane %v3351_v4, 5 }
 0x309   : > { %7304 = vmatmul.msk.bf16.vlgmr.msrb.gmra.mxu2 %vm420_vm0, %v7438_v46  ;;  %v3258_v46 = vld [vmem:[#allocation2 + $0x28] sm:$0xf]  ;;  %v3341_v50 = vrot.slane %v3340_v21, 4  ;;  %v3336_v63 = vsel %vm8454_vm4, %v3331_v13, %v3335_v7 }
 0x30a   : > { %v3985_v51 = vrot.slane %v3258_v46, 5  ;;  %v3357_v0 = vshll.u32 %v3258_v46, 16  ;;  %v3361_v62 = vshrl.u32 %v3258_v46, 16 }
 0x30b   : > { %v9385_v25 = vpop.f32.mrf.mxu3  ;;  %v3346_v34 = vsel %vm8454_vm4, %v3341_v50, %v3345_v54  ;;  %v3687_v54 = vunpack.c.l.b16 %v3336_v63  ;;  %v3262_v63 = vld [vmem:[#allocation2 + $0x38] sm:$0x1] }
 0x30c   : > { %v3688_v55 = vunpack.c.l.b16 %v3346_v34  ;;  %v3359_v61 = vrot.slane %v3357_v0, 5  ;;  %v3363_v50 = vrot.slane %v3361_v62, 4  ;;  %v3986_v5 = vsel %vm8376_vm10, %v7208_v15, %v3985_v51  ;;  %v3261_v34 = vld [vmem:[#allocation2 + $0x34] sm:$0xf] }
 0x30d   : > { %7190 = vmatmul.msk.bf16.vlgmr.msrb.gmra.mxu0 %vm420_vm0, %v3717_v31  ;;  %v3988_v31 = vrot.slane %v3259_v11, 5 }
 0x30e   : > { %v3718_v13 = vpack.c.b16 %v3688_v55, %v3687_v54  ;;  %v3364_v4 = vor.u32 %v3363_v50, %v3359_v61  ;;  %v3381_v50 = vshll.u32 %v3261_v34, 16 }
 0x30f   : > { %7224 = vmatmul.msk.bf16.gmra.mxu1 %vm420_vm0, %v4116_v29  ;;  %v3350_v29 = vrot.slane %v3348_v38, 4  ;;  %v4087_v38 = vunpack.c.l.b16 %v3986_v5 }
 0x310   : > { %7184 = vmatmul.msk.bf16.gmra.mxu3 %vm420_vm0, %v7433_v2  ;;  %v3987_v2 = vrot.slane %v3985_v51, 4  ;;  %v3365_v51 = vrot.slane %v3364_v4, 4 }
 0x312   : > { %v3989_v21 = vsel %vm8376_vm10, %v3987_v2, %v3988_v31  ;;  %v3354_v2 = vor.u32 %v3353_v8, %v3350_v29  ;;  %v3367_v31 = vshll.u32 %v3259_v11, 16  ;;  %v3385_v11 = vshrl.u32 %v3261_v34, 16 }
 0x313   : > { %v3154_v6 = vpop.f32.mrf.mxu3  ;;  %v4088_v7 = vunpack.c.l.b16 %v3989_v21  ;;  %v3908_v21 = vld [vmem:[#allocation2 + $0x30] sm:$0xe] }
 0x314   : > { %v9396_v46 = vadd.f32 %v3154_v6, %v9044_v1  ;;  %v3355_v62 = vrot.slane %v3354_v2, 4  ;;  %v3260_v1 = vld [vmem:[#allocation2 + $0x30] sm:$0xf]  ;;  %v3369_v15 = vrot.slane %v3367_v31, 5  ;;  %v7209_v5 = vrot.slane %v3908_v21, 9 }
 0x315   : > { %v4117_v0 = vpack.c.b16 %v4088_v7, %v4087_v38  ;;  %v3372_v55 = vshrl.u32 %v3260_v1, 16  ;;  %v3375_v29 = vshll.u32 %v3260_v1, 16  ;;  %v3995_v7 = vrot.slane %v3262_v63, 5 }
 0x316   : > { %v3360_v8 = vsel %vm8454_vm4, %v3355_v62, %v3359_v61  ;;  %v3370_v54 = vsel %vm8454_vm4, %v3365_v51, %v3369_v15  ;;  %v3383_v1 = vrot.slane %v3381_v50, 5  ;;  %v3387_v57 = vrot.slane %v3385_v11, 4  ;;  %v7435_v62 = vld [vmem:[#allocation2 + $0xa8] sm:$0xff] }
 0x317   : > { %v3689_v2 = vunpack.c.l.b16 %v3360_v8  ;;  %v3374_v38 = vrot.slane %v3372_v55, 4  ;;  %v3377_v4 = vrot.slane %v3375_v29, 5  ;;  %v3690_v31 = vunpack.c.l.b16 %v3370_v54 }
 0x318   : > { %v3388_v29 = vor.u32 %v3387_v57, %v3383_v1  ;;  %v3391_v50 = vshll.u32 %v3262_v63, 16  ;;  %v3909_v57 = vld [vmem:[#allocation2 + $0x3c] sm:$0xe] }
 0x319   : > { %7305 = vmatmul.msk.bf16.gmra.mxu2 %vm420_vm0, %v7439_v47  ;;  %v3992_v47 = vrot.slane %v3261_v34, 5  ;;  %v3378_v21 = vor.u32 %v3377_v4, %v3374_v38  ;;  %v3719_v55 = vpack.c.b16 %v3690_v31, %v3689_v2  ;;  %v3265_v2 = vld [vmem:[#allocation2 + $0x44] sm:$0x1] }
 0x31b   : > { %v9402_v6 = vpop.f32.mrf.mxu3  ;;  %v3993_v51 = vsel %vm8376_vm10, %v7209_v5, %v3992_v47  ;;  %v3379_v54 = vrot.slane %v3378_v21, 4  ;;  %v3393_v5 = vrot.slane %v3391_v50, 5  ;;  %v7210_v21 = vrot.slane %v3909_v57, 9 }
 0x31c   : > { %v4089_v8 = vunpack.c.l.b16 %v3993_v51 }
 0x31d   : > { %7191 = vmatmul.msk.bf16.gmra.mxu0 %vm420_vm0, %v3718_v13  ;;  %v7440_v13 = vld [vmem:[#allocation2 + $0x30] sm:$0xff]  ;;  %v3384_v38 = vsel %vm8454_vm4, %v3379_v54, %v3383_v1 }
 0x31f   : > { %7225 = vmatmul.msk.bf16.gmra.mxu1 %vm420_vm0, %v4117_v0 }
 0x320   : > { %7185 = vmatmul.msk.bf16.gmra.mxu3 %vm420_vm0, %v7434_v40  ;;  %v3994_v40 = vrot.slane %v3992_v47, 4  ;;  %v3263_v47 = vld [vmem:[#allocation2 + $0x3c] sm:$0xf] }
 0x322   : > { %v3996_v0 = vsel %vm8376_vm10, %v3994_v40, %v3995_v7  ;;  %v3264_v40 = vld [vmem:[#allocation2 + $0x40] sm:$0xf]  ;;  %v3389_v7 = vrot.slane %v3388_v29, 4 }
 0x323   : > { %v3159_v61 = vpop.f32.mrf.mxu3  ;;  %v4090_v15 = vunpack.c.l.b16 %v3996_v0  ;;  %v3405_v4 = vshll.u32 %v3264_v40, 16  ;;  %v3409_v31 = vshrl.u32 %v3264_v40, 16  ;;  %v7441_v29 = vld [vmem:[#allocation2 + $0x3c] sm:$0xff] }
 0x324   : > { %v9413_v34 = vadd.f32 %v3159_v61, %v9110_v35  ;;  %v3394_v63 = vsel %vm8454_vm4, %v3389_v7, %v3393_v5  ;;  %v3396_v61 = vshrl.u32 %v3263_v47, 16  ;;  %v7436_v7 = vld [vmem:[#allocation2 + $0xb4] sm:$0xff] }
 0x325   : > { %v4118_v11 = vpack.c.b16 %v4090_v15, %v4089_v8  ;;  %v3691_v8 = vunpack.c.l.b16 %v3384_v38  ;;  %v3692_v50 = vunpack.c.l.b16 %v3394_v63  ;;  %v3411_v1 = vrot.slane %v3409_v31, 4 }
 0x326   : > { %v3398_v33 = vrot.slane %v3396_v61, 4  ;;  %v3267_v61 = vld [vmem:[#allocation2 + $0x4c] sm:$0xf] }
 0x329   : > { %7306 = vmatmul.msk.bf16.gmra.mxu2 %vm420_vm0, %v7440_v13  ;;  %v3999_v13 = vrot.slane %v3264_v40, 5 }
 0x32b   : > { %v9419_v35 = vpop.f32.mrf.mxu3  ;;  %v4001_v0 = vrot.slane %v3999_v13, 4 }
 0x32c   : > { %11247 = vst [vmem:[#allocation29_spill] sm:$0xff] %v9419_v35  ;;  %v7443_v35 = vld [vmem:[#allocation2 + $0x54] sm:$0xff] }
 0x32d   : > { %7192 = vmatmul.msk.bf16.gmra.mxu0 %vm420_vm0, %v3719_v55  ;;  %v4002_v55 = vrot.slane %v3265_v2, 5 }
 0x32f   : > { %7226 = vmatmul.msk.bf16.gmra.mxu1 %vm420_vm0, %v4118_v11  ;;  %v3407_v11 = vrot.slane %v3405_v4, 5  ;;  %v4003_v40 = vsel %vm8376_vm10, %v4001_v0, %v4002_v55  ;;  %v3720_v4 = vpack.c.b16 %v3692_v50, %v3691_v8  ;;  %v9439_v8 = vpop.f32.mrf.mxu1  ;;  %v3268_v50 = vld [vmem:[#allocation2 + $0x50] sm:$0x1] }
 0x330   : > { %7186 = vmatmul.msk.bf16.gmra.mxu3 %vm420_vm0, %v7435_v62  ;;  %v3399_v62 = vshll.u32 %v3263_v47, 16  ;;  %v4000_v47 = vsel %vm8376_vm10, %v7210_v21, %v3999_v13  ;;  %v4092_v57 = vunpack.c.l.b16 %v4003_v40  ;;  %v4006_v21 = vrot.slane %v3267_v61, 5  ;;  %11248 = vst [vmem:[#allocation30_spill] sm:$0xff] %v9439_v8 }
 0x331   : > { %v3412_v63 = vor.u32 %v3411_v1, %v3407_v11  ;;  %v4091_v0 = vunpack.c.l.b16 %v4000_v47  ;;  %v3429_v1 = vshll.u32 %v3267_v61, 16 }
 0x332   : > { %v3401_v53 = vrot.slane %v3399_v62, 5  ;;  %v3415_v62 = vshll.u32 %v3265_v2, 16  ;;  %v3433_v2 = vshrl.u32 %v3267_v61, 16 }
 0x333   : > { %v3164_v5 = vpop.f32.mrf.mxu3  ;;  %v3413_v13 = vrot.slane %v3412_v63, 4  ;;  %v3266_v63 = vld [vmem:[#allocation2 + $0x48] sm:$0xf]  ;;  %v9450_v61 = vrot.slane %v3429_v1, 5 }
 0x334   : > { %v712_v51 = vpop.xlane.xlu2 %711  ;;  %v9434_v38 = vadd.f32 %v3164_v5, %v9139_v17  ;;  %v3402_v31 = vor.u32 %v3401_v53, %v3398_v33  ;;  %v3417_v17 = vrot.slane %v3415_v62, 5 }
 0x335   : > { %v746_v15 = vmul.f32 %v712_v51, %v7772_v30  ;;  %v4119_v51 = vpack.c.b16 %v4092_v57, %v4091_v0  ;;  %v4008_v57 = vrot.slane %v4006_v21, 4 }
 0x336   : > { %v3418_v5 = vsel %vm8454_vm4, %v3413_v13, %v3417_v17  ;;  %v3423_v17 = vshll.u32 %v3266_v63, 16 }
 0x337   : > { %v778_v54 = vadd.f32 1e-05, %v746_v15  ;;  %v715_v55 = vpop.xlane.xlu0 %714 }
 0x339   : > { %7307 = vmatmul.msk.bf16.gmra.mxu2 %vm420_vm0, %v7441_v29  ;;  %7537 = vrsqrt.f32 %v778_v54  ;;  %v3403_v29 = vrot.slane %v3402_v31, 4  ;;  %vm1086_vm12 = vweird.f32 %v778_v54  ;;  %v4009_v31 = vrot.slane %v3268_v50, 5 }
 0x33b   : > { %v3408_v47 = vsel %vm8454_vm4, %v3403_v29, %v3407_v11  ;;  %v9448_v62 = vpop.f32.mrf.mxu3  ;;  %v3694_v29 = vunpack.c.l.b16 %v3418_v5 }
 0x33c   : > { %11249 = vst [vmem:[#allocation31_spill] sm:$0xff] %v9448_v62  ;;  %v3693_v11 = vunpack.c.l.b16 %v3408_v47  ;;  %v3439_v62 = vshll.u32 %v3268_v50, 16 }
 0x33d   : > { %7193 = vmatmul.msk.bf16.gmra.mxu0 %vm420_vm0, %v3720_v4 }
 0x33f   : > { %v7538_v15 = vpop.eup %7537  ;;  %7227 = vmatmul.msk.bf16.gmra.mxu1 %vm420_vm0, %v4119_v51  ;;  %v7442_v51 = vld [vmem:[#allocation2 + $0x48] sm:$0xff] }
 0x340   : > { %7187 = vmatmul.msk.bf16.gmra.mxu3 %vm420_vm0, %v7436_v7  ;;  %v1081_v40 = vmul.f32 %v7538_v15, %v778_v54  ;;  %v747_v7 = vmul.f32 %v715_v55, %v7772_v30  ;;  %vm1087_vm15 = vweird.f32 %v7538_v15  ;;  %v3910_v30 = vld [vmem:[#allocation2 + $0x48] sm:$0xe]  ;;  %v3435_v55 = vrot.slane %v3433_v2, 4 }
 0x341   : > { %vm1088_vm1 = vmor %vm1086_vm12, %vm1087_vm15  ;;  %v7211_v13 = vrot.slane %v3910_v30, 9  ;;  %v4010_v54 = vsel %vm8376_vm10, %v4008_v57, %v4009_v31  ;;  %v3721_v57 = vpack.c.b16 %v3694_v29, %v3693_v11  ;;  %v9462_v31 = vld [vmem:[#allocation2 + $0x58] sm:$0xf]  ;;  %v7615_v29 = vld [vmem:[%s11175_s4] ss:$0 sm:$0xff] }
 0x342   : > { %v1082_v33 = vmul.f32 %v7538_v15, %v1081_v40  ;;  %v9441_v53 = vadd.f32 1e-05, %v747_v7  ;;  %v3420_v7 = vshrl.u32 %v3266_v63, 16  ;;  %v9457_v1 = vpop.f32.mrf.mxu1  ;;  %v4094_v2 = vunpack.c.l.b16 %v4010_v54 }
 0x343   : > { %v3436_v47 = vor.u32 %v3435_v55, %v9450_v61  ;;  %v3425_v63 = vrot.slane %v3423_v17, 5  ;;  %v4013_v11 = vrot.slane %v9462_v31, 5  ;;  %v3441_v17 = vrot.slane %v3439_v62, 5  ;;  %v3271_v62 = vld [vmem:[#allocation2 + $0x5c] sm:$0x1] }
 0x344   : > { %v1083_v4 = vmul.f32 0.5, %v1082_v33  ;;  %7539 = vrsqrt.f32 %v9441_v53  ;;  %v4007_v33 = vsel %vm8376_vm10, %v7211_v13, %v4006_v21  ;;  %vm1096_vm5 = vweird.f32 %v9441_v53 }
 0x345   : > { %v3437_v55 = vrot.slane %v3436_v47, 4  ;;  %v4016_v32 = vrot.slane %v3271_v62, 5 }
 0x346   : > { %v1084_v0 = vsub.f32 1.5, %v1083_v4 }
 0x348   : > { %v1085_v40 = vmul.f32 %v7538_v15, %v1084_v0  ;;  %v4093_v0 = vunpack.c.l.b16 %v4007_v33  ;;  %v9477_v33 = vpop.f32.mrf.mxu0 }
 0x349   : > { %7308 = vmatmul.msk.bf16.gmra.mxu2 %vm420_vm0, %v7442_v51  ;;  %v3422_v51 = vrot.slane %v3420_v7, 4  ;;  %11250 = vst [vmem:[#allocation32_spill] sm:$0xff] %v9477_v33 }
 0x34a   : > { %v7540_v4 = vpop.eup %7539  ;;  %v1089_v8 = vsel %vm1088_vm1, %v7538_v15, %v1085_v40  ;;  %v7614_v15 = vld [vmem:[%s11174_s3] ss:$0 sm:$0xff] }
 0x34b   : > { %v1130_v5 = vmul.f32 %v1089_v8, %v9200_v60  ;;  %v1091_v30 = vmul.f32 %v7540_v4, %v9441_v53  ;;  %v3169_v60 = vpop.f32.mrf.mxu3  ;;  %v4120_v8 = vpack.c.b16 %v4094_v2, %v4093_v0  ;;  %vm1097_vm6 = vweird.f32 %v7540_v4  ;;  %v9479_v2 = vpop.f32.mrf.mxu2 }
 0x34c   : > { %v9474_v40 = vadd.f32 %v3169_v60, %v9299_v19  ;;  %v3426_v7 = vor.u32 %v3425_v63, %v3422_v51  ;;  %11251 = vst [vmem:[#allocation33_spill] sm:$0xff] %v9479_v2  ;;  %vm9483_vm8 = vmor %vm1096_vm5, %vm1097_vm6  ;;  %v9487_v19 = vpop.f32.mrf.mxu1  ;;  %v3442_v51 = vsel %vm8454_vm4, %v3437_v55, %v3441_v17  ;;  %v3453_v63 = vshll.u32 %v9462_v31, 16 }
 0x34d   : > { %v1166_v21 = vmul.f32 %v7614_v15, %v1130_v5  ;;  %v1092_v13 = vmul.f32 %v7540_v4, %v1091_v30  ;;  %7194 = vmatmul.msk.bf16.gmra.mxu0 %vm420_vm0, %v3721_v57  ;;  %v3911_v30 = vld [vmem:[#allocation2 + $0x54] sm:$0xe]  ;;  %v4015_v60 = vrot.slane %v4013_v11, 4 }
 0x34e   : > { %v3269_v57 = vld [vmem:[#allocation2 + $0x54] sm:$0xf]  ;;  %v9506_v0 = vrot.slane %v3453_v63, 5 }
 0x34f   : > { %v1202_v50 = vadd.f32 %v7615_v29, %v1166_v21  ;;  %v1093_v54 = vmul.f32 0.5, %v1092_v13  ;;  %7228 = vmatmul.msk.bf16.gmra.mxu1 %vm420_vm0, %v4120_v8  ;;  %v3457_v8 = vshrl.u32 %v9462_v31, 16  ;;  %v3444_v53 = vshrl.u32 %v3269_v57, 16 }
 0x351   : > { %v1290_v47 = vpack.c.bf16 %v1202_v50, %v1202_v50  ;;  %v1094_v5 = vsub.f32 1.5, %v1093_v54  ;;  %v3427_v50 = vrot.slane %v3426_v7, 4  ;;  %v7212_v54 = vrot.slane %v3911_v30, 9 }
 0x352   : > { %v3696_v7 = vunpack.c.l.b16 %v3442_v51 }
 0x353   : > { %v1551_v21 = vshrl.u32 %v1290_v47, 16  ;;  %v1095_v13 = vmul.f32 %v7540_v4, %v1094_v5  ;;  %v1554_v33 = vshll.u32 %v1290_v47, 16  ;;  %v9498_v17 = vpop.f32.mrf.mxu3  ;;  %v3432_v31 = vsel %vm8454_vm4, %v3427_v50, %v9450_v61  ;;  %v3273_v50 = vld [vmem:[#allocation2 + $0x64] sm:$0xf] }
 0x354   : > { %11254 = vst [vmem:[#allocation34_spill] sm:$0xff] %v9498_v17  ;;  %v3447_v5 = vshll.u32 %v3269_v57, 16  ;;  %v4017_v47 = vsel %vm8376_vm10, %v4015_v60, %v4016_v32  ;;  %v3695_v17 = vunpack.c.l.b16 %v3432_v31  ;;  %v4014_v61 = vsel %vm8376_vm10, %v7212_v54, %v4013_v11  ;;  %v9514_v32 = vpop.f32.mrf.mxu1 }
 0x355   : > { %v9493_v2 = vrot.slane %v1551_v21, 7  ;;  %v1099_v58 = vsel %vm9483_vm8, %v7540_v4, %v1095_v13  ;;  %v3459_v4 = vrot.slane %v3457_v8, 4  ;;  %v2898_v13 = vpop.f32.mrf.mxu2  ;;  %v4096_v51 = vunpack.c.l.b16 %v4017_v47  ;;  %v1730_v47 = vld [vmem:[#allocation2 + $0xc8] sm:$0x1] }
 0x356   : > { %v1131_v55 = vmul.f32 %v1099_v58, %v9221_v18  ;;  %v2325_v58 = vpop.f32.mrf.mxu0  ;;  %v3722_v63 = vpack.c.b16 %v3696_v7, %v3695_v17  ;;  %v3449_v60 = vrot.slane %v3447_v5, 5  ;;  %v4095_v8 = vunpack.c.l.b16 %v4014_v61 }
 0x357   : > { %v1556_v30 = vor.u32 %v1554_v33, %v9493_v2  ;;  %v2546_v57 = vadd.f32 %v9457_v1, %v2325_v58  ;;  %v3463_v11 = vshll.u32 %v3271_v62, 16  ;;  %v4591_v1 = vld [vmem:[#allocation2 + $0x1c] sm:$0xf]  ;;  %v4020_v7 = vrot.slane %v3273_v50, 5 }
 0x358   : > { %v1167_v21 = vmul.f32 %v7614_v15, %v1131_v55  ;;  %v3446_v15 = vrot.slane %v3444_v53, 4  ;;  %v4121_v55 = vpack.c.b16 %v4096_v51, %v4095_v8  ;;  %v4648_v58 = vshll.u32 %v4591_v1, 16  ;;  %v4590_v51 = vld [vmem:[#allocation2 + $0x18] sm:$0xf] }
 0x359   : > { %7309 = vmatmul.msk.bf16.gmra.mxu2 %vm420_vm0, %v7443_v35  ;;  %v1727_v18 = vsel %vm8102_vm7, %v1556_v30, %v1726_v3  ;;  %v3460_v35 = vor.u32 %v3459_v4, %v9506_v0  ;;  %v9517_v3 = vadd.f32 %v2898_v13, %v2546_v57  ;;  %v4652_v62 = vshrl.u32 %v4591_v1, 16  ;;  %v9526_v57 = vld [vmem:[#allocation2 + $0x68] sm:$0x1] }
 0x35a   : > { %1728 = vst [vmem:[#allocation2 + $0xc0] sm:$0xf] %v1727_v18  ;;  %v1203_v33 = vadd.f32 %v7615_v29, %v1167_v21  ;;  %v3450_v17 = vor.u32 %v3449_v60, %v3446_v15  ;;  %v3465_v18 = vrot.slane %v3463_v11, 5  ;;  %v1557_v13 = vrot.slane %v9493_v2, 4 }
 0x35b   : > { %v3174_v29 = vpop.f32.mrf.mxu3  ;;  %v3461_v53 = vrot.slane %v3460_v35, 4  ;;  %v3912_v35 = vld [vmem:[#allocation2 + $0x60] sm:$0xe]  ;;  %v3477_v8 = vshll.u32 %v3273_v50, 16  ;;  %v4639_v1 = vshrl.u32 %v4590_v51, 16 }
 0x35c   : > { %v1291_v43 = vpack.c.bf16 %v1203_v33, %v1203_v33  ;;  %v9521_v31 = vadd.f32 %v3174_v29, %v9340_v56  ;;  %v3451_v15 = vrot.slane %v3450_v17, 4  ;;  %v3481_v29 = vshrl.u32 %v3273_v50, 16 }
 0x35d   : > { %7195 = vmatmul.msk.bf16.gmra.mxu0 %vm420_vm0, %v3722_v63  ;;  %v2900_v21 = vpop.f32.mrf.mxu2  ;;  %v9528_v63 = vpop.f32.mrf.mxu1  ;;  %v3466_v60 = vsel %vm8454_vm4, %v3461_v53, %v3465_v18  ;;  %v4642_v17 = vshll.u32 %v4590_v51, 16  ;;  %v7213_v37 = vrot.slane %v3912_v35, 9 }
 0x35e   : > { %v1559_v54 = vshrl.u32 %v1291_v43, 16  ;;  %v1562_v30 = vshll.u32 %v1291_v43, 16  ;;  %v2327_v4 = vpop.f32.mrf.mxu0  ;;  %v4022_v43 = vrot.slane %v4020_v7, 4  ;;  %v3456_v49 = vsel %vm8454_vm4, %v3451_v15, %v9506_v0  ;;  %v4592_v15 = vld [vmem:[#allocation2 + $0x20] sm:$0x1] }
 0x35f   : > { %7229 = vmatmul.msk.bf16.gmra.mxu1 %vm420_vm0, %v4121_v55  ;;  %v2548_v56 = vadd.f32 %v9487_v19, %v2327_v4  ;;  %v3272_v19 = vld [vmem:[#allocation2 + $0x60] sm:$0xf]  ;;  %v4023_v55 = vrot.slane %v9526_v57, 5  ;;  %v3698_v4 = vunpack.c.l.b16 %v3466_v60  ;;  %v3697_v51 = vunpack.c.l.b16 %v3456_v49  ;;  %v3276_v49 = vld [vmem:[#allocation2 + $0x70] sm:$0xf] }
 0x360   : > { %v1561_v5 = vrot.slane %v1559_v54, 7  ;;  %v3471_v18 = vshll.u32 %v3272_v19, 16  ;;  %v4021_v0 = vsel %vm8376_vm10, %v7213_v37, %v4020_v7  ;;  %v4641_v60 = vrot.slane %v4639_v1, 4 }
 0x361   : > { %v9536_v54 = vadd.f32 %v2900_v21, %v2548_v56  ;;  %v4024_v50 = vsel %vm8376_vm10, %v4022_v43, %v4023_v55  ;;  %v3468_v21 = vshrl.u32 %v3272_v19, 16  ;;  %v4644_v35 = vrot.slane %v4642_v17, 5 }
 0x362   : > { %v1564_v61 = vor.u32 %v1562_v30, %v1561_v5  ;;  %v1566_v33 = vrot.slane %v1561_v5, 4  ;;  %v7444_v5 = vld [vmem:[#allocation2 + $0x60] sm:$0xff]  ;;  %v9545_v30 = vrot.slane %v4648_v58, 5  ;;  %v3723_v43 = vpack.c.b16 %v3698_v4, %v3697_v51 }
 0x363   : > { %v9540_v53 = vpop.f32.mrf.mxu3  ;;  %v4097_v55 = vunpack.c.l.b16 %v4021_v0  ;;  %v3487_v17 = vshll.u32 %v9526_v57, 16  ;;  %v4645_v4 = vor.u32 %v4644_v35, %v4641_v60  ;;  %v9567_v35 = vld [vmem:[#allocation2 + $0x74] sm:$0x1] }
 0x364   : > { %v1565_v11 = vsel %vm8156_vm13, %v1557_v13, %v1564_v61  ;;  %v1731_v2 = vsel %vm8164_vm14, %v1566_v33, %v1730_v47  ;;  %11255 = vst [vmem:[#allocation35_spill] sm:$0xff] %v9540_v53  ;;  %v4654_v47 = vrot.slane %v4652_v62, 4  ;;  %v9550_v13 = vrot.slane %v3477_v8, 5 }
 0x365   : > { %1729 = vst.msk [vmem:[#allocation2 + $0xc4] sm:$0xf] %vm1204_vm2, %v1565_v11  ;;  %v3483_v61 = vrot.slane %v3481_v29, 4  ;;  %v2903_v56 = vpop.f32.mrf.mxu2  ;;  %v4098_v62 = vunpack.c.l.b16 %v4024_v50  ;;  %v3470_v11 = vrot.slane %v3468_v21, 4  ;;  %v4593_v50 = vld [vmem:[#allocation2 + $0x24] sm:$0xf] }
 0x366   : > { %1732 = vst [vmem:[#allocation2 + $0xc8] sm:$0x1] %v1731_v2  ;;  %v2330_v33 = vpop.f32.mrf.mxu0  ;;  %v3473_v2 = vrot.slane %v3471_v18, 5  ;;  %v4655_v19 = vor.u32 %v4654_v47, %v9545_v30  ;;  %v3489_v57 = vrot.slane %v3487_v17, 5  ;;  %v4646_v60 = vrot.slane %v4645_v4, 4 }
 0x367   : > { %v2551_v58 = vadd.f32 %v9514_v32, %v2330_v33  ;;  %v4658_v32 = vshll.u32 %v4592_v15, 16  ;;  %v4122_v1 = vpack.c.b16 %v4098_v62, %v4097_v55  ;;  %v4027_v33 = vrot.slane %v3276_v49, 5  ;;  %v3275_v4 = vld [vmem:[#allocation2 + $0x6c] sm:$0xf] }
 0x368   : > { %v3474_v21 = vor.u32 %v3473_v2, %v3470_v11  ;;  %v4656_v18 = vrot.slane %v4655_v19, 4  ;;  %v4663_v15 = vshrl.u32 %v4593_v50, 16  ;;  %v4030_v17 = vrot.slane %v9567_v35, 5 }
 0x369   : > { %7310 = vmatmul.msk.bf16.gmra.mxu2 %vm420_vm0, %v7444_v5  ;;  %v9556_v8 = vadd.f32 %v2903_v56, %v2551_v58  ;;  %v3484_v5 = vor.u32 %v3483_v61, %v9550_v13  ;;  %v4594_v61 = vld [vmem:[#allocation2 + $0x28] sm:$0xf]  ;;  %v4660_v58 = vrot.slane %v4658_v32, 5  ;;  %v4029_v2 = vrot.slane %v4027_v33, 4  ;;  %v3913_v32 = vld [vmem:[#allocation2 + $0x6c] sm:$0xe] }
 0x36a   : > { %v4676_v19 = vshrl.u32 %v4594_v61, 16  ;;  %vm5678_vm2 = vcmask 64512  }
 0x36b   : > { %v3179_v37 = vpop.f32.mrf.mxu3  ;;  %v3485_v56 = vrot.slane %v3484_v5, 4  ;;  %v4661_v11 = vsel %vm8454_vm4, %v4656_v18, %v4660_v58  ;;  %v7445_v18 = vld [vmem:[#allocation2 + $0x6c] sm:$0xff] }
 0x36c   : > { %v7437_v29 = vld [vmem:[#allocation2 + $0xc0] sm:$0xff]  ;;  %v2555_v7 = vpop.f32.mrf.mxu1  ;;  %v9563_v47 = vadd.f32 %v3179_v37, %v9369_v36  ;;  %v4672_v36 = vshll.u32 %v4594_v61, 16  ;;  %v3501_v37 = vshll.u32 %v3276_v49, 16 }
 0x36d   : > { %7196 = vmatmul.msk.bf16.gmra.mxu0 %vm420_vm0, %v3723_v43  ;;  %7188 = vmatmul.msk.bf16.gmra.mxu3 %vm420_vm0, %v7437_v29  ;;  %v2905_v0 = vpop.f32.mrf.mxu2  ;;  %v4666_v43 = vshll.u32 %v4593_v50, 16  ;;  %v3475_v29 = vrot.slane %v3474_v21, 4  ;;  %v3490_v5 = vsel %vm8454_vm4, %v3485_v56, %v3489_v57  ;;  %v4665_v50 = vrot.slane %v4663_v15, 4 }
 0x36e   : > { %v2332_v51 = vpop.f32.mrf.mxu0  ;;  %v4651_v56 = vsel %vm8454_vm4, %v4646_v60, %v9545_v30  ;;  %v3700_v58 = vunpack.c.l.b16 %v3490_v5  ;;  %v4031_v15 = vsel %vm8376_vm10, %v4029_v2, %v4030_v17  ;;  %v3492_v57 = vshrl.u32 %v3275_v4, 16  ;;  %v4595_v5 = vld [vmem:[#allocation2 + $0x2c] sm:$0x1] }
 0x36f   : > { %7230 = vmatmul.msk.bf16.gmra.mxu1 %vm420_vm0, %v4122_v1  ;;  %v2553_v62 = vadd.f32 %v9528_v63, %v2332_v51  ;;  %v3505_v1 = vshrl.u32 %v3276_v49, 16  ;;  %v4668_v21 = vrot.slane %v4666_v43, 5  ;;  %v3480_v61 = vsel %vm8454_vm4, %v3475_v29, %v9550_v13 }
 0x370   : > { %v9586_v49 = vrot.slane %v4672_v36, 5  ;;  %v4678_v43 = vrot.slane %v4676_v19, 4  ;;  %v9591_v53 = vrot.slane %v3501_v37, 5  ;;  %v3699_v29 = vunpack.c.l.b16 %v3480_v61  ;;  %v3279_v61 = vld [vmem:[#allocation2 + $0x7c] sm:$0xf] }
 0x371   : > { %v9571_v55 = vadd.f32 %v2905_v0, %v2553_v62  ;;  %v5025_v0 = vunpack.c.l.b16 %v4661_v11  ;;  %v7214_v62 = vrot.slane %v3913_v32, 9  ;;  %v3507_v13 = vrot.slane %v3505_v1, 4 }
 0x372   : > { %v5024_v23 = vunpack.c.l.b16 %v4651_v56  ;;  %v4669_v60 = vor.u32 %v4668_v21, %v4665_v50  ;;  %v4100_v11 = vunpack.c.l.b16 %v4031_v15  ;;  %v3724_v2 = vpack.c.b16 %v3700_v58, %v3699_v29 }
 0x373   : > { %v9578_v51 = vpop.f32.mrf.mxu3  ;;  %v4028_v30 = vsel %vm8376_vm10, %v7214_v62, %v4027_v33  ;;  %v4679_v17 = vor.u32 %v4678_v43, %v9586_v49  ;;  %v3494_v37 = vrot.slane %v3492_v57, 4  ;;  %v3508_v1 = vor.u32 %v3507_v13, %v9591_v53  ;;  %v4597_v43 = vld [vmem:[#allocation2 + $0x34] sm:$0xf] }
 0x374   : > { %v9575_v63 = vpop.f32.mrf.mxu1  ;;  %11256 = vst [vmem:[#allocation36_spill] sm:$0xff] %v9578_v51  ;;  %v3495_v51 = vshll.u32 %v3275_v4, 16  ;;  %v5056_v19 = vpack.c.b16 %v5025_v0, %v5024_v23  ;;  %v4099_v4 = vunpack.c.l.b16 %v4028_v30  ;;  %v4670_v50 = vrot.slane %v4669_v60, 4 }
 0x375   : > { %v3511_v0 = vshll.u32 %v9567_v35, 16  ;;  %v4680_v15 = vrot.slane %v4679_v17, 4  ;;  %v3509_v13 = vrot.slane %v3508_v1, 4  ;;  %v9611_v35 = vld [vmem:[#allocation2 + $0x80] sm:$0x1]  ;;  %v4700_v17 = vshrl.u32 %v4597_v43, 16 }
 0x376   : > { %v3497_v41 = vrot.slane %v3495_v51, 5  ;;  %v4123_v23 = vpack.c.b16 %v4100_v11, %v4099_v4  ;;  %v4675_v29 = vsel %vm8454_vm4, %v4670_v50, %v9586_v49  ;;  %v3914_v4 = vld [vmem:[#allocation2 + $0x78] sm:$0xe]  ;;  %v3529_v1 = vshrl.u32 %v3279_v61, 16 }
 0x378   : > { %v3498_v57 = vor.u32 %v3497_v41, %v3494_v37  ;;  %v3525_v37 = vshll.u32 %v3279_v61, 16 }
 0x379   : > { %7311 = vmatmul.msk.bf16.gmra.mxu2 %vm420_vm0, %v7445_v18  ;;  %v4596_v18 = vld [vmem:[#allocation2 + $0x30] sm:$0xf] }
 0x37a   : > { %v2335_v36 = vpop.f32.mrf.mxu0  ;;  %v4687_v58 = vshrl.u32 %v4596_v18, 16  ;;  %v4690_v62 = vshll.u32 %v4596_v18, 16  ;;  %v3499_v18 = vrot.slane %v3498_v57, 4 }
 0x37b   : > { %v2556_v32 = vadd.f32 %v2555_v7, %v2335_v36  ;;  %v4682_v7 = vshll.u32 %v4595_v5, 16  ;;  %v3184_v21 = vpop.f32.mrf.mxu3  ;;  %v3513_v36 = vrot.slane %v3511_v0, 5 }
 0x37c   : > { %v2908_v39 = vpop.f32.mrf.mxu2  ;;  %v9600_v33 = vpop.f32.mrf.mxu1  ;;  %v9605_v51 = vadd.f32 %v3184_v21, %v9517_v3  ;;  %v4689_v11 = vrot.slane %v4687_v58, 4  ;;  %v4692_v5 = vrot.slane %v4690_v62, 5  ;;  %v4696_v3 = vshll.u32 %v4597_v43, 16  ;;  %v7446_v58 = vld [vmem:[#allocation2 + $0x78] sm:$0xff] }
 0x37d   : > { %v9597_v56 = vadd.f32 %v2908_v39, %v2556_v32  ;;  %7197 = vmatmul.msk.bf16.gmra.mxu0 %vm420_vm0, %v3724_v2  ;;  %7321 = vmatmul.msk.bf16.vlgmr.msra.gmra.mxu3 %vm420_vm0, %v5056_v19  ;;  %v4034_v39 = vrot.slane %v3279_v61, 5  ;;  %v4684_v30 = vrot.slane %v4682_v7, 5  ;;  %v3514_v49 = vsel %vm8454_vm4, %v3509_v13, %v3513_v36 }
 0x37e   : > { %v5026_v21 = vunpack.c.l.b16 %v4675_v29  ;;  %v3504_v62 = vsel %vm8454_vm4, %v3499_v18, %v9591_v53  ;;  %v4693_v43 = vor.u32 %v4692_v5, %v4689_v11  ;;  %v4698_v57 = vrot.slane %v4696_v3, 5  ;;  %v4598_v18 = vld [vmem:[#allocation2 + $0x38] sm:$0x1] }
 0x37f   : > { %7231 = vmatmul.msk.bf16.gmra.mxu1 %vm420_vm0, %v4123_v23  ;;  %v4685_v19 = vsel %vm8454_vm4, %v4680_v15, %v4684_v30  ;;  %v4036_v41 = vrot.slane %v4034_v39, 4  ;;  %v3278_v23 = vld [vmem:[#allocation2 + $0x78] sm:$0xf]  ;;  %v3702_v13 = vunpack.c.l.b16 %v3514_v49  ;;  %v7215_v61 = vrot.slane %v3914_v4, 9 }
 0x380   : > { %v5027_v15 = vunpack.c.l.b16 %v4685_v19  ;;  %v3516_v29 = vshrl.u32 %v3278_v23, 16  ;;  %v3519_v36 = vshll.u32 %v3278_v23, 16  ;;  %v3701_v9 = vunpack.c.l.b16 %v3504_v62  ;;  %v3282_v62 = vld [vmem:[#allocation2 + $0x88] sm:$0xf] }
 0x381   : > { %v4035_v53 = vsel %vm8376_vm10, %v7215_v61, %v4034_v39  ;;  %v2503_v11 = vadd.f32 %v8795_v48, %v8811_v16  ;;  %v4694_v4 = vrot.slane %v4693_v43, 4  ;;  %v4706_v16 = vshll.u32 %v4598_v18, 16 }
 0x382   : > { %v2337_v60 = vpop.f32.mrf.mxu0  ;;  %v5057_v3 = vpack.c.b16 %v5027_v15, %v5026_v21  ;;  %v3725_v49 = vpack.c.b16 %v3702_v13, %v3701_v9  ;;  %v3518_v23 = vrot.slane %v3516_v29, 4  ;;  %v3535_v15 = vshll.u32 %v9611_v35, 16 }
 0x383   : > { %v2558_v32 = vadd.f32 %v9575_v63, %v2337_v60  ;;  %v4037_v63 = vrot.slane %v9611_v35, 5  ;;  %v9623_v0 = vpop.f32.mrf.mxu3  ;;  %v4702_v60 = vrot.slane %v4700_v17, 4  ;;  %v2934_v21 = vadd.f32 %v8804_v44, %v2503_v11 }
 0x384   : > { %v2910_v2 = vpop.f32.mrf.mxu2  ;;  %v9620_v7 = vpop.f32.mrf.mxu1  ;;  %v4699_v44 = vsel %vm8454_vm4, %v4694_v4, %v4698_v57  ;;  %v3537_v11 = vrot.slane %v3535_v15, 5  ;;  %v3549_v4 = vshll.u32 %v3282_v62, 16 }
 0x385   : > { %v9618_v50 = vadd.f32 %v2910_v2, %v2558_v32  ;;  %v4038_v30 = vsel %vm8376_vm10, %v4036_v41, %v4037_v63  ;;  %v9631_v32 = vrot.slane %v3525_v37, 5  ;;  %v3531_v2 = vrot.slane %v3529_v1, 4 }
 0x386   : > { %v4102_v19 = vunpack.c.l.b16 %v4038_v30  ;;  %v4703_v63 = vor.u32 %v4702_v60, %v4698_v57  ;;  %v4101_v37 = vunpack.c.l.b16 %v4035_v53  ;;  %v3521_v1 = vrot.slane %v3519_v36, 5  ;;  %v4599_v30 = vld [vmem:[#allocation2 + $0x3c] sm:$0xf]  ;;  %v4600_v53 = vld [vmem:[#allocation2 + $0x40] sm:$0xf] }
 0x387   : > { %v3220_v36 = vadd.f32 %v9338_v20, %v2934_v21  ;;  %v3915_v20 = vld [vmem:[#allocation2 + $0x84] sm:$0xe]  ;;  %v4724_v21 = vshrl.u32 %v4600_v53, 16 }
 0x388   : > { %v4124_v9 = vpack.c.b16 %v4102_v19, %v4101_v37  ;;  %v4704_v61 = vrot.slane %v4703_v63, 4  ;;  %v3522_v60 = vor.u32 %v3521_v1, %v3518_v23  ;;  %v3553_v37 = vshrl.u32 %v3282_v62, 16 }
 0x389   : > { %7312 = vmatmul.msk.bf16.gmra.mxu2 %vm420_vm0, %v7446_v58  ;;  %v3532_v58 = vor.u32 %v3531_v2, %v9631_v32  ;;  %v4708_v2 = vrot.slane %v4706_v16, 5  ;;  %v4720_v16 = vshll.u32 %v4600_v53, 16  ;;  %v9675_v53 = vrot.slane %v3549_v4, 5 }
 0x38a   : > { %v3793_v5 = vpop.f32.mrf.mxu0  ;;  %v3523_v63 = vrot.slane %v3522_v60, 4 }
 0x38b   : > { %v3873_v41 = vadd.f32 %v3793_v5, %v9329_v22  ;;  %v3189_v22 = vpop.f32.mrf.mxu3  ;;  %v3533_v29 = vrot.slane %v3532_v58, 4  ;;  %v4711_v5 = vshrl.u32 %v4599_v30, 16 }
 0x38c   : > { %v4478_v17 = vpop.f32.mrf.mxu2  ;;  %v9641_v48 = vpop.f32.mrf.mxu1  ;;  %v9647_v43 = vadd.f32 %v3189_v22, %v9556_v8  ;;  %v9655_v8 = vld [vmem:[#allocation2 + $0x8c] sm:$0x1]  ;;  %v3528_v15 = vsel %vm8454_vm4, %v3523_v63, %v9631_v32 }
 0x38d   : > { %v4271_v39 = vadd.f32 %v9600_v33, %v3873_v41  ;;  %7198 = vmatmul.msk.bf16.gmra.mxu0 %vm420_vm0, %v3725_v49  ;;  %7322 = vmatmul.msk.bf16.gmra.mxu3 %vm420_vm0, %v5057_v3  ;;  %v4041_v33 = vrot.slane %v3282_v62, 5  ;;  %v4714_v3 = vshll.u32 %v4599_v30, 16  ;;  %v4709_v41 = vsel %vm8454_vm4, %v4704_v61, %v4708_v2 }
 0x38e   : > { %v3538_v57 = vsel %vm8454_vm4, %v3533_v29, %v3537_v11  ;;  %v4044_v58 = vrot.slane %v9655_v8, 5  ;;  %v5029_v61 = vunpack.c.l.b16 %v4709_v41  ;;  %v4713_v30 = vrot.slane %v4711_v5, 4 }
 0x38f   : > { %v9649_v13 = vadd.f32 %v4478_v17, %v4271_v39  ;;  %7232 = vmatmul.msk.bf16.gmra.mxu1 %vm420_vm0, %v4124_v9  ;;  %v5028_v17 = vunpack.c.l.b16 %v4699_v44  ;;  %v4043_v49 = vrot.slane %v4041_v33, 4  ;;  %v3281_v39 = vld [vmem:[#allocation2 + $0x84] sm:$0xf]  ;;  %v4716_v60 = vrot.slane %v4714_v3, 5 }
 0x390   : > { %v7447_v9 = vld [vmem:[#allocation2 + $0x84] sm:$0xff]  ;;  %v7216_v29 = vrot.slane %v3915_v20, 9  ;;  %v3543_v2 = vshll.u32 %v3281_v39, 16  ;;  %v3703_v11 = vunpack.c.l.b16 %v3528_v15  ;;  %v9679_v5 = vrot.slane %v4720_v16, 5 }
 0x391   : > { %v4045_v44 = vsel %vm8376_vm10, %v4043_v49, %v4044_v58  ;;  %v4726_v3 = vrot.slane %v4724_v21, 4  ;;  %v4717_v4 = vor.u32 %v4716_v60, %v4713_v30  ;;  %v3285_v58 = vld [vmem:[#allocation2 + $0x94] sm:$0xf]  ;;  %v4601_v16 = vld [vmem:[#allocation2 + $0x44] sm:$0x1] }
 0x392   : > { %v3795_v35 = vpop.f32.mrf.mxu0  ;;  %v4042_v32 = vsel %vm8376_vm10, %v7216_v29, %v4041_v33  ;;  %v4104_v63 = vunpack.c.l.b16 %v4045_v44  ;;  %v3916_v30 = vld [vmem:[#allocation2 + $0x90] sm:$0xe]  ;;  %v4048_v60 = vrot.slane %v3285_v58, 5 }
 0x393   : > { %v3874_v19 = vadd.f32 %v3795_v35, %v3220_v36  ;;  %v9665_v22 = vpop.f32.mrf.mxu3  ;;  %v3540_v36 = vshrl.u32 %v3281_v39, 16  ;;  %v3555_v35 = vrot.slane %v3553_v37, 4  ;;  %v4103_v37 = vunpack.c.l.b16 %v4042_v32 }
 0x394   : > { %v4480_v18 = vpop.f32.mrf.mxu2  ;;  %v9662_v1 = vpop.f32.mrf.mxu1  ;;  %v4727_v15 = vor.u32 %v4726_v3, %v9679_v5  ;;  %v4718_v3 = vrot.slane %v4717_v4, 4 }
 0x395   : > { %v4272_v23 = vadd.f32 %v9620_v7, %v3874_v19  ;;  %v3704_v7 = vunpack.c.l.b16 %v3538_v57  ;;  %v11257_v19 = vld [vmem:[#allocation3_spill] sm:$0xff]  ;;  %v3542_v39 = vrot.slane %v3540_v36, 4  ;;  %v3556_v33 = vor.u32 %v3555_v35, %v9675_v53  ;;  %v3284_v35 = vld [vmem:[#allocation2 + $0x90] sm:$0xf] }
 0x396   : > { %v4730_v36 = vshll.u32 %v4601_v16, 16 }
 0x397   : > { %v9670_v62 = vadd.f32 %v4480_v18, %v4272_v23  ;;  %v2508_v18 = vadd.f32 %v11257_v19, %v8831_v42  ;;  %v3726_v20 = vpack.c.b16 %v3704_v7, %v3703_v11  ;;  %v5058_v23 = vpack.c.b16 %v5029_v61, %v5028_v17  ;;  %v11258_v7 = vld [vmem:[#allocation4_spill] sm:$0xff] }
 0x398   : > { %v4125_v17 = vpack.c.b16 %v4104_v63, %v4103_v37  ;;  %v3559_v61 = vshll.u32 %v9655_v8, 16  ;;  %v3557_v32 = vrot.slane %v3556_v33, 4  ;;  %v4728_v19 = vrot.slane %v4727_v15, 4 }
 0x399   : > { %7313 = vmatmul.msk.bf16.gmra.mxu2 %vm420_vm0, %v7447_v9  ;;  %v3545_v9 = vrot.slane %v3543_v2, 5  ;;  %v2936_v29 = vadd.f32 %v11258_v7, %v2508_v18  ;;  %v9698_v2 = vld [vmem:[#allocation2 + $0x98] sm:$0x1]  ;;  %v4732_v16 = vrot.slane %v4730_v36, 5 }
 0x39a   : > { %v3798_v41 = vpop.f32.mrf.mxu0  ;;  %v3561_v18 = vrot.slane %v3559_v61, 5  ;;  %v4602_v61 = vld [vmem:[#allocation2 + $0x48] sm:$0xf] }
 0x39b   : > { %v3875_v49 = vadd.f32 %v3798_v41, %v9360_v59  ;;  %v3194_v59 = vpop.f32.mrf.mxu3  ;;  %v3546_v11 = vor.u32 %v3545_v9, %v3542_v39  ;;  %v3222_v8 = vadd.f32 %v9366_v26, %v2936_v29  ;;  %v7217_v41 = vrot.slane %v3916_v30, 9  ;;  %v7448_v29 = vld [vmem:[#allocation2 + $0x90] sm:$0xff] }
 0x39c   : > { %v4483_v57 = vpop.f32.mrf.mxu2  ;;  %v9687_v42 = vpop.f32.mrf.mxu1  ;;  %v9694_v44 = vadd.f32 %v3194_v59, %v9597_v56  ;;  %v4051_v56 = vrot.slane %v9698_v2, 5  ;;  %v3577_v59 = vshrl.u32 %v3285_v58, 16  ;;  %v3562_v4 = vsel %vm8454_vm4, %v3557_v32, %v3561_v18 }
 0x39d   : > { %v4273_v21 = vadd.f32 %v9641_v48, %v3875_v49  ;;  %7199 = vmatmul.msk.bf16.gmra.mxu0 %vm420_vm0, %v3726_v20  ;;  %7323 = vmatmul.msk.bf16.gmra.mxu3 %vm420_vm0, %v5058_v23  ;;  %v4050_v49 = vrot.slane %v4048_v60, 4  ;;  %v4603_v20 = vld [vmem:[#allocation2 + $0x4c] sm:$0xf]  ;;  %v4723_v26 = vsel %vm8454_vm4, %v4718_v3, %v9679_v5  ;;  %v3567_v39 = vshll.u32 %v3284_v35, 16 }
 0x39e   : > { %v4733_v15 = vsel %vm8454_vm4, %v4728_v19, %v4732_v16  ;;  %v4744_v30 = vshll.u32 %v4603_v20, 16  ;;  %v4748_v7 = vshrl.u32 %v4603_v20, 16  ;;  %v4049_v5 = vsel %vm8376_vm10, %v7217_v41, %v4048_v60 }
 0x39f   : > { %v9696_v48 = vadd.f32 %v4483_v57, %v4273_v21  ;;  %7233 = vmatmul.msk.bf16.gmra.mxu1 %vm420_vm0, %v4125_v17  ;;  %v3564_v57 = vshrl.u32 %v3284_v35, 16  ;;  %v3573_v21 = vshll.u32 %v3285_v58, 16  ;;  %v3547_v17 = vrot.slane %v3546_v11, 4 }
 0x3a0   : > { %v3706_v32 = vunpack.c.l.b16 %v3562_v4  ;;  %v5030_v19 = vunpack.c.l.b16 %v4723_v26  ;;  %v4735_v18 = vshrl.u32 %v4602_v61, 16  ;;  %v4738_v20 = vshll.u32 %v4602_v61, 16  ;;  %v4604_v61 = vld [vmem:[#allocation2 + $0x50] sm:$0x1] }
 0x3a1   : > { %v3552_v36 = vsel %vm8454_vm4, %v3547_v17, %v9675_v53  ;;  %v3566_v35 = vrot.slane %v3564_v57, 4  ;;  %v9724_v3 = vrot.slane %v3573_v21, 5  ;;  %v9727_v16 = vrot.slane %v4744_v30, 5  ;;  %v11260_v57 = vld [vmem:[#allocation5_spill] sm:$0xff] }
 0x3a2   : > { %v3800_v63 = vpop.f32.mrf.mxu0  ;;  %v3705_v53 = vunpack.c.l.b16 %v3552_v36  ;;  %v4750_v60 = vrot.slane %v4748_v7, 4  ;;  %v4105_v4 = vunpack.c.l.b16 %v4049_v5 }
 0x3a3   : > { %v3876_v23 = vadd.f32 %v3800_v63, %v3222_v8  ;;  %v9713_v58 = vpop.f32.mrf.mxu3  ;;  %v3579_v8 = vrot.slane %v3577_v59, 4  ;;  %v5031_v63 = vunpack.c.l.b16 %v4733_v15 }
 0x3a4   : > { %v4485_v37 = vpop.f32.mrf.mxu2  ;;  %v9709_v33 = vpop.f32.mrf.mxu1  ;;  %v3727_v59 = vpack.c.b16 %v3706_v32, %v3705_v53  ;;  %v3583_v32 = vshll.u32 %v9698_v2, 16  ;;  %v4754_v53 = vshll.u32 %v4604_v61, 16  ;;  %v9748_v2 = vld [vmem:[#allocation2 + $0xa4] sm:$0x1] }
 0x3a5   : > { %v4274_v9 = vadd.f32 %v9662_v1, %v3876_v23  ;;  %v4052_v1 = vsel %vm8376_vm10, %v4050_v49, %v4051_v56  ;;  %v3569_v23 = vrot.slane %v3567_v39, 5  ;;  %v11259_v56 = vld [vmem:[#allocation8_spill] sm:$0xff]  ;;  %v5059_v26 = vpack.c.b16 %v5031_v63, %v5030_v19  ;;  %v3917_v19 = vld [vmem:[#allocation2 + $0x9c] sm:$0xe]  ;;  %v11261_v63 = vld [vmem:[#allocation6_spill] sm:$0xff] }
 0x3a6   : > { %v4106_v49 = vunpack.c.l.b16 %v4052_v1  ;;  %v3580_v15 = vor.u32 %v3579_v8, %v9724_v3  ;;  %v4740_v39 = vrot.slane %v4738_v20, 5  ;;  %v4751_v1 = vor.u32 %v4750_v60, %v9727_v16  ;;  %v3287_v60 = vld [vmem:[#allocation2 + $0x9c] sm:$0xf] }
 0x3a7   : > { %v9722_v11 = vadd.f32 %v4485_v37, %v4274_v9  ;;  %v2513_v37 = vadd.f32 %v11260_v57, %v11259_v56  ;;  %v3288_v9 = vld [vmem:[#allocation2 + $0xa0] sm:$0xf]  ;;  %v3570_v36 = vor.u32 %v3569_v23, %v3566_v35  ;;  %v7218_v57 = vrot.slane %v3917_v19, 9 }
 0x3a8   : > { %v4126_v5 = vpack.c.b16 %v4106_v49, %v4105_v4  ;;  %v4055_v8 = vrot.slane %v3288_v9, 5  ;;  %v3581_v35 = vrot.slane %v3580_v15, 4  ;;  %v4752_v56 = vrot.slane %v4751_v1, 4 }
 0x3a9   : > { %7314 = vmatmul.msk.bf16.gmra.mxu2 %vm420_vm0, %v7448_v29  ;;  %v4737_v29 = vrot.slane %v4735_v18, 4  ;;  %v2938_v18 = vadd.f32 %v11261_v63, %v2513_v37  ;;  %v3571_v49 = vrot.slane %v3570_v36, 4  ;;  %v3585_v37 = vrot.slane %v3583_v32, 5  ;;  %v4605_v32 = vld [vmem:[#allocation2 + $0x54] sm:$0xf] }
 0x3aa   : > { %v3803_v41 = vpop.f32.mrf.mxu0  ;;  %v3601_v4 = vshrl.u32 %v3288_v9, 16  ;;  %v4058_v36 = vrot.slane %v9748_v2, 5  ;;  %v3591_v1 = vshll.u32 %v3287_v60, 16 }
 0x3ab   : > { %v3877_v21 = vadd.f32 %v3803_v41, %v9379_v27  ;;  %v3199_v27 = vpop.f32.mrf.mxu3  ;;  %v4741_v23 = vor.u32 %v4740_v39, %v4737_v29  ;;  %v3224_v41 = vadd.f32 %v9385_v25, %v2938_v18  ;;  %v3576_v15 = vsel %vm8454_vm4, %v3571_v49, %v9724_v3  ;;  %v7449_v18 = vld [vmem:[#allocation2 + $0x9c] sm:$0xff] }
 0x3ac   : > { %v4488_v17 = vpop.f32.mrf.mxu2  ;;  %v9735_v7 = vpop.f32.mrf.mxu1  ;;  %v9742_v20 = vadd.f32 %v3199_v27, %v9173_v52  ;;  %v3597_v52 = vshll.u32 %v3288_v9, 16  ;;  %v4756_v29 = vrot.slane %v4754_v53, 5  ;;  %v3588_v25 = vshrl.u32 %v3287_v60, 16 }
 0x3ad   : > { %v4275_v30 = vadd.f32 %v9687_v42, %v3877_v21  ;;  %7200 = vmatmul.msk.bf16.gmra.mxu0 %vm420_vm0, %v3727_v59  ;;  %7324 = vmatmul.msk.bf16.gmra.mxu3 %vm420_vm0, %v5059_v26  ;;  %v4057_v59 = vrot.slane %v4055_v8, 4  ;;  %v3586_v39 = vsel %vm8454_vm4, %v3581_v35, %v3585_v37  ;;  %v4056_v53 = vsel %vm8376_vm10, %v7218_v57, %v4055_v8 }
 0x3ae   : > { %v3593_v37 = vrot.slane %v3591_v1, 5  ;;  %v4762_v8 = vshll.u32 %v4605_v32, 16  ;;  %v3707_v57 = vunpack.c.l.b16 %v3576_v15 }
 0x3af   : > { %v9744_v42 = vadd.f32 %v4488_v17, %v4275_v30  ;;  %7234 = vmatmul.msk.bf16.gmra.mxu1 %vm420_vm0, %v4126_v5  ;;  %v9750_v17 = vld [vmem:[#allocation2 + $0x58] sm:$0xf]  ;;  %v4742_v30 = vrot.slane %v4741_v23, 4  ;;  %v4757_v5 = vsel %vm8454_vm4, %v4752_v56, %v4756_v29  ;;  %v4059_v35 = vsel %vm8376_vm10, %v4057_v59, %v4058_v36  ;;  %v11263_v36 = vld [vmem:[#allocation12_spill] sm:$0xff] }
 0x3b0   : > { %v4768_v19 = vshll.u32 %v9750_v17, 16  ;;  %v4772_v3 = vshrl.u32 %v9750_v17, 16  ;;  %v3603_v23 = vrot.slane %v3601_v4, 4  ;;  %v3590_v56 = vrot.slane %v3588_v25, 4 }
 0x3b1   : > { %v4747_v49 = vsel %vm8454_vm4, %v4742_v30, %v9727_v16  ;;  %v4107_v30 = vunpack.c.l.b16 %v4056_v53 }
 0x3b2   : > { %v3805_v21 = vpop.f32.mrf.mxu0  ;;  %v9779_v29 = vrot.slane %v4768_v19, 5  ;;  %v4774_v59 = vrot.slane %v4772_v3, 4  ;;  %v5032_v4 = vunpack.c.l.b16 %v4747_v49  ;;  %v3594_v15 = vor.u32 %v3593_v37, %v3590_v56  ;;  %v9787_v19 = vld [vmem:[#allocation2 + $0x5c] sm:$0x1] }
 0x3b3   : > { %v3878_v26 = vadd.f32 %v3805_v21, %v3224_v41  ;;  %v9765_v63 = vpop.f32.mrf.mxu3  ;;  %v3708_v41 = vunpack.c.l.b16 %v3586_v39  ;;  %v5033_v21 = vunpack.c.l.b16 %v4757_v5  ;;  %v9785_v5 = vld [vmem:[#allocation2 + $0xac] sm:$0xf]  ;;  %v3607_v49 = vshll.u32 %v9748_v2, 16  ;;  %v11266_v37 = vld [vmem:[#allocation11_spill] sm:$0xff] }
 0x3b4   : > { %v4490_v61 = vpop.f32.mrf.mxu2  ;;  %v9759_v9 = vpop.f32.mrf.mxu1  ;;  %11262 = vst [vmem:[#allocation3_spill] sm:$0xff] %v9765_v63  ;;  %v4062_v56 = vrot.slane %v9785_v5, 5  ;;  %v3595_v2 = vrot.slane %v3594_v15, 4 }
 0x3b5   : > { %v4276_v27 = vadd.f32 %v9709_v33, %v3878_v26  ;;  %v9771_v33 = vrot.slane %v3597_v52, 5  ;;  %v4759_v26 = vshrl.u32 %v4605_v32, 16  ;;  %v3728_v25 = vpack.c.b16 %v3708_v41, %v3707_v57 }
 0x3b6   : > { %v5060_v32 = vpack.c.b16 %v5033_v21, %v5032_v4  ;;  %v4778_v57 = vshll.u32 %v9787_v19, 16  ;;  %v3609_v4 = vrot.slane %v3607_v49, 5  ;;  %v4064_v15 = vrot.slane %v4062_v56, 4 }
 0x3b7   : > { %v9773_v60 = vadd.f32 %v4490_v61, %v4276_v27  ;;  %v4108_v61 = vunpack.c.l.b16 %v4059_v35  ;;  %v3604_v39 = vor.u32 %v3603_v23, %v9771_v33  ;;  %v11264_v27 = vld [vmem:[#allocation10_spill] sm:$0xff]  ;;  %v4761_v3 = vrot.slane %v4759_v26, 4 }
 0x3b8   : > { %v2518_v63 = vadd.f32 %v11264_v27, %v11263_v36  ;;  %v3290_v36 = vld [vmem:[#allocation2 + $0xa8] sm:$0xf] }
 0x3b9   : > { %7315 = vmatmul.msk.bf16.gmra.mxu2 %vm420_vm0, %v7449_v18  ;;  %v4764_v18 = vrot.slane %v4762_v8, 5  ;;  %v4127_v41 = vpack.c.b16 %v4108_v61, %v4107_v30  ;;  %v3605_v21 = vrot.slane %v3604_v39, 4  ;;  %v9806_v39 = vld [vmem:[#allocation2 + $0xb0] sm:$0x1]  ;;  %v3615_v49 = vshll.u32 %v3290_v36, 16 }
 0x3ba   : > { %v3808_v52 = vpop.f32.mrf.mxu0  ;;  %v2940_v26 = vadd.f32 %v11266_v37, %v2518_v63  ;;  %v3621_v63 = vshll.u32 %v9785_v5, 16 }
 0x3bb   : > { %v3879_v16 = vadd.f32 %v3808_v52, %v9396_v46  ;;  %v4775_v46 = vor.u32 %v4774_v59, %v9779_v29  ;;  %v3204_v53 = vpop.f32.mrf.mxu3  ;;  %v4765_v59 = vor.u32 %v4764_v18, %v4761_v3  ;;  %v4065_v18 = vrot.slane %v9806_v39, 5 }
 0x3bc   : > { %v4493_v1 = vpop.f32.mrf.mxu2  ;;  %v9791_v23 = vpop.f32.mrf.mxu1  ;;  %v9799_v8 = vadd.f32 %v3204_v53, %v9188_v10  ;;  %v3226_v52 = vadd.f32 %v9402_v6, %v2940_v26  ;;  %v3600_v10 = vsel %vm8454_vm4, %v3595_v2, %v9771_v33  ;;  %v3610_v6 = vsel %vm8454_vm4, %v3605_v21, %v3609_v4  ;;  %v7450_v26 = vld [vmem:[#allocation2 + $0xa8] sm:$0xff]  ;;  %v4608_v4 = vld [vmem:[#allocation2 + $0x60] sm:$0xf] }
 0x3bd   : > { %v4277_v35 = vadd.f32 %v9735_v7, %v3879_v16  ;;  %7201 = vmatmul.msk.bf16.gmra.mxu0 %vm420_vm0, %v3728_v25  ;;  %11265 = vst [vmem:[#allocation4_spill] sm:$0xff] %v9791_v23  ;;  %7325 = vmatmul.msk.bf16.gmra.mxu3 %vm420_vm0, %v5060_v32  ;;  %v4776_v61 = vrot.slane %v4775_v46, 4  ;;  %v3625_v16 = vshrl.u32 %v9785_v5, 16  ;;  %v9813_v25 = vld [vmem:[#allocation2 + $0x64] sm:$0xf]  ;;  %v4766_v3 = vrot.slane %v4765_v59, 4 }
 0x3be   : > { %v3918_v32 = vld [vmem:[#allocation2 + $0xa8] sm:$0xe]  ;;  %v4792_v53 = vshll.u32 %v9813_v25, 16  ;;  %v9827_v59 = vrot.slane %v3621_v63, 5 }
 0x3bf   : > { %v9801_v7 = vadd.f32 %v4493_v1, %v4277_v35  ;;  %7235 = vmatmul.msk.bf16.gmra.mxu1 %vm420_vm0, %v4127_v41  ;;  %v4780_v1 = vrot.slane %v4778_v57, 5  ;;  %v3612_v35 = vshrl.u32 %v3290_v36, 16  ;;  %v4796_v41 = vshrl.u32 %v9813_v25, 16 }
 0x3c0   : > { %v3709_v57 = vunpack.c.l.b16 %v3600_v10  ;;  %v7219_v2 = vrot.slane %v3918_v32, 9  ;;  %v3710_v36 = vunpack.c.l.b16 %v3610_v6  ;;  %v4786_v32 = vshll.u32 %v4608_v4, 16 }
 0x3c1   : > { %v4781_v5 = vsel %vm8454_vm4, %v4776_v61, %v4780_v1  ;;  %v4771_v61 = vsel %vm8454_vm4, %v4766_v3, %v9779_v29  ;;  %v3614_v63 = vrot.slane %v3612_v35, 4  ;;  %v3617_v1 = vrot.slane %v3615_v49, 5  ;;  %v9846_v35 = vld [vmem:[#allocation2 + $0x68] sm:$0x1]  ;;  %v3294_v49 = vld [vmem:[#allocation2 + $0xb8] sm:$0xf] }
 0x3c2   : > { %v3810_v27 = vpop.f32.mrf.mxu0  ;;  %v4063_v10 = vsel %vm8376_vm10, %v7219_v2, %v4062_v56  ;;  %v4798_v6 = vrot.slane %v4796_v41, 4  ;;  %v3729_v3 = vpack.c.b16 %v3710_v36, %v3709_v57  ;;  %v3631_v56 = vshll.u32 %v9806_v39, 16  ;;  %11269 = vst [vmem:[#allocation6_spill] sm:$0xff] %v9846_v35 }
 0x3c3   : > { %v3880_v30 = vadd.f32 %v3810_v27, %v3226_v52  ;;  %v9825_v21 = vpop.f32.mrf.mxu3  ;;  %v3627_v52 = vrot.slane %v3625_v16, 4  ;;  %v4066_v27 = vsel %vm8376_vm10, %v4064_v15, %v4065_v18  ;;  %v4783_v16 = vshrl.u32 %v4608_v4, 16 }
 0x3c4   : > { %v9819_v46 = vpop.f32.mrf.mxu1  ;;  %v4495_v37 = vpop.f32.mrf.mxu2  ;;  %v4110_v23 = vunpack.c.l.b16 %v4066_v27  ;;  %v4788_v2 = vrot.slane %v4786_v32, 5  ;;  %v4802_v39 = vshll.u32 %v9846_v35, 16  ;;  %v4069_v36 = vrot.slane %v3294_v49, 5 }
 0x3c5   : > { %v4278_v33 = vadd.f32 %v9759_v9, %v3880_v30  ;;  %11267 = vst [vmem:[#allocation8_spill] sm:$0xff] %v9819_v46  ;;  %v5035_v30 = vunpack.c.l.b16 %v4781_v5  ;;  %v5034_v46 = vunpack.c.l.b16 %v4771_v61  ;;  %v3628_v29 = vor.u32 %v3627_v52, %v9827_v59  ;;  %v3293_v61 = vld [vmem:[#allocation2 + $0xb4] sm:$0xf] }
 0x3c6   : > { %v4109_v5 = vunpack.c.l.b16 %v4063_v10  ;;  %v4785_v41 = vrot.slane %v4783_v16, 4  ;;  %v9858_v16 = vld [vmem:[#allocation2 + $0x70] sm:$0xf] }
 0x3c7   : > { %v9829_v9 = vadd.f32 %v4495_v37, %v4278_v33  ;;  %v9839_v33 = vrot.slane %v4792_v53, 5  ;;  %v5061_v18 = vpack.c.b16 %v5035_v30, %v5034_v46  ;;  %v3629_v46 = vrot.slane %v3628_v29, 4  ;;  %11272 = vst [vmem:[#allocation11_spill] sm:$0xff] %v9858_v16 }
 0x3c8   : > { %v3633_v30 = vrot.slane %v3631_v56, 5  ;;  %v4789_v10 = vor.u32 %v4788_v2, %v4785_v41  ;;  %v4804_v29 = vrot.slane %v4802_v39, 5  ;;  %v3639_v41 = vshll.u32 %v3293_v61, 16 }
 0x3c9   : > { %7316 = vmatmul.msk.bf16.gmra.mxu2 %vm420_vm0, %v7450_v26  ;;  %v3618_v26 = vor.u32 %v3617_v1, %v3614_v63  ;;  %v4799_v52 = vor.u32 %v4798_v6, %v9839_v33  ;;  %v3295_v1 = vld [vmem:[#allocation2 + $0xbc] sm:$0x1]  ;;  %v3636_v6 = vshrl.u32 %v3293_v61, 16  ;;  %v4816_v2 = vshll.u32 %v9858_v16, 16 }
 0x3ca   : > { %v3813_v37 = vpop.f32.mrf.mxu0  ;;  %v4072_v56 = vrot.slane %v3295_v1, 5 }
 0x3cb   : > { %v9843_v15 = vadd.f32 %v3813_v37, %v9413_v34  ;;  %v3209_v4 = vpop.f32.mrf.mxu3  ;;  %v4128_v34 = vpack.c.b16 %v4110_v23, %v4109_v5  ;;  %v3619_v27 = vrot.slane %v3618_v26, 4  ;;  %v4800_v63 = vrot.slane %v4799_v52, 4  ;;  %v4611_v37 = vld [vmem:[#allocation2 + $0x6c] sm:$0xf] }
 0x3cc   : > { %v9849_v53 = vpop.f32.mrf.mxu1  ;;  %v9854_v57 = vadd.f32 %v3209_v4, %v9232_v24  ;;  %v3634_v23 = vsel %vm8454_vm4, %v3629_v46, %v3633_v30  ;;  %v3645_v5 = vshll.u32 %v3294_v49, 16  ;;  %v3649_v26 = vshrl.u32 %v3294_v49, 16  ;;  %v7451_v30 = vld [vmem:[#allocation2 + $0xb4] sm:$0xff] }
 0x3cd   : > { %11268 = vst [vmem:[#allocation5_spill] sm:$0xff] %v9843_v15  ;;  %7202 = vmatmul.msk.bf16.gmra.mxu0 %vm420_vm0, %v3729_v3  ;;  %7326 = vmatmul.msk.bf16.gmra.mxu3 %vm420_vm0, %v5061_v18  ;;  %v3624_v24 = vsel %vm8454_vm4, %v3619_v27, %v9827_v59  ;;  %v3919_v3 = vld [vmem:[#allocation2 + $0xb4] sm:$0xe]  ;;  %v4071_v18 = vrot.slane %v4069_v36, 4  ;;  %v4820_v52 = vshrl.u32 %v9858_v16, 16  ;;  %v4805_v59 = vsel %vm8454_vm4, %v4800_v63, %v4804_v29 }
 0x3ce   : > { %11270 = vst [vmem:[#allocation12_spill] sm:$0xff] %v9849_v53  ;;  %v4807_v46 = vshrl.u32 %v4611_v37, 16  ;;  %v4810_v27 = vshll.u32 %v4611_v37, 16  ;;  %v3711_v39 = vunpack.c.l.b16 %v3624_v24  ;;  %v3712_v53 = vunpack.c.l.b16 %v3634_v23 }
 0x3cf   : > { %11271 = vst [vmem:[#allocation10_spill] sm:$0xff] %v9854_v57  ;;  %7236 = vmatmul.msk.bf16.gmra.mxu1 %vm420_vm0, %v4128_v34  ;;  %v4790_v34 = vrot.slane %v4789_v10, 4  ;;  %v4073_v61 = vsel %vm8376_vm10, %v4071_v18, %v4072_v56  ;;  %v3647_v15 = vrot.slane %v3645_v5, 5  ;;  %v3651_v16 = vrot.slane %v3649_v26, 4  ;;  %v9884_v26 = vld [vmem:[#allocation2 + $0x74] sm:$0x1] }
 0x3d0   : > { %v5037_v10 = vunpack.c.l.b16 %v4805_v59  ;;  %v4818_v63 = vrot.slane %v4816_v2, 5  ;;  %v4822_v29 = vrot.slane %v4820_v52, 4  ;;  %v3641_v23 = vrot.slane %v3639_v41, 5  ;;  %v3297_v52 = vld [vmem:[#allocation2 + $0xc4] sm:$0xf] }
 0x3d1   : > { %v4795_v49 = vsel %vm8454_vm4, %v4790_v34, %v9839_v33  ;;  %v4809_v37 = vrot.slane %v4807_v46, 4  ;;  %v4112_v33 = vunpack.c.l.b16 %v4073_v61  ;;  %v3730_v18 = vpack.c.b16 %v3712_v53, %v3711_v39  ;;  %v3298_v61 = vld [vmem:[#allocation2 + $0xc8] sm:$0x1] }
 0x3d2   : > { %v9860_v32 = vpop.f32.mrf.mxu0  ;;  %v5036_v35 = vunpack.c.l.b16 %v4795_v49  ;;  %v3652_v5 = vor.u32 %v3651_v16, %v3647_v15  ;;  %v4823_v2 = vor.u32 %v4822_v29, %v4818_v63  ;;  %v3655_v41 = vshll.u32 %v3295_v1, 16 }
 0x3d3   : > { %11273 = vst [vmem:[#allocation37_spill] sm:$0xff] %v9860_v32  ;;  %v7220_v32 = vrot.slane %v3919_v3, 9  ;;  %v4812_v3 = vrot.slane %v4810_v27, 5 }
 0x3d4   : > { %v9869_v4 = vpop.f32.mrf.mxu1  ;;  %v5062_v56 = vpack.c.b16 %v5037_v10, %v5036_v35  ;;  %v3653_v53 = vrot.slane %v3652_v5, 4  ;;  %v4824_v35 = vrot.slane %v4823_v2, 4  ;;  %v3657_v27 = vrot.slane %v3655_v41, 5 }
 0x3d5   : > { %11274 = vst [vmem:[#allocation38_spill] sm:$0xff] %v9869_v4  ;;  %v3638_v4 = vrot.slane %v3636_v6, 4  ;;  %v4070_v24 = vsel %vm8376_vm10, %v7220_v32, %v4069_v36  ;;  %v4813_v59 = vor.u32 %v4812_v3, %v4809_v37  ;;  %v3920_v37 = vld [vmem:[#allocation2 + $0xc0] sm:$0xe]  ;;  %v3669_v3 = vshll.u32 %v3297_v52, 16 }
 0x3d6   : > { %v4111_v6 = vunpack.c.l.b16 %v4070_v24  ;;  %v3658_v10 = vsel %vm8454_vm4, %v3653_v53, %v3657_v27 }
 0x3d7   : > { %v3642_v32 = vor.u32 %v3641_v23, %v3638_v4  ;;  %v9894_v4 = vld [vmem:[#allocation2 + $0x7c] sm:$0xf]  ;;  %v3671_v27 = vrot.slane %v3669_v3, 5 }
 0x3d8   : > { %v4129_v46 = vpack.c.b16 %v4112_v33, %v4111_v6  ;;  %v3673_v33 = vshrl.u32 %v3297_v52, 16  ;;  %v3296_v6 = vld [vmem:[#allocation2 + $0xc0] sm:$0xf]  ;;  %v4844_v2 = vshrl.u32 %v9894_v4, 16 }
 0x3d9   : > { %7317 = vmatmul.msk.bf16.gmra.mxu2 %vm420_vm0, %v7451_v30  ;;  %v3643_v16 = vrot.slane %v3642_v32, 4  ;;  %v4814_v30 = vrot.slane %v4813_v59, 4  ;;  %v7452_v32 = vld [vmem:[#allocation2 + $0xc0] sm:$0xff]  ;;  %v3714_v59 = vunpack.c.l.b16 %v3658_v10 }
 0x3da   : > { %v3818_v57 = vpop.f32.mrf.mxu0 }
 0x3db   : > { %v9882_v34 = vadd.f32 %v3818_v57, %v9434_v38  ;;  %v4826_v38 = vshll.u32 %v9884_v26, 16  ;;  %v4076_v57 = vrot.slane %v3297_v52, 5  ;;  %v3648_v1 = vsel %vm8454_vm4, %v3643_v16, %v3647_v15 }
 0x3dc   : > { %v9887_v36 = vpop.f32.mrf.mxu1  ;;  %v4819_v29 = vsel %vm8454_vm4, %v4814_v30, %v4818_v63  ;;  %v4840_v15 = vshll.u32 %v9894_v4, 16  ;;  %v3713_v41 = vunpack.c.l.b16 %v3648_v1  ;;  %v3660_v52 = vshrl.u32 %v3296_v6, 16 }
 0x3dd   : > { %11275 = vst [vmem:[#allocation39_spill] sm:$0xff] %v9882_v34  ;;  %7203 = vmatmul.msk.bf16.gmra.mxu0 %vm420_vm0, %v3730_v18  ;;  %7327 = vmatmul.msk.bf16.gmra.mxu3 %vm420_vm0, %v5062_v56  ;;  %v4828_v49 = vrot.slane %v4826_v38, 5  ;;  %v4078_v24 = vrot.slane %v4076_v57, 4  ;;  %v4614_v18 = vld [vmem:[#allocation2 + $0x78] sm:$0xf]  ;;  %v4079_v56 = vrot.slane %v3298_v61, 5  ;;  %v5038_v63 = vunpack.c.l.b16 %v4819_v29 }
 0x3de   : > { %11276 = vst [vmem:[#allocation40_spill] sm:$0xff] %v9887_v36  ;;  %v7221_v38 = vrot.slane %v3920_v37, 9  ;;  %v3663_v16 = vshll.u32 %v3296_v6, 16  ;;  %v3675_v30 = vrot.slane %v3673_v33, 4  ;;  %v4834_v1 = vshll.u32 %v4614_v18, 16 }
 0x3df   : > { %7237 = vmatmul.msk.bf16.gmra.mxu1 %vm420_vm0, %v4129_v46  ;;  %v4829_v23 = vsel %vm8454_vm4, %v4824_v35, %v4828_v49  ;;  %v4080_v53 = vsel %vm8376_vm10, %v4078_v24, %v4079_v56  ;;  %v4831_v35 = vshrl.u32 %v4614_v18, 16  ;;  %v9911_v49 = vpop.f32.mrf.mxu3  ;;  %v4842_v10 = vrot.slane %v4840_v15, 5  ;;  %v9918_v33 = vld [vmem:[#allocation2 + $0x80] sm:$0x1] }
 0x3e0   : > { %v5039_v46 = vunpack.c.l.b16 %v4829_v23  ;;  %v4846_v29 = vrot.slane %v4844_v2, 4  ;;  %v4114_v37 = vunpack.c.l.b16 %v4080_v53  ;;  %v3731_v24 = vpack.c.b16 %v3714_v59, %v3713_v41 }
 0x3e1   : > { %v3665_v6 = vrot.slane %v3663_v16, 5  ;;  %v3676_v3 = vor.u32 %v3675_v30, %v3671_v27  ;;  %v4836_v18 = vrot.slane %v4834_v1, 5  ;;  %v4850_v41 = vshll.u32 %v9918_v33, 16  ;;  %v9931_v16 = vld [vmem:[#allocation2 + $0x88] sm:$0xf]  ;;  %v7453_v1 = vld [vmem:[#allocation2 + $0xcc] sm:$0xff] }
 0x3e2   : > { %v9892_v39 = vpop.f32.mrf.mxu0  ;;  %v5063_v56 = vpack.c.b16 %v5039_v46, %v5038_v63  ;;  %v4847_v15 = vor.u32 %v4846_v29, %v4842_v10 }
 0x3e3   : > { %11277 = vst [vmem:[#allocation41_spill] sm:$0xff] %v9892_v39  ;;  %v3662_v39 = vrot.slane %v3660_v52, 4  ;;  %v3677_v59 = vrot.slane %v3676_v3, 4  ;;  %v4852_v30 = vrot.slane %v4850_v41, 5 }
 0x3e4   : > { %v9904_v5 = vpop.f32.mrf.mxu1 }
 0x3e5   : > { %11278 = vst [vmem:[#allocation42_spill] sm:$0xff] %v9904_v5  ;;  %v4077_v5 = vsel %vm8376_vm10, %v7221_v38, %v4076_v57  ;;  %v4833_v57 = vrot.slane %v4831_v35, 4  ;;  %v4848_v38 = vrot.slane %v4847_v15, 4 }
 0x3e7   : > { %v4837_v46 = vor.u32 %v4836_v18, %v4833_v57 }
 0x3e9   : > { %7318 = vmatmul.msk.bf16.gmra.mxu2 %vm420_vm0, %v7452_v32  ;;  %v4113_v32 = vunpack.c.l.b16 %v4077_v5  ;;  %v3666_v5 = vor.u32 %v3665_v6, %v3662_v39  ;;  %v4838_v39 = vrot.slane %v4837_v46, 4 }
 0x3ea   : > { %v3823_v23 = vpop.f32.mrf.mxu0 }
 0x3eb   : > { %v9916_v36 = vadd.f32 %v3823_v23, %v9474_v40  ;;  %v4130_v2 = vpack.c.b16 %v4114_v37, %v4113_v32  ;;  %v3679_v40 = vshll.u32 %v3298_v61, 16  ;;  %v3667_v61 = vrot.slane %v3666_v5, 4 }
 0x3ec   : > { %v9921_v34 = vpop.f32.mrf.mxu1  ;;  %v4853_v37 = vsel %vm8454_vm4, %v4848_v38, %v4852_v30  ;;  %v4843_v3 = vsel %vm8454_vm4, %v4838_v39, %v4842_v10  ;;  %v9952_v10 = vld [vmem:[#allocation2 + $0x8c] sm:$0x1]  ;;  %v7616_v30 = vld [vmem:[#allocation2 + $0x1c] sm:$0xf] }
 0x3ed   : > { %7204 = vmatmul.msk.bf16.gmra.mxu0 %vm420_vm0, %v3731_v24  ;;  %7328 = vmatmul.msk.bf16.gmra.mxu3 %vm420_vm0, %v5063_v56  ;;  %v3681_v35 = vrot.slane %v3679_v40, 5  ;;  %v4617_v24 = vld [vmem:[#allocation2 + $0x84] sm:$0xf]  ;;  %v4868_v56 = vshrl.u32 %v9931_v16, 16  ;;  %v3672_v32 = vsel %vm8454_vm4, %v3667_v61, %v3671_v27  ;;  %v5041_v57 = vunpack.c.l.b16 %v4853_v37 }
 0x3ee   : > { %v4855_v18 = vshrl.u32 %v4617_v24, 16  ;;  %v4858_v40 = vshll.u32 %v4617_v24, 16  ;;  %v5040_v46 = vunpack.c.l.b16 %v4843_v3  ;;  %v5244_v24 = vld [vmem:[#allocation2 + $0x18] sm:$0xe] }
 0x3ef   : > { %7238 = vmatmul.msk.bf16.gmra.mxu1 %vm420_vm0, %v4130_v2  ;;  %v3682_v29 = vsel %vm8454_vm4, %v3677_v59, %v3681_v35  ;;  %v3715_v2 = vunpack.c.l.b16 %v3672_v32  ;;  %v4870_v5 = vrot.slane %v4868_v56, 4 }
 0x3f0   : > { %v3214_v63 = vpop.f32.mrf.mxu3  ;;  %v3716_v6 = vunpack.c.l.b16 %v3682_v29  ;;  %v5064_v35 = vpack.c.b16 %v5041_v57, %v5040_v46  ;;  %v4857_v29 = vrot.slane %v4855_v18, 4  ;;  %v4860_v39 = vrot.slane %v4858_v40, 5 }
 0x3f1   : > { %v9927_v53 = vadd.f32 %v3214_v63, %v9283_v12  ;;  %v4864_v12 = vshll.u32 %v9931_v16, 16  ;;  %v7337_v57 = vrot.slane %v5244_v24, 9 }
 0x3f2   : > { %v9929_v52 = vpop.f32.mrf.mxu0  ;;  %v3732_v38 = vpack.c.b16 %v3716_v6, %v3715_v2  ;;  %v4861_v56 = vor.u32 %v4860_v39, %v4857_v29  ;;  %v4620_v29 = vld [vmem:[#allocation2 + $0x90] sm:$0xf] }
 0x3f3   : > { %v4866_v41 = vrot.slane %v4864_v12, 5 }
 0x3f4   : > { %v9935_v23 = vpop.f32.mrf.mxu1  ;;  %v4862_v46 = vrot.slane %v4861_v56, 4 }
 0x3f5   : > { %v4871_v37 = vor.u32 %v4870_v5, %v4866_v41 }
 0x3f6   : > { %v4867_v39 = vsel %vm8454_vm4, %v4862_v46, %v4866_v41 }
 0x3f7   : > { %v4872_v32 = vrot.slane %v4871_v37, 4 }
 0x3f8   : > { %v3216_v15 = vpop.f32.mrf.mxu3 }
 0x3f9   : > { %7319 = vmatmul.msk.bf16.gmra.mxu2 %vm420_vm0, %v7453_v1  ;;  %v9947_v59 = vadd.f32 %v3216_v15, %v9302_v14  ;;  %v5310_v1 = vrot.slane %v7616_v30, 5  ;;  %v4874_v14 = vshll.u32 %v9952_v10, 16  ;;  %v7617_v15 = vld [vmem:[#allocation2 + $0x20] sm:$0x1] }
 0x3fa   : > { %v3828_v63 = vpop.f32.mrf.mxu0  ;;  %v5313_v2 = vrot.slane %v7617_v15, 5 }
 0x3fb   : > { %v9950_v27 = vadd.f32 %v3828_v63, %v9521_v31  ;;  %v5312_v31 = vrot.slane %v5310_v1, 4  ;;  %v4876_v18 = vrot.slane %v4874_v14, 5  ;;  %v5311_v40 = vsel %vm8376_vm10, %v7337_v57, %v5310_v1 }
 0x3fc   : > { %v9955_v61 = vpop.f32.mrf.mxu1  ;;  %v5422_v24 = vunpack.c.l.b16 %v5311_v40  ;;  %v4882_v57 = vshll.u32 %v4620_v29, 16 }
 0x3fd   : > { %7205 = vmatmul.msk.bf16.gmra.mxu0 %vm420_vm0, %v3732_v38  ;;  %11279 = vst [vmem:[#allocation43_spill] sm:$0xff] %v9955_v61  ;;  %7329 = vmatmul.msk.bf16.gmra.mxu3 %vm420_vm0, %v5064_v35  ;;  %v5314_v5 = vsel %vm8376_vm10, %v5312_v31, %v5313_v2  ;;  %v4877_v38 = vsel %vm8454_vm4, %v4872_v32, %v4876_v18  ;;  %v5042_v32 = vunpack.c.l.b16 %v4867_v39  ;;  %v7619_v61 = vld [vmem:[#allocation2 + $0x28] sm:$0xf] }
 0x3fe   : > { %v5423_v37 = vunpack.c.l.b16 %v5314_v5  ;;  %v5043_v14 = vunpack.c.l.b16 %v4877_v38  ;;  %v5317_v41 = vrot.slane %v7619_v61, 5  ;;  %v4884_v46 = vrot.slane %v4882_v57, 5 }
 0x400   : > { %v5132_v12 = vpop.f32.mrf.mxu3 }
 0x401   : > { %v9960_v6 = vadd.f32 %v5132_v12, %v9649_v13  ;;  %v7618_v13 = vld [vmem:[#allocation2 + $0x94] sm:$0xf]  ;;  %v4879_v12 = vshrl.u32 %v4620_v29, 16  ;;  %v5319_v29 = vrot.slane %v5317_v41, 4 }
 0x402   : > { %v9962_v3 = vpop.f32.mrf.mxu0  ;;  %v4888_v35 = vshll.u32 %v7618_v13, 16  ;;  %v4892_v30 = vshrl.u32 %v7618_v13, 16  ;;  %v5454_v13 = vpack.c.b16 %v5423_v37, %v5422_v24  ;;  %v7621_v24 = vld [vmem:[#allocation2 + $0x2c] sm:$0x1] }
 0x403   : > { %v4881_v5 = vrot.slane %v4879_v12, 4 }
 0x404   : > { %v9968_v63 = vpop.f32.mrf.mxu1  ;;  %v4890_v31 = vrot.slane %v4888_v35, 5  ;;  %v4894_v15 = vrot.slane %v4892_v30, 4  ;;  %v5245_v30 = vld [vmem:[#allocation2 + $0x24] sm:$0xe] }
 0x405   : > { %11280 = vst [vmem:[#allocation44_spill] sm:$0xff] %v9968_v63  ;;  %v5065_v63 = vpack.c.b16 %v5043_v14, %v5042_v32  ;;  %v7338_v14 = vrot.slane %v5245_v30, 9 }
 0x406   : > { %v4895_v38 = vor.u32 %v4894_v15, %v4890_v31 }
 0x408   : > { %v5134_v1 = vpop.f32.mrf.mxu3 }
 0x409   : > { %v9975_v56 = vadd.f32 %v5134_v1, %v9670_v62  ;;  %v7620_v62 = vld [vmem:[#allocation2 + $0x98] sm:$0x1]  ;;  %v4896_v1 = vrot.slane %v4895_v38, 4  ;;  %v5318_v38 = vsel %vm8376_vm10, %v7338_v14, %v5317_v41 }
 0x40a   : > { %v3833_v2 = vpop.f32.mrf.mxu0  ;;  %v4898_v35 = vshll.u32 %v7620_v62, 16 }
 0x40b   : > { %v9978_v18 = vadd.f32 %v3833_v2, %v9563_v47  ;;  %v4885_v47 = vor.u32 %v4884_v46, %v4881_v5  ;;  %v5320_v2 = vrot.slane %v7621_v24, 5  ;;  %v7622_v5 = vld [vmem:[#allocation2 + $0xa0] sm:$0xf]  ;;  %v5424_v24 = vunpack.c.l.b16 %v5318_v38 }
 0x40c   : > { %v9981_v40 = vpop.f32.mrf.mxu1  ;;  %v4900_v12 = vrot.slane %v4898_v35, 5  ;;  %v4912_v46 = vshll.u32 %v7622_v5, 16 }
 0x40d   : > { %7354 = vmatmul.msk.bf16.vlgmr.msra.gmra.mxu0 %vm420_vm0, %v5454_v13  ;;  %11281 = vst [vmem:[#allocation45_spill] sm:$0xff] %v9981_v40  ;;  %7330 = vmatmul.msk.bf16.gmra.mxu3 %vm420_vm0, %v5065_v63  ;;  %v5321_v57 = vsel %vm8376_vm10, %v5319_v29, %v5320_v2  ;;  %v4886_v15 = vrot.slane %v4885_v47, 4  ;;  %v4623_v13 = vld [vmem:[#allocation2 + $0x9c] sm:$0xf] }
 0x40e   : > { %v4901_v32 = vsel %vm8454_vm4, %v4896_v1, %v4900_v12  ;;  %v5425_v35 = vunpack.c.l.b16 %v5321_v57  ;;  %v4906_v2 = vshll.u32 %v4623_v13, 16  ;;  %v4914_v47 = vrot.slane %v4912_v46, 5 }
 0x40f   : > { %v4891_v62 = vsel %vm8454_vm4, %v4886_v15, %v4890_v31  ;;  %v5045_v30 = vunpack.c.l.b16 %v4901_v32 }
 0x410   : > { %v5137_v39 = vpop.f32.mrf.mxu3  ;;  %v5044_v40 = vunpack.c.l.b16 %v4891_v62  ;;  %v5455_v41 = vpack.c.b16 %v5425_v35, %v5424_v24  ;;  %v4908_v32 = vrot.slane %v4906_v2, 5 }
 0x411   : > { %v9985_v37 = vadd.f32 %v5137_v39, %v9696_v48  ;;  %v4916_v48 = vshrl.u32 %v7622_v5, 16  ;;  %v4903_v39 = vshrl.u32 %v4623_v13, 16 }
 0x412   : > { %v9987_v61 = vpop.f32.mrf.mxu0  ;;  %v5066_v14 = vpack.c.b16 %v5045_v30, %v5044_v40 }
 0x413   : > { %11282 = vst [vmem:[#allocation46_spill] sm:$0xff] %v9987_v61  ;;  %v7623_v61 = vld [vmem:[#allocation2 + $0x34] sm:$0xf]  ;;  %v4905_v15 = vrot.slane %v4903_v39, 4  ;;  %v7625_v39 = vld [vmem:[#allocation2 + $0x38] sm:$0x1] }
 0x414   : > { %v9991_v63 = vpop.f32.mrf.mxu1  ;;  %v5324_v31 = vrot.slane %v7623_v61, 5  ;;  %v5327_v24 = vrot.slane %v7625_v39, 5 }
 0x415   : > { %11283 = vst [vmem:[#allocation47_spill] sm:$0xff] %v9991_v63  ;;  %v4918_v63 = vrot.slane %v4916_v48, 4  ;;  %v5246_v48 = vld [vmem:[#allocation2 + $0x30] sm:$0xe]  ;;  %v4909_v40 = vor.u32 %v4908_v32, %v4905_v15  ;;  %v7626_v15 = vld [vmem:[#allocation2 + $0xac] sm:$0xf] }
 0x416   : > { %v5326_v38 = vrot.slane %v5324_v31, 4  ;;  %v4940_v32 = vshrl.u32 %v7626_v15, 16 }
 0x417   : > { %v4919_v13 = vor.u32 %v4918_v63, %v4914_v47 }
 0x418   : > { %v5139_v29 = vpop.f32.mrf.mxu3  ;;  %v4942_v39 = vrot.slane %v4940_v32, 4  ;;  %v5247_v32 = vld [vmem:[#allocation2 + $0x3c] sm:$0xe] }
 0x419   : > { %v10000_v1 = vadd.f32 %v5139_v29, %v9722_v11  ;;  %v7624_v11 = vld [vmem:[#allocation2 + $0xa4] sm:$0x1]  ;;  %v4920_v35 = vrot.slane %v4919_v13, 4  ;;  %v7339_v29 = vrot.slane %v5246_v48, 9 }
 0x41a   : > { %v3838_v12 = vpop.f32.mrf.mxu0  ;;  %v4922_v46 = vshll.u32 %v7624_v11, 16 }
 0x41b   : > { %v10003_v5 = vadd.f32 %v3838_v12, %v9605_v51  ;;  %v3238_v51 = vadd.f32 %v9623_v0, %v9536_v54  ;;  %v5328_v12 = vsel %vm8376_vm10, %v5326_v38, %v5327_v24  ;;  %v4626_v0 = vld [vmem:[#allocation2 + $0xa8] sm:$0xf]  ;;  %v5325_v13 = vsel %vm8376_vm10, %v7339_v29, %v5324_v31 }
 0x41c   : > { %v10006_v57 = vpop.f32.mrf.mxu1  ;;  %v4924_v2 = vrot.slane %v4922_v46, 5  ;;  %v5427_v46 = vunpack.c.l.b16 %v5328_v12 }
 0x41d   : > { %7355 = vmatmul.msk.bf16.gmra.mxu0 %vm420_vm0, %v5455_v41  ;;  %7331 = vmatmul.msk.bf16.gmra.mxu3 %vm420_vm0, %v5066_v14  ;;  %v4910_v14 = vrot.slane %v4909_v40, 4 }
 0x41e   : > { %v4925_v54 = vsel %vm8454_vm4, %v4920_v35, %v4924_v2 }
 0x41f   : > { %v4915_v11 = vsel %vm8454_vm4, %v4910_v14, %v4914_v47  ;;  %v5047_v48 = vunpack.c.l.b16 %v4925_v54 }
 0x420   : > { %v5142_v62 = vpop.f32.mrf.mxu3  ;;  %v5046_v2 = vunpack.c.l.b16 %v4915_v11 }
 0x421   : > { %v10012_v61 = vadd.f32 %v5142_v62, %v9744_v42  ;;  %v4936_v42 = vshll.u32 %v7626_v15, 16  ;;  %v5426_v62 = vunpack.c.l.b16 %v5325_v13 }
 0x422   : > { %v3840_v30 = vpop.f32.mrf.mxu0  ;;  %v5067_v29 = vpack.c.b16 %v5047_v48, %v5046_v2 }
 0x423   : > { %v10014_v63 = vadd.f32 %v3840_v30, %v3238_v51  ;;  %v4927_v51 = vshrl.u32 %v4626_v0, 16  ;;  %v4930_v30 = vshll.u32 %v4626_v0, 16  ;;  %v4938_v40 = vrot.slane %v4936_v42, 5 }
 0x424   : > { %v10018_v41 = vpop.f32.mrf.mxu1  ;;  %v5456_v31 = vpack.c.b16 %v5427_v46, %v5426_v62  ;;  %v7340_v62 = vrot.slane %v5247_v32, 9 }
 0x425   : > { %11284 = vst [vmem:[#allocation48_spill] sm:$0xff] %v10018_v41  ;;  %v7627_v41 = vld [vmem:[#allocation2 + $0x40] sm:$0xf]  ;;  %v4929_v14 = vrot.slane %v4927_v51, 4  ;;  %v4932_v54 = vrot.slane %v4930_v30, 5  ;;  %v4943_v0 = vor.u32 %v4942_v39, %v4938_v40 }
 0x426   : > { %v5331_v47 = vrot.slane %v7627_v41, 5  ;;  %v7629_v51 = vld [vmem:[#allocation2 + $0x44] sm:$0x1]  ;;  %v10041_v39 = vld [vmem:[#allocation2 + $0xb8] sm:$0xf] }
 0x427   : > { %v4933_v46 = vor.u32 %v4932_v54, %v4929_v14  ;;  %v4944_v48 = vrot.slane %v4943_v0, 4  ;;  %v5334_v30 = vrot.slane %v7629_v51, 5  ;;  %v4964_v14 = vshrl.u32 %v10041_v39, 16 }
 0x428   : > { %v5144_v38 = vpop.f32.mrf.mxu3  ;;  %v5333_v13 = vrot.slane %v5331_v47, 4  ;;  %v5332_v0 = vsel %vm8376_vm10, %v7340_v62, %v5331_v47 }
 0x429   : > { %v10027_v35 = vadd.f32 %v5144_v38, %v9773_v60  ;;  %v7628_v60 = vld [vmem:[#allocation2 + $0xb0] sm:$0x1] }
 0x42a   : > { %v3843_v24 = vpop.f32.mrf.mxu0  ;;  %v4946_v42 = vshll.u32 %v7628_v60, 16 }
 0x42b   : > { %v10030_v15 = vadd.f32 %v3843_v24, %v9647_v43  ;;  %v3240_v43 = vadd.f32 %v9665_v22, %v9571_v55  ;;  %v4629_v22 = vld [vmem:[#allocation2 + $0xb4] sm:$0xf] }
 0x42c   : > { %v10033_v12 = vpop.f32.mrf.mxu1  ;;  %v4948_v2 = vrot.slane %v4946_v42, 5 }
 0x42d   : > { %7356 = vmatmul.msk.bf16.gmra.mxu0 %vm420_vm0, %v5456_v31  ;;  %11285 = vst [vmem:[#allocation49_spill] sm:$0xff] %v10033_v12  ;;  %7332 = vmatmul.msk.bf16.gmra.mxu3 %vm420_vm0, %v5067_v29  ;;  %v5335_v31 = vsel %vm8376_vm10, %v5333_v13, %v5334_v30  ;;  %v4934_v29 = vrot.slane %v4933_v46, 4  ;;  %v4951_v13 = vshrl.u32 %v4629_v22, 16  ;;  %v4954_v46 = vshll.u32 %v4629_v22, 16  ;;  %v10063_v12 = vld [vmem:[#allocation2 + $0xbc] sm:$0x1] }
 0x42e   : > { %v4949_v55 = vsel %vm8454_vm4, %v4944_v48, %v4948_v2  ;;  %v5429_v42 = vunpack.c.l.b16 %v5335_v31 }
 0x42f   : > { %v4939_v60 = vsel %vm8454_vm4, %v4934_v29, %v4938_v40  ;;  %v5049_v32 = vunpack.c.l.b16 %v4949_v55  ;;  %v7630_v40 = vld [vmem:[#allocation2 + $0x4c] sm:$0xf]  ;;  %v4953_v29 = vrot.slane %v4951_v13, 4  ;;  %v4956_v55 = vrot.slane %v4954_v46, 5 }
 0x430   : > { %v5147_v11 = vpop.f32.mrf.mxu3  ;;  %v5048_v2 = vunpack.c.l.b16 %v4939_v60  ;;  %v5338_v31 = vrot.slane %v7630_v40, 5 }
 0x431   : > { %v10039_v41 = vadd.f32 %v5147_v11, %v9801_v7  ;;  %v4960_v7 = vshll.u32 %v10041_v39, 16  ;;  %v5428_v11 = vunpack.c.l.b16 %v5332_v0  ;;  %v4957_v0 = vor.u32 %v4956_v55, %v4953_v29 }
 0x432   : > { %v3845_v38 = vpop.f32.mrf.mxu0  ;;  %v5068_v62 = vpack.c.b16 %v5049_v32, %v5048_v2 }
 0x433   : > { %v10043_v24 = vadd.f32 %v3845_v38, %v3240_v43  ;;  %v4962_v48 = vrot.slane %v4960_v7, 5  ;;  %v4966_v38 = vrot.slane %v4964_v14, 4  ;;  %v5457_v47 = vpack.c.b16 %v5429_v42, %v5428_v11  ;;  %v5248_v42 = vld [vmem:[#allocation2 + $0x48] sm:$0xe] }
 0x434   : > { %v10051_v54 = vpop.f32.mrf.mxu1  ;;  %v5340_v14 = vrot.slane %v5338_v31, 4 }
 0x435   : > { %11286 = vst [vmem:[#allocation50_spill] sm:$0xff] %v10043_v24  ;;  %v4967_v22 = vor.u32 %v4966_v38, %v4962_v48  ;;  %v7341_v38 = vrot.slane %v5248_v42, 9 }
 0x436   : > { %11287 = vst [vmem:[#allocation51_spill] sm:$0xff] %v10051_v54 }
 0x437   : > { %v4968_v60 = vrot.slane %v4967_v22, 4  ;;  %v5339_v29 = vsel %vm8376_vm10, %v7341_v38, %v5338_v31  ;;  %v10088_v31 = vld [vmem:[#allocation2 + $0xc8] sm:$0x1] }
 0x438   : > { %v5149_v43 = vpop.f32.mrf.mxu3 }
 0x439   : > { %v10058_v51 = vadd.f32 %v5149_v43, %v9829_v9  ;;  %v4970_v9 = vshll.u32 %v10063_v12, 16  ;;  %v7631_v43 = vld [vmem:[#allocation2 + $0x50] sm:$0x1] }
 0x43a   : > { %v3848_v30 = vpop.f32.mrf.mxu0  ;;  %v5341_v11 = vrot.slane %v7631_v43, 5 }
 0x43b   : > { %v10061_v54 = vadd.f32 %v3848_v30, %v9694_v44  ;;  %v3242_v44 = vadd.f32 %v9713_v58, %v9618_v50  ;;  %v10070_v30 = vld [vmem:[#allocation2 + $0xc4] sm:$0xf]  ;;  %v4972_v46 = vrot.slane %v4970_v9, 5  ;;  %v4632_v50 = vld [vmem:[#allocation2 + $0xc0] sm:$0xf] }
 0x43c   : > { %v4251_v7 = vpop.f32.mrf.mxu1  ;;  %v5342_v2 = vsel %vm8376_vm10, %v5340_v14, %v5341_v11  ;;  %v4984_v58 = vshll.u32 %v10070_v30, 16  ;;  %v4988_v40 = vshrl.u32 %v10070_v30, 16  ;;  %v4978_v42 = vshll.u32 %v4632_v50, 16 }
 0x43d   : > { %11288 = vst [vmem:[#allocation52_spill] sm:$0xff] %v10061_v54  ;;  %7357 = vmatmul.msk.bf16.gmra.mxu0 %vm420_vm0, %v5457_v47  ;;  %7333 = vmatmul.msk.bf16.gmra.mxu3 %vm420_vm0, %v5068_v62  ;;  %v4958_v47 = vrot.slane %v4957_v0, 4  ;;  %v4973_v62 = vsel %vm8454_vm4, %v4968_v60, %v4972_v46  ;;  %v5431_v22 = vunpack.c.l.b16 %v5342_v2  ;;  %v5430_v14 = vunpack.c.l.b16 %v5339_v29 }
 0x43e   : > { %v5051_v9 = vunpack.c.l.b16 %v4973_v62  ;;  %v4986_v0 = vrot.slane %v4984_v58, 5  ;;  %v5345_v46 = vrot.slane %v9750_v17, 5  ;;  %v4980_v2 = vrot.slane %v4978_v42, 5  ;;  %v4635_v17 = vld [vmem:[#allocation2 + $0xcc] sm:$0xf] }
 0x43f   : > { %v4963_v55 = vsel %vm8454_vm4, %v4958_v47, %v4962_v48  ;;  %v5458_v54 = vpack.c.b16 %v5431_v22, %v5430_v14  ;;  %v11292_v22 = vld [vmem:[#allocation17_spill] sm:$0xff] }
 0x440   : > { %v5050_v11 = vunpack.c.l.b16 %v4963_v55  ;;  %v5347_v58 = vrot.slane %v5345_v46, 4  ;;  %v10096_v55 = vld [vmem:[#allocation2 + $0xd0] sm:$0xf] }
 0x442   : > { %v3850_v32 = vpop.f32.mrf.mxu0  ;;  %v5069_v38 = vpack.c.b16 %v5051_v9, %v5050_v11  ;;  %v11293_v9 = vld [vmem:[#allocation3_spill] sm:$0xff]  ;;  %v5002_v11 = vshll.u32 %v4635_v17, 16 }
 0x443   : > { %v10072_v13 = vadd.f32 %v3850_v32, %v3242_v44  ;;  %v4975_v44 = vshrl.u32 %v4632_v50, 16  ;;  %v4990_v32 = vrot.slane %v4988_v40, 4  ;;  %v4994_v50 = vshll.u32 %v10088_v31, 16  ;;  %v5249_v40 = vld [vmem:[#allocation2 + $0x54] sm:$0xe] }
 0x444   : > { %v10084_v43 = vpop.f32.mrf.mxu1 }
 0x445   : > { %11289 = vst [vmem:[#allocation53_spill] sm:$0xff] %v10072_v13  ;;  %v4977_v48 = vrot.slane %v4975_v44, 4  ;;  %v4991_v62 = vor.u32 %v4990_v32, %v4986_v0  ;;  %v3244_v44 = vadd.f32 %v11293_v9, %v11292_v22  ;;  %v4996_v42 = vrot.slane %v4994_v50, 5 }
 0x446   : > { %11290 = vst [vmem:[#allocation54_spill] sm:$0xff] %v10084_v43  ;;  %v4999_v32 = vshrl.u32 %v4635_v17, 16  ;;  %v10112_v43 = vld [vmem:[#allocation2 + $0xd4] sm:$0x1] }
 0x447   : > { %v4981_v29 = vor.u32 %v4980_v2, %v4977_v48 }
 0x449   : > { %v4982_v2 = vrot.slane %v4981_v29, 4 }
 0x44a   : > { %v3853_v60 = vpop.f32.mrf.mxu0 }
 0x44b   : > { %v3897_v13 = vadd.f32 %v3853_v60, %v9742_v20  ;;  %v5348_v20 = vrot.slane %v9787_v19, 5  ;;  %v5012_v19 = vshrl.u32 %v10096_v55, 16  ;;  %v4987_v50 = vsel %vm8454_vm4, %v4982_v2, %v4986_v0 }
 0x44c   : > { %v4256_v48 = vpop.f32.mrf.mxu1  ;;  %v5052_v29 = vunpack.c.l.b16 %v4987_v50  ;;  %v5352_v0 = vrot.slane %v9813_v25, 5  ;;  %v11296_v50 = vld [vmem:[#allocation6_spill] sm:$0xff] }
 0x44d   : > { %v10090_v47 = vadd.f32 %v4251_v7, %v3897_v13  ;;  %7358 = vmatmul.msk.bf16.gmra.mxu0 %vm420_vm0, %v5458_v54  ;;  %7334 = vmatmul.msk.bf16.gmra.mxu3 %vm420_vm0, %v5069_v38  ;;  %v4992_v7 = vrot.slane %v4991_v62, 4  ;;  %v7342_v54 = vrot.slane %v5249_v40, 9  ;;  %v5349_v14 = vsel %vm8376_vm10, %v5347_v58, %v5348_v20 }
 0x44e   : > { %v5008_v38 = vshll.u32 %v10096_v55, 16  ;;  %v5433_v58 = vunpack.c.l.b16 %v5349_v14  ;;  %v5001_v40 = vrot.slane %v4999_v32, 4  ;;  %v5004_v20 = vrot.slane %v5002_v11, 5 }
 0x44f   : > { %11291 = vst [vmem:[#allocation55_spill] sm:$0xff] %v10090_v47  ;;  %v4997_v22 = vsel %vm8454_vm4, %v4992_v7, %v4996_v42  ;;  %v5346_v62 = vsel %vm8376_vm10, %v7342_v54, %v5345_v46  ;;  %v5014_v17 = vrot.slane %v5012_v19, 4  ;;  %v5018_v46 = vshll.u32 %v10112_v43, 16 }
 0x450   : > { %v5010_v9 = vrot.slane %v5008_v38, 5  ;;  %v5005_v42 = vor.u32 %v5004_v20, %v5001_v40  ;;  %v5354_v2 = vrot.slane %v5352_v0, 4 }
 0x451   : > { %v5020_v19 = vrot.slane %v5018_v46, 5  ;;  %v11297_v46 = vld [vmem:[#allocation10_spill] sm:$0xff] }
 0x452   : > { %v3855_v13 = vpop.f32.mrf.mxu0  ;;  %v5015_v24 = vor.u32 %v5014_v17, %v5010_v9  ;;  %v5006_v11 = vrot.slane %v5005_v42, 4 }
 0x453   : > { %v10102_v60 = vadd.f32 %v3855_v13, %v3244_v44  ;;  %v5053_v44 = vunpack.c.l.b16 %v4997_v22  ;;  %v5432_v13 = vunpack.c.l.b16 %v5346_v62  ;;  %v5250_v22 = vld [vmem:[#allocation2 + $0x60] sm:$0xe] }
 0x454   : > { %v10120_v32 = vpop.f32.mrf.mxu1  ;;  %v5016_v38 = vrot.slane %v5015_v24, 4  ;;  %v7343_v40 = vrot.slane %v5250_v22, 9 }
 0x455   : > { %11294 = vst [vmem:[#allocation17_spill] sm:$0xff] %v10102_v60  ;;  %v5459_v47 = vpack.c.b16 %v5433_v58, %v5432_v13  ;;  %v5070_v54 = vpack.c.b16 %v5053_v44, %v5052_v29  ;;  %v5355_v58 = vrot.slane %v11296_v50, 5 }
 0x457   : > { %v5356_v24 = vsel %vm8376_vm10, %v5354_v2, %v5355_v58  ;;  %v11299_v2 = vld [vmem:[#allocation21_spill] sm:$0xff] }
 0x458   : > { %v5435_v44 = vunpack.c.l.b16 %v5356_v24 }
 0x45a   : > { %v3858_v60 = vpop.f32.mrf.mxu0 }
 0x45b   : > { %v3899_v7 = vadd.f32 %v3858_v60, %v9799_v8  ;;  %v11295_v8 = vld [vmem:[#allocation18_spill] sm:$0xff] }
 0x45c   : > { %v3246_v60 = vadd.f32 %v9825_v21, %v11295_v8  ;;  %v5353_v21 = vsel %vm8376_vm10, %v7343_v40, %v5352_v0  ;;  %v4261_v13 = vpop.f32.mrf.mxu1  ;;  %v3248_v0 = vadd.f32 %v9911_v49, %v11299_v2  ;;  %v5251_v8 = vld [vmem:[#allocation2 + $0x6c] sm:$0xe] }
 0x45d   : > { %v10117_v14 = vadd.f32 %v4256_v48, %v3899_v7  ;;  %7359 = vmatmul.msk.bf16.gmra.mxu0 %vm420_vm0, %v5459_v47  ;;  %7335 = vmatmul.msk.bf16.gmra.mxu3 %vm420_vm0, %v5070_v54  ;;  %v5011_v47 = vsel %vm8454_vm4, %v5006_v11, %v5010_v9  ;;  %v5021_v48 = vsel %vm8454_vm4, %v5016_v38, %v5020_v19  ;;  %v5434_v29 = vunpack.c.l.b16 %v5353_v21  ;;  %v11298_v11 = vld [vmem:[#allocation11_spill] sm:$0xff] }
 0x45e   : > { %v5054_v20 = vunpack.c.l.b16 %v5011_v47  ;;  %v5055_v17 = vunpack.c.l.b16 %v5021_v48  ;;  %v5359_v28 = vrot.slane %v11298_v11, 5  ;;  %v7344_v58 = vrot.slane %v5251_v8, 9 }
 0x45f   : > { %v5460_v9 = vpack.c.b16 %v5435_v44, %v5434_v29  ;;  %v5366_v44 = vrot.slane %v9894_v4, 5  ;;  %v5252_v29 = vld [vmem:[#allocation2 + $0x78] sm:$0xe]  ;;  %vm6563_vm4 = vcmask 1043456  }
 0x460   : > { %v5071_v42 = vpack.c.b16 %v5055_v17, %v5054_v20  ;;  %v5361_v19 = vrot.slane %v5359_v28, 4  ;;  %v5360_v48 = vsel %vm8376_vm10, %v7344_v58, %v5359_v28  ;;  %v10169_v28 = vld [vmem:[%s11173_s2] ss:$0 sm:$0xff] }
 0x461   : > { %v5436_v24 = vunpack.c.l.b16 %v5360_v48 }
 0x462   : > { %v3860_v62 = vpop.f32.mrf.mxu0 }
 0x463   : > { %v10126_v25 = vadd.f32 %v3860_v62, %v3246_v60  ;;  %v5362_v62 = vrot.slane %v9884_v26, 5 }
 0x464   : > { %v10144_v60 = vpop.f32.mrf.mxu1 }
 0x465   : > { %v5363_v47 = vsel %vm8376_vm10, %v5361_v19, %v5362_v62  ;;  %v5253_v62 = vld [vmem:[#allocation2 + $0x84] sm:$0xe] }
 0x466   : > { %v5437_v40 = vunpack.c.l.b16 %v5363_v47  ;;  %v5376_v47 = vrot.slane %v9952_v10, 5  ;;  %v7346_v48 = vrot.slane %v5253_v62, 9 }
 0x468   : > { %v5461_v17 = vpack.c.b16 %v5437_v40, %v5436_v24 }
 0x46a   : > { %v3863_v7 = vpop.f32.mrf.mxu0 }
 0x46b   : > { %v3901_v54 = vadd.f32 %v3863_v7, %v11297_v46 }
 0x46c   : > { %v4266_v21 = vpop.f32.mrf.mxu1 }
 0x46d   : > { %v10138_v38 = vadd.f32 %v4261_v13, %v3901_v54  ;;  %7360 = vmatmul.msk.bf16.gmra.mxu0 %vm420_vm0, %v5460_v9  ;;  %7336 = vmatmul.msk.bf16.gmra.mxu3 %vm420_vm0, %v5071_v42  ;;  %v5368_v13 = vrot.slane %v5366_v44, 4  ;;  %v5369_v42 = vrot.slane %v9918_v33, 5  ;;  %v7345_v54 = vrot.slane %v5252_v29, 9 }
 0x46f   : > { %v5367_v9 = vsel %vm8376_vm10, %v7345_v54, %v5366_v44 }
 0x470   : > { %v5438_v11 = vunpack.c.l.b16 %v5367_v9  ;;  %v11300_v9 = vld [vmem:[#allocation7_spill] sm:$0xff] }
 0x472   : > { %v3865_v22 = vpop.f32.mrf.mxu0 }
 0x473   : > { %v10147_v50 = vadd.f32 %v3865_v22, %v3248_v0 }
 0x47a   : > { %v3868_v20 = vpop.f32.mrf.mxu0 }
 0x47b   : > { %v3903_v49 = vadd.f32 %v3868_v20, %v9927_v53  ;;  %v5370_v53 = vsel %vm8376_vm10, %v5368_v13, %v5369_v42 }
 0x47c   : > { %v5439_v4 = vunpack.c.l.b16 %v5370_v53 }
 0x47d   : > { %7361 = vmatmul.msk.bf16.gmra.mxu0 %vm420_vm0, %v5461_v17  ;;  %v10156_v26 = vadd.f32 %v4266_v21, %v3903_v49 }
 0x47e   : > { %v5462_v2 = vpack.c.b16 %v5439_v4, %v5438_v11 }
 0x482   : > { %v3870_v7 = vpop.f32.mrf.mxu0 }
 0x483   : > { %v10160_v46 = vadd.f32 %v3870_v7, %v9947_v59  ;;  %v5373_v59 = vrot.slane %v9931_v16, 5 }
 0x485   : > { %v5375_v22 = vrot.slane %v5373_v59, 4  ;;  %v5374_v24 = vsel %vm8376_vm10, %v7346_v48, %v5373_v59  ;;  %v5404_v48 = vrot.slane %v10063_v12, 5 }
 0x486   : > { %v5440_v17 = vunpack.c.l.b16 %v5374_v24 }
 0x487   : > { %v5377_v16 = vsel %vm8376_vm10, %v5375_v22, %v5376_v47 }
 0x488   : > { %v5441_v49 = vunpack.c.l.b16 %v5377_v16 }
 0x48a   : > { %v5530_v19 = vpop.f32.mrf.mxu0 }
 0x48b   : > { %v5610_v33 = vadd.f32 %v5530_v19, %v9960_v6 }
 0x48d   : > { %7362 = vmatmul.msk.bf16.gmra.mxu0 %vm420_vm0, %v5462_v2  ;;  %v10175_v0 = vadd.f32 %v10169_v28, %v5610_v33 }
 0x48f   : > { %v5679_v8 = vsel %vm5678_vm2, %v10175_v0, 0.0 }
 0x490   : > { %5680 = vadd.xlane.f32.xlu1 %v5679_v8  ;;  %v11301_v8 = vld [vmem:[#allocation9_spill] sm:$0xff] }
 0x492   : > { %v5532_v58 = vpop.f32.mrf.mxu0 }
 0x493   : > { %v5611_v6 = vadd.f32 %v5532_v58, %v9975_v56  ;;  %v5463_v56 = vpack.c.b16 %v5441_v49, %v5440_v17  ;;  %v11302_v58 = vld [vmem:[#allocation16_spill] sm:$0xff] }
 0x495   : > { %v10184_v40 = vadd.f32 %v10169_v28, %v5611_v6  ;;  %v5257_v6 = vld [vmem:[#allocation2 + $0xb4] sm:$0xe] }
 0x497   : > { %v5682_v20 = vsel %vm5678_vm2, %v10184_v40, 0.0 }
 0x498   : > { %5683 = vadd.xlane.f32.xlu2 %v5682_v20 }
 0x49a   : > { %v5535_v21 = vpop.f32.mrf.mxu0 }
 0x49b   : > { %v5612_v10 = vadd.f32 %v5535_v21, %v9985_v37  ;;  %v5408_v21 = vrot.slane %v10070_v30, 5 }
 0x49d   : > { %7363 = vmatmul.msk.bf16.gmra.mxu0 %vm420_vm0, %v5463_v56  ;;  %v10193_v44 = vadd.f32 %v10169_v28, %v5612_v10  ;;  %v5258_v10 = vld [vmem:[#allocation2 + $0xc0] sm:$0xe]  ;;  %v5411_v56 = vrot.slane %v10088_v31, 5 }
 0x49f   : > { %v5685_v13 = vsel %vm5678_vm2, %v10193_v44, 0.0 }
 0x4a0   : > { %5686 = vadd.xlane.f32.xlu0 %v5685_v13  ;;  %v7351_v13 = vrot.slane %v5258_v10, 9  ;;  %v11305_v10 = vld [vmem:[#allocation14_spill] sm:$0xff] }
 0x4a2   : > { %v5537_v29 = vpop.f32.mrf.mxu0 }
 0x4a3   : > { %v5613_v7 = vadd.f32 %v5537_v29, %v10000_v1  ;;  %v5409_v29 = vsel %vm8376_vm10, %v7351_v13, %v5408_v21  ;;  %v11306_v13 = vld [vmem:[#allocation5_spill] sm:$0xff] }
 0x4a5   : > { %v10199_v42 = vadd.f32 %v10169_v28, %v5613_v7 }
 0x4a7   : > { %v5688_v54 = vsel %vm5678_vm2, %v10199_v42, 0.0 }
 0x4a8   : > { %5689 = vadd.xlane.f32.xlu1 %v5688_v54  ;;  %v7647_v54 = vmov 8.0  }
 0x4a9   : > { %7541 = vrcp.f32 %v7647_v54 }
 0x4aa   : > { %v5540_v37 = vpop.f32.mrf.mxu0 }
 0x4ab   : > { %v5614_v53 = vadd.f32 %v5540_v37, %v10012_v61  ;;  %v5450_v37 = vunpack.c.l.b16 %v5409_v29 }
 0x4ad   : > { %7364 = vmatmul.msk.bf16.gmra.mxu0 %vm420_vm0, %v11300_v9  ;;  %v10207_v4 = vadd.f32 %v10169_v28, %v5614_v53  ;;  %v5415_v53 = vrot.slane %v10096_v55, 5  ;;  %v5259_v9 = vld [vmem:[#allocation2 + $0xcc] sm:$0xe] }
 0x4af   : > { %v5691_v11 = vsel %vm5678_vm2, %v10207_v4, 0.0  ;;  %v5417_v31 = vrot.slane %v5415_v53, 4 }
 0x4b0   : > { %5692 = vadd.xlane.f32.xlu2 %v5691_v11  ;;  %v7542_v11 = vpop.eup %7541 }
 0x4b1   : > { %vm5780_vm7 = vweird.f32 %v7542_v11 }
 0x4b2   : > { %v5542_v1 = vpop.f32.mrf.mxu0 }
 0x4b3   : > { %v5615_v19 = vadd.f32 %v5542_v1, %v10027_v35  ;;  %v5401_v35 = vrot.slane %v10041_v39, 5  ;;  %v5410_v39 = vrot.slane %v5408_v21, 4  ;;  %v7352_v1 = vrot.slane %v5259_v9, 9  ;;  %v11308_v9 = vld [vmem:[#allocation29_spill] sm:$0xff] }
 0x4b5   : > { %v10213_v33 = vadd.f32 %v10169_v28, %v5615_v19  ;;  %v5403_v47 = vrot.slane %v5401_v35, 4  ;;  %v5412_v12 = vsel %vm8376_vm10, %v5410_v39, %v5411_v56  ;;  %v5418_v19 = vrot.slane %v10112_v43, 5 }
 0x4b6   : > { %v5451_v7 = vunpack.c.l.b16 %v5412_v12  ;;  %v11307_v12 = vld [vmem:[#allocation4_spill] sm:$0xff] }
 0x4b7   : > { %v5694_v2 = vsel %vm5678_vm2, %v10213_v33, 0.0  ;;  %v5405_v16 = vsel %vm8376_vm10, %v5403_v47, %v5404_v48  ;;  %v4498_v48 = vpop.f32.mrf.mxu2  ;;  %v4279_v29 = vadd.f32 %v11307_v12, %v11306_v13  ;;  %v11313_v13 = vld [vmem:[#allocation20_spill] sm:$0xff] }
 0x4b8   : > { %5695 = vadd.xlane.f32.xlu0 %v5694_v2  ;;  %v5449_v20 = vunpack.c.l.b16 %v5405_v16  ;;  %v5468_v30 = vpack.c.b16 %v5451_v7, %v5450_v37  ;;  %v5776_v2 = vmul.f32 8.0, %v7542_v11 }
 0x4ba   : > { %v5545_v61 = vpop.f32.mrf.mxu0 }
 0x4bb   : > { %v5616_v59 = vadd.f32 %v5545_v61, %v10039_v41  ;;  %v7350_v41 = vrot.slane %v5257_v6, 9  ;;  %v5416_v61 = vsel %vm8376_vm10, %v7352_v1, %v5415_v53 }
 0x4bd   : > { %7365 = vmatmul.msk.bf16.gmra.mxu0 %vm420_vm0, %v11301_v8  ;;  %v10221_v22 = vadd.f32 %v10169_v28, %v5616_v59  ;;  %v5402_v24 = vsel %vm8376_vm10, %v7350_v41, %v5401_v35  ;;  %v5419_v59 = vsel %vm8376_vm10, %v5417_v31, %v5418_v19  ;;  %v5452_v8 = vunpack.c.l.b16 %v5416_v61  ;;  %v5152_v41 = vpop.f32.mrf.mxu3  ;;  %v11309_v19 = vld [vmem:[#allocation37_spill] sm:$0xff] }
 0x4be   : > { %v5448_v49 = vunpack.c.l.b16 %v5402_v24  ;;  %v5777_v35 = vsub.f32 1.0, %v5776_v2  ;;  %v4566_v31 = vadd.f32 %v4498_v48, %v4279_v29  ;;  %v11314_v29 = vld [vmem:[#allocation39_spill] sm:$0xff] }
 0x4bf   : > { %v5697_v62 = vsel %vm5678_vm2, %v10221_v22, 0.0  ;;  %v4500_v7 = vpop.f32.mrf.mxu2 }
 0x4c0   : > { %5698 = vadd.xlane.f32.xlu0 %v5697_v62  ;;  %v5467_v17 = vpack.c.b16 %v5449_v20, %v5448_v49  ;;  %v5453_v62 = vunpack.c.l.b16 %v5419_v59  ;;  %v5778_v47 = vmul.f32 %v7542_v11, %v5777_v35  ;;  %v11304_v49 = vld [vmem:[#allocation13_spill] sm:$0xff] }
 0x4c2   : > { %v5547_v55 = vpop.f32.mrf.mxu0  ;;  %v5779_v6 = vadd.f32 %v7542_v11, %v5778_v47 }
 0x4c3   : > { %v5617_v54 = vadd.f32 %v5547_v55, %v10058_v51  ;;  %v5220_v51 = vadd.f32 %v5152_v41, %v4566_v31 }
 0x4c4   : > { %v10248_v43 = vsel %vm5780_vm7, %v7542_v11, %v5779_v6 }
 0x4c5   : > { %v5154_v53 = vpop.f32.mrf.mxu3  ;;  %v10270_v59 = vadd.f32 %v10169_v28, %v5617_v54  ;;  %v11315_v54 = vld [vmem:[#allocation12_spill] sm:$0xff] }
 0x4c7   : > { %v5700_v47 = vsel %vm5678_vm2, %v10270_v59, 0.0 }
 0x4ca   : > { %v5550_v16 = vpop.f32.mrf.mxu0 }
 0x4cb   : > { %v5618_v55 = vadd.f32 %v5550_v16, %v5220_v51 }
 0x4cd   : > { %7366 = vmatmul.msk.bf16.gmra.mxu0 %vm420_vm0, %v11302_v58  ;;  %v5469_v58 = vpack.c.b16 %v5453_v62, %v5452_v8  ;;  %v11310_v62 = vld [vmem:[#allocation8_spill] sm:$0xff]  ;;  %v10285_v16 = vadd.f32 %v10169_v28, %v5618_v55 }
 0x4d2   : > { %v5552_v1 = vpop.f32.mrf.mxu0 }
 0x4dd   : > { %7367 = vmatmul.msk.bf16.gmra.mxu0 %vm420_vm0, %v5467_v17  ;;  %v2523_v17 = vadd.f32 %v11304_v49, %v11303_v45  ;;  %v5157_v45 = vpop.f32.mrf.mxu3 }
 0x4df   : > { %v2942_v56 = vadd.f32 %v11305_v10, %v2523_v17 }
 0x4e1   : > { %v3228_v11 = vadd.f32 %v11308_v9, %v2942_v56 }
 0x4e3   : > { %v3882_v2 = vadd.f32 %v11309_v19, %v3228_v11  ;;  %v11316_v11 = vld [vmem:[#allocation31_spill] sm:$0xff]  ;;  %v11317_v19 = vld [vmem:[#allocation41_spill] sm:$0xff] }
 0x4e5   : > { %v4280_v35 = vadd.f32 %v11310_v62, %v3882_v2  ;;  %v5159_v62 = vpop.f32.mrf.mxu3 }
 0x4e7   : > { %v4567_v49 = vadd.f32 %v4500_v7, %v4280_v35 }
 0x4e9   : > { %v5221_v10 = vadd.f32 %v5154_v53, %v4567_v49  ;;  %v11320_v49 = vld [vmem:[#allocation23_spill] sm:$0xff] }
 0x4ed   : > { %7368 = vmatmul.msk.bf16.gmra.mxu0 %vm420_vm0, %v5468_v30 }
 0x4fd   : > { %7369 = vmatmul.msk.bf16.gmra.mxu0 %vm420_vm0, %v5469_v58 }
 0x503   : > { %v5681_v24 = vpop.xlane.xlu1 %5680 }
 0x504   : > { %v5782_v20 = vmul.f32 %v10248_v43, %v5681_v24  ;;  %v11311_v24 = vld [vmem:[#allocation22_spill] sm:$0xff] }
 0x506   : > { %v10254_v21 = vsub.f32 %v10175_v0, %v5782_v20  ;;  %v11312_v20 = vld [vmem:[#allocation19_spill] sm:$0xff] }
 0x507   : > { %v2528_v41 = vadd.f32 %v11312_v20, %v11311_v24 }
 0x508   : > { %v5846_v39 = vmul.f32 %v10254_v21, %v10254_v21 }
 0x509   : > { %v2944_v12 = vadd.f32 %v11313_v13, %v2528_v41  ;;  %v11319_v41 = vld [vmem:[#allocation25_spill] sm:$0xff] }
 0x50a   : > { %v5878_v37 = vsel %vm5678_vm2, %v5846_v39, 0.0  ;;  %v5555_v39 = vpop.f32.mrf.mxu0 }
 0x50b   : > { %v5684_v30 = vpop.xlane.xlu2 %5683  ;;  %5879 = vadd.xlane.f32.xlu1 %v5878_v37  ;;  %v4281_v37 = vadd.f32 %v11315_v54, %v11314_v29  ;;  %v11321_v54 = vld [vmem:[#allocation24_spill] sm:$0xff] }
 0x50c   : > { %v5783_v0 = vmul.f32 %v10248_v43, %v5684_v30  ;;  %v5619_v30 = vadd.f32 %v5552_v1, %v5221_v10 }
 0x50e   : > { %v10267_v61 = vsub.f32 %v10184_v40, %v5783_v0  ;;  %v4503_v40 = vpop.f32.mrf.mxu2  ;;  %v3230_v0 = vadd.f32 %v11316_v11, %v2944_v12  ;;  %v10302_v1 = vadd.f32 %v10169_v28, %v5619_v30  ;;  %v5162_v30 = vpop.f32.mrf.mxu3 }
 0x50f   : > { %v4568_v31 = vadd.f32 %v4503_v40, %v4281_v37 }
 0x510   : > { %v5847_v8 = vmul.f32 %v10267_v61, %v10267_v61  ;;  %v3884_v2 = vadd.f32 %v11317_v19, %v3230_v0  ;;  %v5706_v24 = vsel %vm5678_vm2, %v10302_v1, 0.0 }
 0x511   : > { %v5222_v35 = vadd.f32 %v5157_v45, %v4568_v31  ;;  %v2533_v45 = vadd.f32 %v11320_v49, %v11319_v41  ;;  %v11323_v31 = vld [vmem:[#allocation34_spill] sm:$0xff] }
 0x512   : > { %v5881_v58 = vsel %vm5678_vm2, %v5847_v8, 0.0 }
 0x513   : > { %v5687_v6 = vpop.xlane.xlu0 %5686  ;;  %5882 = vadd.xlane.f32.xlu2 %v5881_v58  ;;  %5701 = vadd.xlane.f32.xlu1 %v5700_v47  ;;  %v5557_v58 = vpop.f32.mrf.mxu0  ;;  %v11318_v47 = vld [vmem:[#allocation38_spill] sm:$0xff]  ;;  %v2946_v37 = vadd.f32 %v11321_v54, %v2533_v45 }
 0x514   : > { %v5784_v48 = vmul.f32 %v10248_v43, %v5687_v6  ;;  %v4282_v6 = vadd.f32 %v11318_v47, %v3884_v2  ;;  %v11324_v47 = vld [vmem:[#allocation42_spill] sm:$0xff] }
 0x515   : > { %v3232_v19 = vadd.f32 %v11323_v31, %v2946_v37 }
 0x516   : > { %v10282_v17 = vsub.f32 %v10193_v44, %v5784_v48  ;;  %v5703_v44 = vsel %vm5678_vm2, %v10285_v16, 0.0  ;;  %v4505_v51 = vpop.f32.mrf.mxu2  ;;  %v5620_v48 = vadd.f32 %v5555_v39, %v5222_v35 }
 0x517   : > { %v4569_v10 = vadd.f32 %v4505_v51, %v4282_v6 }
 0x518   : > { %v5848_v56 = vmul.f32 %v10282_v17, %v10282_v17  ;;  %v10317_v13 = vadd.f32 %v10169_v28, %v5620_v48 }
 0x519   : > { %v5223_v12 = vadd.f32 %v5159_v62, %v4569_v10  ;;  %v3886_v62 = vadd.f32 %v9929_v52, %v3232_v19  ;;  %v5164_v52 = vpop.f32.mrf.mxu3 }
 0x51a   : > { %v5884_v9 = vsel %vm5678_vm2, %v5848_v56, 0.0 }
 0x51b   : > { %v5690_v7 = vpop.xlane.xlu1 %5689  ;;  %5885 = vadd.xlane.f32.xlu2 %v5884_v9  ;;  %5704 = vadd.xlane.f32.xlu1 %v5703_v44  ;;  %v11322_v9 = vld [vmem:[#allocation40_spill] sm:$0xff]  ;;  %v5560_v0 = vpop.f32.mrf.mxu0  ;;  %v4284_v6 = vadd.f32 %v11324_v47, %v3886_v62 }
 0x51c   : > { %v5785_v53 = vmul.f32 %v10248_v43, %v5690_v7  ;;  %v4283_v44 = vadd.f32 %v11322_v9, %v9916_v36  ;;  %v5621_v7 = vadd.f32 %v5557_v58, %v5223_v12 }
 0x51e   : > { %v10299_v8 = vsub.f32 %v10199_v42, %v5785_v53  ;;  %v4508_v39 = vpop.f32.mrf.mxu2  ;;  %v10334_v36 = vadd.f32 %v10169_v28, %v5621_v7 }
 0x51f   : > { %v4570_v51 = vadd.f32 %v4508_v39, %v4283_v44 }
 0x520   : > { %v5849_v55 = vmul.f32 %v10299_v8, %v10299_v8 }
 0x521   : > { %v5167_v9 = vpop.f32.mrf.mxu3 }
 0x522   : > { %v5887_v40 = vsel %vm5678_vm2, %v5849_v55, 0.0  ;;  %v5224_v55 = vadd.f32 %v5162_v30, %v4570_v51  ;;  %v11326_v51 = vld [vmem:[#allocation26_spill] sm:$0xff] }
 0x523   : > { %v5693_v20 = vpop.xlane.xlu2 %5692  ;;  %5888 = vadd.xlane.f32.xlu0 %v5887_v40  ;;  %5707 = vadd.xlane.f32.xlu2 %v5706_v24  ;;  %v5562_v41 = vpop.f32.mrf.mxu0 }
 0x524   : > { %v5786_v42 = vmul.f32 %v10248_v43, %v5693_v20  ;;  %v5622_v40 = vadd.f32 %v5560_v0, %v5224_v55  ;;  %v5712_v20 = vsel %vm5678_vm2, %v10334_v36, 0.0 }
 0x526   : > { %v10314_v56 = vsub.f32 %v10207_v4, %v5786_v42  ;;  %v5709_v4 = vsel %vm5678_vm2, %v10317_v13, 0.0  ;;  %v4510_v48 = vpop.f32.mrf.mxu2  ;;  %v10347_v10 = vadd.f32 %v10169_v28, %v5622_v40 }
 0x527   : > { %v4571_v49 = vadd.f32 %v4510_v48, %v4284_v6  ;;  %v11327_v48 = vld [vmem:[#allocation27_spill] sm:$0xff] }
 0x528   : > { %v5850_v29 = vmul.f32 %v10314_v56, %v10314_v56  ;;  %v5715_v30 = vsel %vm5678_vm2, %v10347_v10, 0.0 }
 0x529   : > { %v5225_v39 = vadd.f32 %v5164_v52, %v4571_v49  ;;  %v11328_v52 = vld [vmem:[#allocation35_spill] sm:$0xff] }
 0x52a   : > { %v5890_v11 = vsel %vm5678_vm2, %v5850_v29, 0.0  ;;  %v4285_v29 = vadd.f32 %v9921_v34, %v9950_v27 }
 0x52b   : > { %v5696_v53 = vpop.xlane.xlu0 %5695  ;;  %5891 = vadd.xlane.f32.xlu0 %v5890_v11  ;;  %5710 = vadd.xlane.f32.xlu2 %v5709_v4  ;;  %v5623_v54 = vadd.f32 %v5562_v41, %v5225_v39  ;;  %v5565_v11 = vpop.f32.mrf.mxu0 }
 0x52c   : > { %v5787_v2 = vmul.f32 %v10248_v43, %v5696_v53 }
 0x52d   : > { %v10357_v7 = vadd.f32 %v10169_v28, %v5623_v54 }
 0x52e   : > { %v10331_v35 = vsub.f32 %v10213_v33, %v5787_v2  ;;  %v11325_v2 = vld [vmem:[#allocation28_spill] sm:$0xff] }
 0x52f   : > { %v5718_v34 = vsel %vm5678_vm2, %v10357_v7, 0.0  ;;  %v2538_v62 = vadd.f32 %v11326_v51, %v11325_v2 }
 0x530   : > { %v5851_v58 = vmul.f32 %v10331_v35, %v10331_v35 }
 0x531   : > { %v2948_v40 = vadd.f32 %v11327_v48, %v2538_v62 }
 0x532   : > { %v5893_v24 = vsel %vm5678_vm2, %v5851_v58, 0.0  ;;  %v5169_v58 = vpop.f32.mrf.mxu3 }
 0x533   : > { %v5699_v42 = vpop.xlane.xlu0 %5698  ;;  %5894 = vadd.xlane.f32.xlu1 %v5893_v24  ;;  %5713 = vadd.xlane.f32.xlu0 %v5712_v20  ;;  %v5567_v6 = vpop.f32.mrf.mxu0 }
 0x534   : > { %v5788_v33 = vmul.f32 %v10248_v43, %v5699_v42  ;;  %v3234_v42 = vadd.f32 %v11328_v52, %v2948_v40 }
 0x536   : > { %v10344_v45 = vsub.f32 %v10221_v22, %v5788_v33  ;;  %v4513_v22 = vpop.f32.mrf.mxu2  ;;  %v3888_v39 = vadd.f32 %v9962_v3, %v3234_v42 }
 0x537   : > { %v4572_v44 = vadd.f32 %v4513_v22, %v4285_v29 }
 0x538   : > { %v5852_v12 = vmul.f32 %v10344_v45, %v10344_v45 }
 0x539   : > { %v5226_v4 = vadd.f32 %v5167_v9, %v4572_v44  ;;  %v4286_v44 = vadd.f32 %v9935_v23, %v3888_v39 }
 0x53a   : > { %v5896_v37 = vsel %vm5678_vm2, %v5852_v12, 0.0 }
 0x53b   : > { %5897 = vadd.xlane.f32.xlu1 %v5896_v37  ;;  %5716 = vadd.xlane.f32.xlu0 %v5715_v30  ;;  %v5624_v0 = vadd.f32 %v5565_v11, %v5226_v4  ;;  %v5172_v30 = vpop.f32.mrf.mxu3  ;;  %v10383_v11 = vpop.f32.mrf.mxu0 }
 0x53d   : > { %v10362_v27 = vadd.f32 %v10169_v28, %v5624_v0 }
 0x53e   : > { %v4515_v55 = vpop.f32.mrf.mxu2 }
 0x53f   : > { %v5721_v53 = vsel %vm5678_vm2, %v10362_v27, 0.0  ;;  %v4573_v48 = vadd.f32 %v4515_v55, %v4286_v44  ;;  %v11333_v55 = vld [vmem:[#allocation33_spill] sm:$0xff] }
 0x541   : > { %v5227_v52 = vadd.f32 %v5169_v58, %v4573_v48 }
 0x543   : > { %5719 = vadd.xlane.f32.xlu1 %v5718_v34  ;;  %v5174_v58 = vpop.f32.mrf.mxu3 }
 0x546   : > { %v4518_v37 = vpop.f32.mrf.mxu2 }
 0x54b   : > { %5722 = vadd.xlane.f32.xlu1 %v5721_v53 }
 0x57e   : > { %v5880_v31 = vpop.xlane.xlu1 %5879 }
 0x57f   : > { %v5974_v19 = vmul.f32 %v5880_v31, %v10248_v43  ;;  %v11329_v31 = vld [vmem:[#allocation32_spill] sm:$0xff] }
 0x581   : > { %v6006_v47 = vadd.f32 1e-05, %v5974_v19  ;;  %v11330_v19 = vld [vmem:[#allocation30_spill] sm:$0xff] }
 0x582   : > { %v2543_v2 = vadd.f32 %v11330_v19, %v11329_v31  ;;  %v11336_v19 = vld [vmem:[#allocation46_spill] sm:$0xff] }
 0x583   : > { %7543 = vrsqrt.f32 %v6006_v47  ;;  %vm6044_vm13 = vweird.f32 %v6006_v47 }
 0x586   : > { %v5883_v24 = vpop.xlane.xlu2 %5882  ;;  %v5702_v20 = vpop.xlane.xlu1 %5701 }
 0x587   : > { %v5975_v33 = vmul.f32 %v5883_v24, %v10248_v43  ;;  %v5789_v41 = vmul.f32 %v10248_v43, %v5702_v20 }
 0x589   : > { %v7544_v49 = vpop.eup %7543  ;;  %v10374_v12 = vadd.f32 1e-05, %v5975_v33  ;;  %v10377_v29 = vsub.f32 %v10270_v59, %v5789_v41  ;;  %v2950_v41 = vadd.f32 %v11333_v55, %v2543_v2 }
 0x58a   : > { %v6039_v54 = vmul.f32 %v7544_v49, %v6006_v47  ;;  %vm6045_vm0 = vweird.f32 %v7544_v49  ;;  %v11334_v47 = vld [vmem:[#allocation43_spill] sm:$0xff] }
 0x58b   : > { %7545 = vrsqrt.f32 %v10374_v12  ;;  %v5853_v22 = vmul.f32 %v10377_v29, %v10377_v29  ;;  %vm10396_vm14 = vmor %vm6044_vm13, %vm6045_vm0  ;;  %vm6054_vm9 = vweird.f32 %v10374_v12 }
 0x58c   : > { %v6040_v9 = vmul.f32 %v7544_v49, %v6039_v54  ;;  %v4287_v54 = vadd.f32 %v11334_v47, %v9978_v18 }
 0x58d   : > { %v5899_v3 = vsel %vm5678_vm2, %v5853_v22, 0.0  ;;  %v4520_v22 = vpop.f32.mrf.mxu2 }
 0x58e   : > { %v6041_v4 = vmul.f32 0.5, %v6040_v9  ;;  %v5886_v0 = vpop.xlane.xlu2 %5885  ;;  %v5705_v34 = vpop.xlane.xlu1 %5704  ;;  %5900 = vadd.xlane.f32.xlu2 %v5899_v3  ;;  %v5625_v9 = vadd.f32 %v5567_v6, %v5227_v52  ;;  %v11335_v3 = vld [vmem:[#allocation36_spill] sm:$0xff] }
 0x58f   : > { %v5976_v59 = vmul.f32 %v5886_v0, %v10248_v43  ;;  %v5790_v53 = vmul.f32 %v10248_v43, %v5705_v34  ;;  %v6510_v6 = vld [vmem:[%s11178_s7] sm:$0xf] }
 0x590   : > { %v6042_v51 = vsub.f32 1.5, %v6041_v4  ;;  %v3236_v4 = vadd.f32 %v11335_v3, %v2950_v41  ;;  %v10430_v42 = vadd.f32 %v10169_v28, %v5625_v9  ;;  %v6565_v41 = vsel %vm6563_vm4, %v6510_v6, 0  ;;  %v5177_v6 = vpop.f32.mrf.mxu3 }
 0x591   : > { %v7546_v62 = vpop.eup %7545  ;;  %v10390_v23 = vadd.f32 1e-05, %v5976_v59  ;;  %v10393_v40 = vsub.f32 %v10285_v16, %v5790_v53  ;;  %v10413_v53 = vld [vmem:[%s11176_s5] ss:$0 sm:$0xff]  ;;  %6574 = vmatpush.bf16.msra.mxu1 %v6565_v41 }
 0x592   : > { %v6043_v24 = vmul.f32 %v7544_v49, %v6042_v51  ;;  %v6049_v20 = vmul.f32 %v7546_v62, %v10374_v12  ;;  %v3890_v2 = vadd.f32 %v11336_v19, %v3236_v4  ;;  %v5572_v51 = vpop.f32.mrf.mxu0  ;;  %vm6055_vm10 = vweird.f32 %v7546_v62  ;;  %v11337_v12 = vld [vmem:[#allocation44_spill] sm:$0xff] }
 0x593   : > { %7547 = vrsqrt.f32 %v10390_v23  ;;  %v5854_v33 = vmul.f32 %v10393_v40, %v10393_v40  ;;  %vm6056_vm11 = vmor %vm6054_vm9, %vm6055_vm10  ;;  %v5724_v4 = vsel %vm5678_vm2, %v10430_v42, 0.0  ;;  %vm6064_vm12 = vweird.f32 %v10390_v23 }
 0x594   : > { %v6047_v16 = vsel %vm10396_vm14, %v7544_v49, %v6043_v24  ;;  %v6050_v39 = vmul.f32 %v7546_v62, %v6049_v20  ;;  %v4574_v20 = vadd.f32 %v4518_v37, %v4287_v54  ;;  %v10439_v37 = vld [vmem:[%s11177_s6] ss:$0 sm:$0xff]  ;;  %v4288_v47 = vadd.f32 %v11337_v12, %v3890_v2 }
 0x595   : > { %v5902_v44 = vsel %vm5678_vm2, %v5854_v33, 0.0  ;;  %v6358_v49 = vmul.f32 %v6047_v16, %v10254_v21 }
 0x596   : > { %v6051_v0 = vmul.f32 0.5, %v6050_v39  ;;  %v5889_v34 = vpop.xlane.xlu0 %5888  ;;  %v5708_v59 = vpop.xlane.xlu2 %5707  ;;  %5903 = vadd.xlane.f32.xlu2 %v5902_v44  ;;  %v5228_v16 = vadd.f32 %v5172_v30, %v4574_v20 }
 0x597   : > { %v5977_v18 = vmul.f32 %v5889_v34, %v10248_v43  ;;  %v5791_v31 = vmul.f32 %v10248_v43, %v5708_v59 }
 0x598   : > { %v6052_v48 = vsub.f32 1.5, %v6051_v0  ;;  %v5626_v30 = vadd.f32 %v10383_v11, %v5228_v16 }
 0x599   : > { %v10422_v24 = vpop.eup %7547  ;;  %v10424_v52 = vadd.f32 1e-05, %v5977_v18  ;;  %v10427_v21 = vsub.f32 %v10302_v1, %v5791_v31  ;;  %v6394_v1 = vmul.f32 %v10413_v53, %v6358_v49  ;;  %v4523_v49 = vpop.f32.mrf.mxu2 }
 0x59a   : > { %v6053_v33 = vmul.f32 %v7546_v62, %v6052_v48  ;;  %v6059_v55 = vmul.f32 %v10422_v24, %v10390_v23  ;;  %vm6065_vm3 = vweird.f32 %v10422_v24  ;;  %v5575_v16 = vpop.f32.mrf.mxu0 }
 0x59b   : > { %7549 = vrsqrt.f32 %v10424_v52  ;;  %v5855_v39 = vmul.f32 %v10427_v21, %v10427_v21  ;;  %v6430_v18 = vadd.f32 %v10439_v37, %v6394_v1  ;;  %vm6066_vm15 = vmor %vm6064_vm12, %vm6065_vm3  ;;  %vm6074_vm5 = vweird.f32 %v10424_v52 }
 0x59c   : > { %v6057_v54 = vsel %vm6056_vm11, %v7546_v62, %v6053_v33  ;;  %v6060_v9 = vmul.f32 %v10422_v24, %v6059_v55  ;;  %v10464_v55 = vadd.f32 %v10169_v28, %v5626_v30 }
 0x59d   : > { %v6359_v44 = vmul.f32 %v6057_v54, %v10267_v61  ;;  %v5905_v3 = vsel %vm5678_vm2, %v5855_v39, 0.0  ;;  %v4575_v61 = vadd.f32 %v4520_v22, %v4288_v47  ;;  %v6462_v39 = vmax.f32 %v6430_v18, 0.0  ;;  %v11338_v47 = vld [vmem:[#allocation45_spill] sm:$0xff] }
 0x59e   : > { %v6061_v0 = vmul.f32 0.5, %v6060_v9  ;;  %v5892_v34 = vpop.xlane.xlu0 %5891  ;;  %v5711_v59 = vpop.xlane.xlu2 %5710  ;;  %5906 = vadd.xlane.f32.xlu0 %v5905_v3  ;;  %5725 = vadd.xlane.f32.xlu2 %v5724_v4  ;;  %v4289_v54 = vadd.f32 %v11338_v47, %v10003_v5  ;;  %v5727_v3 = vsel %vm5678_vm2, %v10464_v55, 0.0 }
 0x59f   : > { %v6395_v62 = vmul.f32 %v10413_v53, %v6359_v44  ;;  %v5978_v31 = vmul.f32 %v5892_v34, %v10248_v43  ;;  %v5792_v11 = vmul.f32 %v10248_v43, %v5711_v59  ;;  %v5229_v41 = vadd.f32 %v5174_v58, %v4575_v61 }
 0x5a0   : > { %v6062_v19 = vsub.f32 1.5, %v6061_v0 }
 0x5a1   : > { %v7550_v2 = vpop.eup %7549  ;;  %v6431_v48 = vadd.f32 %v10439_v37, %v6395_v62  ;;  %v10458_v20 = vadd.f32 1e-05, %v5978_v31  ;;  %v10461_v33 = vsub.f32 %v10317_v13, %v5792_v11  ;;  %v5627_v30 = vadd.f32 %v5572_v51, %v5229_v41  ;;  %v4525_v31 = vpop.f32.mrf.mxu2 }
 0x5a2   : > { %v6063_v1 = vmul.f32 %v10422_v24, %v6062_v19  ;;  %v6069_v22 = vmul.f32 %v7550_v2, %v10424_v52  ;;  %vm6075_vm1 = vweird.f32 %v7550_v2  ;;  %v4576_v62 = vadd.f32 %v4523_v49, %v4289_v54 }
 0x5a3   : > { %v6463_v12 = vmax.f32 %v6431_v48, 0.0  ;;  %7551 = vrsqrt.f32 %v10458_v20  ;;  %v5856_v13 = vmul.f32 %v10461_v33, %v10461_v33  ;;  %v10488_v19 = vadd.f32 %v10169_v28, %v5627_v30  ;;  %vm6076_vm6 = vmor %vm6074_vm5, %vm6075_vm1 }
 0x5a4   : > { %v6067_v58 = vsel %vm6066_vm15, %v10422_v24, %v6063_v1  ;;  %v6070_v9 = vmul.f32 %v7550_v2, %v6069_v22  ;;  %v5230_v1 = vadd.f32 %v5177_v6, %v4576_v62  ;;  %vm6084_vm7 = vweird.f32 %v10458_v20 }
 0x5a5   : > { %v6494_v44 = vpack.c.bf16 %v6463_v12, %v6462_v39  ;;  %v5908_v23 = vsel %vm5678_vm2, %v5856_v13, 0.0  ;;  %v6360_v59 = vmul.f32 %v6067_v58, %v10282_v17  ;;  %v5179_v17 = vpop.f32.mrf.mxu3  ;;  %v5577_v12 = vpop.f32.mrf.mxu0  ;;  %v5730_v6 = vsel %vm5678_vm2, %v10488_v19, 0.0 }
 0x5a6   : > { %v6071_v4 = vmul.f32 0.5, %v6070_v9  ;;  %v5895_v0 = vpop.xlane.xlu1 %5894  ;;  %v5714_v34 = vpop.xlane.xlu0 %5713  ;;  %5909 = vadd.xlane.f32.xlu0 %v5908_v23  ;;  %5728 = vadd.xlane.f32.xlu2 %v5727_v3  ;;  %v5628_v54 = vadd.f32 %v5575_v16, %v5230_v1 }
 0x5a7   : > { %v5979_v18 = vmul.f32 %v5895_v0, %v10248_v43  ;;  %v5793_v5 = vmul.f32 %v10248_v43, %v5714_v34  ;;  %7370 = vmatmul.msk.bf16.vlgmr.msra.gmra.mxu1 %vm5678_vm2, %v6494_v44  ;;  %v6396_v22 = vmul.f32 %v10413_v53, %v6360_v59 }
 0x5a8   : > { %v6072_v51 = vsub.f32 1.5, %v6071_v4  ;;  %v10511_v0 = vadd.f32 %v10169_v28, %v5628_v54 }
 0x5a9   : > { %v7552_v24 = vpop.eup %7551  ;;  %v10482_v11 = vadd.f32 1e-05, %v5979_v18  ;;  %v10485_v61 = vsub.f32 %v10334_v36, %v5793_v5  ;;  %v11339_v36 = vld [vmem:[#allocation47_spill] sm:$0xff]  ;;  %v4528_v5 = vpop.f32.mrf.mxu2 }
 0x5aa   : > { %v6073_v48 = vmul.f32 %v7550_v2, %v6072_v51  ;;  %v6079_v41 = vmul.f32 %v7552_v24, %v10458_v20  ;;  %v4290_v39 = vadd.f32 %v11339_v36, %v10014_v63  ;;  %vm6085_vm8 = vweird.f32 %v7552_v24 }
 0x5ab   : > { %7553 = vrsqrt.f32 %v10482_v11  ;;  %v5857_v49 = vmul.f32 %v10485_v61, %v10485_v61  ;;  %vm10516_vm0 = vmor %vm6084_vm7, %vm6085_vm8  ;;  %v5733_v36 = vsel %vm5678_vm2, %v10511_v0, 0.0  ;;  %vm6094_vm14 = vweird.f32 %v10482_v11 }
 0x5ac   : > { %v6077_v13 = vsel %vm6076_vm6, %v7550_v2, %v6073_v48  ;;  %v6080_v47 = vmul.f32 %v7552_v24, %v6079_v41  ;;  %v6432_v2 = vadd.f32 %v10439_v37, %v6396_v22  ;;  %v4577_v3 = vadd.f32 %v4525_v31, %v4290_v39 }
 0x5ad   : > { %v6361_v52 = vmul.f32 %v6077_v13, %v10299_v8  ;;  %v5911_v58 = vsel %vm5678_vm2, %v5857_v49, 0.0  ;;  %v4291_v41 = vadd.f32 %v10006_v57, %v10030_v15  ;;  %v5182_v1 = vpop.f32.mrf.mxu3  ;;  %v5580_v13 = vpop.f32.mrf.mxu0 }
 0x5ae   : > { %v6081_v9 = vmul.f32 0.5, %v6080_v47  ;;  %v10502_v30 = vpop.xlane.xlu1 %5897  ;;  %v5717_v44 = vpop.xlane.xlu0 %5716  ;;  %5912 = vadd.xlane.f32.xlu1 %v5911_v58  ;;  %5731 = vadd.xlane.f32.xlu0 %v5730_v6  ;;  %v5231_v51 = vadd.f32 %v5179_v17, %v4577_v3  ;;  %v6464_v31 = vmax.f32 %v6432_v2, 0.0 }
 0x5af   : > { %v6397_v23 = vmul.f32 %v10413_v53, %v6361_v52  ;;  %v5794_v63 = vmul.f32 %v10248_v43, %v5717_v44 }
 0x5b0   : > { %v6082_v16 = vsub.f32 1.5, %v6081_v9  ;;  %v5629_v49 = vadd.f32 %v5577_v12, %v5231_v51 }
 0x5b1   : > { %v7554_v8 = vpop.eup %7553  ;;  %v10508_v4 = vsub.f32 %v10347_v10, %v5794_v63  ;;  %v6433_v34 = vadd.f32 %v10439_v37, %v6397_v23  ;;  %v11342_v23 = vld [vmem:[#allocation50_spill] sm:$0xff]  ;;  %v11343_v63 = vld [vmem:[#allocation48_spill] sm:$0xff]  ;;  %v4530_v3 = vpop.f32.mrf.mxu2 }
 0x5b2   : > { %v6083_v59 = vmul.f32 %v7552_v24, %v6082_v16  ;;  %v6089_v18 = vmul.f32 %v7554_v8, %v10482_v11  ;;  %vm6095_vm13 = vweird.f32 %v7554_v8  ;;  %v10536_v58 = vadd.f32 %v10169_v28, %v5629_v49 }
 0x5b3   : > { %v5858_v10 = vmul.f32 %v10508_v4, %v10508_v4  ;;  %v6465_v48 = vmax.f32 %v6433_v34, 0.0  ;;  %vm6096_vm10 = vmor %vm6094_vm14, %vm6095_vm13  ;;  %v4292_v2 = vadd.f32 %v11343_v63, %v11342_v23 }
 0x5b4   : > { %v6087_v20 = vsel %vm10516_vm0, %v7552_v24, %v6083_v59  ;;  %v6090_v22 = vmul.f32 %v7554_v8, %v6089_v18  ;;  %v4578_v24 = vadd.f32 %v4528_v5, %v4291_v41  ;;  %v5736_v11 = vsel %vm5678_vm2, %v10536_v58, 0.0 }
 0x5b5   : > { %v5914_v17 = vsel %vm5678_vm2, %v5858_v10, 0.0  ;;  %v6495_v39 = vpack.c.bf16 %v6465_v48, %v6464_v31  ;;  %v6362_v52 = vmul.f32 %v6087_v20, %v10314_v56  ;;  %v5184_v18 = vpop.f32.mrf.mxu3  ;;  %v4579_v31 = vadd.f32 %v4530_v3, %v4292_v2 }
 0x5b6   : > { %v6091_v47 = vmul.f32 0.5, %v6090_v22  ;;  %v5720_v54 = vpop.xlane.xlu1 %5719  ;;  %5915 = vadd.xlane.f32.xlu1 %v5914_v17  ;;  %5734 = vadd.xlane.f32.xlu0 %v5733_v36  ;;  %v5232_v9 = vadd.f32 %v5182_v1, %v4578_v24  ;;  %v11344_v17 = vld [vmem:[#allocation52_spill] sm:$0xff]  ;;  %v11345_v36 = vld [vmem:[#allocation49_spill] sm:$0xff]  ;;  %v5980_v2 = vmul.f32 %v10502_v30, %v10248_v43 }
 0x5b7   : > { %v5795_v57 = vmul.f32 %v10248_v43, %v5720_v54  ;;  %7371 = vmatmul.msk.bf16.gmra.mxu1 %vm5678_vm2, %v6495_v39  ;;  %v6398_v44 = vmul.f32 %v10413_v53, %v6362_v52  ;;  %v5233_v1 = vadd.f32 %v5184_v18, %v4579_v31  ;;  %v4293_v39 = vadd.f32 %v11345_v36, %v11344_v17 }
 0x5b8   : > { %v6092_v15 = vsub.f32 1.5, %v6091_v47 }
 0x5b9   : > { %v10533_v12 = vsub.f32 %v10357_v7, %v5795_v57  ;;  %v5630_v7 = vadd.f32 %v5580_v13, %v5232_v9  ;;  %v6434_v10 = vadd.f32 %v10439_v37, %v6398_v44  ;;  %v4533_v52 = vpop.f32.mrf.mxu2 }
 0x5ba   : > { %v6093_v6 = vmul.f32 %v7554_v8, %v6092_v15  ;;  %v4580_v15 = vadd.f32 %v4533_v52, %v4293_v39 }
 0x5bb   : > { %v5859_v56 = vmul.f32 %v10533_v12, %v10533_v12  ;;  %v6466_v22 = vmax.f32 %v6434_v10, 0.0 }
 0x5bc   : > { %v6097_v16 = vsel %vm6096_vm10, %v7554_v8, %v6093_v6  ;;  %v5582_v8 = vpop.f32.mrf.mxu0 }
 0x5bd   : > { %v6363_v34 = vmul.f32 %v6097_v16, %v10331_v35  ;;  %v5917_v59 = vsel %vm5678_vm2, %v5859_v56, 0.0  ;;  %v10555_v35 = vadd.f32 %v10169_v28, %v5630_v7  ;;  %v5631_v13 = vadd.f32 %v5582_v8, %v5233_v1  ;;  %v5187_v57 = vpop.f32.mrf.mxu3 }
 0x5be   : > { %v5723_v5 = vpop.xlane.xlu1 %5722  ;;  %5918 = vadd.xlane.f32.xlu2 %v5917_v59  ;;  %5737 = vadd.xlane.f32.xlu1 %v5736_v11  ;;  %v5234_v9 = vadd.f32 %v5187_v57, %v4580_v15  ;;  %v6012_v16 = vadd.f32 1e-05, %v5980_v2  ;;  %v11346_v2 = vld [vmem:[#allocation53_spill] sm:$0xff] }
 0x5bf   : > { %v6399_v51 = vmul.f32 %v10413_v53, %v6363_v34  ;;  %v5796_v62 = vmul.f32 %v10248_v43, %v5723_v5  ;;  %v10567_v24 = vadd.f32 %v10169_v28, %v5631_v13 }
 0x5c0   : > { %7555 = vrsqrt.f32 %v6012_v16  ;;  %vm6104_vm11 = vweird.f32 %v6012_v16 }
 0x5c1   : > { %v10552_v48 = vsub.f32 %v10362_v27, %v5796_v62  ;;  %v6435_v41 = vadd.f32 %v10439_v37, %v6399_v51  ;;  %v5739_v27 = vsel %vm5678_vm2, %v10555_v35, 0.0  ;;  %v5742_v56 = vsel %vm5678_vm2, %v10567_v24, 0.0  ;;  %v4535_v31 = vpop.f32.mrf.mxu2 }
 0x5c3   : > { %v5860_v20 = vmul.f32 %v10552_v48, %v10552_v48  ;;  %v6467_v49 = vmax.f32 %v6435_v41, 0.0 }
 0x5c4   : > { %v5585_v6 = vpop.f32.mrf.mxu0 }
 0x5c5   : > { %v5920_v47 = vsel %vm5678_vm2, %v5860_v20, 0.0  ;;  %v6496_v54 = vpack.c.bf16 %v6467_v49, %v6466_v22  ;;  %v5632_v44 = vadd.f32 %v5585_v6, %v5234_v9  ;;  %v5189_v30 = vpop.f32.mrf.mxu3 }
 0x5c6   : > { %5921 = vadd.xlane.f32.xlu2 %v5920_v47  ;;  %5740 = vadd.xlane.f32.xlu1 %v5739_v27  ;;  %v7556_v3 = vpop.eup %7555 }
 0x5c7   : > { %7372 = vmatmul.msk.bf16.gmra.mxu1 %vm5678_vm2, %v6496_v54  ;;  %v10572_v23 = vadd.f32 %v10169_v28, %v5632_v44  ;;  %v6099_v7 = vmul.f32 %v7556_v3, %v6012_v16  ;;  %vm6105_vm9 = vweird.f32 %v7556_v3  ;;  %v11347_v16 = vld [vmem:[#allocation51_spill] sm:$0xff] }
 0x5c8   : > { %vm6106_vm3 = vmor %vm6104_vm11, %vm6105_vm9 }
 0x5c9   : > { %v5745_v63 = vsel %vm5678_vm2, %v10572_v23, 0.0  ;;  %v6100_v34 = vmul.f32 %v7556_v3, %v6099_v7  ;;  %v4538_v44 = vpop.f32.mrf.mxu2 }
 0x5cb   : > { %v6101_v18 = vmul.f32 0.5, %v6100_v34 }
 0x5cc   : > { %v5587_v20 = vpop.f32.mrf.mxu0 }
 0x5cd   : > { %v6102_v28 = vsub.f32 1.5, %v6101_v18 }
 0x5ce   : > { %5743 = vadd.xlane.f32.xlu2 %v5742_v56  ;;  %v10588_v56 = vpop.f32.mrf.mxu3 }
 0x5cf   : > { %v6103_v10 = vmul.f32 %v7556_v3, %v6102_v28 }
 0x5d1   : > { %v6107_v22 = vsel %vm6106_vm3, %v7556_v3, %v6103_v10  ;;  %v4294_v3 = vadd.f32 %v11347_v16, %v11346_v2 }
 0x5d2   : > { %v6364_v13 = vmul.f32 %v6107_v22, %v10344_v45 }
 0x5d4   : > { %v6400_v45 = vmul.f32 %v10413_v53, %v6364_v13  ;;  %v10596_v34 = vpop.f32.mrf.mxu0 }
 0x5d6   : > { %5746 = vadd.xlane.f32.xlu2 %v5745_v63 }
 0x601   : > { %v5901_v59 = vpop.xlane.xlu2 %5900 }
 0x602   : > { %v5981_v11 = vmul.f32 %v5901_v59, %v10248_v43 }
 0x604   : > { %v6013_v5 = vadd.f32 1e-05, %v5981_v11 }
 0x606   : > { %7557 = vrsqrt.f32 %v6013_v5  ;;  %vm6114_vm15 = vweird.f32 %v6013_v5 }
 0x609   : > { %v5904_v51 = vpop.xlane.xlu2 %5903 }
 0x60a   : > { %v5982_v62 = vmul.f32 %v5904_v51, %v10248_v43 }
 0x60c   : > { %v7558_v8 = vpop.eup %7557  ;;  %v6014_v41 = vadd.f32 1e-05, %v5982_v62 }
 0x60d   : > { %v6109_v1 = vmul.f32 %v7558_v8, %v6013_v5  ;;  %vm6115_vm12 = vweird.f32 %v7558_v8 }
 0x60e   : > { %7559 = vrsqrt.f32 %v6014_v41  ;;  %vm6116_vm1 = vmor %vm6114_vm15, %vm6115_vm12  ;;  %vm6124_vm6 = vweird.f32 %v6014_v41 }
 0x60f   : > { %v6110_v49 = vmul.f32 %v7558_v8, %v6109_v1  ;;  %v6436_v1 = vadd.f32 %v10439_v37, %v6400_v45  ;;  %v4540_v45 = vpop.f32.mrf.mxu2 }
 0x611   : > { %v6111_v17 = vmul.f32 0.5, %v6110_v49  ;;  %v5907_v36 = vpop.xlane.xlu0 %5906  ;;  %v5726_v39 = vpop.xlane.xlu2 %5725 }
 0x612   : > { %v5983_v47 = vmul.f32 %v5907_v36, %v10248_v43  ;;  %v5797_v27 = vmul.f32 %v10248_v43, %v5726_v39 }
 0x613   : > { %v6112_v54 = vsub.f32 1.5, %v6111_v17  ;;  %v10604_v17 = vpop.f32.mrf.mxu1 }
 0x614   : > { %v7560_v52 = vpop.eup %7559  ;;  %v10583_v57 = vadd.f32 1e-05, %v5983_v47  ;;  %v10586_v15 = vsub.f32 %v10430_v42, %v5797_v27 }
 0x615   : > { %v6113_v6 = vmul.f32 %v7558_v8, %v6112_v54  ;;  %v6119_v9 = vmul.f32 %v7560_v52, %v6014_v41  ;;  %vm6125_vm5 = vweird.f32 %v7560_v52  ;;  %v6468_v54 = vmax.f32 %v6436_v1, 0.0 }
 0x616   : > { %7561 = vrsqrt.f32 %v10583_v57  ;;  %v5861_v63 = vmul.f32 %v10586_v15, %v10586_v15  ;;  %vm10616_vm8 = vmor %vm6124_vm6, %vm6125_vm5 }
 0x617   : > { %v6117_v7 = vsel %vm6116_vm1, %v7558_v8, %v6113_v6  ;;  %v6120_v42 = vmul.f32 %v7560_v52, %v6119_v9  ;;  %v4581_v8 = vadd.f32 %v4535_v31, %v4294_v3 }
 0x618   : > { %v6365_v59 = vmul.f32 %v6117_v7, %v10377_v29  ;;  %v5923_v11 = vsel %vm5678_vm2, %v5861_v63, 0.0  ;;  %v5194_v63 = vpop.f32.mrf.mxu3 }
 0x619   : > { %v6121_v18 = vmul.f32 0.5, %v6120_v42  ;;  %v5910_v5 = vpop.xlane.xlu0 %5909  ;;  %v5729_v28 = vpop.xlane.xlu2 %5728  ;;  %5924 = vadd.xlane.f32.xlu0 %v5923_v11  ;;  %v5235_v13 = vadd.f32 %v5189_v30, %v4581_v8 }
 0x61a   : > { %v6401_v51 = vmul.f32 %v10413_v53, %v6365_v59  ;;  %v5984_v62 = vmul.f32 %v5910_v5, %v10248_v43  ;;  %v5798_v10 = vmul.f32 %v10248_v43, %v5729_v28 }
 0x61b   : > { %v6122_v22 = vsub.f32 1.5, %v6121_v18  ;;  %v5633_v2 = vadd.f32 %v5587_v20, %v5235_v13  ;;  %v6704_v20 = vld [vmem:[%s11180_s9] sm:$0xf]  ;;  %v10629_v18 = vpop.f32.mrf.mxu0  ;;  %v11351_v13 = vld [vmem:[#allocation17_spill] sm:$0xff] }
 0x61c   : > { %v7562_v49 = vpop.eup %7561  ;;  %v10606_v29 = vadd.f32 1e-05, %v5984_v62  ;;  %v10609_v36 = vsub.f32 %v10464_v55, %v5798_v10  ;;  %v6437_v39 = vadd.f32 %v10439_v37, %v6401_v51  ;;  %v6758_v28 = vsel %vm6563_vm4, %v6704_v20, 0  ;;  %v11350_v62 = vld [vmem:[#allocation55_spill] sm:$0xff] }
 0x61d   : > { %v6123_v47 = vmul.f32 %v7560_v52, %v6122_v22  ;;  %v6129_v27 = vmul.f32 %v7562_v49, %v10583_v57  ;;  %vm6135_vm7 = vweird.f32 %v7562_v49  ;;  %v4582_v10 = vadd.f32 %v4538_v44, %v11350_v62  ;;  %6767 = vmatpush.bf16.msra.mxu2 %v6758_v28 }
 0x61e   : > { %7563 = vrsqrt.f32 %v10606_v29  ;;  %v5862_v31 = vmul.f32 %v10609_v36, %v10609_v36  ;;  %v6469_v6 = vmax.f32 %v6437_v39, 0.0  ;;  %v10644_v39 = vld [vmem:[%s11173_s2] ss:$0 sm:$0xff]  ;;  %vm6134_vm4 = vweird.f32 %v10583_v57 }
 0x61f   : > { %v6130_v55 = vmul.f32 %v7562_v49, %v6129_v27  ;;  %v6127_v30 = vsel %vm10616_vm8, %v7560_v52, %v6123_v47  ;;  %v11352_v47 = vld [vmem:[#allocation54_spill] sm:$0xff]  ;;  %v5236_v44 = vadd.f32 %v10588_v56, %v4582_v10  ;;  %vm6136_vm0 = vmor %vm6134_vm4, %vm6135_vm7  ;;  %vm6144_vm14 = vweird.f32 %v10606_v29 }
 0x620   : > { %v5926_v41 = vsel %vm5678_vm2, %v5862_v31, 0.0  ;;  %v6497_v16 = vpack.c.bf16 %v6469_v6, %v6468_v54  ;;  %v6366_v52 = vmul.f32 %v6127_v30, %v10393_v40  ;;  %v10647_v40 = vadd.f32 %v10644_v39, %v5633_v2  ;;  %v10660_v54 = vld [vmem:[%s11179_s8] ss:$0 sm:$0xff] }
 0x621   : > { %v6131_v3 = vmul.f32 0.5, %v6130_v55  ;;  %v5913_v7 = vpop.xlane.xlu1 %5912  ;;  %v5732_v42 = vpop.xlane.xlu0 %5731  ;;  %5927 = vadd.xlane.f32.xlu0 %v5926_v41  ;;  %v4296_v27 = vadd.f32 %v11352_v47, %v11351_v13  ;;  %v5634_v2 = vadd.f32 %v10596_v34, %v5236_v44 }
 0x622   : > { %v5985_v59 = vmul.f32 %v5913_v7, %v10248_v43  ;;  %v5799_v11 = vmul.f32 %v10248_v43, %v5732_v42  ;;  %7373 = vmatmul.msk.bf16.gmra.mxu1 %vm5678_vm2, %v6497_v16  ;;  %v6402_v9 = vmul.f32 %v10413_v53, %v6366_v52  ;;  %v5748_v41 = vsel %vm5678_vm2, %v10647_v40, 0.0  ;;  %v5197_v52 = vpop.f32.mrf.mxu3 }
 0x623   : > { %v6132_v5 = vsub.f32 1.5, %v6131_v3  ;;  %v4583_v16 = vadd.f32 %v4540_v45, %v4296_v27  ;;  %v5595_v27 = vpop.f32.mrf.mxu0 }
 0x624   : > { %v10633_v51 = vpop.eup %7563  ;;  %v10636_v1 = vadd.f32 1e-05, %v5985_v59  ;;  %v10639_v8 = vsub.f32 %v10488_v19, %v5799_v11  ;;  %v6576_v22 = vpop.f32.mrf.mxu1  ;;  %v6438_v45 = vadd.f32 %v10439_v37, %v6402_v9 }
 0x625   : > { %v6133_v31 = vmul.f32 %v7562_v49, %v6132_v5  ;;  %v6139_v19 = vmul.f32 %v10633_v51, %v10606_v29  ;;  %v4543_v59 = vpop.f32.mrf.mxu2  ;;  %v6577_v11 = vadd.f32 %v10660_v54, %v6576_v22  ;;  %v5237_v20 = vadd.f32 %v5194_v63, %v4583_v16 }
 0x626   : > { %7565 = vrsqrt.f32 %v10636_v1  ;;  %v5863_v6 = vmul.f32 %v10639_v8, %v10639_v8  ;;  %vm6145_vm13 = vweird.f32 %v10633_v51  ;;  %v10683_v22 = vadd.f32 %v10644_v39, %v5634_v2 }
 0x627   : > { %v6137_v57 = vsel %vm6136_vm0, %v7562_v49, %v6133_v31  ;;  %v6140_v55 = vmul.f32 %v10633_v51, %v6139_v19  ;;  %vm10690_vm10 = vmor %vm6144_vm14, %vm6145_vm13  ;;  %v6470_v9 = vmax.f32 %v6438_v45, 0.0  ;;  %vm6154_vm11 = vweird.f32 %v10636_v1 }
 0x628   : > { %v6367_v56 = vmul.f32 %v6137_v57, %v10427_v21  ;;  %v5929_v30 = vsel %vm5678_vm2, %v5863_v6, 0.0 }
 0x629   : > { %v6141_v3 = vmul.f32 0.5, %v6140_v55  ;;  %v5916_v7 = vpop.xlane.xlu1 %5915  ;;  %v5735_v42 = vpop.xlane.xlu0 %5734  ;;  %5930 = vadd.xlane.f32.xlu1 %v5929_v30  ;;  %5749 = vadd.xlane.f32.xlu0 %v5748_v41  ;;  %v5751_v41 = vsel %vm5678_vm2, %v10683_v22, 0.0 }
 0x62a   : > { %v6403_v49 = vmul.f32 %v10413_v53, %v6367_v56  ;;  %v5986_v34 = vmul.f32 %v5916_v7, %v10248_v43  ;;  %v5800_v21 = vmul.f32 %v10248_v43, %v5735_v42  ;;  %v5635_v56 = vadd.f32 %v10629_v18, %v5237_v20 }
 0x62b   : > { %v6142_v5 = vsub.f32 1.5, %v6141_v3  ;;  %v4584_v20 = vadd.f32 %v4543_v59, %v10117_v14  ;;  %v4298_v59 = vadd.f32 %v10120_v32, %v10126_v25 }
 0x62c   : > { %v7566_v28 = vpop.eup %7565  ;;  %v10677_v62 = vadd.f32 1e-05, %v5986_v34  ;;  %v10680_v10 = vsub.f32 %v10511_v0, %v5800_v21  ;;  %v6578_v13 = vpop.f32.mrf.mxu1  ;;  %v6439_v47 = vadd.f32 %v10439_v37, %v6403_v49  ;;  %v6656_v0 = vmax.f32 %v6577_v11, 0.0 }
 0x62d   : > { %v6143_v63 = vmul.f32 %v10633_v51, %v6142_v5  ;;  %v6149_v31 = vmul.f32 %v7566_v28, %v10636_v1  ;;  %v6579_v19 = vadd.f32 %v10660_v54, %v6578_v13  ;;  %vm6155_vm9 = vweird.f32 %v7566_v28  ;;  %v4545_v5 = vpop.f32.mrf.mxu2 }
 0x62e   : > { %7567 = vrsqrt.f32 %v10677_v62  ;;  %v5864_v6 = vmul.f32 %v10680_v10, %v10680_v10  ;;  %v6471_v2 = vmax.f32 %v6439_v47, 0.0  ;;  %v10718_v47 = vadd.f32 %v10644_v39, %v5635_v56  ;;  %vm6156_vm3 = vmor %vm6154_vm11, %vm6155_vm9 }
 0x62f   : > { %v6147_v57 = vsel %vm10690_vm10, %v10633_v51, %v6143_v63  ;;  %v6150_v29 = vmul.f32 %v7566_v28, %v6149_v31  ;;  %v6657_v55 = vmax.f32 %v6579_v19, 0.0  ;;  %v5199_v63 = vpop.f32.mrf.mxu3  ;;  %v5238_v44 = vadd.f32 %v5197_v52, %v4584_v20 }
 0x630   : > { %v5932_v30 = vsel %vm5678_vm2, %v5864_v6, 0.0  ;;  %v6498_v49 = vpack.c.bf16 %v6471_v2, %v6470_v9  ;;  %v6368_v11 = vmul.f32 %v6147_v57, %v10461_v33  ;;  %vm6164_vm15 = vweird.f32 %v10677_v62 }
 0x631   : > { %v6151_v16 = vmul.f32 0.5, %v6150_v29  ;;  %v6688_v3 = vpack.c.bf16 %v6657_v55, %v6656_v0  ;;  %v5919_v7 = vpop.xlane.xlu2 %5918  ;;  %v5738_v42 = vpop.xlane.xlu1 %5737  ;;  %5933 = vadd.xlane.f32.xlu1 %v5932_v30  ;;  %5752 = vadd.xlane.f32.xlu0 %v5751_v41  ;;  %v5636_v9 = vadd.f32 %v5595_v27, %v5238_v44  ;;  %v5754_v29 = vsel %vm5678_vm2, %v10718_v47, 0.0 }
 0x632   : > { %v5987_v51 = vmul.f32 %v5919_v7, %v10248_v43  ;;  %v5801_v34 = vmul.f32 %v10248_v43, %v5738_v42  ;;  %7374 = vmatmul.msk.bf16.gmra.mxu1 %vm5678_vm2, %v6498_v49  ;;  %v6404_v14 = vmul.f32 %v10413_v53, %v6368_v11  ;;  %v5597_v0 = vpop.f32.mrf.mxu0  ;;  %v4585_v41 = vadd.f32 %v4545_v5, %v4298_v59 }
 0x633   : > { %v6152_v21 = vsub.f32 1.5, %v6151_v16  ;;  %7386 = vmatmul.msk.bf16.vlgmr.msra.gmra.mxu2 %vm5678_vm2, %v6688_v3  ;;  %v10746_v7 = vadd.f32 %v10644_v39, %v5636_v9 }
 0x634   : > { %v10709_v18 = vpop.eup %7567  ;;  %v10712_v45 = vadd.f32 1e-05, %v5987_v51  ;;  %v10715_v13 = vsub.f32 %v10536_v58, %v5801_v34  ;;  %v6581_v33 = vpop.f32.mrf.mxu1 }
 0x635   : > { %v6153_v31 = vmul.f32 %v7566_v28, %v6152_v21  ;;  %v6159_v19 = vmul.f32 %v10709_v18, %v10677_v62  ;;  %vm6165_vm12 = vweird.f32 %v10709_v18  ;;  %v4548_v34 = vpop.f32.mrf.mxu2  ;;  %v5239_v21 = vadd.f32 %v5199_v63, %v4585_v41 }
 0x636   : > { %7569 = vrsqrt.f32 %v10712_v45  ;;  %v5865_v58 = vmul.f32 %v10715_v13, %v10715_v13  ;;  %vm10753_vm1 = vmor %vm6164_vm15, %vm6165_vm12  ;;  %v5757_v59 = vsel %vm5678_vm2, %v10746_v7, 0.0  ;;  %vm6174_vm6 = vweird.f32 %v10712_v45 }
 0x637   : > { %v6157_v6 = vsel %vm6156_vm3, %v7566_v28, %v6153_v31  ;;  %v6160_v1 = vmul.f32 %v10709_v18, %v6159_v19  ;;  %v6440_v28 = vadd.f32 %v10439_v37, %v6404_v14  ;;  %v5202_v31 = vpop.f32.mrf.mxu3 }
 0x638   : > { %v6369_v57 = vmul.f32 %v6157_v6, %v10485_v61  ;;  %v5935_v52 = vsel %vm5678_vm2, %v5865_v58, 0.0  ;;  %v6582_v61 = vadd.f32 %v10660_v54, %v6581_v33  ;;  %v5637_v58 = vadd.f32 %v5597_v0, %v5239_v21 }
 0x639   : > { %v6161_v55 = vmul.f32 0.5, %v6160_v1  ;;  %v10735_v2 = vpop.xlane.xlu2 %5921  ;;  %v5741_v56 = vpop.xlane.xlu1 %5740  ;;  %5936 = vadd.xlane.f32.xlu2 %v5935_v52  ;;  %5755 = vadd.xlane.f32.xlu1 %v5754_v29  ;;  %v6472_v5 = vmax.f32 %v6440_v28, 0.0  ;;  %v4586_v0 = vadd.f32 %v4548_v34, %v10138_v38  ;;  %v4300_v38 = vadd.f32 %v10144_v60, %v10147_v50 }
 0x63a   : > { %v6405_v32 = vmul.f32 %v10413_v53, %v6369_v57  ;;  %v5802_v25 = vmul.f32 %v10248_v43, %v5741_v56  ;;  %v6658_v44 = vmax.f32 %v6582_v61, 0.0  ;;  %v5600_v1 = vpop.f32.mrf.mxu0 }
 0x63b   : > { %v6162_v27 = vsub.f32 1.5, %v6161_v55 }
 0x63c   : > { %v7570_v30 = vpop.eup %7569  ;;  %v10743_v16 = vsub.f32 %v10555_v35, %v5802_v25  ;;  %v6583_v3 = vpop.f32.mrf.mxu1  ;;  %v6441_v42 = vadd.f32 %v10439_v37, %v6405_v32  ;;  %v10774_v25 = vadd.f32 %v10644_v39, %v5637_v58 }
 0x63d   : > { %v6163_v49 = vmul.f32 %v10709_v18, %v6162_v27  ;;  %v6169_v11 = vmul.f32 %v7570_v30, %v10712_v45  ;;  %v6584_v51 = vadd.f32 %v10660_v54, %v6583_v3  ;;  %vm6175_vm5 = vweird.f32 %v7570_v30 }
 0x63e   : > { %v5866_v35 = vmul.f32 %v10743_v16, %v10743_v16  ;;  %v6473_v33 = vmax.f32 %v6441_v42, 0.0  ;;  %vm6176_vm8 = vmor %vm6174_vm6, %vm6175_vm5  ;;  %v5760_v45 = vsel %vm5678_vm2, %v10774_v25, 0.0 }
 0x63f   : > { %v6167_v62 = vsel %vm10753_vm1, %v10709_v18, %v6163_v49  ;;  %v6170_v19 = vmul.f32 %v7570_v30, %v6169_v11  ;;  %v6659_v14 = vmax.f32 %v6584_v51, 0.0  ;;  %v5204_v11 = vpop.f32.mrf.mxu3 }
 0x640   : > { %v5938_v63 = vsel %vm5678_vm2, %v5866_v35, 0.0  ;;  %v6499_v6 = vpack.c.bf16 %v6473_v33, %v6472_v5  ;;  %v6370_v29 = vmul.f32 %v6167_v62, %v10508_v4  ;;  %v5240_v4 = vadd.f32 %v5202_v31, %v4586_v0 }
 0x641   : > { %v6171_v9 = vmul.f32 0.5, %v6170_v19  ;;  %v6689_v57 = vpack.c.bf16 %v6659_v14, %v6658_v44  ;;  %v5744_v52 = vpop.xlane.xlu2 %5743  ;;  %5939 = vadd.xlane.f32.xlu2 %v5938_v63  ;;  %5758 = vadd.xlane.f32.xlu1 %v5757_v59 }
 0x642   : > { %v5803_v18 = vmul.f32 %v10248_v43, %v5744_v52  ;;  %7375 = vmatmul.msk.bf16.gmra.mxu1 %vm5678_vm2, %v6499_v6  ;;  %v6406_v27 = vmul.f32 %v10413_v53, %v6370_v29  ;;  %v5638_v3 = vadd.f32 %v5600_v1, %v5240_v4  ;;  %v5602_v50 = vpop.f32.mrf.mxu0 }
 0x643   : > { %v6172_v55 = vsub.f32 1.5, %v6171_v9  ;;  %7387 = vmatmul.msk.bf16.gmra.mxu2 %vm5678_vm2, %v6689_v57 }
 0x644   : > { %v10771_v56 = vsub.f32 %v10567_v24, %v5803_v18  ;;  %v6586_v32 = vpop.f32.mrf.mxu1  ;;  %v4550_v24 = vpop.f32.mrf.mxu2  ;;  %v6442_v60 = vadd.f32 %v10439_v37, %v6406_v27  ;;  %v10794_v5 = vadd.f32 %v10644_v39, %v5638_v3 }
 0x645   : > { %v6173_v28 = vmul.f32 %v7570_v30, %v6172_v55  ;;  %v4587_v20 = vadd.f32 %v4550_v24, %v4300_v38 }
 0x646   : > { %v5867_v61 = vmul.f32 %v10771_v56, %v10771_v56  ;;  %v6474_v19 = vmax.f32 %v6442_v60, 0.0  ;;  %v5763_v59 = vsel %vm5678_vm2, %v10794_v5, 0.0 }
 0x647   : > { %v6177_v41 = vsel %vm6176_vm8, %v7570_v30, %v6173_v28  ;;  %v6587_v30 = vadd.f32 %v10660_v54, %v6586_v32  ;;  %vm6881_vm8 = vcmask 125952  }
 0x648   : > { %v6371_v42 = vmul.f32 %v6177_v41, %v10533_v12  ;;  %v5941_v49 = vsel %vm5678_vm2, %v5867_v61, 0.0 }
 0x649   : > { %v5747_v51 = vpop.xlane.xlu2 %5746  ;;  %5942 = vadd.xlane.f32.xlu0 %v5941_v49  ;;  %5761 = vadd.xlane.f32.xlu2 %v5760_v45  ;;  %v6660_v14 = vmax.f32 %v6587_v30, 0.0 }
 0x64a   : > { %v6407_v34 = vmul.f32 %v10413_v53, %v6371_v42  ;;  %v5804_v21 = vmul.f32 %v10248_v43, %v5747_v51  ;;  %v5241_v53 = vadd.f32 %v5204_v11, %v4587_v20  ;;  %v5605_v29 = vpop.f32.mrf.mxu0 }
 0x64c   : > { %v10791_v12 = vsub.f32 %v10572_v23, %v5804_v21  ;;  %v6588_v35 = vpop.f32.mrf.mxu1  ;;  %v6443_v33 = vadd.f32 %v10439_v37, %v6407_v34  ;;  %v5639_v63 = vadd.f32 %v5602_v50, %v5241_v53  ;;  %v4553_v1 = vpop.f32.mrf.mxu2 }
 0x64d   : > { %v6589_v31 = vadd.f32 %v10660_v54, %v6588_v35  ;;  %v5207_v37 = vpop.f32.mrf.mxu3  ;;  %v4588_v57 = vadd.f32 %v4553_v1, %v10156_v26  ;;  %v5988_v26 = vmul.f32 %v10735_v2, %v10248_v43 }
 0x64e   : > { %v5868_v62 = vmul.f32 %v10791_v12, %v10791_v12  ;;  %v6475_v44 = vmax.f32 %v6443_v33, 0.0  ;;  %v10807_v52 = vadd.f32 %v10644_v39, %v5639_v63  ;;  %v4302_v63 = vadd.f32 %v10604_v17, %v10160_v46 }
 0x64f   : > { %v6661_v58 = vmax.f32 %v6589_v31, 0.0  ;;  %v5242_v18 = vadd.f32 %v5207_v37, %v4588_v57  ;;  %v6020_v4 = vadd.f32 1e-05, %v5988_v26 }
 0x650   : > { %v5944_v23 = vsel %vm5678_vm2, %v5868_v62, 0.0  ;;  %v6500_v6 = vpack.c.bf16 %v6475_v44, %v6474_v19  ;;  %v5766_v0 = vsel %vm5678_vm2, %v10807_v52, 0.0 }
 0x651   : > { %v6690_v9 = vpack.c.bf16 %v6661_v58, %v6660_v14  ;;  %5945 = vadd.xlane.f32.xlu0 %v5944_v23  ;;  %5764 = vadd.xlane.f32.xlu2 %v5763_v59  ;;  %v5640_v55 = vadd.f32 %v5605_v29, %v5242_v18  ;;  %7571 = vrsqrt.f32 %v6020_v4  ;;  %vm6184_vm4 = vweird.f32 %v6020_v4 }
 0x652   : > { %7376 = vmatmul.msk.bf16.gmra.mxu1 %vm5678_vm2, %v6500_v6  ;;  %v10833_v6 = vld [vmem:[%s11176_s5] ss:$0 sm:$0xff] }
 0x653   : > { %7388 = vmatmul.msk.bf16.gmra.mxu2 %vm5678_vm2, %v6690_v9  ;;  %v10812_v32 = vadd.f32 %v10644_v39, %v5640_v55 }
 0x655   : > { %v5769_v28 = vsel %vm5678_vm2, %v10812_v32, 0.0  ;;  %v5209_v46 = vpop.f32.mrf.mxu3 }
 0x657   : > { %v7572_v27 = vpop.eup %7571 }
 0x658   : > { %v6179_v61 = vmul.f32 %v7572_v27, %v6020_v4  ;;  %vm6185_vm7 = vweird.f32 %v7572_v27 }
 0x659   : > { %5767 = vadd.xlane.f32.xlu0 %v5766_v0  ;;  %vm6186_vm0 = vmor %vm6184_vm4, %vm6185_vm7 }
 0x65a   : > { %v6180_v38 = vmul.f32 %v7572_v27, %v6179_v61 }
 0x65c   : > { %v6181_v3 = vmul.f32 0.5, %v6180_v38 }
 0x65e   : > { %v6182_v49 = vsub.f32 1.5, %v6181_v3 }
 0x660   : > { %v6183_v51 = vmul.f32 %v7572_v27, %v6182_v49 }
 0x661   : > { %5770 = vadd.xlane.f32.xlu0 %v5769_v28 }
 0x662   : > { %v6187_v60 = vsel %vm6186_vm0, %v7572_v27, %v6183_v51  ;;  %v10847_v27 = vld [vmem:[%s11177_s6] ss:$0 sm:$0xff] }
 0x663   : > { %v6372_v33 = vmul.f32 %v6187_v60, %v10552_v48  ;;  %v4555_v48 = vpop.f32.mrf.mxu2 }
 0x664   : > { %v4589_v29 = vadd.f32 %v4555_v48, %v4302_v63 }
 0x665   : > { %v6408_v1 = vmul.f32 %v10833_v6, %v6372_v33 }
 0x68c   : > { %v5925_v41 = vpop.xlane.xlu0 %5924 }
 0x68d   : > { %v5989_v24 = vmul.f32 %v5925_v41, %v10248_v43 }
 0x68f   : > { %v6021_v42 = vadd.f32 1e-05, %v5989_v24  ;;  %v5243_v24 = vadd.f32 %v5209_v46, %v4589_v29 }
 0x691   : > { %7573 = vrsqrt.f32 %v6021_v42  ;;  %vm6194_vm14 = vweird.f32 %v6021_v42 }
 0x694   : > { %v5928_v45 = vpop.xlane.xlu0 %5927 }
 0x695   : > { %v5990_v11 = vmul.f32 %v5928_v45, %v10248_v43 }
 0x697   : > { %v7574_v34 = vpop.eup %7573  ;;  %v6022_v21 = vadd.f32 1e-05, %v5990_v11  ;;  %v5607_v11 = vpop.f32.mrf.mxu0 }
 0x698   : > { %v6189_v2 = vmul.f32 %v7574_v34, %v6021_v42  ;;  %vm6195_vm13 = vweird.f32 %v7574_v34 }
 0x699   : > { %7575 = vrsqrt.f32 %v6022_v21  ;;  %vm6196_vm10 = vmor %vm6194_vm14, %vm6195_vm13  ;;  %vm6204_vm11 = vweird.f32 %v6022_v21 }
 0x69a   : > { %v6190_v50 = vmul.f32 %v7574_v34, %v6189_v2 }
 0x69c   : > { %v6191_v30 = vmul.f32 0.5, %v6190_v50  ;;  %v5931_v20 = vpop.xlane.xlu1 %5930  ;;  %v5750_v35 = vpop.xlane.xlu0 %5749 }
 0x69d   : > { %v5991_v31 = vmul.f32 %v5931_v20, %v10248_v43  ;;  %v5805_v53 = vmul.f32 %v10248_v43, %v5750_v35 }
 0x69e   : > { %v6192_v62 = vsub.f32 1.5, %v6191_v30 }
 0x69f   : > { %v7576_v19 = vpop.eup %7575  ;;  %v10823_v44 = vadd.f32 1e-05, %v5991_v31  ;;  %v10826_v14 = vsub.f32 %v10647_v40, %v5805_v53  ;;  %v6591_v58 = vpop.f32.mrf.mxu1  ;;  %v5641_v31 = vadd.f32 %v5607_v11, %v5243_v24 }
 0x6a0   : > { %v6193_v23 = vmul.f32 %v7574_v34, %v6192_v62  ;;  %v6199_v59 = vmul.f32 %v7576_v19, %v6022_v21  ;;  %vm6205_vm9 = vweird.f32 %v7576_v19  ;;  %v6592_v38 = vadd.f32 %v10660_v54, %v6591_v58 }
 0x6a1   : > { %7577 = vrsqrt.f32 %v10823_v44  ;;  %v5869_v40 = vmul.f32 %v10826_v14, %v10826_v14  ;;  %vm10859_vm3 = vmor %vm6204_vm11, %vm6205_vm9  ;;  %vm6214_vm15 = vweird.f32 %v10823_v44 }
 0x6a2   : > { %v6197_v9 = vsel %vm6196_vm10, %v7574_v34, %v6193_v23  ;;  %v6200_v37 = vmul.f32 %v7576_v19, %v6199_v59  ;;  %v6662_v21 = vmax.f32 %v6592_v38, 0.0 }
 0x6a3   : > { %v6373_v17 = vmul.f32 %v6197_v9, %v10586_v15  ;;  %v5947_v57 = vsel %vm5678_vm2, %v5869_v40, 0.0  ;;  %v6444_v15 = vadd.f32 %v10847_v27, %v6408_v1 }
 0x6a4   : > { %v6201_v18 = vmul.f32 0.5, %v6200_v37  ;;  %v5934_v55 = vpop.xlane.xlu1 %5933  ;;  %v5753_v0 = vpop.xlane.xlu0 %5752  ;;  %5948 = vadd.xlane.f32.xlu1 %v5947_v57 }
 0x6a5   : > { %v6409_v28 = vmul.f32 %v10833_v6, %v6373_v17  ;;  %v5992_v26 = vmul.f32 %v5934_v55, %v10248_v43  ;;  %v5806_v4 = vmul.f32 %v10248_v43, %v5753_v0  ;;  %v6476_v50 = vmax.f32 %v6444_v15, 0.0 }
 0x6a6   : > { %v6202_v61 = vsub.f32 1.5, %v6201_v18  ;;  %v10880_v17 = vadd.f32 %v10644_v39, %v5641_v31 }
 0x6a7   : > { %v7578_v41 = vpop.eup %7577  ;;  %v10851_v3 = vadd.f32 1e-05, %v5992_v26  ;;  %v10854_v42 = vsub.f32 %v10683_v22, %v5806_v4  ;;  %v6593_v49 = vpop.f32.mrf.mxu1  ;;  %v6445_v45 = vadd.f32 %v10847_v27, %v6409_v28  ;;  %v10895_v26 = vld [vmem:[%s11181_s10] ss:$0 sm:$0xff] }
 0x6a8   : > { %v6203_v51 = vmul.f32 %v7576_v19, %v6202_v61  ;;  %v6209_v34 = vmul.f32 %v7578_v41, %v10823_v44  ;;  %v6594_v2 = vadd.f32 %v10660_v54, %v6593_v49  ;;  %vm6215_vm12 = vweird.f32 %v7578_v41 }
 0x6a9   : > { %7579 = vrsqrt.f32 %v10851_v3  ;;  %v5870_v22 = vmul.f32 %v10854_v42, %v10854_v42  ;;  %v6477_v30 = vmax.f32 %v6445_v45, 0.0  ;;  %vm6216_vm1 = vmor %vm6214_vm15, %vm6215_vm12  ;;  %v5772_v44 = vsel %vm5678_vm2, %v10880_v17, 0.0 }
 0x6aa   : > { %v6207_v20 = vsel %vm10859_vm3, %v7576_v19, %v6203_v51  ;;  %v6210_v35 = vmul.f32 %v7578_v41, %v6209_v34  ;;  %v6663_v33 = vmax.f32 %v6594_v2, 0.0  ;;  %vm6224_vm6 = vweird.f32 %v10851_v3 }
 0x6ab   : > { %v5950_v53 = vsel %vm5678_vm2, %v5870_v22, 0.0  ;;  %v6501_v62 = vpack.c.bf16 %v6477_v30, %v6476_v50  ;;  %v6374_v48 = vmul.f32 %v6207_v20, %v10609_v36 }
 0x6ac   : > { %v6211_v58 = vmul.f32 0.5, %v6210_v35  ;;  %v6691_v63 = vpack.c.bf16 %v6663_v33, %v6662_v21  ;;  %v5937_v23 = vpop.xlane.xlu2 %5936  ;;  %v5756_v59 = vpop.xlane.xlu1 %5755  ;;  %5951 = vadd.xlane.f32.xlu1 %v5950_v53 }
 0x6ad   : > { %v5993_v1 = vmul.f32 %v5937_v23, %v10248_v43  ;;  %v5807_v40 = vmul.f32 %v10248_v43, %v5756_v59  ;;  %7377 = vmatmul.msk.bf16.gmra.mxu1 %vm5678_vm2, %v6501_v62  ;;  %v6410_v18 = vmul.f32 %v10833_v6, %v6374_v48 }
 0x6ae   : > { %v6212_v19 = vsub.f32 1.5, %v6211_v58  ;;  %7389 = vmatmul.msk.bf16.gmra.mxu2 %vm5678_vm2, %v6691_v63 }
 0x6af   : > { %v7580_v9 = vpop.eup %7579  ;;  %v10874_v37 = vadd.f32 1e-05, %v5993_v1  ;;  %v10877_v46 = vsub.f32 %v10718_v47, %v5807_v40  ;;  %v6596_v29 = vpop.f32.mrf.mxu1  ;;  %v6446_v24 = vadd.f32 %v10847_v27, %v6410_v18 }
 0x6b0   : > { %v6213_v36 = vmul.f32 %v7578_v41, %v6212_v19  ;;  %v6219_v57 = vmul.f32 %v7580_v9, %v10851_v3  ;;  %vm6225_vm5 = vweird.f32 %v7580_v9  ;;  %v6597_v45 = vadd.f32 %v10660_v54, %v6596_v29 }
 0x6b1   : > { %7581 = vrsqrt.f32 %v10874_v37  ;;  %v5871_v55 = vmul.f32 %v10877_v46, %v10877_v46  ;;  %vm10917_vm7 = vmor %vm6224_vm6, %vm6225_vm5  ;;  %v6478_v33 = vmax.f32 %v6446_v24, 0.0  ;;  %vm6234_vm0 = vweird.f32 %v10874_v37 }
 0x6b2   : > { %v6217_v47 = vsel %vm6216_vm1, %v7578_v41, %v6213_v36  ;;  %v6220_v0 = vmul.f32 %v7580_v9, %v6219_v57  ;;  %v6664_v58 = vmax.f32 %v6597_v45, 0.0 }
 0x6b3   : > { %v6375_v39 = vmul.f32 %v6217_v47, %v10639_v8  ;;  %v5953_v28 = vsel %vm5678_vm2, %v5871_v55, 0.0 }
 0x6b4   : > { %v6221_v4 = vmul.f32 0.5, %v6220_v0  ;;  %v5940_v15 = vpop.xlane.xlu2 %5939  ;;  %v5759_v61 = vpop.xlane.xlu1 %5758  ;;  %5954 = vadd.xlane.f32.xlu2 %v5953_v28  ;;  %5773 = vadd.xlane.f32.xlu1 %v5772_v44 }
 0x6b5   : > { %v6411_v38 = vmul.f32 %v10833_v6, %v6375_v39  ;;  %v5994_v8 = vmul.f32 %v5940_v15, %v10248_v43  ;;  %v5808_v41 = vmul.f32 %v10248_v43, %v5759_v61 }
 0x6b6   : > { %v6222_v49 = vsub.f32 1.5, %v6221_v4  ;;  %v6769_v11 = vpop.f32.mrf.mxu2 }
 0x6b7   : > { %v7582_v51 = vpop.eup %7581  ;;  %v10903_v34 = vadd.f32 1e-05, %v5994_v8  ;;  %v10906_v2 = vsub.f32 %v10746_v7, %v5808_v41  ;;  %v6770_v60 = vadd.f32 %v10895_v26, %v6769_v11  ;;  %v6447_v22 = vadd.f32 %v10847_v27, %v6411_v38  ;;  %v6598_v20 = vpop.f32.mrf.mxu1 }
 0x6b8   : > { %v6223_v50 = vmul.f32 %v7580_v9, %v6222_v49  ;;  %v6229_v30 = vmul.f32 %v7582_v51, %v10874_v37  ;;  %v6599_v21 = vadd.f32 %v10660_v54, %v6598_v20  ;;  %vm6235_vm4 = vweird.f32 %v7582_v51 }
 0x6b9   : > { %7583 = vrsqrt.f32 %v10903_v34  ;;  %v6849_v35 = vpack.c.bf16 %v6770_v60, %v6770_v60  ;;  %v5872_v3 = vmul.f32 %v10906_v2, %v10906_v2  ;;  %v6479_v62 = vmax.f32 %v6447_v22, 0.0  ;;  %vm6236_vm13 = vmor %vm6234_vm0, %vm6235_vm4 }
 0x6ba   : > { %v6227_v31 = vsel %vm10917_vm7, %v7580_v9, %v6223_v50  ;;  %v6230_v53 = vmul.f32 %v7582_v51, %v6229_v30  ;;  %v6665_v63 = vmax.f32 %v6599_v21, 0.0  ;;  %vm6244_vm10 = vweird.f32 %v10903_v34 }
 0x6bb   : > { %6882 = vst.msk [vmem:[%s10913_s28] sm:$0xf] %vm6881_vm8, %v6849_v35  ;;  %v5956_v1 = vsel %vm5678_vm2, %v5872_v3, 0.0  ;;  %v6502_v40 = vpack.c.bf16 %v6479_v62, %v6478_v33  ;;  %v6376_v19 = vmul.f32 %v6227_v31, %v10680_v10 }
 0x6bc   : > { %v6231_v23 = vmul.f32 0.5, %v6230_v53  ;;  %v5943_v59 = vpop.xlane.xlu0 %5942  ;;  %v5762_v48 = vpop.xlane.xlu2 %5761  ;;  %v6692_v36 = vpack.c.bf16 %v6665_v63, %v6664_v58  ;;  %5957 = vadd.xlane.f32.xlu2 %v5956_v1 }
 0x6bd   : > { %v5995_v9 = vmul.f32 %v5943_v59, %v10248_v43  ;;  %v5809_v57 = vmul.f32 %v10248_v43, %v5762_v48  ;;  %7378 = vmatmul.msk.bf16.gmra.mxu1 %vm5678_vm2, %v6502_v40  ;;  %v6412_v4 = vmul.f32 %v10833_v6, %v6376_v19 }
 0x6be   : > { %v6232_v29 = vsub.f32 1.5, %v6231_v23  ;;  %v6771_v18 = vpop.f32.mrf.mxu2  ;;  %7390 = vmatmul.msk.bf16.gmra.mxu2 %vm5678_vm2, %v6692_v36 }
 0x6bf   : > { %v7584_v55 = vpop.eup %7583  ;;  %v10934_v47 = vadd.f32 1e-05, %v5995_v9  ;;  %v10937_v0 = vsub.f32 %v10774_v25, %v5809_v57  ;;  %v6772_v10 = vadd.f32 %v10895_v26, %v6771_v18  ;;  %v6601_v44 = vpop.f32.mrf.mxu1 }
 0x6c0   : > { %v6233_v39 = vmul.f32 %v7582_v51, %v6232_v29  ;;  %v6239_v28 = vmul.f32 %v7584_v55, %v10903_v34  ;;  %vm6245_vm14 = vweird.f32 %v7584_v55 }
 0x6c1   : > { %7585 = vrsqrt.f32 %v10934_v47  ;;  %v6850_v15 = vpack.c.bf16 %v6772_v10, %v6772_v10  ;;  %v5873_v25 = vmul.f32 %v10937_v0, %v10937_v0  ;;  %vm6246_vm9 = vmor %vm6244_vm10, %vm6245_vm14  ;;  %vm6254_vm3 = vweird.f32 %v10934_v47 }
 0x6c2   : > { %v6237_v61 = vsel %vm6236_vm13, %v7582_v51, %v6233_v39  ;;  %v6240_v38 = vmul.f32 %v7584_v55, %v6239_v28  ;;  %v6448_v51 = vadd.f32 %v10847_v27, %v6412_v4 }
 0x6c3   : > { %v6377_v8 = vmul.f32 %v6237_v61, %v10715_v13  ;;  %6883 = vst.msk [vmem:[%s10913_s28 + $0x4] sm:$0xf] %vm6881_vm8, %v6850_v15  ;;  %v5959_v49 = vsel %vm5678_vm2, %v5873_v25, 0.0  ;;  %v6602_v13 = vadd.f32 %v10660_v54, %v6601_v44 }
 0x6c4   : > { %v6241_v41 = vmul.f32 0.5, %v6240_v38  ;;  %v10950_v37 = vpop.xlane.xlu0 %5945  ;;  %v5765_v24 = vpop.xlane.xlu2 %5764  ;;  %5960 = vadd.xlane.f32.xlu0 %v5959_v49  ;;  %v6480_v3 = vmax.f32 %v6448_v51, 0.0 }
 0x6c5   : > { %v6413_v45 = vmul.f32 %v10833_v6, %v6377_v8  ;;  %v5810_v11 = vmul.f32 %v10248_v43, %v5765_v24  ;;  %v6666_v23 = vmax.f32 %v6602_v13, 0.0 }
 0x6c6   : > { %v6242_v60 = vsub.f32 1.5, %v6241_v41  ;;  %v6774_v22 = vpop.f32.mrf.mxu2 }
 0x6c7   : > { %v7586_v50 = vpop.eup %7585  ;;  %v10958_v30 = vsub.f32 %v10794_v5, %v5810_v11  ;;  %v6775_v20 = vadd.f32 %v10895_v26, %v6774_v22  ;;  %v6449_v7 = vadd.f32 %v10847_v27, %v6413_v45  ;;  %v6603_v33 = vpop.f32.mrf.mxu1 }
 0x6c8   : > { %v6243_v35 = vmul.f32 %v7584_v55, %v6242_v60  ;;  %v6249_v21 = vmul.f32 %v7586_v50, %v10934_v47  ;;  %v6604_v53 = vadd.f32 %v10660_v54, %v6603_v33  ;;  %vm6255_vm11 = vweird.f32 %v7586_v50 }
 0x6c9   : > { %v6851_v31 = vpack.c.bf16 %v6775_v20, %v6775_v20  ;;  %v5874_v5 = vmul.f32 %v10958_v30, %v10958_v30  ;;  %v6481_v63 = vmax.f32 %v6449_v7, 0.0  ;;  %vm6256_vm12 = vmor %vm6254_vm3, %vm6255_vm11 }
 0x6ca   : > { %v6247_v62 = vsel %vm6246_vm9, %v7584_v55, %v6243_v35  ;;  %v6250_v58 = vmul.f32 %v7586_v50, %v6249_v21  ;;  %v6667_v59 = vmax.f32 %v6604_v53, 0.0 }
 0x6cb   : > { %6884 = vst.msk [vmem:[%s10913_s28 + $0x8] sm:$0xf] %vm6881_vm8, %v6851_v31  ;;  %v6378_v34 = vmul.f32 %v6247_v62, %v10743_v16  ;;  %v5962_v40 = vsel %vm5678_vm2, %v5874_v5, 0.0  ;;  %v6503_v19 = vpack.c.bf16 %v6481_v63, %v6480_v3  ;;  %v5996_v31 = vmul.f32 %v10950_v37, %v10248_v43 }
 0x6cc   : > { %v6251_v48 = vmul.f32 0.5, %v6250_v58  ;;  %v5768_v1 = vpop.xlane.xlu0 %5767  ;;  %v6693_v36 = vpack.c.bf16 %v6667_v59, %v6666_v23  ;;  %5963 = vadd.xlane.f32.xlu1 %v5962_v40 }
 0x6cd   : > { %v5811_v9 = vmul.f32 %v10248_v43, %v5768_v1  ;;  %7379 = vmatmul.msk.bf16.gmra.mxu1 %vm5678_vm2, %v6503_v19  ;;  %v6414_v55 = vmul.f32 %v10833_v6, %v6378_v34  ;;  %v6028_v53 = vadd.f32 1e-05, %v5996_v31 }
 0x6ce   : > { %v6252_v57 = vsub.f32 1.5, %v6251_v48  ;;  %v6776_v29 = vpop.f32.mrf.mxu2  ;;  %7391 = vmatmul.msk.bf16.gmra.mxu2 %vm5678_vm2, %v6693_v36 }
 0x6cf   : > { %v10974_v18 = vsub.f32 %v10807_v52, %v5811_v9  ;;  %v6777_v16 = vadd.f32 %v10895_v26, %v6776_v29  ;;  %v6606_v39 = vpop.f32.mrf.mxu1  ;;  %v6450_v38 = vadd.f32 %v10847_v27, %v6414_v55  ;;  %7587 = vrsqrt.f32 %v6028_v53 }
 0x6d0   : > { %v6253_v10 = vmul.f32 %v7586_v50, %v6252_v57  ;;  %v6607_v41 = vadd.f32 %v10660_v54, %v6606_v39  ;;  %vm6264_vm1 = vweird.f32 %v6028_v53 }
 0x6d1   : > { %v6852_v28 = vpack.c.bf16 %v6777_v16, %v6777_v16  ;;  %v5875_v44 = vmul.f32 %v10974_v18, %v10974_v18  ;;  %v6482_v11 = vmax.f32 %v6450_v38, 0.0 }
 0x6d2   : > { %v6257_v4 = vsel %vm6256_vm12, %v7586_v50, %v6253_v10  ;;  %v6668_v13 = vmax.f32 %v6607_v41, 0.0 }
 0x6d3   : > { %v6379_v15 = vmul.f32 %v6257_v4, %v10771_v56  ;;  %6885 = vst.msk [vmem:[%s10913_s28 + $0xc] sm:$0xf] %vm6881_vm8, %v6852_v28  ;;  %v5965_v52 = vsel %vm5678_vm2, %v5875_v44, 0.0 }
 0x6d4   : > { %5966 = vadd.xlane.f32.xlu2 %v5965_v52  ;;  %v5771_v61 = vpop.xlane.xlu0 %5770 }
 0x6d5   : > { %v6415_v47 = vmul.f32 %v10833_v6, %v6379_v15  ;;  %v5812_v25 = vmul.f32 %v10248_v43, %v5771_v61  ;;  %v7588_v3 = vpop.eup %7587 }
 0x6d6   : > { %v6779_v8 = vpop.f32.mrf.mxu2  ;;  %v6259_v62 = vmul.f32 %v7588_v3, %v6028_v53  ;;  %vm6265_vm15 = vweird.f32 %v7588_v3 }
 0x6d7   : > { %v10991_v24 = vsub.f32 %v10812_v32, %v5812_v25  ;;  %v6780_v56 = vadd.f32 %v10895_v26, %v6779_v8  ;;  %v6451_v49 = vadd.f32 %v10847_v27, %v6415_v47  ;;  %v6608_v45 = vpop.f32.mrf.mxu1  ;;  %vm6266_vm5 = vmor %vm6264_vm1, %vm6265_vm15 }
 0x6d8   : > { %v6609_v60 = vadd.f32 %v10660_v54, %v6608_v45  ;;  %v6260_v58 = vmul.f32 %v7588_v3, %v6259_v62 }
 0x6d9   : > { %v6853_v51 = vpack.c.bf16 %v6780_v56, %v6780_v56  ;;  %v5876_v22 = vmul.f32 %v10991_v24, %v10991_v24  ;;  %v6483_v50 = vmax.f32 %v6451_v49, 0.0 }
 0x6da   : > { %v6669_v20 = vmax.f32 %v6609_v60, 0.0  ;;  %v6261_v23 = vmul.f32 0.5, %v6260_v58 }
 0x6db   : > { %6886 = vst.msk [vmem:[%s10913_s28 + $0x10] sm:$0xf] %vm6881_vm8, %v6853_v51  ;;  %v5968_v32 = vsel %vm5678_vm2, %v5876_v22, 0.0  ;;  %v6504_v7 = vpack.c.bf16 %v6483_v50, %v6482_v11 }
 0x6dc   : > { %5969 = vadd.xlane.f32.xlu0 %v5968_v32  ;;  %v6694_v35 = vpack.c.bf16 %v6669_v20, %v6668_v13  ;;  %v6262_v34 = vsub.f32 1.5, %v6261_v23  ;;  %v11027_v20 = vld [vmem:[%s11179_s8] ss:$0 sm:$0xff] }
 0x6dd   : > { %7380 = vmatmul.msk.bf16.gmra.mxu1 %vm5678_vm2, %v6504_v7 }
 0x6de   : > { %v6781_v21 = vpop.f32.mrf.mxu2  ;;  %7392 = vmatmul.msk.bf16.gmra.mxu2 %vm5678_vm2, %v6694_v35  ;;  %v6263_v19 = vmul.f32 %v7588_v3, %v6262_v34 }
 0x6df   : > { %v6782_v33 = vadd.f32 %v10895_v26, %v6781_v21 }
 0x6e0   : > { %v6267_v57 = vsel %vm6266_vm5, %v7588_v3, %v6263_v19 }
 0x6e1   : > { %v6854_v54 = vpack.c.bf16 %v6782_v33, %v6782_v33  ;;  %v6380_v28 = vmul.f32 %v6267_v57, %v10791_v12 }
 0x6e3   : > { %6887 = vst.msk [vmem:[%s10913_s28 + $0x14] sm:$0xf] %vm6881_vm8, %v6854_v54  ;;  %v6416_v8 = vmul.f32 %v10833_v6, %v6380_v28 }
 0x6e5   : > { %v6452_v50 = vadd.f32 %v10847_v27, %v6416_v8 }
 0x6e7   : > { %v6484_v3 = vmax.f32 %v6452_v50, 0.0 }
 0x717   : > { %v5949_v5 = vpop.xlane.xlu1 %5948 }
 0x718   : > { %v5997_v63 = vmul.f32 %v5949_v5, %v10248_v43 }
 0x71a   : > { %v6029_v59 = vadd.f32 1e-05, %v5997_v63 }
 0x71c   : > { %7589 = vrsqrt.f32 %v6029_v59  ;;  %vm6274_vm7 = vweird.f32 %v6029_v59 }
 0x71f   : > { %v5952_v48 = vpop.xlane.xlu1 %5951 }
 0x720   : > { %v5998_v1 = vmul.f32 %v5952_v48, %v10248_v43 }
 0x722   : > { %v7590_v40 = vpop.eup %7589  ;;  %v6030_v36 = vadd.f32 1e-05, %v5998_v1 }
 0x723   : > { %v6269_v37 = vmul.f32 %v7590_v40, %v6029_v59  ;;  %vm6275_vm6 = vweird.f32 %v7590_v40 }
 0x724   : > { %7591 = vrsqrt.f32 %v6030_v36  ;;  %vm6276_vm4 = vmor %vm6274_vm7, %vm6275_vm6  ;;  %vm6284_vm13 = vweird.f32 %v6030_v36 }
 0x725   : > { %v6270_v9 = vmul.f32 %v7590_v40, %v6269_v37 }
 0x727   : > { %v6271_v29 = vmul.f32 0.5, %v6270_v9  ;;  %v5955_v16 = vpop.xlane.xlu2 %5954  ;;  %v5774_v55 = vpop.xlane.xlu1 %5773 }
 0x728   : > { %v5999_v10 = vmul.f32 %v5955_v16, %v10248_v43  ;;  %v5813_v39 = vmul.f32 %v10248_v43, %v5774_v55 }
 0x729   : > { %v6272_v44 = vsub.f32 1.5, %v6271_v29 }
 0x72a   : > { %v7592_v4 = vpop.eup %7591  ;;  %v6031_v15 = vadd.f32 1e-05, %v5999_v10  ;;  %v11014_v52 = vsub.f32 %v10880_v17, %v5813_v39  ;;  %v6611_v61 = vpop.f32.mrf.mxu1 }
 0x72b   : > { %v6273_v38 = vmul.f32 %v7590_v40, %v6272_v44  ;;  %v6279_v47 = vmul.f32 %v7592_v4, %v6030_v36  ;;  %vm6285_vm0 = vweird.f32 %v7592_v4 }
 0x72c   : > { %7593 = vrsqrt.f32 %v6031_v15  ;;  %v5877_v25 = vmul.f32 %v11014_v52, %v11014_v52  ;;  %vm6286_vm14 = vmor %vm6284_vm13, %vm6285_vm0  ;;  %vm6294_vm9 = vweird.f32 %v6031_v15 }
 0x72d   : > { %v6277_v41 = vsel %vm6276_vm4, %v7590_v40, %v6273_v38  ;;  %v6280_v12 = vmul.f32 %v7592_v4, %v6279_v47 }
 0x72e   : > { %v6381_v56 = vmul.f32 %v6277_v41, %v10826_v14  ;;  %v5971_v49 = vsel %vm5678_vm2, %v5877_v25, 0.0  ;;  %v6612_v14 = vadd.f32 %v11027_v20, %v6611_v61 }
 0x72f   : > { %v6281_v45 = vmul.f32 0.5, %v6280_v12  ;;  %5972 = vadd.xlane.f32.xlu1 %v5971_v49  ;;  %v5958_v11 = vpop.xlane.xlu2 %5957 }
 0x730   : > { %v6417_v17 = vmul.f32 %v10833_v6, %v6381_v56  ;;  %v6000_v60 = vmul.f32 %v5958_v11, %v10248_v43  ;;  %v6670_v63 = vmax.f32 %v6612_v14, 0.0 }
 0x731   : > { %v6282_v51 = vsub.f32 1.5, %v6281_v45  ;;  %v6784_v22 = vpop.f32.mrf.mxu2 }
 0x732   : > { %v7594_v13 = vpop.eup %7593  ;;  %v6785_v32 = vadd.f32 %v10895_v26, %v6784_v22  ;;  %v6613_v7 = vpop.f32.mrf.mxu1  ;;  %v6453_v35 = vadd.f32 %v10847_v27, %v6417_v17  ;;  %v6032_v54 = vadd.f32 1e-05, %v6000_v60 }
 0x733   : > { %v6283_v21 = vmul.f32 %v7592_v4, %v6282_v51  ;;  %v6289_v33 = vmul.f32 %v7594_v13, %v6031_v15  ;;  %v6614_v53 = vadd.f32 %v11027_v20, %v6613_v7  ;;  %vm6295_vm10 = vweird.f32 %v7594_v13 }
 0x734   : > { %v6855_v31 = vpack.c.bf16 %v6785_v32, %v6785_v32  ;;  %v6485_v62 = vmax.f32 %v6453_v35, 0.0  ;;  %7595 = vrsqrt.f32 %v6032_v54  ;;  %vm6296_vm11 = vmor %vm6294_vm9, %vm6295_vm10  ;;  %vm6304_vm12 = vweird.f32 %v6032_v54 }
 0x735   : > { %v6290_v58 = vmul.f32 %v7594_v13, %v6289_v33  ;;  %v6287_v5 = vsel %vm6286_vm14, %v7592_v4, %v6283_v21  ;;  %v6671_v23 = vmax.f32 %v6614_v53, 0.0 }
 0x736   : > { %6888 = vst.msk [vmem:[%s10913_s28 + $0x18] sm:$0xf] %vm6881_vm8, %v6855_v31  ;;  %v6505_v59 = vpack.c.bf16 %v6485_v62, %v6484_v3  ;;  %v6382_v40 = vmul.f32 %v6287_v5, %v10854_v42 }
 0x737   : > { %v6291_v34 = vmul.f32 0.5, %v6290_v58  ;;  %v6695_v48 = vpack.c.bf16 %v6671_v23, %v6670_v63  ;;  %v5961_v1 = vpop.xlane.xlu0 %5960 }
 0x738   : > { %7381 = vmatmul.msk.bf16.gmra.mxu1 %vm5678_vm2, %v6505_v59  ;;  %v6001_v36 = vmul.f32 %v5961_v1, %v10248_v43  ;;  %v6418_v42 = vmul.f32 %v10833_v6, %v6382_v40 }
 0x739   : > { %v6292_v19 = vsub.f32 1.5, %v6291_v34  ;;  %v6786_v37 = vpop.f32.mrf.mxu2  ;;  %7393 = vmatmul.msk.bf16.gmra.mxu2 %vm5678_vm2, %v6695_v48 }
 0x73a   : > { %v6787_v9 = vadd.f32 %v10895_v26, %v6786_v37  ;;  %v7596_v57 = vpop.eup %7595  ;;  %v6033_v16 = vadd.f32 1e-05, %v6001_v36  ;;  %v6616_v55 = vpop.f32.mrf.mxu1  ;;  %v6454_v25 = vadd.f32 %v10847_v27, %v6418_v42 }
 0x73b   : > { %v6293_v29 = vmul.f32 %v7594_v13, %v6292_v19  ;;  %v6299_v10 = vmul.f32 %v7596_v57, %v6032_v54  ;;  %vm6305_vm3 = vweird.f32 %v7596_v57  ;;  %v6617_v41 = vadd.f32 %v11027_v20, %v6616_v55 }
 0x73c   : > { %v6856_v39 = vpack.c.bf16 %v6787_v9, %v6787_v9  ;;  %7597 = vrsqrt.f32 %v6033_v16  ;;  %vm6306_vm15 = vmor %vm6304_vm12, %vm6305_vm3  ;;  %v6486_v50 = vmax.f32 %v6454_v25, 0.0  ;;  %vm6314_vm5 = vweird.f32 %v6033_v16 }
 0x73d   : > { %v6297_v28 = vsel %vm6296_vm11, %v7594_v13, %v6293_v29  ;;  %v6300_v4 = vmul.f32 %v7596_v57, %v6299_v10  ;;  %v6672_v7 = vmax.f32 %v6617_v41, 0.0 }
 0x73e   : > { %v6383_v44 = vmul.f32 %v6297_v28, %v10877_v46  ;;  %6889 = vst.msk [vmem:[%s10913_s28 + $0x1c] sm:$0xf] %vm6881_vm8, %v6856_v39 }
 0x73f   : > { %v6301_v38 = vmul.f32 0.5, %v6300_v4  ;;  %v5964_v47 = vpop.xlane.xlu1 %5963 }
 0x740   : > { %v6419_v61 = vmul.f32 %v10833_v6, %v6383_v44  ;;  %v6002_v15 = vmul.f32 %v5964_v47, %v10248_v43 }
 0x741   : > { %v6302_v8 = vsub.f32 1.5, %v6301_v38  ;;  %v6789_v12 = vpop.f32.mrf.mxu2 }
 0x742   : > { %v6455_v56 = vadd.f32 %v10847_v27, %v6419_v61  ;;  %v7598_v49 = vpop.eup %7597  ;;  %v6034_v46 = vadd.f32 1e-05, %v6002_v15  ;;  %v6790_v45 = vadd.f32 %v10895_v26, %v6789_v12  ;;  %v6618_v17 = vpop.f32.mrf.mxu1 }
 0x743   : > { %v6303_v11 = vmul.f32 %v7596_v57, %v6302_v8  ;;  %v6309_v51 = vmul.f32 %v7598_v49, %v6033_v16  ;;  %v6619_v60 = vadd.f32 %v11027_v20, %v6618_v17  ;;  %vm6315_vm1 = vweird.f32 %v7598_v49 }
 0x744   : > { %7599 = vrsqrt.f32 %v6034_v46  ;;  %v6857_v22 = vpack.c.bf16 %v6790_v45, %v6790_v45  ;;  %v6487_v13 = vmax.f32 %v6455_v56, 0.0  ;;  %vm6316_vm6 = vmor %vm6314_vm5, %vm6315_vm1  ;;  %vm6324_vm4 = vweird.f32 %v6034_v46 }
 0x745   : > { %v6307_v14 = vsel %vm6306_vm15, %v7596_v57, %v6303_v11  ;;  %v6310_v32 = vmul.f32 %v7598_v49, %v6309_v51  ;;  %v6673_v35 = vmax.f32 %v6619_v60, 0.0 }
 0x746   : > { %6890 = vst.msk [vmem:[%s10913_s28 + $0x20] sm:$0xf] %vm6881_vm8, %v6857_v22  ;;  %v6506_v33 = vpack.c.bf16 %v6487_v13, %v6486_v50  ;;  %v6384_v3 = vmul.f32 %v6307_v14, %v10906_v2 }
 0x747   : > { %v5967_v21 = vpop.xlane.xlu2 %5966  ;;  %v6311_v31 = vmul.f32 0.5, %v6310_v32  ;;  %v6696_v53 = vpack.c.bf16 %v6673_v35, %v6672_v7 }
 0x748   : > { %v6003_v54 = vmul.f32 %v5967_v21, %v10248_v43  ;;  %7382 = vmatmul.msk.bf16.gmra.mxu1 %vm5678_vm2, %v6506_v33  ;;  %v6420_v1 = vmul.f32 %v10833_v6, %v6384_v3 }
 0x749   : > { %v6312_v62 = vsub.f32 1.5, %v6311_v31  ;;  %v6791_v5 = vpop.f32.mrf.mxu2  ;;  %7394 = vmatmul.msk.bf16.gmra.mxu2 %vm5678_vm2, %v6696_v53 }
 0x74a   : > { %v6035_v58 = vadd.f32 1e-05, %v6003_v54  ;;  %v7600_v63 = vpop.eup %7599  ;;  %v6792_v23 = vadd.f32 %v10895_v26, %v6791_v5  ;;  %v6621_v59 = vpop.f32.mrf.mxu1  ;;  %v6456_v57 = vadd.f32 %v10847_v27, %v6420_v1 }
 0x74b   : > { %v6313_v34 = vmul.f32 %v7598_v49, %v6312_v62  ;;  %v6319_v48 = vmul.f32 %v7600_v63, %v6034_v46  ;;  %vm6325_vm7 = vweird.f32 %v7600_v63  ;;  %v6622_v16 = vadd.f32 %v11027_v20, %v6621_v59 }
 0x74c   : > { %7601 = vrsqrt.f32 %v6035_v58  ;;  %v6858_v2 = vpack.c.bf16 %v6792_v23, %v6792_v23  ;;  %vm6326_vm0 = vmor %vm6324_vm4, %vm6325_vm7  ;;  %v6488_v47 = vmax.f32 %v6456_v57, 0.0  ;;  %vm6334_vm14 = vweird.f32 %v6035_v58 }
 0x74d   : > { %v6317_v40 = vsel %vm6316_vm6, %v7598_v49, %v6313_v34  ;;  %v6320_v19 = vmul.f32 %v7600_v63, %v6319_v48  ;;  %v6674_v8 = vmax.f32 %v6622_v16, 0.0 }
 0x74e   : > { %v6385_v36 = vmul.f32 %v6317_v40, %v10937_v0  ;;  %6891 = vst.msk [vmem:[%s10913_s28 + $0x24] sm:$0xf] %vm6881_vm8, %v6858_v2 }
 0x74f   : > { %v6321_v37 = vmul.f32 0.5, %v6320_v19  ;;  %v5970_v48 = vpop.xlane.xlu0 %5969 }
 0x750   : > { %v6421_v9 = vmul.f32 %v10833_v6, %v6385_v36  ;;  %v6004_v1 = vmul.f32 %v5970_v48, %v10248_v43 }
 0x751   : > { %v6322_v55 = vsub.f32 1.5, %v6321_v37  ;;  %v6794_v10 = vpop.f32.mrf.mxu2 }
 0x752   : > { %v7602_v29 = vpop.eup %7601  ;;  %v6795_v42 = vadd.f32 %v10895_v26, %v6794_v10  ;;  %v6623_v28 = vpop.f32.mrf.mxu1  ;;  %v6457_v0 = vadd.f32 %v10847_v27, %v6421_v9  ;;  %v6036_v2 = vadd.f32 1e-05, %v6004_v1 }
 0x753   : > { %v6329_v39 = vmul.f32 %v7602_v29, %v6035_v58  ;;  %v6323_v44 = vmul.f32 %v7600_v63, %v6322_v55  ;;  %v6624_v4 = vadd.f32 %v11027_v20, %v6623_v28  ;;  %vm6335_vm13 = vweird.f32 %v7602_v29 }
 0x754   : > { %v6859_v38 = vpack.c.bf16 %v6795_v42, %v6795_v42  ;;  %v6489_v15 = vmax.f32 %v6457_v0, 0.0  ;;  %vm6336_vm10 = vmor %vm6334_vm14, %vm6335_vm13  ;;  %7603 = vrsqrt.f32 %v6036_v2  ;;  %vm6344_vm11 = vweird.f32 %v6036_v2 }
 0x755   : > { %v6330_v61 = vmul.f32 %v7602_v29, %v6329_v39  ;;  %v6327_v25 = vsel %vm6326_vm0, %v7600_v63, %v6323_v44  ;;  %v6675_v41 = vmax.f32 %v6624_v4, 0.0 }
 0x756   : > { %6892 = vst.msk [vmem:[%s10913_s28 + $0x28] sm:$0xf] %vm6881_vm8, %v6859_v38  ;;  %v6507_v56 = vpack.c.bf16 %v6489_v15, %v6488_v47  ;;  %v6386_v49 = vmul.f32 %v6327_v25, %v10958_v30 }
 0x757   : > { %v6331_v12 = vmul.f32 0.5, %v6330_v61  ;;  %v6697_v45 = vpack.c.bf16 %v6675_v41, %v6674_v8 }
 0x758   : > { %7383 = vmatmul.msk.bf16.gmra.mxu1 %vm5678_vm2, %v6507_v56  ;;  %v6422_v22 = vmul.f32 %v10833_v6, %v6386_v49 }
 0x759   : > { %v6332_v17 = vsub.f32 1.5, %v6331_v12  ;;  %v6796_v46 = vpop.f32.mrf.mxu2  ;;  %7395 = vmatmul.msk.bf16.gmra.mxu2 %vm5678_vm2, %v6697_v45 }
 0x75a   : > { %v6797_v51 = vadd.f32 %v10895_v26, %v6796_v46  ;;  %v6626_v60 = vpop.f32.mrf.mxu1  ;;  %v6458_v32 = vadd.f32 %v10847_v27, %v6422_v22  ;;  %v7604_v40 = vpop.eup %7603 }
 0x75b   : > { %v6333_v11 = vmul.f32 %v7602_v29, %v6332_v17  ;;  %v6627_v7 = vadd.f32 %v11027_v20, %v6626_v60  ;;  %v6339_v19 = vmul.f32 %v7604_v40, %v6036_v2  ;;  %vm6345_vm9 = vweird.f32 %v7604_v40 }
 0x75c   : > { %v6860_v13 = vpack.c.bf16 %v6797_v51, %v6797_v51  ;;  %v6490_v54 = vmax.f32 %v6458_v32, 0.0  ;;  %vm6346_vm3 = vmor %vm6344_vm11, %vm6345_vm9 }
 0x75d   : > { %v6337_v50 = vsel %vm6336_vm10, %v7602_v29, %v6333_v11  ;;  %v6676_v62 = vmax.f32 %v6627_v7, 0.0  ;;  %v6340_v36 = vmul.f32 %v7604_v40, %v6339_v19 }
 0x75e   : > { %v6387_v30 = vmul.f32 %v6337_v50, %v10974_v18  ;;  %6893 = vst.msk [vmem:[%s10913_s28 + $0x2c] sm:$0xf] %vm6881_vm8, %v6860_v13 }
 0x75f   : > { %v6341_v57 = vmul.f32 0.5, %v6340_v36 }
 0x760   : > { %v6423_v14 = vmul.f32 %v10833_v6, %v6387_v30 }
 0x761   : > { %v6799_v35 = vpop.f32.mrf.mxu2  ;;  %v6342_v55 = vsub.f32 1.5, %v6341_v57 }
 0x762   : > { %v6459_v21 = vadd.f32 %v10847_v27, %v6423_v14  ;;  %v6800_v33 = vadd.f32 %v10895_v26, %v6799_v35  ;;  %v6628_v31 = vpop.f32.mrf.mxu1 }
 0x763   : > { %v6629_v53 = vadd.f32 %v11027_v20, %v6628_v31  ;;  %v6343_v16 = vmul.f32 %v7604_v40, %v6342_v55 }
 0x764   : > { %v6491_v18 = vmax.f32 %v6459_v21, 0.0  ;;  %v6861_v3 = vpack.c.bf16 %v6800_v33, %v6800_v33 }
 0x765   : > { %v6677_v58 = vmax.f32 %v6629_v53, 0.0  ;;  %v6347_v42 = vsel %vm6346_vm3, %v7604_v40, %v6343_v16 }
 0x766   : > { %v6508_v5 = vpack.c.bf16 %v6491_v18, %v6490_v54  ;;  %6894 = vst.msk [vmem:[%s10913_s28 + $0x30] sm:$0xf] %vm6881_vm8, %v6861_v3  ;;  %v6388_v44 = vmul.f32 %v6347_v42, %v10991_v24 }
 0x767   : > { %v6698_v63 = vpack.c.bf16 %v6677_v58, %v6676_v62 }
 0x768   : > { %7384 = vmatmul.msk.bf16.gmra.mxu1 %vm5678_vm2, %v6508_v5 }
 0x769   : > { %v6801_v23 = vpop.f32.mrf.mxu2  ;;  %7396 = vmatmul.msk.bf16.gmra.mxu2 %vm5678_vm2, %v6698_v63 }
 0x76a   : > { %v6802_v59 = vadd.f32 %v10895_v26, %v6801_v23 }
 0x76c   : > { %v6862_v34 = vpack.c.bf16 %v6802_v59, %v6802_v59 }
 0x76e   : > { %6895 = vst.msk [vmem:[%s10913_s28 + $0x34] sm:$0xf] %vm6881_vm8, %v6862_v34 }
 0x7a2   : > { %v5973_v37 = vpop.xlane.xlu1 %5972 }
 0x7a3   : > { %v6005_v9 = vmul.f32 %v5973_v37, %v10248_v43  ;;  %v6424_v43 = vmul.f32 %v10833_v6, %v6388_v44 }
 0x7a5   : > { %v6037_v29 = vadd.f32 1e-05, %v6005_v9  ;;  %v6460_v8 = vadd.f32 %v10847_v27, %v6424_v43 }
 0x7a7   : > { %7605 = vrsqrt.f32 %v6037_v29  ;;  %vm6354_vm15 = vweird.f32 %v6037_v29  ;;  %v6492_v17 = vmax.f32 %v6460_v8, 0.0 }
 0x7ad   : > { %v7606_v10 = vpop.eup %7605 }
 0x7ae   : > { %v6349_v39 = vmul.f32 %v7606_v10, %v6037_v29  ;;  %vm6355_vm12 = vweird.f32 %v7606_v10 }
 0x7af   : > { %vm6356_vm1 = vmor %vm6354_vm15, %vm6355_vm12 }
 0x7b0   : > { %v6350_v28 = vmul.f32 %v7606_v10, %v6349_v39 }
 0x7b2   : > { %v6351_v0 = vmul.f32 0.5, %v6350_v28 }
 0x7b4   : > { %v6352_v4 = vsub.f32 1.5, %v6351_v0 }
 0x7b5   : > { %v6631_v61 = vpop.f32.mrf.mxu1 }
 0x7b6   : > { %v6353_v38 = vmul.f32 %v7606_v10, %v6352_v4  ;;  %v6632_v41 = vadd.f32 %v11027_v20, %v6631_v61 }
 0x7b8   : > { %v6357_v47 = vsel %vm6356_vm1, %v7606_v10, %v6353_v38  ;;  %v6678_v11 = vmax.f32 %v6632_v41, 0.0 }
 0x7b9   : > { %v6389_v15 = vmul.f32 %v6357_v47, %v11014_v52 }
 0x7bb   : > { %v6425_v25 = vmul.f32 %v10833_v6, %v6389_v15 }
 0x7bc   : > { %v6804_v12 = vpop.f32.mrf.mxu2 }
 0x7bd   : > { %v6633_v24 = vpop.f32.mrf.mxu1  ;;  %v6461_v56 = vadd.f32 %v10847_v27, %v6425_v25  ;;  %v6805_v49 = vadd.f32 %v10895_v26, %v6804_v12 }
 0x7be   : > { %v6634_v45 = vadd.f32 %v11027_v20, %v6633_v24 }
 0x7bf   : > { %v6493_v46 = vmax.f32 %v6461_v56, 0.0  ;;  %v6863_v51 = vpack.c.bf16 %v6805_v49, %v6805_v49 }
 0x7c0   : > { %v6679_v52 = vmax.f32 %v6634_v45, 0.0 }
 0x7c1   : > { %v6509_v60 = vpack.c.bf16 %v6493_v46, %v6492_v17  ;;  %6896 = vst.msk [vmem:[%s10913_s28 + $0x38] sm:$0xf] %vm6881_vm8, %v6863_v51 }
 0x7c2   : > { %v6699_v6 = vpack.c.bf16 %v6679_v52, %v6678_v11 }
 0x7c3   : > { %7385 = vmatmul.msk.bf16.gmra.mxu1 %vm5678_vm2, %v6509_v60 }
 0x7c4   : > { %7397 = vmatmul.msk.bf16.gmra.mxu2 %vm5678_vm2, %v6699_v6  ;;  %v6806_v27 = vpop.f32.mrf.mxu2 }
 0x7c5   : > { %v6807_v22 = vadd.f32 %v10895_v26, %v6806_v27  ;;  %v6636_v50 = vpop.f32.mrf.mxu1 }
 0x7c6   : > { %v6637_v30 = vadd.f32 %v11027_v20, %v6636_v50 }
 0x7c7   : > { %v6864_v13 = vpack.c.bf16 %v6807_v22, %v6807_v22 }
 0x7c8   : > { %v6680_v33 = vmax.f32 %v6637_v30, 0.0 }
 0x7c9   : > { %6897 = vst.msk [vmem:[%s10913_s28 + $0x3c] sm:$0xf] %vm6881_vm8, %v6864_v13 }
 0x7cc   : > { %v6809_v14 = vpop.f32.mrf.mxu2 }
 0x7cd   : > { %v6810_v32 = vadd.f32 %v10895_v26, %v6809_v14  ;;  %v6638_v7 = vpop.f32.mrf.mxu1  ;;  %v7636_v14 = vld [vmem:[%s11181_s10] ss:$0 sm:$0xff] }
 0x7ce   : > { %v6639_v35 = vadd.f32 %v11027_v20, %v6638_v7 }
 0x7cf   : > { %v6865_v21 = vpack.c.bf16 %v6810_v32, %v6810_v32 }
 0x7d0   : > { %v6681_v31 = vmax.f32 %v6639_v35, 0.0 }
 0x7d1   : > { %6898 = vst.msk [vmem:[%s10913_s28 + $0x40] sm:$0xf] %vm6881_vm8, %v6865_v21 }
 0x7d2   : > { %v6700_v53 = vpack.c.bf16 %v6681_v31, %v6680_v33 }
 0x7d4   : > { %v6811_v54 = vpop.f32.mrf.mxu2  ;;  %7398 = vmatmul.msk.bf16.gmra.mxu2 %vm5678_vm2, %v6700_v53 }
 0x7d5   : > { %v6812_v18 = vadd.f32 %v10895_v26, %v6811_v54  ;;  %v6641_v3 = vpop.f32.mrf.mxu1 }
 0x7d6   : > { %v6642_v58 = vadd.f32 %v11027_v20, %v6641_v3 }
 0x7d7   : > { %v6866_v62 = vpack.c.bf16 %v6812_v18, %v6812_v18 }
 0x7d8   : > { %v6682_v48 = vmax.f32 %v6642_v58, 0.0 }
 0x7d9   : > { %6899 = vst.msk [vmem:[%s10913_s28 + $0x44] sm:$0xf] %vm6881_vm8, %v6866_v62 }
 0x7dc   : > { %v6814_v5 = vpop.f32.mrf.mxu2 }
 0x7dd   : > { %v6815_v63 = vadd.f32 %v10895_v26, %v6814_v5  ;;  %v6643_v23 = vpop.f32.mrf.mxu1 }
 0x7de   : > { %v6644_v59 = vadd.f32 %v11027_v20, %v6643_v23 }
 0x7df   : > { %v6867_v34 = vpack.c.bf16 %v6815_v63, %v6815_v63 }
 0x7e0   : > { %v6683_v1 = vmax.f32 %v6644_v59, 0.0 }
 0x7e1   : > { %6900 = vst.msk [vmem:[%s10913_s28 + $0x48] sm:$0xf] %vm6881_vm8, %v6867_v34 }
 0x7e2   : > { %v6701_v2 = vpack.c.bf16 %v6683_v1, %v6682_v48 }
 0x7e4   : > { %v6816_v40 = vpop.f32.mrf.mxu2  ;;  %7399 = vmatmul.msk.bf16.gmra.mxu2 %vm5678_vm2, %v6701_v2 }
 0x7e5   : > { %v6817_v19 = vadd.f32 %v10895_v26, %v6816_v40  ;;  %v6646_v36 = vpop.f32.mrf.mxu1 }
 0x7e6   : > { %v6647_v9 = vadd.f32 %v11027_v20, %v6646_v36 }
 0x7e7   : > { %v6868_v37 = vpack.c.bf16 %v6817_v19, %v6817_v19 }
 0x7e8   : > { %v6684_v39 = vmax.f32 %v6647_v9, 0.0 }
 0x7e9   : > { %6901 = vst.msk [vmem:[%s10913_s28 + $0x4c] sm:$0xf] %vm6881_vm8, %v6868_v37 }
 0x7ec   : > { %v6819_v57 = vpop.f32.mrf.mxu2 }
 0x7ed   : > { %v6820_v29 = vadd.f32 %v10895_v26, %v6819_v57  ;;  %v6648_v55 = vpop.f32.mrf.mxu1 }
 0x7ee   : > { %v6649_v16 = vadd.f32 %v11027_v20, %v6648_v55 }
 0x7ef   : > { %v6869_v10 = vpack.c.bf16 %v6820_v29, %v6820_v29 }
 0x7f0   : > { %v6685_v42 = vmax.f32 %v6649_v16, 0.0 }
 0x7f1   : > { %6902 = vst.msk [vmem:[%s10913_s28 + $0x50] sm:$0xf] %vm6881_vm8, %v6869_v10 }
 0x7f2   : > { %v6702_v28 = vpack.c.bf16 %v6685_v42, %v6684_v39 }
 0x7f4   : > { %v6821_v0 = vpop.f32.mrf.mxu2  ;;  %7400 = vmatmul.msk.bf16.gmra.mxu2 %vm5678_vm2, %v6702_v28 }
 0x7f5   : > { %v6822_v44 = vadd.f32 %v10895_v26, %v6821_v0 }
 0x7f7   : > { %v6870_v4 = vpack.c.bf16 %v6822_v44, %v6822_v44 }
 0x7f9   : > { %6903 = vst.msk [vmem:[%s10913_s28 + $0x54] sm:$0xf] %vm6881_vm8, %v6870_v4 }
 0x840   : > { %v6651_v61 = vpop.f32.mrf.mxu1 }
 0x841   : > { %v6652_v38 = vadd.f32 %v11027_v20, %v6651_v61 }
 0x843   : > { %v6686_v41 = vmax.f32 %v6652_v38, 0.0 }
 0x847   : > { %v6824_v43 = vpop.f32.mrf.mxu2 }
 0x848   : > { %v6825_v47 = vadd.f32 %v10895_v26, %v6824_v43  ;;  %v6653_v15 = vpop.f32.mrf.mxu1 }
 0x849   : > { %v6654_v25 = vadd.f32 %v11027_v20, %v6653_v15 }
 0x84a   : > { %v6871_v8 = vpack.c.bf16 %v6825_v47, %v6825_v47 }
 0x84b   : > { %v6687_v12 = vmax.f32 %v6654_v25, 0.0 }
 0x84c   : > { %6904 = vst.msk [vmem:[%s10913_s28 + $0x58] sm:$0xf] %vm6881_vm8, %v6871_v8 }
 0x84d   : > { %v6703_v24 = vpack.c.bf16 %v6687_v12, %v6686_v41 }
 0x84f   : > { %v6826_v56 = vpop.f32.mrf.mxu2  ;;  %7401 = vmatmul.msk.bf16.gmra.mxu2 %vm5678_vm2, %v6703_v24 }
 0x850   : > { %v6827_v49 = vadd.f32 %v10895_v26, %v6826_v56 }
 0x852   : > { %v6872_v45 = vpack.c.bf16 %v6827_v49, %v6827_v49 }
 0x854   : > { %6905 = vst.msk [vmem:[%s10913_s28 + $0x5c] sm:$0xf] %vm6881_vm8, %v6872_v45 }
 0x857   : > { %v6829_v17 = vpop.f32.mrf.mxu2 }
 0x858   : > { %v6830_v20 = vadd.f32 %v10895_v26, %v6829_v17 }
 0x85a   : > { %v6873_v46 = vpack.c.bf16 %v6830_v20, %v6830_v20 }
 0x85c   : > { %6906 = vst.msk [vmem:[%s10913_s28 + $0x60] sm:$0xf] %vm6881_vm8, %v6873_v46 }
 0x85f   : > { %v6831_v11 = vpop.f32.mrf.mxu2 }
 0x860   : > { %v6832_v51 = vadd.f32 %v10895_v26, %v6831_v11 }
 0x862   : > { %v6874_v52 = vpack.c.bf16 %v6832_v51, %v6832_v51 }
 0x864   : > { %6907 = vst.msk [vmem:[%s10913_s28 + $0x64] sm:$0xf] %vm6881_vm8, %v6874_v52 }
 0x867   : > { %v6834_v60 = vpop.f32.mrf.mxu2 }
 0x868   : > { %v6835_v6 = vadd.f32 %v10895_v26, %v6834_v60 }
 0x86a   : > { %v6875_v27 = vpack.c.bf16 %v6835_v6, %v6835_v6 }
 0x86c   : > { %6908 = vst.msk [vmem:[%s10913_s28 + $0x68] sm:$0xf] %vm6881_vm8, %v6875_v27 }
 0x86f   : > { %v6836_v22 = vpop.f32.mrf.mxu2 }
 0x870   : > { %v6837_v50 = vadd.f32 %v10895_v26, %v6836_v22 }
 0x872   : > { %v6876_v13 = vpack.c.bf16 %v6837_v50, %v6837_v50 }
 0x874   : > { %6909 = vst.msk [vmem:[%s10913_s28 + $0x6c] sm:$0xf] %vm6881_vm8, %v6876_v13 }
 0x877   : > { %v6839_v30 = vpop.f32.mrf.mxu2 }
 0x878   : > { %v6840_v32 = vadd.f32 %v7636_v14, %v6839_v30 }
 0x87a   : > { %v6877_v7 = vpack.c.bf16 %v6840_v32, %v6840_v32 }
 0x87c   : > { %6910 = vst.msk [vmem:[%s10913_s28 + $0x70] sm:$0xf] %vm6881_vm8, %v6877_v7 }
 0x87f   : > { %v6841_v35 = vpop.f32.mrf.mxu2 }
 0x880   : > { %v6842_v21 = vadd.f32 %v7636_v14, %v6841_v35 }
 0x882   : > { %v6878_v33 = vpack.c.bf16 %v6842_v21, %v6842_v21 }
 0x884   : > { %6911 = vst.msk [vmem:[%s10913_s28 + $0x74] sm:$0xf] %vm6881_vm8, %v6878_v33 }
 0x8d2   : > { %v6844_v31 = vpop.f32.mrf.mxu2 }
 0x8d3   : > { %v6845_v26 = vadd.f32 %v7636_v14, %v6844_v31 }
 0x8d5   : > { %v6879_v53 = vpack.c.bf16 %v6845_v26, %v6845_v26 }
 0x8d7   : > { %6912 = vst.msk [vmem:[%s10913_s28 + $0x78] sm:$0xf] %vm6881_vm8, %v6879_v53 }
 0x8da   : > { %v6846_v54 = vpop.f32.mrf.mxu2 }
 0x8db   : > { %v6847_v18 = vadd.f32 %v7636_v14, %v6846_v54 }
 0x8dd   : > { %v6880_v3 = vpack.c.bf16 %v6847_v18, %v6847_v18 }
 0x8df   : > { %6913 = vst.msk [vmem:[%s10913_s28 + $0x7c] sm:$0xf] %vm6881_vm8, %v6880_v3 }
 0x8e0 PF: > { %s21_s17 = sadd.s32 1, %s7643_s17  }
 0x8e1   : > { %p18_p4 = scmp.ge.s32.totalorder %s21_s17, 4  }
 0x8e3   :  { %20 = sbr.rel (!%p18_p4) target bundleno = 1 (0x1), region = 104 }

</bundles_post_ra>
